<compile_context>
chip_gen: v6e
topology: v6e:2x2x1
jax: 0.10.0
libtpu: 0.0.40
codegen_flags: <defaults>
</compile_context>

<pallas_src>
import jax
import jax.numpy as jnp
from jax import lax
from jax.experimental import pallas as pl
from jax.experimental.pallas import tpu as pltpu

D_MODEL = 64          # chosen d_model (must be divisible by GROUPS)
VOCAB = 28
MAX_LEN = 3075
CONV_OUT = 256
KSIZE = 10
GROUPS = 4
HID = 128             # LSTM hidden size per direction
ATT_HID = 10
ATT_PAD = 128         # attention hidden dim zero-padded to a full lane tile
FC_HID = 32
LN_EPS = 1e-5
BN_EPS = 1e-5
UNROLL = 4            # manual unroll factor of the recurrence loop
VMEM_LIMIT = 48 * 1024 * 1024


def _sigmoid(x):
    # sigmoid via tanh: exact identity, runs on the EUP slot, overflow-safe.
    return 0.5 * (jnp.tanh(0.5 * x) + 1.0)


def _const_spec(shape):
    # full-array block, same block for every grid step (weights / tables)
    return pl.BlockSpec(shape, lambda b, n=len(shape): (0,) * n)


# --------------------------------------------------------------------------
# Kernel 1: one-hot (built in-kernel) -> token+pos embedding -> LayerNorm ->
#           grouped Conv1d as K accumulated matmuls (no im2col buffer) ->
#           ReLU -> BatchNorm(eval, folded) -> SE layer.  Grid over batch.
# --------------------------------------------------------------------------
def embed_conv_se_kernel(tok_ref, tokemb_ref, posemb_ref, lng_ref, lnb_ref,
                         wcat_ref, cbias_ref, bnsc_ref, bnsh_ref,
                         sew1_ref, seb1_ref, sew2_ref, seb2_ref, feat_ref):
    L = tok_ref.shape[0]
    V = tokemb_ref.shape[0]
    Lp = feat_ref.shape[0]

    # one-hot from int32 ids (no (B, L, V) HBM round trip)
    ids = tok_ref[...]                                     # (L, 1) int32
    iota = lax.broadcasted_iota(jnp.int32, (L, V), 1)
    onehot = (ids == iota).astype(jnp.float32)             # (L, V)

    # token + positional embedding, LayerNorm (f32)
    e = jnp.dot(onehot, tokemb_ref[...], preferred_element_type=jnp.float32)
    e = e + posemb_ref[...]
    mu = jnp.mean(e, axis=-1, keepdims=True)
    var = jnp.mean(jnp.square(e - mu), axis=-1, keepdims=True)
    e = (e - mu) * lax.rsqrt(var + LN_EPS) * lng_ref[...] + lnb_ref[...]

    # grouped Conv1d as K accumulated (Lp, D)@(D, 256) bf16 matmuls:
    # avoids materializing the (Lp, K*D) im2col buffer and its relayouts.
    acc = jnp.zeros((Lp, CONV_OUT), jnp.float32)
    for k in range(KSIZE):
        acc = acc + jnp.dot(
            e[k:k + Lp, :].astype(jnp.bfloat16),
            wcat_ref[k * D_MODEL:(k + 1) * D_MODEL, :],
            preferred_element_type=jnp.float32)
    acc = acc + cbias_ref[...]
    acc = jnp.maximum(acc, 0.0)                 # module order: conv -> ReLU -> BN
    acc = acc * bnsc_ref[...] + bnsh_ref[...]   # BatchNorm1d (eval, folded); Dropout=id

    # SE layer: global average pool as an MXU contraction, 2-layer MLP, sigmoid
    pooled = jnp.dot(jnp.full((1, Lp), 1.0 / Lp, jnp.float32), acc,
                     preferred_element_type=jnp.float32)            # (1, C)
    y = jnp.maximum(jnp.dot(pooled, sew1_ref[...],
                            preferred_element_type=jnp.float32) + seb1_ref[...],
                    0.0)
    y = _sigmoid(jnp.dot(y, sew2_ref[...], preferred_element_type=jnp.float32)
                 + seb2_ref[...])
    feat_ref[...] = (acc * y).astype(feat_ref.dtype)


def embed_conv_se_forward(tok3, tok_tab, pos_tab, ln_g, ln_b,
                          wcat16, cbias, bn_scale, bn_shift,
                          se_w1, se_b1, se_w2, se_b2):
    B, L, _ = tok3.shape
    Lp = L - KSIZE + 1
    flops = B * (2 * L * VOCAB * D_MODEL
                 + 2 * Lp * KSIZE * D_MODEL * CONV_OUT
                 + 2 * Lp * CONV_OUT
                 + 4 * CONV_OUT * CONV_OUT)
    bytes_acc = (4 * B * L + 2 * B * Lp * CONV_OUT
                 + 4 * (VOCAB * D_MODEL + L * D_MODEL)
                 + 2 * KSIZE * D_MODEL * CONV_OUT
                 + 8 * CONV_OUT * CONV_OUT + 64 * CONV_OUT)
    return pl.pallas_call(
        embed_conv_se_kernel,
        out_shape=jax.ShapeDtypeStruct((B, Lp, CONV_OUT), jnp.bfloat16),
        grid=(B,),
        in_specs=[
            pl.BlockSpec((None, L, 1), lambda b: (b, 0, 0)),     # token ids
            _const_spec((VOCAB, D_MODEL)),                       # tok embed table
            _const_spec((L, D_MODEL)),                           # pos embed [:L]
            _const_spec((1, D_MODEL)),                           # LN gamma
            _const_spec((1, D_MODEL)),                           # LN beta
            _const_spec((KSIZE * D_MODEL, CONV_OUT)),            # conv taps (bf16)
            _const_spec((1, CONV_OUT)),                          # conv bias
            _const_spec((1, CONV_OUT)),                          # BN scale
            _const_spec((1, CONV_OUT)),                          # BN shift
            _const_spec((CONV_OUT, CONV_OUT)),                   # SE w1
            _const_spec((1, CONV_OUT)),                          # SE b1
            _const_spec((CONV_OUT, CONV_OUT)),                   # SE w2
            _const_spec((1, CONV_OUT)),                          # SE b2
        ],
        out_specs=pl.BlockSpec((None, Lp, CONV_OUT), lambda b: (b, 0, 0)),
        compiler_params=pltpu.CompilerParams(
            dimension_semantics=("parallel",), vmem_limit_bytes=VMEM_LIMIT),
        cost_estimate=pl.CostEstimate(flops=int(flops),
                                      transcendentals=int(B * 2 * CONV_OUT),
                                      bytes_accessed=int(bytes_acc)),
    )(tok3, tok_tab, pos_tab, ln_g, ln_b, wcat16, cbias, bn_scale, bn_shift,
      se_w1, se_b1, se_w2, se_b2)


# --------------------------------------------------------------------------
# Kernel 2: bidirectional LSTM, whole (padded) batch per kernel instance.
# Grid over time chunks ("arbitrary"): each step projects its feat chunk for
# both directions into VMEM scratch, then runs the recurrence over the chunk.
# h/c are carried in scratch across grid steps; one block-diagonal bf16 matmul
# per timestep drives both directions; outputs are time-major (8,128) tiles.
# --------------------------------------------------------------------------
def make_bilstm_kernel(seq_len, pad_t, tch, unroll, bpad):
    H = HID

    def kernel(featf_ref, featb_ref, wih_ref, whh_ref, bias_ref,
               outf_ref, outb_ref, hn_ref,
               ginf_ref, ginb_ref, hst_ref, cst_ref):
        j = pl.program_id(0)

        @pl.when(j == 0)
        def _():
            hst_ref[...] = jnp.zeros_like(hst_ref)
            cst_ref[...] = jnp.zeros_like(cst_ref)

        # chunked input projection for both directions (bf16 x bf16 -> f32)
        ginf_ref[...] = jnp.dot(featf_ref[...], wih_ref[:, 0:4 * H],
                                preferred_element_type=jnp.float32)
        ginb_ref[...] = jnp.dot(featb_ref[...], wih_ref[:, 4 * H:8 * H],
                                preferred_element_type=jnp.float32)

        whh = whh_ref[...]                      # (2H, 8H) bf16, block-diagonal
        bias_f = bias_ref[:, 0:4 * H]
        bias_b = bias_ref[:, 4 * H:8 * H]

        def gates(pre, c):                      # gate order i, f, g, o
            i = _sigmoid(pre[:, 0:H])
            f = _sigmoid(pre[:, H:2 * H])
            g = jnp.tanh(pre[:, 2 * H:3 * H])
            o = _sigmoid(pre[:, 3 * H:4 * H])
            c_new = f * c + i * g
            return o * jnp.tanh(c_new), c_new

        t_base = j * tch

        def one_step(lt, hf, cf, hb, cb):
            # one fused MXU push for both directions (block-diagonal whh)
            hcat = jnp.concatenate([hf, hb], axis=1).astype(jnp.bfloat16)
            rec = jnp.dot(hcat, whh, preferred_element_type=jnp.float32)
            rf = pl.multiple_of(lt * bpad, 8)
            rb = pl.multiple_of((tch - 1 - lt) * bpad, 8)
            pre_f = rec[:, 0:4 * H] + ginf_ref[pl.ds(rf, bpad), :] + bias_f
            pre_b = rec[:, 4 * H:8 * H] + ginb_ref[pl.ds(rb, bpad), :] + bias_b
            hf_n, cf_n = gates(pre_f, cf)
            hb_n, cb_n = gates(pre_b, cb)
            t = t_base + lt
            ok_f = t < seq_len                  # freeze state on padded steps
            ok_b = t >= pad_t
            hf = jnp.where(ok_f, hf_n, hf)
            cf = jnp.where(ok_f, cf_n, cf)
            hb = jnp.where(ok_b, hb_n, hb)
            cb = jnp.where(ok_b, cb_n, cb)
            outf_ref[pl.ds(rf, bpad), :] = hf.astype(outf_ref.dtype)
            outb_ref[pl.ds(rb, bpad), :] = hb.astype(outb_ref.dtype)
            return hf, cf, hb, cb

        def body(u, carry):
            hf, cf, hb, cb = carry
            for k in range(unroll):             # manual unroll (LLO visibility)
                hf, cf, hb, cb = one_step(u * unroll + k, hf, cf, hb, cb)
            return hf, cf, hb, cb

        carry = (hst_ref[:, 0:H], cst_ref[:, 0:H],
                 hst_ref[:, H:2 * H], cst_ref[:, H:2 * H])
        hf, cf, hb, cb = lax.fori_loop(0, tch // unroll, body, carry)

        hst_ref[:, 0:H] = hf
        hst_ref[:, H:2 * H] = hb
        cst_ref[:, 0:H] = cf
        cst_ref[:, H:2 * H] = cb
        hn_ref[:, 0:H] = hf                     # fwd final (t = Lp-1)
        hn_ref[:, H:2 * H] = hb                 # bwd final (t = 0)

    return kernel


def bilstm_forward(feat, wih_cat, whh_cat, bias_cat):
    B, Lp, C = feat.shape
    BPAD = ((B + 7) // 8) * 8
    tch = min(max(2048 // BPAD, UNROLL),
              UNROLL * ((Lp + UNROLL - 1) // UNROLL))
    tch = max(UNROLL, (tch // UNROLL) * UNROLL)
    n_blocks = (Lp + tch - 1) // tch
    Lp_pad = n_blocks * tch
    pad_t = Lp_pad - Lp

    # time-major, batch-minor, zero-padded layout (Lp_pad*BPAD, C) in bf16
    featp = jnp.zeros((Lp_pad, BPAD, C), feat.dtype)
    featp = featp.at[:Lp, :B, :].set(jnp.transpose(feat, (1, 0, 2)))
    feat2d = featp.reshape(Lp_pad * BPAD, C)

    kernel = make_bilstm_kernel(Lp, pad_t, tch, UNROLL, BPAD)
    flops = (Lp_pad * BPAD * 2 * C * 8 * HID
             + Lp_pad * 2 * BPAD * 2 * HID * 8 * HID)
    bytes_acc = (2 * (2 * Lp_pad * BPAD * C + 2 * Lp_pad * BPAD * HID)
                 + 2 * (C + 2 * HID) * 8 * HID + 4 * BPAD * 2 * HID)

    out_f2, out_b2, hn = pl.pallas_call(
        kernel,
        out_shape=(jax.ShapeDtypeStruct((Lp_pad * BPAD, HID), jnp.bfloat16),
                   jax.ShapeDtypeStruct((Lp_pad * BPAD, HID), jnp.bfloat16),
                   jax.ShapeDtypeStruct((BPAD, 2 * HID), jnp.float32)),
        grid=(n_blocks,),
        in_specs=[
            pl.BlockSpec((tch * BPAD, C), lambda j: (j, 0)),               # fwd chunk
            pl.BlockSpec((tch * BPAD, C), lambda j: (n_blocks - 1 - j, 0)),  # bwd chunk
            _const_spec((C, 8 * HID)),                                     # [w_ih f | b]
            _const_spec((2 * HID, 8 * HID)),                               # block-diag w_hh
            _const_spec((1, 8 * HID)),                                     # [bias f | b]
        ],
        out_specs=(pl.BlockSpec((tch * BPAD, HID), lambda j: (j, 0)),
                   pl.BlockSpec((tch * BPAD, HID), lambda j: (n_blocks - 1 - j, 0)),
                   pl.BlockSpec((BPAD, 2 * HID), lambda j: (0, 0))),
        scratch_shapes=[pltpu.VMEM((tch * BPAD, 4 * HID), jnp.float32),    # gin fwd
                        pltpu.VMEM((tch * BPAD, 4 * HID), jnp.float32),    # gin bwd
                        pltpu.VMEM((BPAD, 2 * HID), jnp.float32),          # h state
                        pltpu.VMEM((BPAD, 2 * HID), jnp.float32)],         # c state
        compiler_params=pltpu.CompilerParams(
            dimension_semantics=("arbitrary",), vmem_limit_bytes=VMEM_LIMIT),
        cost_estimate=pl.CostEstimate(flops=int(flops),
                                      transcendentals=int(Lp_pad * BPAD * 10 * HID),
                                      bytes_accessed=int(bytes_acc)),
    )(feat2d, feat2d, wih_cat, whh_cat, bias_cat)

    out_f = out_f2.reshape(Lp_pad, BPAD, HID)[:Lp, :B]
    out_b = out_b2.reshape(Lp_pad, BPAD, HID)[:Lp, :B]
    seq_out = jnp.transpose(jnp.concatenate([out_f, out_b], axis=-1), (1, 0, 2))
    return seq_out, hn[:B]                      # (B, Lp, 2H) bf16, (B, 2H) f32


# --------------------------------------------------------------------------
# Kernel 3: Bahdanau attention (+padded hidden dim) + fc_task + classifier.
# Separate call because h_n.view(B, 2H) mixes batch elements (kept faithful).
# Grid over batch.
# --------------------------------------------------------------------------
def attn_fc_kernel(seq_ref, h_ref, aw1_ref, ab1_ref, aw2_ref, ab2_ref,
                   av_ref, abv_ref, fw1_ref, fb1_ref, fw2t_ref, fb2_ref,
                   cw_ref, cb_ref, logit_ref, rep_ref):
    seq = seq_ref[...]                                             # (Lp, 2H) bf16
    # attention hidden dim is zero-padded 10 -> 128: padded cols are exactly 0
    s1 = jnp.dot(seq, aw1_ref[...], preferred_element_type=jnp.float32) + ab1_ref[...]
    s2 = jnp.dot(h_ref[...], aw2_ref[...], preferred_element_type=jnp.float32) + ab2_ref[...]
    t = jnp.tanh(s1 + s2)                                          # (Lp, 128) f32
    # score via an MXU mat-vec instead of a VPU multiply + lane reduce
    score = jnp.dot(t, av_ref[...], preferred_element_type=jnp.float32) + abv_ref[...]
    score = score - jnp.max(score, axis=0, keepdims=True)          # softmax over seq
    ex = jnp.exp(score)
    attw = ex / jnp.sum(ex, axis=0, keepdims=True)                 # exact divide
    ctx = jnp.sum(attw * seq.astype(jnp.float32), axis=0, keepdims=True)   # (1, 2H)

    # fc_task: Linear(256,32) -> Dropout(id) -> ReLU -> Linear(32,2)
    r1 = jnp.maximum(jnp.dot(ctx, fw1_ref[...], preferred_element_type=jnp.float32)
                     + fb1_ref[...], 0.0)
    fw2t = fw2t_ref[...]
    rep0 = jnp.sum(r1 * fw2t[0:1, :], axis=-1, keepdims=True)
    rep1 = jnp.sum(r1 * fw2t[1:2, :], axis=-1, keepdims=True)
    rep = jnp.concatenate([rep0, rep1], axis=1) + fb2_ref[...]     # (1, 2)

    # classifier: Linear(2,1) + sigmoid
    logit = jnp.sum(rep * cw_ref[...], axis=-1, keepdims=True) + cb_ref[...]
    rep_ref[...] = rep
    logit_ref[...] = _sigmoid(logit)


def attn_fc_forward(seq_out, h_view3, aw1, ab1, aw2, ab2, av, abv,
                    fw1, fb1, fw2t, fb2, cw, cb):
    B, Lp, C = seq_out.shape
    flops = B * (2 * Lp * C * ATT_PAD + 2 * Lp * ATT_PAD + 2 * Lp * C
                 + 2 * C * FC_HID)
    bytes_acc = 2 * B * Lp * C + 4 * (B * C + 2 * C * ATT_PAD + C * FC_HID + 256)
    return pl.pallas_call(
        attn_fc_kernel,
        out_shape=(jax.ShapeDtypeStruct((B, 1, 1), jnp.float32),
                   jax.ShapeDtypeStruct((B, 1, 2), jnp.float32)),
        grid=(B,),
        in_specs=[
            pl.BlockSpec((None, Lp, C), lambda b: (b, 0, 0)),    # LSTM outputs (bf16)
            pl.BlockSpec((None, 1, C), lambda b: (b, 0, 0)),     # h_n.view row
            _const_spec((C, ATT_PAD)),                           # W1 (padded, bf16)
            _const_spec((1, ATT_PAD)),                           # b1
            _const_spec((C, ATT_PAD)),                           # W2 (padded)
            _const_spec((1, ATT_PAD)),                           # b2
            _const_spec((ATT_PAD, 1)),                           # V weight (column)
            _const_spec((1, 1)),                                 # V bias
            _const_spec((C, FC_HID)),                            # fc1 weight
            _const_spec((1, FC_HID)),                            # fc1 bias
            _const_spec((2, FC_HID)),                            # fc2 weight (out,in)
            _const_spec((1, 2)),                                 # fc2 bias
            _const_spec((1, 2)),                                 # classifier weight
            _const_spec((1, 1)),                                 # classifier bias
        ],
        out_specs=(pl.BlockSpec((None, 1, 1), lambda b: (b, 0, 0)),
                   pl.BlockSpec((None, 1, 2), lambda b: (b, 0, 0))),
        compiler_params=pltpu.CompilerParams(
            dimension_semantics=("parallel",), vmem_limit_bytes=VMEM_LIMIT),
        cost_estimate=pl.CostEstimate(flops=int(flops),
                                      transcendentals=int(B * Lp * 2),
                                      bytes_accessed=int(bytes_acc)),
    )(seq_out, h_view3, aw1, ab1, aw2, ab2, av, abv, fw1, fb1, fw2t, fb2, cw, cb)


# --------------------------------------------------------------------------
# Parameter setup (deterministic, synthetic) + glue
# --------------------------------------------------------------------------
def _pad_cols(a, width):
    out = jnp.zeros((a.shape[0], width), jnp.float32)
    return out.at[:, :a.shape[1]].set(a)


def init_params(key):
    ks = jax.random.split(key, 32)
    s = 0.1
    nrm = jax.random.normal
    p = {}
    p["tok"] = nrm(ks[0], (VOCAB, D_MODEL), jnp.float32) * s
    p["pos"] = nrm(ks[1], (MAX_LEN, D_MODEL), jnp.float32) * s
    p["ln_g"] = jnp.ones((1, D_MODEL), jnp.float32) \
        + 0.05 * nrm(ks[2], (1, D_MODEL), jnp.float32)
    p["ln_b"] = 0.05 * nrm(ks[3], (1, D_MODEL), jnp.float32)

    # grouped Conv1d weight (out=256, in/groups, K) -> block-diagonal tap
    # weights, flattened to (K*D, 256); kernel slices per-tap (64, 256) blocks.
    conv_w = nrm(ks[4], (CONV_OUT, D_MODEL // GROUPS, KSIZE), jnp.float32) * s
    in_g = D_MODEL // GROUPS
    out_g = CONV_OUT // GROUPS
    wtap = jnp.zeros((KSIZE, D_MODEL, CONV_OUT), jnp.float32)
    for g in range(GROUPS):
        blk = jnp.transpose(conv_w[g * out_g:(g + 1) * out_g], (2, 1, 0))
        wtap = wtap.at[:, g * in_g:(g + 1) * in_g,
                       g * out_g:(g + 1) * out_g].set(blk)
    p["wcat"] = wtap.reshape(KSIZE * D_MODEL, CONV_OUT).astype(jnp.bfloat16)
    p["cbias"] = nrm(ks[5], (1, CONV_OUT), jnp.float32) * s

    bn_g = jnp.ones((CONV_OUT,), jnp.float32) \
        + 0.05 * nrm(ks[6], (CONV_OUT,), jnp.float32)
    bn_b = 0.05 * nrm(ks[7], (CONV_OUT,), jnp.float32)
    bn_mean = 0.1 * nrm(ks[8], (CONV_OUT,), jnp.float32)
    bn_var = 1.0 + 0.1 * jax.random.uniform(ks[9], (CONV_OUT,), jnp.float32)
    scale = bn_g / jnp.sqrt(bn_var + BN_EPS)
    p["bn_scale"] = scale.reshape(1, CONV_OUT)
    p["bn_shift"] = (bn_b - bn_mean * scale).reshape(1, CONV_OUT)

    p["se_w1"] = nrm(ks[10], (CONV_OUT, CONV_OUT), jnp.float32) * (s / 4)
    p["se_b1"] = nrm(ks[11], (1, CONV_OUT), jnp.float32) * s
    p["se_w2"] = nrm(ks[12], (CONV_OUT, CONV_OUT), jnp.float32) * (s / 4)
    p["se_b2"] = nrm(ks[13], (1, CONV_OUT), jnp.float32) * s

    # LSTM weights (in, 4H) for right-multiplication; gate order i,f,g,o;
    # bias = b_ih + b_hh folded.  Input weights of both directions concatenated;
    # recurrent weights combined into one block-diagonal (2H, 8H) matrix so a
    # single MXU push per timestep drives both directions.  Pre-cast to bf16.
    wihf = nrm(ks[14], (CONV_OUT, 4 * HID), jnp.float32) * (s / 2)
    wihb = nrm(ks[17], (CONV_OUT, 4 * HID), jnp.float32) * (s / 2)
    p["wih_cat"] = jnp.concatenate([wihf, wihb], axis=1).astype(jnp.bfloat16)
    whhf = nrm(ks[15], (HID, 4 * HID), jnp.float32) * (s / 2)
    whhb = nrm(ks[18], (HID, 4 * HID), jnp.float32) * (s / 2)
    whh_cat = jnp.zeros((2 * HID, 8 * HID), jnp.float32)
    whh_cat = whh_cat.at[0:HID, 0:4 * HID].set(whhf)
    whh_cat = whh_cat.at[HID:2 * HID, 4 * HID:8 * HID].set(whhb)
    p["whh_cat"] = whh_cat.astype(jnp.bfloat16)
    bf = nrm(ks[16], (1, 4 * HID), jnp.float32) * s
    bb = nrm(ks[19], (1, 4 * HID), jnp.float32) * s
    p["bias_cat"] = jnp.concatenate([bf, bb], axis=1)              # (1, 8H) f32

    # Bahdanau attention (in_features=256, hidden_units=10, num_task=1),
    # hidden dim zero-padded to ATT_PAD=128 lanes (padding mathematically inert).
    p["aw1"] = _pad_cols(nrm(ks[20], (2 * HID, ATT_HID), jnp.float32) * s,
                         ATT_PAD).astype(jnp.bfloat16)
    p["ab1"] = _pad_cols(nrm(ks[21], (1, ATT_HID), jnp.float32) * s, ATT_PAD)
    p["aw2"] = _pad_cols(nrm(ks[22], (2 * HID, ATT_HID), jnp.float32) * s, ATT_PAD)
    p["ab2"] = _pad_cols(nrm(ks[23], (1, ATT_HID), jnp.float32) * s, ATT_PAD)
    av_row = nrm(ks[24], (1, ATT_HID), jnp.float32) * s
    p["av"] = jnp.zeros((ATT_PAD, 1), jnp.float32).at[:ATT_HID, :].set(av_row.T)
    p["abv"] = nrm(ks[25], (1, 1), jnp.float32) * s

    # fc_task + classifier
    p["fw1"] = nrm(ks[26], (2 * HID, FC_HID), jnp.float32) * s
    p["fb1"] = nrm(ks[27], (1, FC_HID), jnp.float32) * s
    p["fw2t"] = nrm(ks[28], (2, FC_HID), jnp.float32) * s          # (out, in)
    p["fb2"] = nrm(ks[29], (1, 2), jnp.float32) * s
    p["cw"] = nrm(ks[30], (1, 2), jnp.float32) * s                 # (1, in)
    p["cb"] = nrm(ks[31], (1, 1), jnp.float32) * s
    return p


@jax.jit
def forward(tokens, p):
    B, L = tokens.shape
    tok3 = tokens.astype(jnp.int32)[:, :, None]                    # (B, L, 1)

    feat = embed_conv_se_forward(
        tok3, p["tok"], p["pos"][:L], p["ln_g"], p["ln_b"],
        p["wcat"], p["cbias"], p["bn_scale"], p["bn_shift"],
        p["se_w1"], p["se_b1"], p["se_w2"], p["se_b2"])            # (B, Lp, 256) bf16

    seq_out, hn = bilstm_forward(
        feat, p["wih_cat"], p["whh_cat"], p["bias_cat"])           # bf16 / f32

    # Reproduce h_n.view(batch_size, 2H) of the PyTorch (2, B, H) h_n tensor
    # (for B>1 this mixes batch elements' final hidden states — faithful to bug).
    h_f = hn[:, :HID]                                              # (B, H)
    h_b = hn[:, HID:]                                              # (B, H)
    h_view = jnp.stack([h_f, h_b], axis=0).reshape(B, 2 * HID)     # (B, 2H)

    logits3, rep3 = attn_fc_forward(
        seq_out, h_view[:, None, :],
        p["aw1"], p["ab1"], p["aw2"], p["ab2"], p["av"], p["abv"],
        p["fw1"], p["fb1"], p["fw2t"], p["fb2"], p["cw"], p["cb"])
    return logits3.reshape(B, 1), rep3.reshape(B, 2)


if __name__ == "__main__":
    key = jax.random.PRNGKey(0)
    k_tok, k_par = jax.random.split(key)
    B, L = 2, 32                                   # small shapes; L' = 23
    tokens = jax.random.randint(k_tok, (B, L), 0, VOCAB, dtype=jnp.int32)
    params = init_params(k_par)
    logits, representation = forward(tokens, params)
    jax.block_until_ready((logits, representation))
    assert logits.shape == (B, 1) and representation.shape == (B, 2)
    print("KERNEL_OK")
</pallas_src>

<mosaic_0001>
module attributes {stable_mosaic.version = 11 : i64} {
  func.func @embed_conv_se_kernel(%arg0: i32, %arg1: memref<1x32x1xi32, #tpu.memory_space<vmem>>, %arg2: memref<28x64xf32, #tpu.memory_space<vmem>>, %arg3: memref<32x64xf32, #tpu.memory_space<vmem>>, %arg4: memref<1x64xf32, #tpu.memory_space<vmem>>, %arg5: memref<1x64xf32, #tpu.memory_space<vmem>>, %arg6: memref<640x256xbf16, #tpu.memory_space<vmem>>, %arg7: memref<1x256xf32, #tpu.memory_space<vmem>>, %arg8: memref<1x256xf32, #tpu.memory_space<vmem>>, %arg9: memref<1x256xf32, #tpu.memory_space<vmem>>, %arg10: memref<256x256xf32, #tpu.memory_space<vmem>>, %arg11: memref<1x256xf32, #tpu.memory_space<vmem>>, %arg12: memref<256x256xf32, #tpu.memory_space<vmem>>, %arg13: memref<1x256xf32, #tpu.memory_space<vmem>>, %arg14: memref<1x23x256xbf16, #tpu.memory_space<vmem>>) attributes {dimension_semantics = [#tpu.dimension_semantics<parallel>], iteration_bounds = array<i64: 2>, scalar_prefetch = 0 : i64, scratch_operands = 0 : i64, tpu.core_type = #tpu.core_type<tc>, window_params = [{transform_indices = @transform_0, window_bounds = array<i64: 1, 32, 1>}, {pipeline_mode = #tpu.pipeline_mode<synchronous>, transform_indices = @transform_1, window_bounds = array<i64: 28, 64>}, {pipeline_mode = #tpu.pipeline_mode<synchronous>, transform_indices = @transform_2, window_bounds = array<i64: 32, 64>}, {pipeline_mode = #tpu.pipeline_mode<synchronous>, transform_indices = @transform_3, window_bounds = array<i64: 1, 64>}, {pipeline_mode = #tpu.pipeline_mode<synchronous>, transform_indices = @transform_4, window_bounds = array<i64: 1, 64>}, {pipeline_mode = #tpu.pipeline_mode<synchronous>, transform_indices = @transform_5, window_bounds = array<i64: 640, 256>}, {pipeline_mode = #tpu.pipeline_mode<synchronous>, transform_indices = @transform_6, window_bounds = array<i64: 1, 256>}, {pipeline_mode = #tpu.pipeline_mode<synchronous>, transform_indices = @transform_7, window_bounds = array<i64: 1, 256>}, {pipeline_mode = #tpu.pipeline_mode<synchronous>, transform_indices = @transform_8, window_bounds = array<i64: 1, 256>}, {pipeline_mode = #tpu.pipeline_mode<synchronous>, transform_indices = @transform_9, window_bounds = array<i64: 256, 256>}, {pipeline_mode = #tpu.pipeline_mode<synchronous>, transform_indices = @transform_10, window_bounds = array<i64: 1, 256>}, {pipeline_mode = #tpu.pipeline_mode<synchronous>, transform_indices = @transform_11, window_bounds = array<i64: 256, 256>}, {pipeline_mode = #tpu.pipeline_mode<synchronous>, transform_indices = @transform_12, window_bounds = array<i64: 1, 256>}, {transform_indices = @transform_13, window_bounds = array<i64: 1, 23, 256>}]} {
    %c0 = arith.constant 0 : index
    %c0_0 = arith.constant 0 : index
    %c0_1 = arith.constant 0 : index
    %0 = vector.load %arg1[%c0, %c0_0, %c0_1] : memref<1x32x1xi32, #tpu.memory_space<vmem>>, vector<1x32x1xi32>
    %1 = vector.shape_cast %0 : vector<1x32x1xi32> to vector<32x1xi32>
    %2 = tpu.iota {dimensions = array<i32: 1>} : vector<32x28xi32>
    %3 = vector.broadcast %1 : vector<32x1xi32> to vector<32x28xi32>
    %4 = arith.cmpi eq, %3, %2 : vector<32x28xi32>
    %5 = arith.extui %4 : vector<32x28xi1> to vector<32x28xi32>
    %6 = arith.sitofp %5 : vector<32x28xi32> to vector<32x28xf32>
    %c0_2 = arith.constant 0 : index
    %c0_3 = arith.constant 0 : index
    %7 = vector.load %arg2[%c0_2, %c0_3] : memref<28x64xf32, #tpu.memory_space<vmem>>, vector<28x64xf32>
    %cst = arith.constant dense<0.000000e+00> : vector<32x64xf32>
    %8 = tpu.matmul %6, %7, %cst {dimension_numbers = #tpu.dot_dimension_numbers<[1], [0], [0], [1], [0, 0, 1, 1], [], []>} : vector<32x28xf32>, vector<28x64xf32>, vector<32x64xf32> -> vector<32x64xf32>
    %c0_4 = arith.constant 0 : index
    %c0_5 = arith.constant 0 : index
    %9 = vector.load %arg3[%c0_4, %c0_5] : memref<32x64xf32, #tpu.memory_space<vmem>>, vector<32x64xf32>
    %10 = arith.addf %8, %9 : vector<32x64xf32>
    %cst_6 = arith.constant dense<0.000000e+00> : vector<32xf32>
    %11 = vector.multi_reduction <add>, %10, %cst_6 [1] : vector<32x64xf32> to vector<32xf32>
    %12 = vector.shape_cast %11 : vector<32xf32> to vector<32x1xf32>
    %cst_7 = arith.constant 6.400000e+01 : f32
    %13 = vector.broadcast %cst_7 : f32 to vector<32x1xf32>
    %14 = arith.divf %12, %13 : vector<32x1xf32>
    %15 = vector.broadcast %14 : vector<32x1xf32> to vector<32x64xf32>
    %16 = arith.subf %10, %15 : vector<32x64xf32>
    %17 = arith.mulf %16, %16 : vector<32x64xf32>
    %cst_8 = arith.constant dense<0.000000e+00> : vector<32xf32>
    %18 = vector.multi_reduction <add>, %17, %cst_8 [1] : vector<32x64xf32> to vector<32xf32>
    %19 = vector.shape_cast %18 : vector<32xf32> to vector<32x1xf32>
    %cst_9 = arith.constant 6.400000e+01 : f32
    %20 = vector.broadcast %cst_9 : f32 to vector<32x1xf32>
    %21 = arith.divf %19, %20 : vector<32x1xf32>
    %22 = vector.broadcast %14 : vector<32x1xf32> to vector<32x64xf32>
    %23 = arith.subf %10, %22 : vector<32x64xf32>
    %cst_10 = arith.constant 9.99999974E-6 : f32
    %24 = vector.broadcast %cst_10 : f32 to vector<32x1xf32>
    %25 = arith.addf %21, %24 : vector<32x1xf32>
    %26 = math.rsqrt %25 : vector<32x1xf32>
    %27 = vector.broadcast %26 : vector<32x1xf32> to vector<32x64xf32>
    %28 = arith.mulf %23, %27 : vector<32x64xf32>
    %c0_11 = arith.constant 0 : index
    %c0_12 = arith.constant 0 : index
    %29 = vector.load %arg4[%c0_11, %c0_12] : memref<1x64xf32, #tpu.memory_space<vmem>>, vector<1x64xf32>
    %30 = vector.broadcast %29 : vector<1x64xf32> to vector<32x64xf32>
    %31 = arith.mulf %28, %30 : vector<32x64xf32>
    %c0_13 = arith.constant 0 : index
    %c0_14 = arith.constant 0 : index
    %32 = vector.load %arg5[%c0_13, %c0_14] : memref<1x64xf32, #tpu.memory_space<vmem>>, vector<1x64xf32>
    %33 = vector.broadcast %32 : vector<1x64xf32> to vector<32x64xf32>
    %34 = arith.addf %31, %33 : vector<32x64xf32>
    %cst_15 = arith.constant 0.000000e+00 : f32
    %35 = vector.broadcast %cst_15 : f32 to vector<23x256xf32>
    %36 = vector.extract_strided_slice %34 {offsets = [0, 0], sizes = [23, 64], strides = [1, 1]} : vector<32x64xf32> to vector<23x64xf32>
    %37 = arith.truncf %36 : vector<23x64xf32> to vector<23x64xbf16>
    %c0_16 = arith.constant 0 : index
    %c0_17 = arith.constant 0 : index
    %38 = vector.load %arg6[%c0_16, %c0_17] : memref<640x256xbf16, #tpu.memory_space<vmem>>, vector<64x256xbf16>
    %cst_18 = arith.constant dense<0.000000e+00> : vector<23x256xf32>
    %39 = tpu.matmul %37, %38, %cst_18 {dimension_numbers = #tpu.dot_dimension_numbers<[1], [0], [0], [1], [0, 0, 1, 1], [], []>} : vector<23x64xbf16>, vector<64x256xbf16>, vector<23x256xf32> -> vector<23x256xf32>
    %40 = arith.addf %35, %39 : vector<23x256xf32>
    %41 = vector.extract_strided_slice %34 {offsets = [1, 0], sizes = [23, 64], strides = [1, 1]} : vector<32x64xf32> to vector<23x64xf32>
    %42 = arith.truncf %41 : vector<23x64xf32> to vector<23x64xbf16>
    %c64 = arith.constant 64 : index
    %c0_19 = arith.constant 0 : index
    %43 = vector.load %arg6[%c64, %c0_19] : memref<640x256xbf16, #tpu.memory_space<vmem>>, vector<64x256xbf16>
    %cst_20 = arith.constant dense<0.000000e+00> : vector<23x256xf32>
    %44 = tpu.matmul %42, %43, %cst_20 {dimension_numbers = #tpu.dot_dimension_numbers<[1], [0], [0], [1], [0, 0, 1, 1], [], []>} : vector<23x64xbf16>, vector<64x256xbf16>, vector<23x256xf32> -> vector<23x256xf32>
    %45 = arith.addf %40, %44 : vector<23x256xf32>
    %46 = vector.extract_strided_slice %34 {offsets = [2, 0], sizes = [23, 64], strides = [1, 1]} : vector<32x64xf32> to vector<23x64xf32>
    %47 = arith.truncf %46 : vector<23x64xf32> to vector<23x64xbf16>
    %c128 = arith.constant 128 : index
    %c0_21 = arith.constant 0 : index
    %48 = vector.load %arg6[%c128, %c0_21] : memref<640x256xbf16, #tpu.memory_space<vmem>>, vector<64x256xbf16>
    %cst_22 = arith.constant dense<0.000000e+00> : vector<23x256xf32>
    %49 = tpu.matmul %47, %48, %cst_22 {dimension_numbers = #tpu.dot_dimension_numbers<[1], [0], [0], [1], [0, 0, 1, 1], [], []>} : vector<23x64xbf16>, vector<64x256xbf16>, vector<23x256xf32> -> vector<23x256xf32>
    %50 = arith.addf %45, %49 : vector<23x256xf32>
    %51 = vector.extract_strided_slice %34 {offsets = [3, 0], sizes = [23, 64], strides = [1, 1]} : vector<32x64xf32> to vector<23x64xf32>
    %52 = arith.truncf %51 : vector<23x64xf32> to vector<23x64xbf16>
    %c192 = arith.constant 192 : index
    %c0_23 = arith.constant 0 : index
    %53 = vector.load %arg6[%c192, %c0_23] : memref<640x256xbf16, #tpu.memory_space<vmem>>, vector<64x256xbf16>
    %cst_24 = arith.constant dense<0.000000e+00> : vector<23x256xf32>
    %54 = tpu.matmul %52, %53, %cst_24 {dimension_numbers = #tpu.dot_dimension_numbers<[1], [0], [0], [1], [0, 0, 1, 1], [], []>} : vector<23x64xbf16>, vector<64x256xbf16>, vector<23x256xf32> -> vector<23x256xf32>
    %55 = arith.addf %50, %54 : vector<23x256xf32>
    %56 = vector.extract_strided_slice %34 {offsets = [4, 0], sizes = [23, 64], strides = [1, 1]} : vector<32x64xf32> to vector<23x64xf32>
    %57 = arith.truncf %56 : vector<23x64xf32> to vector<23x64xbf16>
    %c256 = arith.constant 256 : index
    %c0_25 = arith.constant 0 : index
    %58 = vector.load %arg6[%c256, %c0_25] : memref<640x256xbf16, #tpu.memory_space<vmem>>, vector<64x256xbf16>
    %cst_26 = arith.constant dense<0.000000e+00> : vector<23x256xf32>
    %59 = tpu.matmul %57, %58, %cst_26 {dimension_numbers = #tpu.dot_dimension_numbers<[1], [0], [0], [1], [0, 0, 1, 1], [], []>} : vector<23x64xbf16>, vector<64x256xbf16>, vector<23x256xf32> -> vector<23x256xf32>
    %60 = arith.addf %55, %59 : vector<23x256xf32>
    %61 = vector.extract_strided_slice %34 {offsets = [5, 0], sizes = [23, 64], strides = [1, 1]} : vector<32x64xf32> to vector<23x64xf32>
    %62 = arith.truncf %61 : vector<23x64xf32> to vector<23x64xbf16>
    %c320 = arith.constant 320 : index
    %c0_27 = arith.constant 0 : index
    %63 = vector.load %arg6[%c320, %c0_27] : memref<640x256xbf16, #tpu.memory_space<vmem>>, vector<64x256xbf16>
    %cst_28 = arith.constant dense<0.000000e+00> : vector<23x256xf32>
    %64 = tpu.matmul %62, %63, %cst_28 {dimension_numbers = #tpu.dot_dimension_numbers<[1], [0], [0], [1], [0, 0, 1, 1], [], []>} : vector<23x64xbf16>, vector<64x256xbf16>, vector<23x256xf32> -> vector<23x256xf32>
    %65 = arith.addf %60, %64 : vector<23x256xf32>
    %66 = vector.extract_strided_slice %34 {offsets = [6, 0], sizes = [23, 64], strides = [1, 1]} : vector<32x64xf32> to vector<23x64xf32>
    %67 = arith.truncf %66 : vector<23x64xf32> to vector<23x64xbf16>
    %c384 = arith.constant 384 : index
    %c0_29 = arith.constant 0 : index
    %68 = vector.load %arg6[%c384, %c0_29] : memref<640x256xbf16, #tpu.memory_space<vmem>>, vector<64x256xbf16>
    %cst_30 = arith.constant dense<0.000000e+00> : vector<23x256xf32>
    %69 = tpu.matmul %67, %68, %cst_30 {dimension_numbers = #tpu.dot_dimension_numbers<[1], [0], [0], [1], [0, 0, 1, 1], [], []>} : vector<23x64xbf16>, vector<64x256xbf16>, vector<23x256xf32> -> vector<23x256xf32>
    %70 = arith.addf %65, %69 : vector<23x256xf32>
    %71 = vector.extract_strided_slice %34 {offsets = [7, 0], sizes = [23, 64], strides = [1, 1]} : vector<32x64xf32> to vector<23x64xf32>
    %72 = arith.truncf %71 : vector<23x64xf32> to vector<23x64xbf16>
    %c448 = arith.constant 448 : index
    %c0_31 = arith.constant 0 : index
    %73 = vector.load %arg6[%c448, %c0_31] : memref<640x256xbf16, #tpu.memory_space<vmem>>, vector<64x256xbf16>
    %cst_32 = arith.constant dense<0.000000e+00> : vector<23x256xf32>
    %74 = tpu.matmul %72, %73, %cst_32 {dimension_numbers = #tpu.dot_dimension_numbers<[1], [0], [0], [1], [0, 0, 1, 1], [], []>} : vector<23x64xbf16>, vector<64x256xbf16>, vector<23x256xf32> -> vector<23x256xf32>
    %75 = arith.addf %70, %74 : vector<23x256xf32>
    %76 = vector.extract_strided_slice %34 {offsets = [8, 0], sizes = [23, 64], strides = [1, 1]} : vector<32x64xf32> to vector<23x64xf32>
    %77 = arith.truncf %76 : vector<23x64xf32> to vector<23x64xbf16>
    %c512 = arith.constant 512 : index
    %c0_33 = arith.constant 0 : index
    %78 = vector.load %arg6[%c512, %c0_33] : memref<640x256xbf16, #tpu.memory_space<vmem>>, vector<64x256xbf16>
    %cst_34 = arith.constant dense<0.000000e+00> : vector<23x256xf32>
    %79 = tpu.matmul %77, %78, %cst_34 {dimension_numbers = #tpu.dot_dimension_numbers<[1], [0], [0], [1], [0, 0, 1, 1], [], []>} : vector<23x64xbf16>, vector<64x256xbf16>, vector<23x256xf32> -> vector<23x256xf32>
    %80 = arith.addf %75, %79 : vector<23x256xf32>
    %81 = vector.extract_strided_slice %34 {offsets = [9, 0], sizes = [23, 64], strides = [1, 1]} : vector<32x64xf32> to vector<23x64xf32>
    %82 = arith.truncf %81 : vector<23x64xf32> to vector<23x64xbf16>
    %c576 = arith.constant 576 : index
    %c0_35 = arith.constant 0 : index
    %83 = vector.load %arg6[%c576, %c0_35] : memref<640x256xbf16, #tpu.memory_space<vmem>>, vector<64x256xbf16>
    %cst_36 = arith.constant dense<0.000000e+00> : vector<23x256xf32>
    %84 = tpu.matmul %82, %83, %cst_36 {dimension_numbers = #tpu.dot_dimension_numbers<[1], [0], [0], [1], [0, 0, 1, 1], [], []>} : vector<23x64xbf16>, vector<64x256xbf16>, vector<23x256xf32> -> vector<23x256xf32>
    %85 = arith.addf %80, %84 : vector<23x256xf32>
    %c0_37 = arith.constant 0 : index
    %c0_38 = arith.constant 0 : index
    %86 = vector.load %arg7[%c0_37, %c0_38] : memref<1x256xf32, #tpu.memory_space<vmem>>, vector<1x256xf32>
    %87 = vector.broadcast %86 : vector<1x256xf32> to vector<23x256xf32>
    %88 = arith.addf %85, %87 : vector<23x256xf32>
    %cst_39 = arith.constant 0.000000e+00 : f32
    %89 = vector.broadcast %cst_39 : f32 to vector<23x256xf32>
    %90 = arith.maximumf %88, %89 : vector<23x256xf32>
    %c0_40 = arith.constant 0 : index
    %c0_41 = arith.constant 0 : index
    %91 = vector.load %arg8[%c0_40, %c0_41] : memref<1x256xf32, #tpu.memory_space<vmem>>, vector<1x256xf32>
    %92 = vector.broadcast %91 : vector<1x256xf32> to vector<23x256xf32>
    %93 = arith.mulf %90, %92 : vector<23x256xf32>
    %c0_42 = arith.constant 0 : index
    %c0_43 = arith.constant 0 : index
    %94 = vector.load %arg9[%c0_42, %c0_43] : memref<1x256xf32, #tpu.memory_space<vmem>>, vector<1x256xf32>
    %95 = vector.broadcast %94 : vector<1x256xf32> to vector<23x256xf32>
    %96 = arith.addf %93, %95 : vector<23x256xf32>
    %cst_44 = arith.constant 0.0434782617 : f32
    %97 = vector.broadcast %cst_44 : f32 to vector<1x23xf32>
    %cst_45 = arith.constant dense<0.000000e+00> : vector<1x256xf32>
    %98 = tpu.matmul %97, %96, %cst_45 {dimension_numbers = #tpu.dot_dimension_numbers<[1], [0], [0], [1], [0, 0, 1, 1], [], []>} : vector<1x23xf32>, vector<23x256xf32>, vector<1x256xf32> -> vector<1x256xf32>
    %c0_46 = arith.constant 0 : index
    %c0_47 = arith.constant 0 : index
    %99 = vector.load %arg10[%c0_46, %c0_47] : memref<256x256xf32, #tpu.memory_space<vmem>>, vector<256x256xf32>
    %cst_48 = arith.constant dense<0.000000e+00> : vector<1x256xf32>
    %100 = tpu.matmul %98, %99, %cst_48 {dimension_numbers = #tpu.dot_dimension_numbers<[1], [0], [0], [1], [0, 0, 1, 1], [], []>} : vector<1x256xf32>, vector<256x256xf32>, vector<1x256xf32> -> vector<1x256xf32>
    %c0_49 = arith.constant 0 : index
    %c0_50 = arith.constant 0 : index
    %101 = vector.load %arg11[%c0_49, %c0_50] : memref<1x256xf32, #tpu.memory_space<vmem>>, vector<1x256xf32>
    %102 = arith.addf %100, %101 : vector<1x256xf32>
    %cst_51 = arith.constant 0.000000e+00 : f32
    %103 = vector.broadcast %cst_51 : f32 to vector<1x256xf32>
    %104 = arith.maximumf %102, %103 : vector<1x256xf32>
    %c0_52 = arith.constant 0 : index
    %c0_53 = arith.constant 0 : index
    %105 = vector.load %arg12[%c0_52, %c0_53] : memref<256x256xf32, #tpu.memory_space<vmem>>, vector<256x256xf32>
    %cst_54 = arith.constant dense<0.000000e+00> : vector<1x256xf32>
    %106 = tpu.matmul %104, %105, %cst_54 {dimension_numbers = #tpu.dot_dimension_numbers<[1], [0], [0], [1], [0, 0, 1, 1], [], []>} : vector<1x256xf32>, vector<256x256xf32>, vector<1x256xf32> -> vector<1x256xf32>
    %c0_55 = arith.constant 0 : index
    %c0_56 = arith.constant 0 : index
    %107 = vector.load %arg13[%c0_55, %c0_56] : memref<1x256xf32, #tpu.memory_space<vmem>>, vector<1x256xf32>
    %108 = arith.addf %106, %107 : vector<1x256xf32>
    %cst_57 = arith.constant 5.000000e-01 : f32
    %109 = vector.broadcast %cst_57 : f32 to vector<1x256xf32>
    %110 = arith.mulf %109, %108 : vector<1x256xf32>
    %111 = math.tanh %110 : vector<1x256xf32>
    %cst_58 = arith.constant 1.000000e+00 : f32
    %112 = vector.broadcast %cst_58 : f32 to vector<1x256xf32>
    %113 = arith.addf %111, %112 : vector<1x256xf32>
    %cst_59 = arith.constant 5.000000e-01 : f32
    %114 = vector.broadcast %cst_59 : f32 to vector<1x256xf32>
    %115 = arith.mulf %114, %113 : vector<1x256xf32>
    %116 = vector.broadcast %115 : vector<1x256xf32> to vector<23x256xf32>
    %117 = arith.mulf %96, %116 : vector<23x256xf32>
    %118 = arith.truncf %117 : vector<23x256xf32> to vector<23x256xbf16>
    %c0_60 = arith.constant 0 : index
    %c0_61 = arith.constant 0 : index
    %c0_62 = arith.constant 0 : index
    %119 = vector.load %arg14[%c0_60, %c0_61, %c0_62] : memref<1x23x256xbf16, #tpu.memory_space<vmem>>, vector<1x23x256xbf16>
    %120 = vector.shape_cast %119 : vector<1x23x256xbf16> to vector<23x256xbf16>
    %121 = vector.shape_cast %118 : vector<23x256xbf16> to vector<1x23x256xbf16>
    tpu.vector_store %arg14[%c0_60, %c0_61, %c0_62], %121 {strides = array<i32>} : memref<1x23x256xbf16, #tpu.memory_space<vmem>>, vector<1x23x256xbf16>,
    return
  }
  func.func @transform_0(%arg0: i32) -> (i32, i32, i32) {
    %c0_i32 = arith.constant 0 : i32
    %c0_i32_0 = arith.constant 0 : i32
    %c0_i32_1 = arith.constant 0 : i32
    return %arg0, %c0_i32, %c0_i32_0 : i32, i32, i32
  }
  func.func @transform_1(%arg0: i32) -> (i32, i32) {
    %c0_i32 = arith.constant 0 : i32
    %c0_i32_0 = arith.constant 0 : i32
    %c0_i32_1 = arith.constant 0 : i32
    return %c0_i32, %c0_i32_0 : i32, i32
  }
  func.func @transform_2(%arg0: i32) -> (i32, i32) {
    %c0_i32 = arith.constant 0 : i32
    %c0_i32_0 = arith.constant 0 : i32
    %c0_i32_1 = arith.constant 0 : i32
    return %c0_i32, %c0_i32_0 : i32, i32
  }
  func.func @transform_3(%arg0: i32) -> (i32, i32) {
    %c0_i32 = arith.constant 0 : i32
    %c0_i32_0 = arith.constant 0 : i32
    %c0_i32_1 = arith.constant 0 : i32
    return %c0_i32, %c0_i32_0 : i32, i32
  }
  func.func @transform_4(%arg0: i32) -> (i32, i32) {
    %c0_i32 = arith.constant 0 : i32
    %c0_i32_0 = arith.constant 0 : i32
    %c0_i32_1 = arith.constant 0 : i32
    return %c0_i32, %c0_i32_0 : i32, i32
  }
  func.func @transform_5(%arg0: i32) -> (i32, i32) {
    %c0_i32 = arith.constant 0 : i32
    %c0_i32_0 = arith.constant 0 : i32
    %c0_i32_1 = arith.constant 0 : i32
    return %c0_i32, %c0_i32_0 : i32, i32
  }
  func.func @transform_6(%arg0: i32) -> (i32, i32) {
    %c0_i32 = arith.constant 0 : i32
    %c0_i32_0 = arith.constant 0 : i32
    %c0_i32_1 = arith.constant 0 : i32
    return %c0_i32, %c0_i32_0 : i32, i32
  }
  func.func @transform_7(%arg0: i32) -> (i32, i32) {
    %c0_i32 = arith.constant 0 : i32
    %c0_i32_0 = arith.constant 0 : i32
    %c0_i32_1 = arith.constant 0 : i32
    return %c0_i32, %c0_i32_0 : i32, i32
  }
  func.func @transform_8(%arg0: i32) -> (i32, i32) {
    %c0_i32 = arith.constant 0 : i32
    %c0_i32_0 = arith.constant 0 : i32
    %c0_i32_1 = arith.constant 0 : i32
    return %c0_i32, %c0_i32_0 : i32, i32
  }
  func.func @transform_9(%arg0: i32) -> (i32, i32) {
    %c0_i32 = arith.constant 0 : i32
    %c0_i32_0 = arith.constant 0 : i32
    %c0_i32_1 = arith.constant 0 : i32
    return %c0_i32, %c0_i32_0 : i32, i32
  }
  func.func @transform_10(%arg0: i32) -> (i32, i32) {
    %c0_i32 = arith.constant 0 : i32
    %c0_i32_0 = arith.constant 0 : i32
    %c0_i32_1 = arith.constant 0 : i32
    return %c0_i32, %c0_i32_0 : i32, i32
  }
  func.func @transform_11(%arg0: i32) -> (i32, i32) {
    %c0_i32 = arith.constant 0 : i32
    %c0_i32_0 = arith.constant 0 : i32
    %c0_i32_1 = arith.constant 0 : i32
    return %c0_i32, %c0_i32_0 : i32, i32
  }
  func.func @transform_12(%arg0: i32) -> (i32, i32) {
    %c0_i32 = arith.constant 0 : i32
    %c0_i32_0 = arith.constant 0 : i32
    %c0_i32_1 = arith.constant 0 : i32
    return %c0_i32, %c0_i32_0 : i32, i32
  }
  func.func @transform_13(%arg0: i32) -> (i32, i32, i32) {
    %c0_i32 = arith.constant 0 : i32
    %c0_i32_0 = arith.constant 0 : i32
    %c0_i32_1 = arith.constant 0 : i32
    return %arg0, %c0_i32, %c0_i32_0 : i32, i32, i32
  }
}

module attributes {stable_mosaic.version = 11 : i64} {
  func.func @kernel(%arg0: i32, %arg1: memref<192x256xbf16, #tpu.memory_space<vmem>>, %arg2: memref<192x256xbf16, #tpu.memory_space<vmem>>, %arg3: memref<256x1024xbf16, #tpu.memory_space<vmem>>, %arg4: memref<256x1024xbf16, #tpu.memory_space<vmem>>, %arg5: memref<1x1024xf32, #tpu.memory_space<vmem>>, %arg6: memref<192x128xbf16, #tpu.memory_space<vmem>>, %arg7: memref<192x128xbf16, #tpu.memory_space<vmem>>, %arg8: memref<8x256xf32, #tpu.memory_space<vmem>>, %arg9: memref<192x512xf32, #tpu.memory_space<vmem>>, %arg10: memref<192x512xf32, #tpu.memory_space<vmem>>, %arg11: memref<8x256xf32, #tpu.memory_space<vmem>>, %arg12: memref<8x256xf32, #tpu.memory_space<vmem>>) attributes {dimension_semantics = [#tpu.dimension_semantics<arbitrary>], iteration_bounds = array<i64: 1>, scalar_prefetch = 0 : i64, scratch_operands = 4 : i64, tpu.core_type = #tpu.core_type<tc>, window_params = [{transform_indices = @transform_0, window_bounds = array<i64: 192, 256>}, {transform_indices = @transform_1, window_bounds = array<i64: 192, 256>}, {pipeline_mode = #tpu.pipeline_mode<synchronous>, transform_indices = @transform_2, window_bounds = array<i64: 256, 1024>}, {pipeline_mode = #tpu.pipeline_mode<synchronous>, transform_indices = @transform_3, window_bounds = array<i64: 256, 1024>}, {pipeline_mode = #tpu.pipeline_mode<synchronous>, transform_indices = @transform_4, window_bounds = array<i64: 1, 1024>}, {transform_indices = @transform_5, window_bounds = array<i64: 192, 128>}, {transform_indices = @transform_6, window_bounds = array<i64: 192, 128>}, {pipeline_mode = #tpu.pipeline_mode<synchronous>, transform_indices = @transform_7, window_bounds = array<i64: 8, 256>}]} {
    %c0_i32 = arith.constant 0 : i32
    %0 = arith.cmpi eq, %arg0, %c0_i32 : i32
    %1 = arith.extui %0 : i1 to i32
    %c0_i32_0 = arith.constant 0 : i32
    %2 = arith.cmpi ne, %1, %c0_i32_0 : i32
    scf.if %2 {
      %cst_39 = arith.constant 0.000000e+00 : f32
      %27 = vector.broadcast %cst_39 : f32 to vector<8x256xf32>
      %c0_40 = arith.constant 0 : index
      %c0_41 = arith.constant 0 : index
      %28 = vector.load %arg11[%c0_40, %c0_41] : memref<8x256xf32, #tpu.memory_space<vmem>>, vector<8x256xf32>
      tpu.vector_store %arg11[%c0_40, %c0_41], %27 {strides = array<i32>} : memref<8x256xf32, #tpu.memory_space<vmem>>, vector<8x256xf32>,
      %cst_42 = arith.constant 0.000000e+00 : f32
      %29 = vector.broadcast %cst_42 : f32 to vector<8x256xf32>
      %c0_43 = arith.constant 0 : index
      %c0_44 = arith.constant 0 : index
      %30 = vector.load %arg12[%c0_43, %c0_44] : memref<8x256xf32, #tpu.memory_space<vmem>>, vector<8x256xf32>
      tpu.vector_store %arg12[%c0_43, %c0_44], %29 {strides = array<i32>} : memref<8x256xf32, #tpu.memory_space<vmem>>, vector<8x256xf32>,
    } else {
    }
    %c0 = arith.constant 0 : index
    %c0_1 = arith.constant 0 : index
    %3 = vector.load %arg1[%c0, %c0_1] : memref<192x256xbf16, #tpu.memory_space<vmem>>, vector<192x256xbf16>
    %c0_2 = arith.constant 0 : index
    %c0_3 = arith.constant 0 : index
    %4 = vector.load %arg3[%c0_2, %c0_3] : memref<256x1024xbf16, #tpu.memory_space<vmem>>, vector<256x512xbf16>
    %cst = arith.constant dense<0.000000e+00> : vector<192x512xf32>
    %5 = tpu.matmul %3, %4, %cst {dimension_numbers = #tpu.dot_dimension_numbers<[1], [0], [0], [1], [0, 0, 1, 1], [], []>} : vector<192x256xbf16>, vector<256x512xbf16>, vector<192x512xf32> -> vector<192x512xf32>
    %c0_4 = arith.constant 0 : index
    %c0_5 = arith.constant 0 : index
    %6 = vector.load %arg9[%c0_4, %c0_5] : memref<192x512xf32, #tpu.memory_space<vmem>>, vector<192x512xf32>
    tpu.vector_store %arg9[%c0_4, %c0_5], %5 {strides = array<i32>} : memref<192x512xf32, #tpu.memory_space<vmem>>, vector<192x512xf32>,
    %c0_6 = arith.constant 0 : index
    %c0_7 = arith.constant 0 : index
    %7 = vector.load %arg2[%c0_6, %c0_7] : memref<192x256xbf16, #tpu.memory_space<vmem>>, vector<192x256xbf16>
    %c0_8 = arith.constant 0 : index
    %c512 = arith.constant 512 : index
    %8 = vector.load %arg3[%c0_8, %c512] : memref<256x1024xbf16, #tpu.memory_space<vmem>>, vector<256x512xbf16>
    %cst_9 = arith.constant dense<0.000000e+00> : vector<192x512xf32>
    %9 = tpu.matmul %7, %8, %cst_9 {dimension_numbers = #tpu.dot_dimension_numbers<[1], [0], [0], [1], [0, 0, 1, 1], [], []>} : vector<192x256xbf16>, vector<256x512xbf16>, vector<192x512xf32> -> vector<192x512xf32>
    %c0_10 = arith.constant 0 : index
    %c0_11 = arith.constant 0 : index
    %10 = vector.load %arg10[%c0_10, %c0_11] : memref<192x512xf32, #tpu.memory_space<vmem>>, vector<192x512xf32>
    tpu.vector_store %arg10[%c0_10, %c0_11], %9 {strides = array<i32>} : memref<192x512xf32, #tpu.memory_space<vmem>>, vector<192x512xf32>,
    %c0_12 = arith.constant 0 : index
    %c0_13 = arith.constant 0 : index
    %11 = vector.load %arg4[%c0_12, %c0_13] : memref<256x1024xbf16, #tpu.memory_space<vmem>>, vector<256x1024xbf16>
    %c0_14 = arith.constant 0 : index
    %c0_15 = arith.constant 0 : index
    %12 = vector.load %arg5[%c0_14, %c0_15] : memref<1x1024xf32, #tpu.memory_space<vmem>>, vector<1x512xf32>
    %c0_16 = arith.constant 0 : index
    %c512_17 = arith.constant 512 : index
    %13 = vector.load %arg5[%c0_16, %c512_17] : memref<1x1024xf32, #tpu.memory_space<vmem>>, vector<1x512xf32>
    %c24_i32 = arith.constant 24 : i32
    %14 = arith.muli %arg0, %c24_i32 : i32
    %c0_18 = arith.constant 0 : index
    %c0_19 = arith.constant 0 : index
    %15 = vector.load %arg11[%c0_18, %c0_19] : memref<8x256xf32, #tpu.memory_space<vmem>>, vector<8x128xf32>
    %c0_20 = arith.constant 0 : index
    %c0_21 = arith.constant 0 : index
    %16 = vector.load %arg12[%c0_20, %c0_21] : memref<8x256xf32, #tpu.memory_space<vmem>>, vector<8x128xf32>
    %c0_22 = arith.constant 0 : index
    %c128 = arith.constant 128 : index
    %17 = vector.load %arg11[%c0_22, %c128] : memref<8x256xf32, #tpu.memory_space<vmem>>, vector<8x128xf32>
    %c0_23 = arith.constant 0 : index
    %c128_24 = arith.constant 128 : index
    %18 = vector.load %arg12[%c0_23, %c128_24] : memref<8x256xf32, #tpu.memory_space<vmem>>, vector<8x128xf32>
    %c0_i32_25 = arith.constant 0 : i32
    %c6_i32 = arith.constant 6 : i32
    %19 = arith.addi %c0_i32_25, %c6_i32 : i32
    %c1_i32 = arith.constant 1 : i32
    %20:4 = scf.for %arg13 = %c0_i32_25 to %19 step %c1_i32 iter_args(%arg14 = %15, %arg15 = %16, %arg16 = %17, %arg17 = %18) -> (vector<8x128xf32>, vector<8x128xf32>, vector<8x128xf32>, vector<8x128xf32>)  : i32 {
      %c4_i32 = arith.constant 4 : i32
      %27 = arith.muli %arg13, %c4_i32 : i32
      %c0_i32_39 = arith.constant 0 : i32
      %28 = arith.addi %27, %c0_i32_39 : i32
      %29 = tpu.concatenate %arg14, %arg16 in 1 : vector<8x128xf32>, vector<8x128xf32> -> vector<8x256xf32>
      %30 = arith.truncf %29 : vector<8x256xf32> to vector<8x256xbf16>
      %cst_40 = arith.constant dense<0.000000e+00> : vector<8x1024xf32>
      %31 = tpu.matmul %30, %11, %cst_40 {dimension_numbers = #tpu.dot_dimension_numbers<[1], [0], [0], [1], [0, 0, 1, 1], [], []>} : vector<8x256xbf16>, vector<256x1024xbf16>, vector<8x1024xf32> -> vector<8x1024xf32>
      %c8_i32 = arith.constant 8 : i32
      %32 = arith.muli %28, %c8_i32 : i32
      %33 = tpu.assume_multiple %32, 8 : i32
      %c23_i32 = arith.constant 23 : i32
      %34 = arith.subi %c23_i32, %28 : i32
      %c8_i32_41 = arith.constant 8 : i32
      %35 = arith.muli %34, %c8_i32_41 : i32
      %36 = tpu.assume_multiple %35, 8 : i32
      %37 = vector.extract_strided_slice %31 {offsets = [0, 0], sizes = [8, 512], strides = [1, 1]} : vector<8x1024xf32> to vector<8x512xf32>
      %38 = arith.index_cast %33 : i32 to index
      %c0_42 = arith.constant 0 : index
      %39 = vector.load %arg9[%38, %c0_42] : memref<192x512xf32, #tpu.memory_space<vmem>>, vector<8x512xf32>
      %40 = arith.addf %37, %39 : vector<8x512xf32>
      %41 = vector.broadcast %12 : vector<1x512xf32> to vector<8x512xf32>
      %42 = arith.addf %40, %41 : vector<8x512xf32>
      %43 = vector.extract_strided_slice %31 {offsets = [0, 512], sizes = [8, 512], strides = [1, 1]} : vector<8x1024xf32> to vector<8x512xf32>
      %44 = arith.index_cast %36 : i32 to index
      %c0_43 = arith.constant 0 : index
      %45 = vector.load %arg10[%44, %c0_43] : memref<192x512xf32, #tpu.memory_space<vmem>>, vector<8x512xf32>
      %46 = arith.addf %43, %45 : vector<8x512xf32>
      %47 = vector.broadcast %13 : vector<1x512xf32> to vector<8x512xf32>
      %48 = arith.addf %46, %47 : vector<8x512xf32>
      %49 = vector.extract_strided_slice %42 {offsets = [0, 0], sizes = [8, 128], strides = [1, 1]} : vector<8x512xf32> to vector<8x128xf32>
      %cst_44 = arith.constant 5.000000e-01 : f32
      %50 = vector.broadcast %cst_44 : f32 to vector<8x128xf32>
      %51 = arith.mulf %50, %49 : vector<8x128xf32>
      %52 = math.tanh %51 : vector<8x128xf32>
      %cst_45 = arith.constant 1.000000e+00 : f32
      %53 = vector.broadcast %cst_45 : f32 to vector<8x128xf32>
      %54 = arith.addf %52, %53 : vector<8x128xf32>
      %cst_46 = arith.constant 5.000000e-01 : f32
      %55 = vector.broadcast %cst_46 : f32 to vector<8x128xf32>
      %56 = arith.mulf %55, %54 : vector<8x128xf32>
      %57 = vector.extract_strided_slice %42 {offsets = [0, 128], sizes = [8, 128], strides = [1, 1]} : vector<8x512xf32> to vector<8x128xf32>
      %cst_47 = arith.constant 5.000000e-01 : f32
      %58 = vector.broadcast %cst_47 : f32 to vector<8x128xf32>
      %59 = arith.mulf %58, %57 : vector<8x128xf32>
      %60 = math.tanh %59 : vector<8x128xf32>
      %cst_48 = arith.constant 1.000000e+00 : f32
      %61 = vector.broadcast %cst_48 : f32 to vector<8x128xf32>
      %62 = arith.addf %60, %61 : vector<8x128xf32>
      %cst_49 = arith.constant 5.000000e-01 : f32
      %63 = vector.broadcast %cst_49 : f32 to vector<8x128xf32>
      %64 = arith.mulf %63, %62 : vector<8x128xf32>
      %65 = vector.extract_strided_slice %42 {offsets = [0, 256], sizes = [8, 128], strides = [1, 1]} : vector<8x512xf32> to vector<8x128xf32>
      %66 = math.tanh %65 : vector<8x128xf32>
      %67 = vector.extract_strided_slice %42 {offsets = [0, 384], sizes = [8, 128], strides = [1, 1]} : vector<8x512xf32> to vector<8x128xf32>
      %cst_50 = arith.constant 5.000000e-01 : f32
      %68 = vector.broadcast %cst_50 : f32 to vector<8x128xf32>
      %69 = arith.mulf %68, %67 : vector<8x128xf32>
      %70 = math.tanh %69 : vector<8x128xf32>
      %cst_51 = arith.constant 1.000000e+00 : f32
      %71 = vector.broadcast %cst_51 : f32 to vector<8x128xf32>
      %72 = arith.addf %70, %71 : vector<8x128xf32>
      %cst_52 = arith.constant 5.000000e-01 : f32
      %73 = vector.broadcast %cst_52 : f32 to vector<8x128xf32>
      %74 = arith.mulf %73, %72 : vector<8x128xf32>
      %75 = arith.mulf %64, %arg15 : vector<8x128xf32>
      %76 = arith.mulf %56, %66 : vector<8x128xf32>
      %77 = arith.addf %75, %76 : vector<8x128xf32>
      %78 = math.tanh %77 : vector<8x128xf32>
      %79 = arith.mulf %74, %78 : vector<8x128xf32>
      %80 = vector.extract_strided_slice %48 {offsets = [0, 0], sizes = [8, 128], strides = [1, 1]} : vector<8x512xf32> to vector<8x128xf32>
      %cst_53 = arith.constant 5.000000e-01 : f32
      %81 = vector.broadcast %cst_53 : f32 to vector<8x128xf32>
      %82 = arith.mulf %81, %80 : vector<8x128xf32>
      %83 = math.tanh %82 : vector<8x128xf32>
      %cst_54 = arith.constant 1.000000e+00 : f32
      %84 = vector.broadcast %cst_54 : f32 to vector<8x128xf32>
      %85 = arith.addf %83, %84 : vector<8x128xf32>
      %cst_55 = arith.constant 5.000000e-01 : f32
      %86 = vector.broadcast %cst_55 : f32 to vector<8x128xf32>
      %87 = arith.mulf %86, %85 : vector<8x128xf32>
      %88 = vector.extract_strided_slice %48 {offsets = [0, 128], sizes = [8, 128], strides = [1, 1]} : vector<8x512xf32> to vector<8x128xf32>
      %cst_56 = arith.constant 5.000000e-01 : f32
      %89 = vector.broadcast %cst_56 : f32 to vector<8x128xf32>
      %90 = arith.mulf %89, %88 : vector<8x128xf32>
      %91 = math.tanh %90 : vector<8x128xf32>
      %cst_57 = arith.constant 1.000000e+00 : f32
      %92 = vector.broadcast %cst_57 : f32 to vector<8x128xf32>
      %93 = arith.addf %91, %92 : vector<8x128xf32>
      %cst_58 = arith.constant 5.000000e-01 : f32
      %94 = vector.broadcast %cst_58 : f32 to vector<8x128xf32>
      %95 = arith.mulf %94, %93 : vector<8x128xf32>
      %96 = vector.extract_strided_slice %48 {offsets = [0, 256], sizes = [8, 128], strides = [1, 1]} : vector<8x512xf32> to vector<8x128xf32>
      %97 = math.tanh %96 : vector<8x128xf32>
      %98 = vector.extract_strided_slice %48 {offsets = [0, 384], sizes = [8, 128], strides = [1, 1]} : vector<8x512xf32> to vector<8x128xf32>
      %cst_59 = arith.constant 5.000000e-01 : f32
      %99 = vector.broadcast %cst_59 : f32 to vector<8x128xf32>
      %100 = arith.mulf %99, %98 : vector<8x128xf32>
      %101 = math.tanh %100 : vector<8x128xf32>
      %cst_60 = arith.constant 1.000000e+00 : f32
      %102 = vector.broadcast %cst_60 : f32 to vector<8x128xf32>
      %103 = arith.addf %101, %102 : vector<8x128xf32>
      %cst_61 = arith.constant 5.000000e-01 : f32
      %104 = vector.broadcast %cst_61 : f32 to vector<8x128xf32>
      %105 = arith.mulf %104, %103 : vector<8x128xf32>
      %106 = arith.mulf %95, %arg17 : vector<8x128xf32>
      %107 = arith.mulf %87, %97 : vector<8x128xf32>
      %108 = arith.addf %106, %107 : vector<8x128xf32>
      %109 = math.tanh %108 : vector<8x128xf32>
      %110 = arith.mulf %105, %109 : vector<8x128xf32>
      %111 = arith.addi %14, %28 : i32
      %c23_i32_62 = arith.constant 23 : i32
      %112 = arith.cmpi slt, %111, %c23_i32_62 : i32
      %c1_i32_63 = arith.constant 1 : i32
      %113 = arith.cmpi sge, %111, %c1_i32_63 : i32
      %114 = arith.select %112, %79, %arg14 : vector<8x128xf32>
      %115 = arith.select %112, %77, %arg15 : vector<8x128xf32>
      %116 = arith.select %113, %110, %arg16 : vector<8x128xf32>
      %117 = arith.select %113, %108, %arg17 : vector<8x128xf32>
      %118 = arith.truncf %114 : vector<8x128xf32> to vector<8x128xbf16>
      %119 = arith.index_cast %33 : i32 to index
      %c0_64 = arith.constant 0 : index
      %120 = vector.load %arg6[%119, %c0_64] : memref<192x128xbf16, #tpu.memory_space<vmem>>, vector<8x128xbf16>
      tpu.vector_store %arg6[%119, %c0_64], %118 {strides = array<i32>} : memref<192x128xbf16, #tpu.memory_space<vmem>>, vector<8x128xbf16>,
      %121 = arith.truncf %116 : vector<8x128xf32> to vector<8x128xbf16>
      %122 = arith.index_cast %36 : i32 to index
      %c0_65 = arith.constant 0 : index
      %123 = vector.load %arg7[%122, %c0_65] : memref<192x128xbf16, #tpu.memory_space<vmem>>, vector<8x128xbf16>
      tpu.vector_store %arg7[%122, %c0_65], %121 {strides = array<i32>} : memref<192x128xbf16, #tpu.memory_space<vmem>>, vector<8x128xbf16>,
      %c4_i32_66 = arith.constant 4 : i32
      %124 = arith.muli %arg13, %c4_i32_66 : i32
      %c1_i32_67 = arith.constant 1 : i32
      %125 = arith.addi %124, %c1_i32_67 : i32
      %126 = tpu.concatenate %114, %116 in 1 : vector<8x128xf32>, vector<8x128xf32> -> vector<8x256xf32>
      %127 = arith.truncf %126 : vector<8x256xf32> to vector<8x256xbf16>
      %cst_68 = arith.constant dense<0.000000e+00> : vector<8x1024xf32>
      %128 = tpu.matmul %127, %11, %cst_68 {dimension_numbers = #tpu.dot_dimension_numbers<[1], [0], [0], [1], [0, 0, 1, 1], [], []>} : vector<8x256xbf16>, vector<256x1024xbf16>, vector<8x1024xf32> -> vector<8x1024xf32>
      %c8_i32_69 = arith.constant 8 : i32
      %129 = arith.muli %125, %c8_i32_69 : i32
      %130 = tpu.assume_multiple %129, 8 : i32
      %c23_i32_70 = arith.constant 23 : i32
      %131 = arith.subi %c23_i32_70, %125 : i32
      %c8_i32_71 = arith.constant 8 : i32
      %132 = arith.muli %131, %c8_i32_71 : i32
      %133 = tpu.assume_multiple %132, 8 : i32
      %134 = vector.extract_strided_slice %128 {offsets = [0, 0], sizes = [8, 512], strides = [1, 1]} : vector<8x1024xf32> to vector<8x512xf32>
      %135 = arith.index_cast %130 : i32 to index
      %c0_72 = arith.constant 0 : index
      %136 = vector.load %arg9[%135, %c0_72] : memref<192x512xf32, #tpu.memory_space<vmem>>, vector<8x512xf32>
      %137 = arith.addf %134, %136 : vector<8x512xf32>
      %138 = vector.broadcast %12 : vector<1x512xf32> to vector<8x512xf32>
      %139 = arith.addf %137, %138 : vector<8x512xf32>
      %140 = vector.extract_strided_slice %128 {offsets = [0, 512], sizes = [8, 512], strides = [1, 1]} : vector<8x1024xf32> to vector<8x512xf32>
      %141 = arith.index_cast %133 : i32 to index
      %c0_73 = arith.constant 0 : index
      %142 = vector.load %arg10[%141, %c0_73] : memref<192x512xf32, #tpu.memory_space<vmem>>, vector<8x512xf32>
      %143 = arith.addf %140, %142 : vector<8x512xf32>
      %144 = vector.broadcast %13 : vector<1x512xf32> to vector<8x512xf32>
      %145 = arith.addf %143, %144 : vector<8x512xf32>
      %146 = vector.extract_strided_slice %139 {offsets = [0, 0], sizes = [8, 128], strides = [1, 1]} : vector<8x512xf32> to vector<8x128xf32>
      %cst_74 = arith.constant 5.000000e-01 : f32
      %147 = vector.broadcast %cst_74 : f32 to vector<8x128xf32>
      %148 = arith.mulf %147, %146 : vector<8x128xf32>
      %149 = math.tanh %148 : vector<8x128xf32>
      %cst_75 = arith.constant 1.000000e+00 : f32
      %150 = vector.broadcast %cst_75 : f32 to vector<8x128xf32>
      %151 = arith.addf %149, %150 : vector<8x128xf32>
      %cst_76 = arith.constant 5.000000e-01 : f32
      %152 = vector.broadcast %cst_76 : f32 to vector<8x128xf32>
      %153 = arith.mulf %152, %151 : vector<8x128xf32>
      %154 = vector.extract_strided_slice %139 {offsets = [0, 128], sizes = [8, 128], strides = [1, 1]} : vector<8x512xf32> to vector<8x128xf32>
      %cst_77 = arith.constant 5.000000e-01 : f32
      %155 = vector.broadcast %cst_77 : f32 to vector<8x128xf32>
      %156 = arith.mulf %155, %154 : vector<8x128xf32>
      %157 = math.tanh %156 : vector<8x128xf32>
      %cst_78 = arith.constant 1.000000e+00 : f32
      %158 = vector.broadcast %cst_78 : f32 to vector<8x128xf32>
      %159 = arith.addf %157, %158 : vector<8x128xf32>
      %cst_79 = arith.constant 5.000000e-01 : f32
      %160 = vector.broadcast %cst_79 : f32 to vector<8x128xf32>
      %161 = arith.mulf %160, %159 : vector<8x128xf32>
      %162 = vector.extract_strided_slice %139 {offsets = [0, 256], sizes = [8, 128], strides = [1, 1]} : vector<8x512xf32> to vector<8x128xf32>
      %163 = math.tanh %162 : vector<8x128xf32>
      %164 = vector.extract_strided_slice %139 {offsets = [0, 384], sizes = [8, 128], strides = [1, 1]} : vector<8x512xf32> to vector<8x128xf32>
      %cst_80 = arith.constant 5.000000e-01 : f32
      %165 = vector.broadcast %cst_80 : f32 to vector<8x128xf32>
      %166 = arith.mulf %165, %164 : vector<8x128xf32>
      %167 = math.tanh %166 : vector<8x128xf32>
      %cst_81 = arith.constant 1.000000e+00 : f32
      %168 = vector.broadcast %cst_81 : f32 to vector<8x128xf32>
      %169 = arith.addf %167, %168 : vector<8x128xf32>
      %cst_82 = arith.constant 5.000000e-01 : f32
      %170 = vector.broadcast %cst_82 : f32 to vector<8x128xf32>
      %171 = arith.mulf %170, %169 : vector<8x128xf32>
      %172 = arith.mulf %161, %115 : vector<8x128xf32>
      %173 = arith.mulf %153, %163 : vector<8x128xf32>
      %174 = arith.addf %172, %173 : vector<8x128xf32>
      %175 = math.tanh %174 : vector<8x128xf32>
      %176 = arith.mulf %171, %175 : vector<8x128xf32>
      %177 = vector.extract_strided_slice %145 {offsets = [0, 0], sizes = [8, 128], strides = [1, 1]} : vector<8x512xf32> to vector<8x128xf32>
      %cst_83 = arith.constant 5.000000e-01 : f32
      %178 = vector.broadcast %cst_83 : f32 to vector<8x128xf32>
      %179 = arith.mulf %178, %177 : vector<8x128xf32>
      %180 = math.tanh %179 : vector<8x128xf32>
      %cst_84 = arith.constant 1.000000e+00 : f32
      %181 = vector.broadcast %cst_84 : f32 to vector<8x128xf32>
      %182 = arith.addf %180, %181 : vector<8x128xf32>
      %cst_85 = arith.constant 5.000000e-01 : f32
      %183 = vector.broadcast %cst_85 : f32 to vector<8x128xf32>
      %184 = arith.mulf %183, %182 : vector<8x128xf32>
      %185 = vector.extract_strided_slice %145 {offsets = [0, 128], sizes = [8, 128], strides = [1, 1]} : vector<8x512xf32> to vector<8x128xf32>
      %cst_86 = arith.constant 5.000000e-01 : f32
      %186 = vector.broadcast %cst_86 : f32 to vector<8x128xf32>
      %187 = arith.mulf %186, %185 : vector<8x128xf32>
      %188 = math.tanh %187 : vector<8x128xf32>
      %cst_87 = arith.constant 1.000000e+00 : f32
      %189 = vector.broadcast %cst_87 : f32 to vector<8x128xf32>
      %190 = arith.addf %188, %189 : vector<8x128xf32>
      %cst_88 = arith.constant 5.000000e-01 : f32
      %191 = vector.broadcast %cst_88 : f32 to vector<8x128xf32>
      %192 = arith.mulf %191, %190 : vector<8x128xf32>
      %193 = vector.extract_strided_slice %145 {offsets = [0, 256], sizes = [8, 128], strides = [1, 1]} : vector<8x512xf32> to vector<8x128xf32>
      %194 = math.tanh %193 : vector<8x128xf32>
      %195 = vector.extract_strided_slice %145 {offsets = [0, 384], sizes = [8, 128], strides = [1, 1]} : vector<8x512xf32> to vector<8x128xf32>
      %cst_89 = arith.constant 5.000000e-01 : f32
      %196 = vector.broadcast %cst_89 : f32 to vector<8x128xf32>
      %197 = arith.mulf %196, %195 : vector<8x128xf32>
      %198 = math.tanh %197 : vector<8x128xf32>
      %cst_90 = arith.constant 1.000000e+00 : f32
      %199 = vector.broadcast %cst_90 : f32 to vector<8x128xf32>
      %200 = arith.addf %198, %199 : vector<8x128xf32>
      %cst_91 = arith.constant 5.000000e-01 : f32
      %201 = vector.broadcast %cst_91 : f32 to vector<8x128xf32>
      %202 = arith.mulf %201, %200 : vector<8x128xf32>
      %203 = arith.mulf %192, %117 : vector<8x128xf32>
      %204 = arith.mulf %184, %194 : vector<8x128xf32>
      %205 = arith.addf %203, %204 : vector<8x128xf32>
      %206 = math.tanh %205 : vector<8x128xf32>
      %207 = arith.mulf %202, %206 : vector<8x128xf32>
      %208 = arith.addi %14, %125 : i32
      %c23_i32_92 = arith.constant 23 : i32
      %209 = arith.cmpi slt, %208, %c23_i32_92 : i32
      %c1_i32_93 = arith.constant 1 : i32
      %210 = arith.cmpi sge, %208, %c1_i32_93 : i32
      %211 = arith.select %209, %176, %114 : vector<8x128xf32>
      %212 = arith.select %209, %174, %115 : vector<8x128xf32>
      %213 = arith.select %210, %207, %116 : vector<8x128xf32>
      %214 = arith.select %210, %205, %117 : vector<8x128xf32>
      %215 = arith.truncf %211 : vector<8x128xf32> to vector<8x128xbf16>
      %216 = arith.index_cast %130 : i32 to index
      %c0_94 = arith.constant 0 : index
      %217 = vector.load %arg6[%216, %c0_94] : memref<192x128xbf16, #tpu.memory_space<vmem>>, vector<8x128xbf16>
      tpu.vector_store %arg6[%216, %c0_94], %215 {strides = array<i32>} : memref<192x128xbf16, #tpu.memory_space<vmem>>, vector<8x128xbf16>,
      %218 = arith.truncf %213 : vector<8x128xf32> to vector<8x128xbf16>
      %219 = arith.index_cast %133 : i32 to index
      %c0_95 = arith.constant 0 : index
      %220 = vector.load %arg7[%219, %c0_95] : memref<192x128xbf16, #tpu.memory_space<vmem>>, vector<8x128xbf16>
      tpu.vector_store %arg7[%219, %c0_95], %218 {strides = array<i32>} : memref<192x128xbf16, #tpu.memory_space<vmem>>, vector<8x128xbf16>,
      %c4_i32_96 = arith.constant 4 : i32
      %221 = arith.muli %arg13, %c4_i32_96 : i32
      %c2_i32 = arith.constant 2 : i32
      %222 = arith.addi %221, %c2_i32 : i32
      %223 = tpu.concatenate %211, %213 in 1 : vector<8x128xf32>, vector<8x128xf32> -> vector<8x256xf32>
      %224 = arith.truncf %223 : vector<8x256xf32> to vector<8x256xbf16>
      %cst_97 = arith.constant dense<0.000000e+00> : vector<8x1024xf32>
      %225 = tpu.matmul %224, %11, %cst_97 {dimension_numbers = #tpu.dot_dimension_numbers<[1], [0], [0], [1], [0, 0, 1, 1], [], []>} : vector<8x256xbf16>, vector<256x1024xbf16>, vector<8x1024xf32> -> vector<8x1024xf32>
      %c8_i32_98 = arith.constant 8 : i32
      %226 = arith.muli %222, %c8_i32_98 : i32
      %227 = tpu.assume_multiple %226, 8 : i32
      %c23_i32_99 = arith.constant 23 : i32
      %228 = arith.subi %c23_i32_99, %222 : i32
      %c8_i32_100 = arith.constant 8 : i32
      %229 = arith.muli %228, %c8_i32_100 : i32
      %230 = tpu.assume_multiple %229, 8 : i32
      %231 = vector.extract_strided_slice %225 {offsets = [0, 0], sizes = [8, 512], strides = [1, 1]} : vector<8x1024xf32> to vector<8x512xf32>
      %232 = arith.index_cast %227 : i32 to index
      %c0_101 = arith.constant 0 : index
      %233 = vector.load %arg9[%232, %c0_101] : memref<192x512xf32, #tpu.memory_space<vmem>>, vector<8x512xf32>
      %234 = arith.addf %231, %233 : vector<8x512xf32>
      %235 = vector.broadcast %12 : vector<1x512xf32> to vector<8x512xf32>
      %236 = arith.addf %234, %235 : vector<8x512xf32>
      %237 = vector.extract_strided_slice %225 {offsets = [0, 512], sizes = [8, 512], strides = [1, 1]} : vector<8x1024xf32> to vector<8x512xf32>
      %238 = arith.index_cast %230 : i32 to index
      %c0_102 = arith.constant 0 : index
      %239 = vector.load %arg10[%238, %c0_102] : memref<192x512xf32, #tpu.memory_space<vmem>>, vector<8x512xf32>
      %240 = arith.addf %237, %239 : vector<8x512xf32>
      %241 = vector.broadcast %13 : vector<1x512xf32> to vector<8x512xf32>
      %242 = arith.addf %240, %241 : vector<8x512xf32>
      %243 = vector.extract_strided_slice %236 {offsets = [0, 0], sizes = [8, 128], strides = [1, 1]} : vector<8x512xf32> to vector<8x128xf32>
      %cst_103 = arith.constant 5.000000e-01 : f32
      %244 = vector.broadcast %cst_103 : f32 to vector<8x128xf32>
      %245 = arith.mulf %244, %243 : vector<8x128xf32>
      %246 = math.tanh %245 : vector<8x128xf32>
      %cst_104 = arith.constant 1.000000e+00 : f32
      %247 = vector.broadcast %cst_104 : f32 to vector<8x128xf32>
      %248 = arith.addf %246, %247 : vector<8x128xf32>
      %cst_105 = arith.constant 5.000000e-01 : f32
      %249 = vector.broadcast %cst_105 : f32 to vector<8x128xf32>
      %250 = arith.mulf %249, %248 : vector<8x128xf32>
      %251 = vector.extract_strided_slice %236 {offsets = [0, 128], sizes = [8, 128], strides = [1, 1]} : vector<8x512xf32> to vector<8x128xf32>
      %cst_106 = arith.constant 5.000000e-01 : f32
      %252 = vector.broadcast %cst_106 : f32 to vector<8x128xf32>
      %253 = arith.mulf %252, %251 : vector<8x128xf32>
      %254 = math.tanh %253 : vector<8x128xf32>
      %cst_107 = arith.constant 1.000000e+00 : f32
      %255 = vector.broadcast %cst_107 : f32 to vector<8x128xf32>
      %256 = arith.addf %254, %255 : vector<8x128xf32>
      %cst_108 = arith.constant 5.000000e-01 : f32
      %257 = vector.broadcast %cst_108 : f32 to vector<8x128xf32>
      %258 = arith.mulf %257, %256 : vector<8x128xf32>
      %259 = vector.extract_strided_slice %236 {offsets = [0, 256], sizes = [8, 128], strides = [1, 1]} : vector<8x512xf32> to vector<8x128xf32>
      %260 = math.tanh %259 : vector<8x128xf32>
      %261 = vector.extract_strided_slice %236 {offsets = [0, 384], sizes = [8, 128], strides = [1, 1]} : vector<8x512xf32> to vector<8x128xf32>
      %cst_109 = arith.constant 5.000000e-01 : f32
      %262 = vector.broadcast %cst_109 : f32 to vector<8x128xf32>
      %263 = arith.mulf %262, %261 : vector<8x128xf32>
      %264 = math.tanh %263 : vector<8x128xf32>
      %cst_110 = arith.constant 1.000000e+00 : f32
      %265 = vector.broadcast %cst_110 : f32 to vector<8x128xf32>
      %266 = arith.addf %264, %265 : vector<8x128xf32>
      %cst_111 = arith.constant 5.000000e-01 : f32
      %267 = vector.broadcast %cst_111 : f32 to vector<8x128xf32>
      %268 = arith.mulf %267, %266 : vector<8x128xf32>
      %269 = arith.mulf %258, %212 : vector<8x128xf32>
      %270 = arith.mulf %250, %260 : vector<8x128xf32>
      %271 = arith.addf %269, %270 : vector<8x128xf32>
      %272 = math.tanh %271 : vector<8x128xf32>
      %273 = arith.mulf %268, %272 : vector<8x128xf32>
      %274 = vector.extract_strided_slice %242 {offsets = [0, 0], sizes = [8, 128], strides = [1, 1]} : vector<8x512xf32> to vector<8x128xf32>
      %cst_112 = arith.constant 5.000000e-01 : f32
      %275 = vector.broadcast %cst_112 : f32 to vector<8x128xf32>
      %276 = arith.mulf %275, %274 : vector<8x128xf32>
      %277 = math.tanh %276 : vector<8x128xf32>
      %cst_113 = arith.constant 1.000000e+00 : f32
      %278 = vector.broadcast %cst_113 : f32 to vector<8x128xf32>
      %279 = arith.addf %277, %278 : vector<8x128xf32>
      %cst_114 = arith.constant 5.000000e-01 : f32
      %280 = vector.broadcast %cst_114 : f32 to vector<8x128xf32>
      %281 = arith.mulf %280, %279 : vector<8x128xf32>
      %282 = vector.extract_strided_slice %242 {offsets = [0, 128], sizes = [8, 128], strides = [1, 1]} : vector<8x512xf32> to vector<8x128xf32>
      %cst_115 = arith.constant 5.000000e-01 : f32
      %283 = vector.broadcast %cst_115 : f32 to vector<8x128xf32>
      %284 = arith.mulf %283, %282 : vector<8x128xf32>
      %285 = math.tanh %284 : vector<8x128xf32>
      %cst_116 = arith.constant 1.000000e+00 : f32
      %286 = vector.broadcast %cst_116 : f32 to vector<8x128xf32>
      %287 = arith.addf %285, %286 : vector<8x128xf32>
      %cst_117 = arith.constant 5.000000e-01 : f32
      %288 = vector.broadcast %cst_117 : f32 to vector<8x128xf32>
      %289 = arith.mulf %288, %287 : vector<8x128xf32>
      %290 = vector.extract_strided_slice %242 {offsets = [0, 256], sizes = [8, 128], strides = [1, 1]} : vector<8x512xf32> to vector<8x128xf32>
      %291 = math.tanh %290 : vector<8x128xf32>
      %292 = vector.extract_strided_slice %242 {offsets = [0, 384], sizes = [8, 128], strides = [1, 1]} : vector<8x512xf32> to vector<8x128xf32>
      %cst_118 = arith.constant 5.000000e-01 : f32
      %293 = vector.broadcast %cst_118 : f32 to vector<8x128xf32>
      %294 = arith.mulf %293, %292 : vector<8x128xf32>
      %295 = math.tanh %294 : vector<8x128xf32>
      %cst_119 = arith.constant 1.000000e+00 : f32
      %296 = vector.broadcast %cst_119 : f32 to vector<8x128xf32>
      %297 = arith.addf %295, %296 : vector<8x128xf32>
      %cst_120 = arith.constant 5.000000e-01 : f32
      %298 = vector.broadcast %cst_120 : f32 to vector<8x128xf32>
      %299 = arith.mulf %298, %297 : vector<8x128xf32>
      %300 = arith.mulf %289, %214 : vector<8x128xf32>
      %301 = arith.mulf %281, %291 : vector<8x128xf32>
      %302 = arith.addf %300, %301 : vector<8x128xf32>
      %303 = math.tanh %302 : vector<8x128xf32>
      %304 = arith.mulf %299, %303 : vector<8x128xf32>
      %305 = arith.addi %14, %222 : i32
      %c23_i32_121 = arith.constant 23 : i32
      %306 = arith.cmpi slt, %305, %c23_i32_121 : i32
      %c1_i32_122 = arith.constant 1 : i32
      %307 = arith.cmpi sge, %305, %c1_i32_122 : i32
      %308 = arith.select %306, %273, %211 : vector<8x128xf32>
      %309 = arith.select %306, %271, %212 : vector<8x128xf32>
      %310 = arith.select %307, %304, %213 : vector<8x128xf32>
      %311 = arith.select %307, %302, %214 : vector<8x128xf32>
      %312 = arith.truncf %308 : vector<8x128xf32> to vector<8x128xbf16>
      %313 = arith.index_cast %227 : i32 to index
      %c0_123 = arith.constant 0 : index
      %314 = vector.load %arg6[%313, %c0_123] : memref<192x128xbf16, #tpu.memory_space<vmem>>, vector<8x128xbf16>
      tpu.vector_store %arg6[%313, %c0_123], %312 {strides = array<i32>} : memref<192x128xbf16, #tpu.memory_space<vmem>>, vector<8x128xbf16>,
      %315 = arith.truncf %310 : vector<8x128xf32> to vector<8x128xbf16>
      %316 = arith.index_cast %230 : i32 to index
      %c0_124 = arith.constant 0 : index
      %317 = vector.load %arg7[%316, %c0_124] : memref<192x128xbf16, #tpu.memory_space<vmem>>, vector<8x128xbf16>
      tpu.vector_store %arg7[%316, %c0_124], %315 {strides = array<i32>} : memref<192x128xbf16, #tpu.memory_space<vmem>>, vector<8x128xbf16>,
      %c4_i32_125 = arith.constant 4 : i32
      %318 = arith.muli %arg13, %c4_i32_125 : i32
      %c3_i32 = arith.constant 3 : i32
      %319 = arith.addi %318, %c3_i32 : i32
      %320 = tpu.concatenate %308, %310 in 1 : vector<8x128xf32>, vector<8x128xf32> -> vector<8x256xf32>
      %321 = arith.truncf %320 : vector<8x256xf32> to vector<8x256xbf16>
      %cst_126 = arith.constant dense<0.000000e+00> : vector<8x1024xf32>
      %322 = tpu.matmul %321, %11, %cst_126 {dimension_numbers = #tpu.dot_dimension_numbers<[1], [0], [0], [1], [0, 0, 1, 1], [], []>} : vector<8x256xbf16>, vector<256x1024xbf16>, vector<8x1024xf32> -> vector<8x1024xf32>
      %c8_i32_127 = arith.constant 8 : i32
      %323 = arith.muli %319, %c8_i32_127 : i32
      %324 = tpu.assume_multiple %323, 8 : i32
      %c23_i32_128 = arith.constant 23 : i32
      %325 = arith.subi %c23_i32_128, %319 : i32
      %c8_i32_129 = arith.constant 8 : i32
      %326 = arith.muli %325, %c8_i32_129 : i32
      %327 = tpu.assume_multiple %326, 8 : i32
      %328 = vector.extract_strided_slice %322 {offsets = [0, 0], sizes = [8, 512], strides = [1, 1]} : vector<8x1024xf32> to vector<8x512xf32>
      %329 = arith.index_cast %324 : i32 to index
      %c0_130 = arith.constant 0 : index
      %330 = vector.load %arg9[%329, %c0_130] : memref<192x512xf32, #tpu.memory_space<vmem>>, vector<8x512xf32>
      %331 = arith.addf %328, %330 : vector<8x512xf32>
      %332 = vector.broadcast %12 : vector<1x512xf32> to vector<8x512xf32>
      %333 = arith.addf %331, %332 : vector<8x512xf32>
      %334 = vector.extract_strided_slice %322 {offsets = [0, 512], sizes = [8, 512], strides = [1, 1]} : vector<8x1024xf32> to vector<8x512xf32>
      %335 = arith.index_cast %327 : i32 to index
      %c0_131 = arith.constant 0 : index
      %336 = vector.load %arg10[%335, %c0_131] : memref<192x512xf32, #tpu.memory_space<vmem>>, vector<8x512xf32>
      %337 = arith.addf %334, %336 : vector<8x512xf32>
      %338 = vector.broadcast %13 : vector<1x512xf32> to vector<8x512xf32>
      %339 = arith.addf %337, %338 : vector<8x512xf32>
      %340 = vector.extract_strided_slice %333 {offsets = [0, 0], sizes = [8, 128], strides = [1, 1]} : vector<8x512xf32> to vector<8x128xf32>
      %cst_132 = arith.constant 5.000000e-01 : f32
      %341 = vector.broadcast %cst_132 : f32 to vector<8x128xf32>
      %342 = arith.mulf %341, %340 : vector<8x128xf32>
      %343 = math.tanh %342 : vector<8x128xf32>
      %cst_133 = arith.constant 1.000000e+00 : f32
      %344 = vector.broadcast %cst_133 : f32 to vector<8x128xf32>
      %345 = arith.addf %343, %344 : vector<8x128xf32>
      %cst_134 = arith.constant 5.000000e-01 : f32
      %346 = vector.broadcast %cst_134 : f32 to vector<8x128xf32>
      %347 = arith.mulf %346, %345 : vector<8x128xf32>
      %348 = vector.extract_strided_slice %333 {offsets = [0, 128], sizes = [8, 128], strides = [1, 1]} : vector<8x512xf32> to vector<8x128xf32>
      %cst_135 = arith.constant 5.000000e-01 : f32
      %349 = vector.broadcast %cst_135 : f32 to vector<8x128xf32>
      %350 = arith.mulf %349, %348 : vector<8x128xf32>
      %351 = math.tanh %350 : vector<8x128xf32>
      %cst_136 = arith.constant 1.000000e+00 : f32
      %352 = vector.broadcast %cst_136 : f32 to vector<8x128xf32>
      %353 = arith.addf %351, %352 : vector<8x128xf32>
      %cst_137 = arith.constant 5.000000e-01 : f32
      %354 = vector.broadcast %cst_137 : f32 to vector<8x128xf32>
      %355 = arith.mulf %354, %353 : vector<8x128xf32>
      %356 = vector.extract_strided_slice %333 {offsets = [0, 256], sizes = [8, 128], strides = [1, 1]} : vector<8x512xf32> to vector<8x128xf32>
      %357 = math.tanh %356 : vector<8x128xf32>
      %358 = vector.extract_strided_slice %333 {offsets = [0, 384], sizes = [8, 128], strides = [1, 1]} : vector<8x512xf32> to vector<8x128xf32>
      %cst_138 = arith.constant 5.000000e-01 : f32
      %359 = vector.broadcast %cst_138 : f32 to vector<8x128xf32>
      %360 = arith.mulf %359, %358 : vector<8x128xf32>
      %361 = math.tanh %360 : vector<8x128xf32>
      %cst_139 = arith.constant 1.000000e+00 : f32
      %362 = vector.broadcast %cst_139 : f32 to vector<8x128xf32>
      %363 = arith.addf %361, %362 : vector<8x128xf32>
      %cst_140 = arith.constant 5.000000e-01 : f32
      %364 = vector.broadcast %cst_140 : f32 to vector<8x128xf32>
      %365 = arith.mulf %364, %363 : vector<8x128xf32>
      %366 = arith.mulf %355, %309 : vector<8x128xf32>
      %367 = arith.mulf %347, %357 : vector<8x128xf32>
      %368 = arith.addf %366, %367 : vector<8x128xf32>
      %369 = math.tanh %368 : vector<8x128xf32>
      %370 = arith.mulf %365, %369 : vector<8x128xf32>
      %371 = vector.extract_strided_slice %339 {offsets = [0, 0], sizes = [8, 128], strides = [1, 1]} : vector<8x512xf32> to vector<8x128xf32>
      %cst_141 = arith.constant 5.000000e-01 : f32
      %372 = vector.broadcast %cst_141 : f32 to vector<8x128xf32>
      %373 = arith.mulf %372, %371 : vector<8x128xf32>
      %374 = math.tanh %373 : vector<8x128xf32>
      %cst_142 = arith.constant 1.000000e+00 : f32
      %375 = vector.broadcast %cst_142 : f32 to vector<8x128xf32>
      %376 = arith.addf %374, %375 : vector<8x128xf32>
      %cst_143 = arith.constant 5.000000e-01 : f32
      %377 = vector.broadcast %cst_143 : f32 to vector<8x128xf32>
      %378 = arith.mulf %377, %376 : vector<8x128xf32>
      %379 = vector.extract_strided_slice %339 {offsets = [0, 128], sizes = [8, 128], strides = [1, 1]} : vector<8x512xf32> to vector<8x128xf32>
      %cst_144 = arith.constant 5.000000e-01 : f32
      %380 = vector.broadcast %cst_144 : f32 to vector<8x128xf32>
      %381 = arith.mulf %380, %379 : vector<8x128xf32>
      %382 = math.tanh %381 : vector<8x128xf32>
      %cst_145 = arith.constant 1.000000e+00 : f32
      %383 = vector.broadcast %cst_145 : f32 to vector<8x128xf32>
      %384 = arith.addf %382, %383 : vector<8x128xf32>
      %cst_146 = arith.constant 5.000000e-01 : f32
      %385 = vector.broadcast %cst_146 : f32 to vector<8x128xf32>
      %386 = arith.mulf %385, %384 : vector<8x128xf32>
      %387 = vector.extract_strided_slice %339 {offsets = [0, 256], sizes = [8, 128], strides = [1, 1]} : vector<8x512xf32> to vector<8x128xf32>
      %388 = math.tanh %387 : vector<8x128xf32>
      %389 = vector.extract_strided_slice %339 {offsets = [0, 384], sizes = [8, 128], strides = [1, 1]} : vector<8x512xf32> to vector<8x128xf32>
      %cst_147 = arith.constant 5.000000e-01 : f32
      %390 = vector.broadcast %cst_147 : f32 to vector<8x128xf32>
      %391 = arith.mulf %390, %389 : vector<8x128xf32>
      %392 = math.tanh %391 : vector<8x128xf32>
      %cst_148 = arith.constant 1.000000e+00 : f32
      %393 = vector.broadcast %cst_148 : f32 to vector<8x128xf32>
      %394 = arith.addf %392, %393 : vector<8x128xf32>
      %cst_149 = arith.constant 5.000000e-01 : f32
      %395 = vector.broadcast %cst_149 : f32 to vector<8x128xf32>
      %396 = arith.mulf %395, %394 : vector<8x128xf32>
      %397 = arith.mulf %386, %311 : vector<8x128xf32>
      %398 = arith.mulf %378, %388 : vector<8x128xf32>
      %399 = arith.addf %397, %398 : vector<8x128xf32>
      %400 = math.tanh %399 : vector<8x128xf32>
      %401 = arith.mulf %396, %400 : vector<8x128xf32>
      %402 = arith.addi %14, %319 : i32
      %c23_i32_150 = arith.constant 23 : i32
      %403 = arith.cmpi slt, %402, %c23_i32_150 : i32
      %c1_i32_151 = arith.constant 1 : i32
      %404 = arith.cmpi sge, %402, %c1_i32_151 : i32
      %405 = arith.select %403, %370, %308 : vector<8x128xf32>
      %406 = arith.select %403, %368, %309 : vector<8x128xf32>
      %407 = arith.select %404, %401, %310 : vector<8x128xf32>
      %408 = arith.select %404, %399, %311 : vector<8x128xf32>
      %409 = arith.truncf %405 : vector<8x128xf32> to vector<8x128xbf16>
      %410 = arith.index_cast %324 : i32 to index
      %c0_152 = arith.constant 0 : index
      %411 = vector.load %arg6[%410, %c0_152] : memref<192x128xbf16, #tpu.memory_space<vmem>>, vector<8x128xbf16>
      tpu.vector_store %arg6[%410, %c0_152], %409 {strides = array<i32>} : memref<192x128xbf16, #tpu.memory_space<vmem>>, vector<8x128xbf16>,
      %412 = arith.truncf %407 : vector<8x128xf32> to vector<8x128xbf16>
      %413 = arith.index_cast %327 : i32 to index
      %c0_153 = arith.constant 0 : index
      %414 = vector.load %arg7[%413, %c0_153] : memref<192x128xbf16, #tpu.memory_space<vmem>>, vector<8x128xbf16>
      tpu.vector_store %arg7[%413, %c0_153], %412 {strides = array<i32>} : memref<192x128xbf16, #tpu.memory_space<vmem>>, vector<8x128xbf16>,
      scf.yield %405, %406, %407, %408 : vector<8x128xf32>, vector<8x128xf32>, vector<8x128xf32>, vector<8x128xf32>
    }
    %c6_i32_26 = arith.constant 6 : i32
    %c0_27 = arith.constant 0 : index
    %c0_28 = arith.constant 0 : index
    %21 = vector.load %arg11[%c0_27, %c0_28] : memref<8x256xf32, #tpu.memory_space<vmem>>, vector<8x128xf32>
    tpu.vector_store %arg11[%c0_27, %c0_28], %20#0 {strides = array<i32>} : memref<8x256xf32, #tpu.memory_space<vmem>>, vector<8x128xf32>,
    %c0_29 = arith.constant 0 : index
    %c128_30 = arith.constant 128 : index
    %22 = vector.load %arg11[%c0_29, %c128_30] : memref<8x256xf32, #tpu.memory_space<vmem>>, vector<8x128xf32>
    tpu.vector_store %arg11[%c0_29, %c128_30], %20#2 {strides = array<i32>} : memref<8x256xf32, #tpu.memory_space<vmem>>, vector<8x128xf32>,
    %c0_31 = arith.constant 0 : index
    %c0_32 = arith.constant 0 : index
    %23 = vector.load %arg12[%c0_31, %c0_32] : memref<8x256xf32, #tpu.memory_space<vmem>>, vector<8x128xf32>
    tpu.vector_store %arg12[%c0_31, %c0_32], %20#1 {strides = array<i32>} : memref<8x256xf32, #tpu.memory_space<vmem>>, vector<8x128xf32>,
    %c0_33 = arith.constant 0 : index
    %c128_34 = arith.constant 128 : index
    %24 = vector.load %arg12[%c0_33, %c128_34] : memref<8x256xf32, #tpu.memory_space<vmem>>, vector<8x128xf32>
    tpu.vector_store %arg12[%c0_33, %c128_34], %20#3 {strides = array<i32>} : memref<8x256xf32, #tpu.memory_space<vmem>>, vector<8x128xf32>,
    %c0_35 = arith.constant 0 : index
    %c0_36 = arith.constant 0 : index
    %25 = vector.load %arg8[%c0_35, %c0_36] : memref<8x256xf32, #tpu.memory_space<vmem>>, vector<8x128xf32>
    tpu.vector_store %arg8[%c0_35, %c0_36], %20#0 {strides = array<i32>} : memref<8x256xf32, #tpu.memory_space<vmem>>, vector<8x128xf32>,
    %c0_37 = arith.constant 0 : index
    %c128_38 = arith.constant 128 : index
    %26 = vector.load %arg8[%c0_37, %c128_38] : memref<8x256xf32, #tpu.memory_space<vmem>>, vector<8x128xf32>
    tpu.vector_store %arg8[%c0_37, %c128_38], %20#2 {strides = array<i32>} : memref<8x256xf32, #tpu.memory_space<vmem>>, vector<8x128xf32>,
    return
  }
  func.func @transform_0(%arg0: i32) -> (i32, i32) {
    %c0_i32 = arith.constant 0 : i32
    %c0_i32_0 = arith.constant 0 : i32
    return %arg0, %c0_i32 : i32, i32
  }
  func.func @transform_1(%arg0: i32) -> (i32, i32) {
    %c0_i32 = arith.constant 0 : i32
    %0 = arith.subi %c0_i32, %arg0 : i32
    %c0_i32_0 = arith.constant 0 : i32
    %c0_i32_1 = arith.constant 0 : i32
    return %0, %c0_i32_0 : i32, i32
  }
  func.func @transform_2(%arg0: i32) -> (i32, i32) {
    %c0_i32 = arith.constant 0 : i32
    %c0_i32_0 = arith.constant 0 : i32
    %c0_i32_1 = arith.constant 0 : i32
    return %c0_i32, %c0_i32_0 : i32, i32
  }
  func.func @transform_3(%arg0: i32) -> (i32, i32) {
    %c0_i32 = arith.constant 0 : i32
    %c0_i32_0 = arith.constant 0 : i32
    %c0_i32_1 = arith.constant 0 : i32
    return %c0_i32, %c0_i32_0 : i32, i32
  }
  func.func @transform_4(%arg0: i32) -> (i32, i32) {
    %c0_i32 = arith.constant 0 : i32
    %c0_i32_0 = arith.constant 0 : i32
    %c0_i32_1 = arith.constant 0 : i32
    return %c0_i32, %c0_i32_0 : i32, i32
  }
  func.func @transform_5(%arg0: i32) -> (i32, i32) {
    %c0_i32 = arith.constant 0 : i32
    %c0_i32_0 = arith.constant 0 : i32
    return %arg0, %c0_i32 : i32, i32
  }
  func.func @transform_6(%arg0: i32) -> (i32, i32) {
    %c0_i32 = arith.constant 0 : i32
    %0 = arith.subi %c0_i32, %arg0 : i32
    %c0_i32_0 = arith.constant 0 : i32
    %c0_i32_1 = arith.constant 0 : i32
    return %0, %c0_i32_0 : i32, i32
  }
  func.func @transform_7(%arg0: i32) -> (i32, i32) {
    %c0_i32 = arith.constant 0 : i32
    %c0_i32_0 = arith.constant 0 : i32
    %c0_i32_1 = arith.constant 0 : i32
    return %c0_i32, %c0_i32_0 : i32, i32
  }
}

module attributes {stable_mosaic.version = 11 : i64} {
  func.func @attn_fc_kernel(%arg0: i32, %arg1: memref<1x23x256xbf16, #tpu.memory_space<vmem>>, %arg2: memref<1x1x256xf32, #tpu.memory_space<vmem>>, %arg3: memref<256x128xbf16, #tpu.memory_space<vmem>>, %arg4: memref<1x128xf32, #tpu.memory_space<vmem>>, %arg5: memref<256x128xf32, #tpu.memory_space<vmem>>, %arg6: memref<1x128xf32, #tpu.memory_space<vmem>>, %arg7: memref<128x1xf32, #tpu.memory_space<vmem>>, %arg8: memref<1x1xf32, #tpu.memory_space<vmem>>, %arg9: memref<256x32xf32, #tpu.memory_space<vmem>>, %arg10: memref<1x32xf32, #tpu.memory_space<vmem>>, %arg11: memref<2x32xf32, #tpu.memory_space<vmem>>, %arg12: memref<1x2xf32, #tpu.memory_space<vmem>>, %arg13: memref<1x2xf32, #tpu.memory_space<vmem>>, %arg14: memref<1x1xf32, #tpu.memory_space<vmem>>, %arg15: memref<1x1x1xf32, #tpu.memory_space<vmem>>, %arg16: memref<1x1x2xf32, #tpu.memory_space<vmem>>) attributes {dimension_semantics = [#tpu.dimension_semantics<parallel>], iteration_bounds = array<i64: 2>, scalar_prefetch = 0 : i64, scratch_operands = 0 : i64, tpu.core_type = #tpu.core_type<tc>, window_params = [{transform_indices = @transform_0, window_bounds = array<i64: 1, 23, 256>}, {transform_indices = @transform_1, window_bounds = array<i64: 1, 1, 256>}, {pipeline_mode = #tpu.pipeline_mode<synchronous>, transform_indices = @transform_2, window_bounds = array<i64: 256, 128>}, {pipeline_mode = #tpu.pipeline_mode<synchronous>, transform_indices = @transform_3, window_bounds = array<i64: 1, 128>}, {pipeline_mode = #tpu.pipeline_mode<synchronous>, transform_indices = @transform_4, window_bounds = array<i64: 256, 128>}, {pipeline_mode = #tpu.pipeline_mode<synchronous>, transform_indices = @transform_5, window_bounds = array<i64: 1, 128>}, {pipeline_mode = #tpu.pipeline_mode<synchronous>, transform_indices = @transform_6, window_bounds = array<i64: 128, 1>}, {pipeline_mode = #tpu.pipeline_mode<synchronous>, transform_indices = @transform_7, window_bounds = array<i64: 1, 1>}, {pipeline_mode = #tpu.pipeline_mode<synchronous>, transform_indices = @transform_8, window_bounds = array<i64: 256, 32>}, {pipeline_mode = #tpu.pipeline_mode<synchronous>, transform_indices = @transform_9, window_bounds = array<i64: 1, 32>}, {pipeline_mode = #tpu.pipeline_mode<synchronous>, transform_indices = @transform_10, window_bounds = array<i64: 2, 32>}, {pipeline_mode = #tpu.pipeline_mode<synchronous>, transform_indices = @transform_11, window_bounds = array<i64: 1, 2>}, {pipeline_mode = #tpu.pipeline_mode<synchronous>, transform_indices = @transform_12, window_bounds = array<i64: 1, 2>}, {pipeline_mode = #tpu.pipeline_mode<synchronous>, transform_indices = @transform_13, window_bounds = array<i64: 1, 1>}, {transform_indices = @transform_14, window_bounds = array<i64: 1, 1, 1>}, {transform_indices = @transform_15, window_bounds = array<i64: 1, 1, 2>}]} {
    %c0 = arith.constant 0 : index
    %c0_0 = arith.constant 0 : index
    %c0_1 = arith.constant 0 : index
    %0 = vector.load %arg1[%c0, %c0_0, %c0_1] : memref<1x23x256xbf16, #tpu.memory_space<vmem>>, vector<1x23x256xbf16>
    %1 = vector.shape_cast %0 : vector<1x23x256xbf16> to vector<23x256xbf16>
    %c0_2 = arith.constant 0 : index
    %c0_3 = arith.constant 0 : index
    %2 = vector.load %arg3[%c0_2, %c0_3] : memref<256x128xbf16, #tpu.memory_space<vmem>>, vector<256x128xbf16>
    %cst = arith.constant dense<0.000000e+00> : vector<23x128xf32>
    %3 = tpu.matmul %1, %2, %cst {dimension_numbers = #tpu.dot_dimension_numbers<[1], [0], [0], [1], [0, 0, 1, 1], [], []>} : vector<23x256xbf16>, vector<256x128xbf16>, vector<23x128xf32> -> vector<23x128xf32>
    %c0_4 = arith.constant 0 : index
    %c0_5 = arith.constant 0 : index
    %4 = vector.load %arg4[%c0_4, %c0_5] : memref<1x128xf32, #tpu.memory_space<vmem>>, vector<1x128xf32>
    %5 = vector.broadcast %4 : vector<1x128xf32> to vector<23x128xf32>
    %6 = arith.addf %3, %5 : vector<23x128xf32>
    %c0_6 = arith.constant 0 : index
    %c0_7 = arith.constant 0 : index
    %c0_8 = arith.constant 0 : index
    %7 = vector.load %arg2[%c0_6, %c0_7, %c0_8] : memref<1x1x256xf32, #tpu.memory_space<vmem>>, vector<1x1x256xf32>
    %8 = vector.shape_cast %7 : vector<1x1x256xf32> to vector<1x256xf32>
    %c0_9 = arith.constant 0 : index
    %c0_10 = arith.constant 0 : index
    %9 = vector.load %arg5[%c0_9, %c0_10] : memref<256x128xf32, #tpu.memory_space<vmem>>, vector<256x128xf32>
    %cst_11 = arith.constant dense<0.000000e+00> : vector<1x128xf32>
    %10 = tpu.matmul %8, %9, %cst_11 {dimension_numbers = #tpu.dot_dimension_numbers<[1], [0], [0], [1], [0, 0, 1, 1], [], []>} : vector<1x256xf32>, vector<256x128xf32>, vector<1x128xf32> -> vector<1x128xf32>
    %c0_12 = arith.constant 0 : index
    %c0_13 = arith.constant 0 : index
    %11 = vector.load %arg6[%c0_12, %c0_13] : memref<1x128xf32, #tpu.memory_space<vmem>>, vector<1x128xf32>
    %12 = arith.addf %10, %11 : vector<1x128xf32>
    %13 = vector.broadcast %12 : vector<1x128xf32> to vector<23x128xf32>
    %14 = arith.addf %6, %13 : vector<23x128xf32>
    %15 = math.tanh %14 : vector<23x128xf32>
    %c0_14 = arith.constant 0 : index
    %c0_15 = arith.constant 0 : index
    %16 = vector.load %arg7[%c0_14, %c0_15] : memref<128x1xf32, #tpu.memory_space<vmem>>, vector<128x1xf32>
    %cst_16 = arith.constant dense<0.000000e+00> : vector<23x1xf32>
    %17 = tpu.matmul %15, %16, %cst_16 {dimension_numbers = #tpu.dot_dimension_numbers<[1], [0], [0], [1], [0, 0, 1, 1], [], []>} : vector<23x128xf32>, vector<128x1xf32>, vector<23x1xf32> -> vector<23x1xf32>
    %c0_17 = arith.constant 0 : index
    %c0_18 = arith.constant 0 : index
    %18 = vector.load %arg8[%c0_17, %c0_18] : memref<1x1xf32, #tpu.memory_space<vmem>>, vector<1x1xf32>
    %19 = vector.broadcast %18 : vector<1x1xf32> to vector<23x1xf32>
    %20 = arith.addf %17, %19 : vector<23x1xf32>
    %cst_19 = arith.constant dense<0xFF800000> : vector<1xf32>
    %21 = vector.multi_reduction <maximumf>, %20, %cst_19 [0] : vector<23x1xf32> to vector<1xf32>
    %22 = vector.shape_cast %21 : vector<1xf32> to vector<1x1xf32>
    %23 = vector.broadcast %22 : vector<1x1xf32> to vector<23x1xf32>
    %24 = arith.subf %20, %23 : vector<23x1xf32>
    %25 = math.exp %24 : vector<23x1xf32>
    %cst_20 = arith.constant dense<0.000000e+00> : vector<1xf32>
    %26 = vector.multi_reduction <add>, %25, %cst_20 [0] : vector<23x1xf32> to vector<1xf32>
    %27 = vector.shape_cast %26 : vector<1xf32> to vector<1x1xf32>
    %28 = vector.broadcast %27 : vector<1x1xf32> to vector<23x1xf32>
    %29 = arith.divf %25, %28 : vector<23x1xf32>
    %30 = arith.extf %1 : vector<23x256xbf16> to vector<23x256xf32>
    %31 = vector.broadcast %29 : vector<23x1xf32> to vector<23x256xf32>
    %32 = arith.mulf %31, %30 : vector<23x256xf32>
    %cst_21 = arith.constant dense<0.000000e+00> : vector<256xf32>
    %33 = vector.multi_reduction <add>, %32, %cst_21 [0] : vector<23x256xf32> to vector<256xf32>
    %34 = vector.shape_cast %33 : vector<256xf32> to vector<1x256xf32>
    %c0_22 = arith.constant 0 : index
    %c0_23 = arith.constant 0 : index
    %35 = vector.load %arg9[%c0_22, %c0_23] : memref<256x32xf32, #tpu.memory_space<vmem>>, vector<256x32xf32>
    %cst_24 = arith.constant dense<0.000000e+00> : vector<1x32xf32>
    %36 = tpu.matmul %34, %35, %cst_24 {dimension_numbers = #tpu.dot_dimension_numbers<[1], [0], [0], [1], [0, 0, 1, 1], [], []>} : vector<1x256xf32>, vector<256x32xf32>, vector<1x32xf32> -> vector<1x32xf32>
    %c0_25 = arith.constant 0 : index
    %c0_26 = arith.constant 0 : index
    %37 = vector.load %arg10[%c0_25, %c0_26] : memref<1x32xf32, #tpu.memory_space<vmem>>, vector<1x32xf32>
    %38 = arith.addf %36, %37 : vector<1x32xf32>
    %cst_27 = arith.constant 0.000000e+00 : f32
    %39 = vector.broadcast %cst_27 : f32 to vector<1x32xf32>
    %40 = arith.maximumf %38, %39 : vector<1x32xf32>
    %c0_28 = arith.constant 0 : index
    %c0_29 = arith.constant 0 : index
    %41 = vector.load %arg11[%c0_28, %c0_29] : memref<2x32xf32, #tpu.memory_space<vmem>>, vector<2x32xf32>
    %42 = vector.extract_strided_slice %41 {offsets = [0, 0], sizes = [1, 32], strides = [1, 1]} : vector<2x32xf32> to vector<1x32xf32>
    %43 = arith.mulf %40, %42 : vector<1x32xf32>
    %cst_30 = arith.constant dense<0.000000e+00> : vector<1xf32>
    %44 = vector.multi_reduction <add>, %43, %cst_30 [1] : vector<1x32xf32> to vector<1xf32>
    %45 = vector.shape_cast %44 : vector<1xf32> to vector<1x1xf32>
    %46 = vector.extract_strided_slice %41 {offsets = [1, 0], sizes = [1, 32], strides = [1, 1]} : vector<2x32xf32> to vector<1x32xf32>
    %47 = arith.mulf %40, %46 : vector<1x32xf32>
    %cst_31 = arith.constant dense<0.000000e+00> : vector<1xf32>
    %48 = vector.multi_reduction <add>, %47, %cst_31 [1] : vector<1x32xf32> to vector<1xf32>
    %49 = vector.shape_cast %48 : vector<1xf32> to vector<1x1xf32>
    %50 = tpu.concatenate %45, %49 in 1 : vector<1x1xf32>, vector<1x1xf32> -> vector<1x2xf32>
    %c0_32 = arith.constant 0 : index
    %c0_33 = arith.constant 0 : index
    %51 = vector.load %arg12[%c0_32, %c0_33] : memref<1x2xf32, #tpu.memory_space<vmem>>, vector<1x2xf32>
    %52 = arith.addf %50, %51 : vector<1x2xf32>
    %c0_34 = arith.constant 0 : index
    %c0_35 = arith.constant 0 : index
    %53 = vector.load %arg13[%c0_34, %c0_35] : memref<1x2xf32, #tpu.memory_space<vmem>>, vector<1x2xf32>
    %54 = arith.mulf %52, %53 : vector<1x2xf32>
    %cst_36 = arith.constant dense<0.000000e+00> : vector<1xf32>
    %55 = vector.multi_reduction <add>, %54, %cst_36 [1] : vector<1x2xf32> to vector<1xf32>
    %56 = vector.shape_cast %55 : vector<1xf32> to vector<1x1xf32>
    %c0_37 = arith.constant 0 : index
    %c0_38 = arith.constant 0 : index
    %57 = vector.load %arg14[%c0_37, %c0_38] : memref<1x1xf32, #tpu.memory_space<vmem>>, vector<1x1xf32>
    %58 = arith.addf %56, %57 : vector<1x1xf32>
    %c0_39 = arith.constant 0 : index
    %c0_40 = arith.constant 0 : index
    %c0_41 = arith.constant 0 : index
    %59 = vector.load %arg16[%c0_39, %c0_40, %c0_41] : memref<1x1x2xf32, #tpu.memory_space<vmem>>, vector<1x1x2xf32>
    %60 = vector.shape_cast %59 : vector<1x1x2xf32> to vector<1x2xf32>
    %61 = vector.shape_cast %52 : vector<1x2xf32> to vector<1x1x2xf32>
    tpu.vector_store %arg16[%c0_39, %c0_40, %c0_41], %61 {strides = array<i32>} : memref<1x1x2xf32, #tpu.memory_space<vmem>>, vector<1x1x2xf32>,
    %cst_42 = arith.constant 5.000000e-01 : f32
    %62 = vector.broadcast %cst_42 : f32 to vector<1x1xf32>
    %63 = arith.mulf %62, %58 : vector<1x1xf32>
    %64 = math.tanh %63 : vector<1x1xf32>
    %cst_43 = arith.constant 1.000000e+00 : f32
    %65 = vector.broadcast %cst_43 : f32 to vector<1x1xf32>
    %66 = arith.addf %64, %65 : vector<1x1xf32>
    %cst_44 = arith.constant 5.000000e-01 : f32
    %67 = vector.broadcast %cst_44 : f32 to vector<1x1xf32>
    %68 = arith.mulf %67, %66 : vector<1x1xf32>
    %c0_45 = arith.constant 0 : index
    %c0_46 = arith.constant 0 : index
    %c0_47 = arith.constant 0 : index
    %69 = vector.load %arg15[%c0_45, %c0_46, %c0_47] : memref<1x1x1xf32, #tpu.memory_space<vmem>>, vector<1x1x1xf32>
    %70 = vector.shape_cast %69 : vector<1x1x1xf32> to vector<1x1xf32>
    %71 = vector.shape_cast %68 : vector<1x1xf32> to vector<1x1x1xf32>
    tpu.vector_store %arg15[%c0_45, %c0_46, %c0_47], %71 {strides = array<i32>} : memref<1x1x1xf32, #tpu.memory_space<vmem>>, vector<1x1x1xf32>,
    return
  }
  func.func @transform_0(%arg0: i32) -> (i32, i32, i32) {
    %c0_i32 = arith.constant 0 : i32
    %c0_i32_0 = arith.constant 0 : i32
    %c0_i32_1 = arith.constant 0 : i32
    return %arg0, %c0_i32, %c0_i32_0 : i32, i32, i32
  }
  func.func @transform_1(%arg0: i32) -> (i32, i32, i32) {
    %c0_i32 = arith.constant 0 : i32
    %c0_i32_0 = arith.constant 0 : i32
    %c0_i32_1 = arith.constant 0 : i32
    return %arg0, %c0_i32, %c0_i32_0 : i32, i32, i32
  }
  func.func @transform_2(%arg0: i32) -> (i32, i32) {
    %c0_i32 = arith.constant 0 : i32
    %c0_i32_0 = arith.constant 0 : i32
    %c0_i32_1 = arith.constant 0 : i32
    return %c0_i32, %c0_i32_0 : i32, i32
  }
  func.func @transform_3(%arg0: i32) -> (i32, i32) {
    %c0_i32 = arith.constant 0 : i32
    %c0_i32_0 = arith.constant 0 : i32
    %c0_i32_1 = arith.constant 0 : i32
    return %c0_i32, %c0_i32_0 : i32, i32
  }
  func.func @transform_4(%arg0: i32) -> (i32, i32) {
    %c0_i32 = arith.constant 0 : i32
    %c0_i32_0 = arith.constant 0 : i32
    %c0_i32_1 = arith.constant 0 : i32
    return %c0_i32, %c0_i32_0 : i32, i32
  }
  func.func @transform_5(%arg0: i32) -> (i32, i32) {
    %c0_i32 = arith.constant 0 : i32
    %c0_i32_0 = arith.constant 0 : i32
    %c0_i32_1 = arith.constant 0 : i32
    return %c0_i32, %c0_i32_0 : i32, i32
  }
  func.func @transform_6(%arg0: i32) -> (i32, i32) {
    %c0_i32 = arith.constant 0 : i32
    %c0_i32_0 = arith.constant 0 : i32
    %c0_i32_1 = arith.constant 0 : i32
    return %c0_i32, %c0_i32_0 : i32, i32
  }
  func.func @transform_7(%arg0: i32) -> (i32, i32) {
    %c0_i32 = arith.constant 0 : i32
    %c0_i32_0 = arith.constant 0 : i32
    %c0_i32_1 = arith.constant 0 : i32
    return %c0_i32, %c0_i32_0 : i32, i32
  }
  func.func @transform_8(%arg0: i32) -> (i32, i32) {
    %c0_i32 = arith.constant 0 : i32
    %c0_i32_0 = arith.constant 0 : i32
    %c0_i32_1 = arith.constant 0 : i32
    return %c0_i32, %c0_i32_0 : i32, i32
  }
  func.func @transform_9(%arg0: i32) -> (i32, i32) {
    %c0_i32 = arith.constant 0 : i32
    %c0_i32_0 = arith.constant 0 : i32
    %c0_i32_1 = arith.constant 0 : i32
    return %c0_i32, %c0_i32_0 : i32, i32
  }
  func.func @transform_10(%arg0: i32) -> (i32, i32) {
    %c0_i32 = arith.constant 0 : i32
    %c0_i32_0 = arith.constant 0 : i32
    %c0_i32_1 = arith.constant 0 : i32
    return %c0_i32, %c0_i32_0 : i32, i32
  }
  func.func @transform_11(%arg0: i32) -> (i32, i32) {
    %c0_i32 = arith.constant 0 : i32
    %c0_i32_0 = arith.constant 0 : i32
    %c0_i32_1 = arith.constant 0 : i32
    return %c0_i32, %c0_i32_0 : i32, i32
  }
  func.func @transform_12(%arg0: i32) -> (i32, i32) {
    %c0_i32 = arith.constant 0 : i32
    %c0_i32_0 = arith.constant 0 : i32
    %c0_i32_1 = arith.constant 0 : i32
    return %c0_i32, %c0_i32_0 : i32, i32
  }
  func.func @transform_13(%arg0: i32) -> (i32, i32) {
    %c0_i32 = arith.constant 0 : i32
    %c0_i32_0 = arith.constant 0 : i32
    %c0_i32_1 = arith.constant 0 : i32
    return %c0_i32, %c0_i32_0 : i32, i32
  }
  func.func @transform_14(%arg0: i32) -> (i32, i32, i32) {
    %c0_i32 = arith.constant 0 : i32
    %c0_i32_0 = arith.constant 0 : i32
    %c0_i32_1 = arith.constant 0 : i32
    return %arg0, %c0_i32, %c0_i32_0 : i32, i32, i32
  }
  func.func @transform_15(%arg0: i32) -> (i32, i32, i32) {
    %c0_i32 = arith.constant 0 : i32
    %c0_i32_0 = arith.constant 0 : i32
    %c0_i32_1 = arith.constant 0 : i32
    return %arg0, %c0_i32, %c0_i32_0 : i32, i32, i32
  }
}

</mosaic_0001>

<bundles_post_ra>
// kernel: forward.5
= control target key start
LH: loop header
LB: loop body
LE: loop exit
PB: predicated region body
PF: predicated region fallthrough
CT: control target
= control target key end

     0   :  { %s2162_s0 = inlined_call_operand.vmem [shape: bf16[2,23,256], index: 0, kind: input, shape index: {}]   ;;  %s2163_s1 = inlined_call_operand.vmem [shape: f32[2,1,256], index: 1, kind: input, shape index: {}]   ;;  %s2164_s2 = inlined_call_operand.vmem [shape: bf16[256,128], index: 2, kind: input, shape index: {}]   ;;  %s2165_s3 = inlined_call_operand.vmem [shape: f32[1,128], index: 3, kind: input, shape index: {}]   ;;  %s2166_s4 = inlined_call_operand.vmem [shape: f32[256,128], index: 4, kind: input, shape index: {}]   ;;  %s2167_s5 = inlined_call_operand.vmem [shape: f32[1,128], index: 5, kind: input, shape index: {}]   ;;  %s2168_s6 = inlined_call_operand.vmem [shape: f32[128,1], index: 6, kind: input, shape index: {}]   ;;  %s2169_s7 = inlined_call_operand.<no memory space> [shape: f32[1,1], index: 7, kind: input, shape index: {}]   ;;  %s2170_s8 = inlined_call_operand.vmem [shape: f32[256,32], index: 8, kind: input, shape index: {}]   ;;  %s2171_s9 = inlined_call_operand.vmem [shape: f32[1,32], index: 9, kind: input, shape index: {}]   ;;  %s2172_s10 = inlined_call_operand.vmem [shape: f32[2,32], index: 10, kind: input, shape index: {}]   ;;  %s2173_s11 = inlined_call_operand.vmem [shape: f32[1,2], index: 11, kind: input, shape index: {}]   ;;  %s2174_s12 = inlined_call_operand.vmem [shape: f32[1,2], index: 12, kind: input, shape index: {}]   ;;  %s2175_s14 = inlined_call_operand.vmem [shape: f32[2,1,1], index: 14, kind: output, shape index: {0}]   ;;  %s2176_s15 = inlined_call_operand.hbm [shape: f32[2,1,2], index: 15, kind: output, shape index: {1}]   ;;  %s2177_s13 = inlined_call_operand.<no memory space> [shape: f32[1,1], index: 13, kind: input, shape index: {}]  }
   0x1   :  { %v21_v0 = vstv %s2169_s7  ;;  %v23_v1 = vstv %s2177_s13 }
   0x2   :  { %22 = vst [vmem:[#allocation2] sm:$0x1] %v21_v0  ;;  %24 = vst [vmem:[#allocation3] sm:$0x1] %v23_v1 }
   0x3   :  { %25 = vsyncpa [#allocation5], 0 }
   0x4   :  { %27 = vsyncpa [#allocation5 + $0x1], 0  ;;  %s1699_s22 = smov 0   ;;  %s1701_s23 = smov 0  }
   0x5   :  { %s1703_s24 = smov 0   ;;  %s1705_s25 = smov 0  }
   0x6 LB: > { %2184 = sst [smem:[#allocation7_spill]] %s1595_s22  ;;  %s1720_s7 = sadd.s32 4294967295, %s1607_s25   ;;  %s1607_s25 = sphi %s1705_s25, %s2195_s25   ;;  %s1603_s24 = sphi %s1703_s24, %s2197_s24   ;;  %s1599_s23 = sphi %s1701_s23, %s2199_s23   ;;  %s1595_s22 = sphi %s1699_s22, %s2198_s22  }
   0x7   : > { %2185 = sst [smem:[#allocation8_spill]] %s1603_s24  ;;  %s1277_s13 = sadd.s32 4294967294, %s1607_s25  }
   0x8   : > { %2186 = sst [smem:[#allocation9_spill]] %s1607_s25  ;;  %s1724_s26 = sadd.s32 1, %s1607_s25  }
   0x9   : > { %2187 = sst [smem:[#allocation10_spill]] %s1724_s26  ;;  %s370_s27 = sadd.s32 1, %s1603_s24 }
   0xa   : > { %s367_s28 = ssub.s32 %s1607_s25, %s1724_s26  ;;  %p380_p0 = scmp.ne.s32.totalorder %s1603_s24, %s1599_s23 }
   0xb   : > { %p368_p1 = scmp.eq.s32.totalorder %s367_s28, 0  ;;  %p381_p2 = scmp.eq.s32.totalorder %s1720_s7, 1 }
   0xc   : > { %p386_p3 = scmp.ne.s32.totalorder %s1599_s23, %s1595_s22  ;;  %p387_p4 = scmp.eq.s32.totalorder %s1277_s13, 1 }
   0xd   : > { %s1735_s29 = scalar_select %p368_p1, %s1603_s24, %s370_s27  }
   0xe   : > { %p1737_p5 = por %p381_p2, %p380_p0  ;;  %p1741_p6 = por %p387_p4, %p386_p3 }
   0xf   : > { %2188 = sst [smem:[#allocation11_spill]] %s1735_s29  ;;  %p1280_p7 = scmp.ge.s32.totalorder %s1607_s25, 1 }
  0x10   : > { %s2190_s16 = scalar_select %p1741_p6, 1, 0 }
  0x11   : > { %p456_p8 = scmp.lt.s32.totalorder %s1607_s25, 3 }
  0x12   : > { %2191 = sst [smem:[#allocation12_spill]] %s2190_s16 }
  0x13   : > { %p457_p9 = pnand %p1280_p7, %p456_p8 }
  0x14   : > { %p510_p10 = scmp.lt.s32.totalorder (!%p457_p9), %s1720_s7, 1  ;;  %s508_s18 = sand.u32 (!%p457_p9), 1, %s1599_s23  }
  0x15   : > { %460 = sbr.rel (%p457_p9) target bundleno = 1202 (0x4b2), region = 76  ;;  %s509_s13 = scalar_lea.vmem (!%p457_p9), [#allocation4], %s508_s18 }
  0x16   : > { %s1305_s27 = sshll.u32 (!%p457_p9), %s1720_s7, 4  ;;  %s1612_s26 = smov (!%p457_p9), [#allocation4]  }
  0x17   : > { %s1189_s29 = scalar_lea.hbm (!%p457_p9), %s2176_s15, %s1305_s27 }
  0x1a   : > { %v758_v2 = vld [vmem:[%s2166_s4 + $0xf8] sm:$0xff]  ;;  %v757_v5 = vld [vmem:[%s2166_s4 + $0xf0] sm:$0xff]  ;;  %v756_v8 = vld [vmem:[%s2166_s4 + $0xe8] sm:$0xff]  ;;  %v761_v29 = vlaneseq  ;;  %s1838_s24 = scalar_select %p510_p10, %s1720_s7, 1  ;;  %v1609_v63 = vmov 0.0   ;;  %vm1610_vm0 = vmmov 0  }
  0x1b   : > { %v742_v3 = vld [vmem:[%s2166_s4 + $0x78] sm:$0xff]  ;;  %1336 = vmatprep.subr.mxu1 %v758_v2  ;;  %v741_v7 = vld [vmem:[%s2166_s4 + $0x70] sm:$0xff]  ;;  %v740_v9 = vld [vmem:[%s2166_s4 + $0x68] sm:$0xff]  ;;  %vm954_vm1 = vcmask 7168   ;;  %vm957_vm2 = vcmask 6144   ;;  %vm1019_vm3 = vcmask 1046528  }
  0x1c   : > { %v1511_v4 = vld [vmem:[%s2164_s2 + $0x78] sm:$0xff]   ;;  %1337 = vmatpush3.msra.mxu1 %v742_v3  ;;  %v1513_v10 = vld [vmem:[%s2164_s2 + $0x70] sm:$0xff]   ;;  %v755_v11 = vld [vmem:[%s2166_s4 + $0xe0] sm:$0xff]  ;;  %v1852_v36 = vshrl.u32 %v761_v29, 7  ;;  %s1282_s19 = sshll.u32 %s1838_s24, 1  ;;  %s1466_s20 = smul.u32 24, %s1838_s24 }
  0x1d   : > { %v1512_v6 = vld [vmem:[%s2164_s2 + $0x38] sm:$0xff]   ;;  %1308 = vmatprep.subr.bf16.mxu0 %v1511_v4  ;;  %1338 = vmatprep.subr.mxu1 %v757_v5  ;;  %v1514_v12 = vld [vmem:[%s2164_s2 + $0x30] sm:$0xff]   ;;  %v739_v13 = vld [vmem:[%s2166_s4 + $0x60] sm:$0xff]  ;;  %s518_s25 = scalar_lea.vmem %s2163_s1, %s1282_s19  ;;  %vm1143_vm4 = vcmask 253952   ;;  %vm1159_vm5 = vcmask 8192  }
  0x1e   : > { %1309 = vmatpush3.bf16.msra.mxu0 %v1512_v6  ;;  %1339 = vmatpush3.msra.mxu1 %v741_v7  ;;  %v754_v14 = vld [vmem:[%s2166_s4 + $0xd8] sm:$0xff]  ;;  %v1515_v16 = vld [vmem:[%s2164_s2 + $0x68] sm:$0xff]   ;;  %v753_v17 = vld [vmem:[%s2166_s4 + $0xd0] sm:$0xff]  ;;  %v767_v45 = vsub.s32 1, %v1852_v36  ;;  %s514_s22 = scalar_lea.vmem %s2162_s0, %s1466_s20  ;;  %v763_v48 = vsub.s32 0, %v1852_v36  ;;  %s1191_s20 = sshll.u32 %s509_s13, 4  ;;  %s1192_s20 = int_to_ptr.vmem [resolvable:$true] %s1191_s20 }
  0x1f   : > { %1340 = vmatprep.subr.mxu1 %v756_v8  ;;  %1310 = vmatprep.subr.bf16.mxu0 %v1513_v10  ;;  %v738_v15 = vld [vmem:[%s2166_s4 + $0x58] sm:$0xff]  ;;  %v1516_v18 = vld [vmem:[%s2164_s2 + $0x28] sm:$0xff]   ;;  %v737_v19 = vld [vmem:[%s2166_s4 + $0x50] sm:$0xff]  ;;  %s1547_s17 = scalar_lea.vmem %s1192_s20, 16 }
  0x20   : > { %1341 = vmatpush3.msra.mxu1 %v740_v9  ;;  %v752_v20 = vld [vmem:[%s2166_s4 + $0xc8] sm:$0xff]  ;;  %v1517_v22 = vld [vmem:[%s2164_s2 + $0x60] sm:$0xff]   ;;  %v750_v26 = vld [vmem:[%s2166_s4 + $0xb8] sm:$0xff]  ;;  %p1548_p11 = scmp.ne.s32.totalorder %s1192_s20, %s1547_s17 }
  0x21   : > { %1342 = vmatprep.subr.mxu1 %v755_v11  ;;  %v736_v21 = vld [vmem:[%s2166_s4 + $0x48] sm:$0xff]  ;;  %v751_v23 = vld [vmem:[%s2166_s4 + $0xc0] sm:$0xff]  ;;  %v1519_v27 = vld [vmem:[%s2164_s2 + $0x58] sm:$0xff]  }
  0x22   : > { %1311 = vmatpush3.bf16.msra.mxu0 %v1514_v12  ;;  %1343 = vmatpush3.msra.mxu1 %v739_v13  ;;  %v1518_v24 = vld [vmem:[%s2164_s2 + $0x20] sm:$0xff]   ;;  %v734_v28 = vld [vmem:[%s2166_s4 + $0x38] sm:$0xff]  ;;  %v749_v30 = vld [vmem:[%s2166_s4 + $0xb0] sm:$0xff]  ;;  %p1549_p12 = pnand %p1548_p11, %p1737_p5 }
  0x23   : > { %1344 = vmatprep.subr.mxu1 %v754_v14  ;;  %1312 = vmatprep.subr.bf16.mxu0 %v1515_v16  ;;  %v735_v25 = vld [vmem:[%s2166_s4 + $0x40] sm:$0xff]  ;;  %v1520_v31 = vld [vmem:[%s2164_s2 + $0x18] sm:$0xff]   ;;  %v733_v32 = vld [vmem:[%s2166_s4 + $0x30] sm:$0xff] }
  0x24   : > { %1345 = vmatpush3.msra.mxu1 %v738_v15  ;;  %v748_v33 = vld [vmem:[%s2166_s4 + $0xa8] sm:$0xff]  ;;  %v1521_v34 = vld [vmem:[%s2164_s2 + $0x50] sm:$0xff]   ;;  %v747_v37 = vld [vmem:[%s2166_s4 + $0xa0] sm:$0xff]  ;;  %p1550_p13 = pneg %p1549_p12 }
  0x25   : > { %1346 = vmatprep.subr.mxu1 %v753_v17  ;;  %v732_v35 = vld [vmem:[%s2166_s4 + $0x28] sm:$0xff]  ;;  %v1522_v38 = vld [vmem:[%s2164_s2 + $0x10] sm:$0xff]   ;;  %v731_v39 = vld [vmem:[%s2166_s4 + $0x20] sm:$0xff] }
  0x26   : > { %1313 = vmatpush3.bf16.msra.mxu0 %v1516_v18  ;;  %1347 = vmatpush3.msra.mxu1 %v737_v19  ;;  %v1523_v40 = vld [vmem:[%s2164_s2 + $0x48] sm:$0xff]   ;;  %v746_v41 = vld [vmem:[%s2166_s4 + $0x98] sm:$0xff]  ;;  %v745_v43 = vld [vmem:[%s2166_s4 + $0x90] sm:$0xff] }
  0x27   : > { %1348 = vmatprep.subr.mxu1 %v752_v20  ;;  %1314 = vmatprep.subr.bf16.mxu0 %v1517_v22  ;;  %v730_v42 = vld [vmem:[%s2166_s4 + $0x18] sm:$0xff]  ;;  %v1524_v44 = vld [vmem:[%s2164_s2 + $0x8] sm:$0xff]   ;;  %v729_v46 = vld [vmem:[%s2166_s4 + $0x10] sm:$0xff] }
  0x28   : > { %1349 = vmatpush3.msra.mxu1 %v736_v21  ;;  %v1525_v47 = vld [vmem:[%s2164_s2 + $0x40] sm:$0xff]   ;;  %v744_v49 = vld [vmem:[%s2166_s4 + $0x88] sm:$0xff]  ;;  %v1917_v60 = vld [vmem:[%s514_s22 + $0x10] sm:$0xff] }
  0x29   : > { %1350 = vmatprep.subr.mxu1 %v751_v23  ;;  %v726_v50 = vld [vmem:[%s518_s25] sm:$0x3]  ;;  %v728_v51 = vld [vmem:[%s2166_s4 + $0x8] sm:$0xff]  ;;  %v1287_v62 = vcombine.high %v1917_v60, %v1917_v60  ;;  %v866_v0 = vld [vmem:[%s2168_s6 + $0x78] sm:$0xff]  ;;  %v1286_v3 = vcombine.low %v1917_v60, %v1917_v60  ;;  %s1176_s25 = scalar_lea.sflag [#allocation5], %s508_s18 }
  0x2a   : > { %1315 = vmatpush3.bf16.msra.mxu0 %v1518_v24  ;;  %1351 = vmatpush3.msra.mxu1 %v735_v25  ;;  %v768_v52 = vrot.slane %v726_v50, %v767_v45  ;;  %v1900_v53 = vld [vmem:[%s514_s22] sm:$0xff]  ;;  %v1902_v54 = vld [vmem:[%s514_s22 + $0x8] sm:$0xff]  ;;  %v764_v59 = vrot.slane %v726_v50, %v763_v48  ;;  %v865_v1 = vld [vmem:[%s2168_s6 + $0x70] sm:$0xff]  ;;  %s1551_s22 = sshll.u32 %s1612_s26, 4  ;;  %s1552_s22 = int_to_ptr.vmem [resolvable:$false] %s1551_s22 }
  0x2b   : > { %1352 = vmatprep.subr.mxu1 %v750_v26  ;;  %1316 = vmatprep.subr.bf16.mxu0 %v1519_v27  ;;  %v743_v55 = vld [vmem:[%s2166_s4 + $0x80] sm:$0xff]  ;;  %v1285_v57 = vcombine.high %v1900_v53, %v1902_v54  ;;  %v1284_v61 = vcombine.low %v1900_v53, %v1902_v54  ;;  %v864_v2 = vld [vmem:[%s2168_s6 + $0x68] sm:$0xff]  ;;  %v862_v5 = vld [vmem:[%s2168_s6 + $0x58] sm:$0xff]  ;;  %s1553_s19 = scalar_lea.vmem %s1552_s22, 32  ;;  %p1554_p0 = scmp.lt.s32.totalorder %s1192_s20, %s1552_s22 }
  0x2c   : > { %1353 = vmatpush3.msra.mxu1 %v734_v28  ;;  %v1526_v56 = vld [vmem:[%s2164_s2] sm:$0xff]   ;;  %835 = vmatprep.mubr.f32.mxu1 %v768_v52  ;;  %v861_v6 = vld [vmem:[%s2168_s6 + $0x50] sm:$0xff]  ;;  %v860_v7 = vld [vmem:[%s2168_s6 + $0x48] sm:$0xff]  ;;  %p1555_p1 = scmp.lt.s32.totalorder %s1553_s19, %s1547_s17 }
  0x2d   : > { %1354 = vmatprep.subr.mxu1 %v749_v30  ;;  %v727_v58 = vld [vmem:[%s2166_s4] sm:$0xff]  ;;  %710 = vmatprep.mubr.bf16.mxu0 %v1285_v57  ;;  %v858_v9 = vld [vmem:[%s2168_s6 + $0x38] sm:$0xff]  ;;  %v857_v10 = vld [vmem:[%s2168_s6 + $0x30] sm:$0xff] }
  0x2e   : > { %1317 = vmatpush3.bf16.msra.mxu0 %v1520_v31  ;;  %1355 = vmatpush3.msra.mxu1 %v733_v32  ;;  %v863_v4 = vld [vmem:[%s2168_s6 + $0x60] sm:$0xff]  ;;  %v856_v11 = vld [vmem:[%s2168_s6 + $0x28] sm:$0xff]  ;;  %v854_v13 = vld [vmem:[%s2168_s6 + $0x18] sm:$0xff]  ;;  %p1556_p2 = por %p1555_p1, %p1554_p0 }
  0x2f   : > { %1356 = vmatprep.subr.mxu1 %v748_v33  ;;  %1318 = vmatprep.subr.bf16.mxu0 %v1521_v34  ;;  %v859_v8 = vld [vmem:[%s2168_s6 + $0x40] sm:$0xff]  ;;  %v853_v14 = vld [vmem:[%s2168_s6 + $0x10] sm:$0xff]  ;;  %v852_v15 = vld [vmem:[%s2168_s6 + $0x8] sm:$0xff] }
  0x30   : > { %1357 = vmatpush3.msra.mxu1 %v732_v35  ;;  %v855_v12 = vld [vmem:[%s2168_s6 + $0x20] sm:$0xff]  ;;  %v1068_v45 = vld [vmem:[%s2170_s8 + $0xf8] sm:$0xff]  ;;  %v1050_v50 = vld [vmem:[%s2170_s8 + $0x68] sm:$0xff]  ;;  %p1557_p3 = pnand %p1556_p2, %p1550_p13 }
  0x31   : > { %1358 = vmatprep.subr.mxu1 %v747_v37  ;;  %v851_v16 = vld [vmem:[%s2168_s6] sm:$0xff] }
  0x32   : > { %1319 = vmatpush3.bf16.msra.mxu0 %v1522_v38  ;;  %1359 = vmatpush3.msra.mxu1 %v731_v39  ;;  %v759_v19 = vld [vmem:[%s2167_s5] sm:$0x1] }
  0x33   : > { %1360 = vmatprep.subr.mxu1 %v746_v41  ;;  %1320 = vmatprep.subr.bf16.mxu0 %v1523_v40  ;;  %v1283_v22 = vld [vmem:[%s2165_s3] ss:$0 sm:$0xff] }
  0x34   : > { %1361 = vmatpush3.msra.mxu1 %v730_v42  ;;  %v1049_v52 = vld [vmem:[%s2170_s8 + $0x60] sm:$0xff] }
  0x35   : > { %1362 = vmatprep.subr.mxu1 %v745_v43  ;;  %v1304_v57 = vld [vmem:[#allocation2] ss:$0 sm:$0xff] }
  0x36   : > { %1321 = vmatpush3.bf16.msra.mxu0 %v1524_v44  ;;  %1363 = vmatpush3.msra.mxu1 %v729_v46  ;;  %v1611_v44 = vmov 0   ;;  %v1052_v46 = vld [vmem:[%s2170_s8 + $0x78] sm:$0xff] }
  0x37   : > { %1364 = vmatprep.subr.mxu1 %v744_v49  ;;  %1322 = vmatprep.subr.bf16.mxu0 %v1525_v47  ;;  %v1067_v47 = vld [vmem:[%s2170_s8 + $0xf0] sm:$0xff]  ;;  %v1066_v49 = vld [vmem:[%s2170_s8 + $0xe8] sm:$0xff] }
  0x38   : > { %1365 = vmatpush3.msra.mxu1 %v728_v51  ;;  %1510 = vset.pattern.permute.xlu1 %v1611_v44  ;;  %v1065_v51 = vld [vmem:[%s2170_s8 + $0xe0] sm:$0xff] }
  0x39   : > { %1366 = vmatprep.subr.mxu1 %v743_v55  ;;  %1509 = vset.pattern.permute.xlu0 %v1611_v44  ;;  %v1064_v55 = vld [vmem:[%s2170_s8 + $0xd8] sm:$0xff]  ;;  %v1045_v44 = vld [vmem:[%s2170_s8 + $0x40] sm:$0xff] }
  0x3a   : > { %1323 = vmatpush3.bf16.msra.mxu0 %v1526_v56  ;;  %1367 = vmatpush3.msra.mxu1 %v727_v58 }
  0x3b   : > { %836 = vmatmul.mubr.f32.vlgmr.msra.gmra.mxu1 %v764_v59  ;;  %1425 = vmatprep.subr.mxu0 %v1609_v63 }
  0x3c   : > { %1390 = vmatprep.subr.mxu1 %v1068_v45  ;;  %v1060_v45 = vld [vmem:[%s2170_s8 + $0xb8] sm:$0xff] }
  0x3d   : > { %711 = vmatmul.mubr.bf16.vlgmr.msra.gmra.mxu0 %v1284_v61  ;;  %1391 = vmatpush3.msra.mxu1 %v1052_v46  ;;  %v1044_v46 = vld [vmem:[%s2170_s8 + $0x38] sm:$0xff] }
  0x3e   : > { %718 = vmatprep.mubr.bf16.mxu0 %v1287_v62  ;;  %1426 = vmatpush3.msra.mxu0 %v866_v0 }
  0x3f   : > { %1427 = vmatprep.subr.mxu0 %v1609_v63  ;;  %1392 = vmatprep.subr.mxu1 %v1067_v47  ;;  %v1059_v47 = vld [vmem:[%s2170_s8 + $0xb0] sm:$0xff] }
  0x40   : > { %1428 = vmatpush3.msra.mxu0 %v865_v1 }
  0x41   : > { %1429 = vmatprep.subr.mxu0 %v1609_v63 }
  0x42   : > { %1430 = vmatpush3.msra.mxu0 %v864_v2 }
  0x43   : > { %1431 = vmatprep.subr.mxu0 %v1609_v63 }
  0x44   : > { %1432 = vmatpush3.msra.mxu0 %v863_v4 }
  0x45   : > { %719 = vmatmul.mubr.bf16.gmra.mxu0 %v1286_v3  ;;  %1433 = vmatprep.subr.mxu0 %v1609_v63 }
  0x46   : > { %1434 = vmatpush3.msra.mxu0 %v862_v5  ;;  %1457 = vmatprep.mubr.msk.f32.mxu0 %vm1610_vm0, %v1609_v63 }
  0x47   : > { %1435 = vmatprep.subr.mxu0 %v1609_v63 }
  0x48   : > { %1436 = vmatpush3.msra.mxu0 %v861_v6 }
  0x49   : > { %1437 = vmatprep.subr.mxu0 %v1609_v63 }
  0x4a   : > { %1438 = vmatpush3.msra.mxu0 %v860_v7 }
  0x4b   : > { %1439 = vmatprep.subr.mxu0 %v1609_v63 }
  0x4c   : > { %1440 = vmatpush3.msra.mxu0 %v859_v8 }
  0x4d   : > { %1441 = vmatprep.subr.mxu0 %v1609_v63 }
  0x4e   : > { %1442 = vmatpush3.msra.mxu0 %v858_v9 }
  0x4f   : > { %1443 = vmatprep.subr.mxu0 %v1609_v63 }
  0x50   : > { %1444 = vmatpush3.msra.mxu0 %v857_v10 }
  0x51   : > { %1445 = vmatprep.subr.mxu0 %v1609_v63 }
  0x52   : > { %1446 = vmatpush3.msra.mxu0 %v856_v11 }
  0x53   : > { %1447 = vmatprep.subr.mxu0 %v1609_v63 }
  0x54   : > { %1448 = vmatpush3.msra.mxu0 %v855_v12 }
  0x55   : > { %1449 = vmatprep.subr.mxu0 %v1609_v63 }
  0x56   : > { %1450 = vmatpush3.msra.mxu0 %v854_v13 }
  0x57   : > { %1451 = vmatprep.subr.mxu0 %v1609_v63 }
  0x58   : > { %1452 = vmatpush3.msra.mxu0 %v853_v14 }
  0x59   : > { %1453 = vmatprep.subr.mxu0 %v1609_v63 }
  0x5a   : > { %1454 = vmatpush3.msra.mxu0 %v852_v15 }
  0x5b   : > { %1455 = vmatprep.subr.mxu0 %v1609_v63 }
  0x5c   : > { %1456 = vmatpush3.msra.mxu0 %v851_v16 }
  0xfb   : > { %v1368_v17 = vpop.f32.mrf.mxu1 }
  0xfd   : > { %v1324_v18 = vpop.f32.mrf.mxu0  ;;  %v1369_v20 = vpop.f32.mrf.mxu1 }
  0xfe   : > { %v1370_v21 = vadd.f32 %v1369_v20, %v1368_v17 }
  0xff   : > { %v1325_v23 = vpop.f32.mrf.mxu0 }
 0x100   : > { %v838_v24 = vadd.f32 %v1370_v21, %v759_v19  ;;  %v1326_v25 = vadd.f32 %v1325_v23, %v1324_v18 }
 0x101   : > { %v1327_v26 = vpop.f32.mrf.mxu0 }
 0x102   : > { %v844_v27 = vrot.slane %v838_v24, %v763_v48  ;;  %v713_v28 = vadd.f32 %v1326_v25, %v1283_v22  ;;  %v1051_v48 = vld [vmem:[%s2170_s8 + $0x70] sm:$0xff] }
 0x103   : > { %v1328_v29 = vpop.f32.mrf.mxu0  ;;  %1393 = vmatpush3.msra.mxu1 %v1051_v48  ;;  %v1043_v48 = vld [vmem:[%s2170_s8 + $0x30] sm:$0xff] }
 0x104   : > { %v845_v30 = vadd.f32 %v844_v27, %v713_v28  ;;  %v1329_v31 = vadd.f32 %v1328_v29, %v1327_v26  ;;  %1394 = vmatprep.subr.mxu1 %v1066_v49  ;;  %v1058_v49 = vld [vmem:[%s2170_s8 + $0xa8] sm:$0xff] }
 0x105   : > { %v1330_v32 = vpop.f32.mrf.mxu0  ;;  %1395 = vmatpush3.msra.mxu1 %v1050_v50  ;;  %v1042_v50 = vld [vmem:[%s2170_s8 + $0x28] sm:$0xff] }
 0x106   : > { %1531 = vtanh.f32 %v845_v30  ;;  %v716_v33 = vadd.f32 %v1329_v31, %v1283_v22  ;;  %1396 = vmatprep.subr.mxu1 %v1065_v51  ;;  %v1057_v51 = vld [vmem:[%s2170_s8 + $0xa0] sm:$0xff] }
 0x107   : > { %v1331_v34 = vpop.f32.mrf.mxu0  ;;  %1397 = vmatpush3.msra.mxu1 %v1049_v52  ;;  %v1041_v52 = vld [vmem:[%s2170_s8 + $0x20] sm:$0xff] }
 0x108   : > { %v846_v35 = vadd.f32 %v844_v27, %v716_v33  ;;  %v1332_v37 = vadd.f32 %v1331_v34, %v1330_v32  ;;  %1398 = vmatprep.subr.mxu1 %v1064_v55  ;;  %v1048_v34 = vld [vmem:[%s2170_s8 + $0x58] sm:$0xff] }
 0x109   : > { %v1333_v38 = vpop.f32.mrf.mxu0  ;;  %1399 = vmatpush3.msra.mxu1 %v1048_v34  ;;  %v1056_v55 = vld [vmem:[%s2170_s8 + $0x98] sm:$0xff] }
 0x10a   : > { %1533 = vtanh.f32 %v846_v35  ;;  %v721_v39 = vadd.f32 %v1332_v37, %v1283_v22  ;;  %v1063_v37 = vld [vmem:[%s2170_s8 + $0xd0] sm:$0xff] }
 0x10b   : > { %v1334_v40 = vpop.f32.mrf.mxu0  ;;  %1400 = vmatprep.subr.mxu1 %v1063_v37 }
 0x10c   : > { %v847_v41 = vadd.f32 %v844_v27, %v721_v39  ;;  %v1047_v40 = vld [vmem:[%s2170_s8 + $0x50] sm:$0xff] }
 0x10d   : > { %1401 = vmatpush3.msra.mxu1 %v1047_v40 }
 0x10e   : > { %1535 = vtanh.f32 %v847_v41  ;;  %v1062_v41 = vld [vmem:[%s2170_s8 + $0xc8] sm:$0xff] }
 0x10f   : > { %1402 = vmatprep.subr.mxu1 %v1062_v41 }
 0x113   : > { %v1532_v42 = vpop.eup %1531 }
 0x114   : > { %1458 = vmatmul.mubr.f32.vlgmr.msra.gmra.mxu0 %v1532_v42  ;;  %v1046_v42 = vld [vmem:[%s2170_s8 + $0x48] sm:$0xff] }
 0x115   : > { %1460 = vmatprep.mubr.msk.f32.mxu0 %vm1610_vm0, %v1609_v63  ;;  %1403 = vmatpush3.msra.mxu1 %v1046_v42 }
 0x117   : > { %v1534_v36 = vpop.eup %1533 }
 0x118   : > { %1461 = vmatmul.mubr.f32.gmra.mxu0 %v1534_v36  ;;  %v1061_v36 = vld [vmem:[%s2170_s8 + $0xc0] sm:$0xff] }
 0x119   : > { %1463 = vmatprep.mubr.msk.f32.mxu0 %vm1610_vm0, %v1609_v63  ;;  %1404 = vmatprep.subr.mxu1 %v1061_v36  ;;  %v1155_v36 = vld [vmem:[%s2173_s11] sm:$0x1] }
 0x11a   : > { %1405 = vmatpush3.msra.mxu1 %v1045_v44 }
 0x11b   : > { %v1536_v43 = vpop.eup %1535  ;;  %1406 = vmatprep.subr.mxu1 %v1060_v45 }
 0x11c   : > { %1464 = vmatmul.mubr.f32.gmra.mxu0 %v1536_v43  ;;  %1407 = vmatpush3.msra.mxu1 %v1044_v46  ;;  %v1157_v46 = vld [vmem:[%s2174_s12] sm:$0x1] }
 0x11d   : > { %1408 = vmatprep.subr.mxu1 %v1059_v47 }
 0x11e   : > { %1409 = vmatpush3.msra.mxu1 %v1043_v48 }
 0x11f   : > { %1410 = vmatprep.subr.mxu1 %v1058_v49 }
 0x120   : > { %1411 = vmatpush3.msra.mxu1 %v1042_v50 }
 0x121   : > { %1412 = vmatprep.subr.mxu1 %v1057_v51 }
 0x122   : > { %1413 = vmatpush3.msra.mxu1 %v1041_v52 }
 0x123   : > { %1414 = vmatprep.subr.mxu1 %v1056_v55 }
 0x1d4   : > { %v940_v56 = vpop.f32.mrf.mxu0 }
 0x1d5   : > { %v941_v61 = vadd.f32 %v1304_v57, %v940_v56  ;;  %v1040_v56 = vld [vmem:[%s2170_s8 + $0x18] sm:$0xff] }
 0x1d6   : > { %v1459_v58 = vpop.f32.mrf.mxu0  ;;  %1415 = vmatpush3.msra.mxu1 %v1040_v56 }
 0x1d7   : > { %v955_v2 = vsel %vm954_vm1, %v941_v61, -inf  ;;  %v1039_v58 = vld [vmem:[%s2170_s8 + $0x10] sm:$0xff] }
 0x1d8   : > { %v945_v59 = vpop.f32.mrf.mxu0 }
 0x1d9   : > { %v946_v62 = vadd.f32 %v1304_v57, %v945_v59  ;;  %v1054_v59 = vld [vmem:[%s2170_s8 + $0x88] sm:$0xff] }
 0x1da   : > { %v1462_v63 = vpop.f32.mrf.mxu0 }
 0x1db   : > { %v956_v0 = vsel %vm954_vm1, %v946_v62, -inf  ;;  %v1037_v63 = vld [vmem:[%s2170_s8] sm:$0xff] }
 0x1dc   : > { %v950_v1 = vpop.f32.mrf.mxu0  ;;  %v959_v4 = vmax.f32 %v955_v2, %v956_v0  ;;  %v995_v0 = vunpack.c.l.bf16 %v1917_v60 }
 0x1dd   : > { %v951_v3 = vadd.f32 %v1304_v57, %v950_v1  ;;  %v1055_v57 = vld [vmem:[%s2170_s8 + $0x90] sm:$0xff]  ;;  %v996_v1 = vunpack.c.h.bf16 %v1917_v60 }
 0x1de   : > { %v1465_v5 = vpop.f32.mrf.mxu0  ;;  %1416 = vmatprep.subr.mxu1 %v1055_v57 }
 0x1df   : > { %v958_v6 = vsel %vm957_vm2, %v951_v3, -inf  ;;  %1417 = vmatpush3.msra.mxu1 %v1039_v58  ;;  %v992_v5 = vunpack.c.h.bf16 %v1900_v53 }
 0x1e0   : > { %v960_v7 = vmax.f32 %v959_v4, %v958_v6  ;;  %1418 = vmatprep.subr.mxu1 %v1054_v59  ;;  %v991_v4 = vunpack.c.l.bf16 %v1900_v53  ;;  %v993_v6 = vunpack.c.l.bf16 %v1902_v54 }
 0x1e2   : > { %v961_v8 = vrot.slane %v960_v7, 4 }
 0x1e4   : > { %v962_v9 = vmax.f32 %v960_v7, %v961_v8  ;;  %v994_v7 = vunpack.c.h.bf16 %v1902_v54 }
 0x1e6   : > { %v963_v10 = vrot.slane %v962_v9, 2 }
 0x1e8   : > { %v964_v11 = vmax.f32 %v962_v9, %v963_v10 }
 0x1ea   : > { %v965_v12 = vrot.slane %v964_v11, 1 }
 0x1ec   : > { %v966_v13 = vmax.f32 %v964_v11, %v965_v12 }
 0x1ee   : > { %v967_v14 = vsub.f32 %v941_v61, %v966_v13  ;;  %v968_v15 = vsub.f32 %v946_v62, %v966_v13  ;;  %v969_v16 = vsub.f32 %v951_v3, %v966_v13  ;;  %v1038_v61 = vld [vmem:[%s2170_s8 + $0x8] sm:$0xff]  ;;  %v1053_v62 = vld [vmem:[%s2170_s8 + $0x80] sm:$0xff] }
 0x1ef   : > { %1419 = vmatpush3.msra.mxu1 %v1038_v61 }
 0x1f0   : > { %v970_v17 = vmul.f32 1.442695, %v967_v14  ;;  %v972_v18 = vmul.f32 1.442695, %v968_v15  ;;  %v974_v19 = vmul.f32 1.442695, %v969_v16  ;;  %1420 = vmatprep.subr.mxu1 %v1053_v62 }
 0x1f1   : > { %1421 = vmatpush3.msra.mxu1 %v1037_v63 }
 0x1f2   : > { %1537 = vpow2.f32 %v970_v17 }
 0x1f3   : > { %1539 = vpow2.f32 %v972_v18 }
 0x1f4   : > { %1541 = vpow2.f32 %v974_v19 }
 0x1ff   : > { %v1538_v20 = vpop.eup %1537 }
 0x200   : > { %v1540_v21 = vpop.eup %1539  ;;  %v976_v22 = vsel %vm954_vm1, %v1538_v20, 0.0 }
 0x201   : > { %v1542_v23 = vpop.eup %1541  ;;  %v977_v24 = vsel %vm954_vm1, %v1540_v21, 0.0 }
 0x202   : > { %v978_v25 = vadd.f32 %v977_v24, %v976_v22  ;;  %v979_v26 = vsel %vm957_vm2, %v1542_v23, 0.0 }
 0x204   : > { %v980_v27 = vadd.f32 %v979_v26, %v978_v25 }
 0x206   : > { %v981_v28 = vrot.slane %v980_v27, 4 }
 0x208   : > { %v982_v29 = vadd.f32 %v981_v28, %v980_v27 }
 0x20a   : > { %v983_v30 = vrot.slane %v982_v29, 2 }
 0x20c   : > { %v984_v31 = vadd.f32 %v983_v30, %v982_v29 }
 0x20e   : > { %v985_v32 = vrot.slane %v984_v31, 1 }
 0x210   : > { %v986_v33 = vadd.f32 %v985_v32, %v984_v31  ;;  %v1069_v31 = vld [vmem:[%s2171_s9] sm:$0x1] }
 0x212   : > { %1543 = vrcp.f32 %v986_v33  ;;  %v1141_v33 = vld [vmem:[%s2172_s10] sm:$0x3] }
 0x213   : > { %v1148_v37 = vrot.slane %v1141_v33, 1 }
 0x21f   : > { %v1544_v35 = vpop.eup %1543 }
 0x220   : > { %v990_v38 = vmul.f32 %v1544_v35, %v1542_v23  ;;  %v988_v39 = vmul.f32 %v1544_v35, %v1538_v20  ;;  %v989_v43 = vmul.f32 %v1544_v35, %v1540_v21 }
 0x222   : > { %1009 = vperm.xlu1 %1510, %v990_v38   ;;  %999 = vperm.xlu0 %1509, %v988_v39  }
 0x226   : > { %1004 = vperm.xlu0 %1509, %v989_v43  }
 0x29d   : > { %v1000_v2 = vpop.permute.xlu0 %999  ;;  %v1010_v3 = vpop.permute.xlu1 %1009 }
 0x29e   : > { %v1016_v8 = vmul.f32 %v1010_v3, %v995_v0  ;;  %v1017_v9 = vmul.f32 %v1010_v3, %v996_v1  ;;  %v1012_v11 = vmul.f32 %v1000_v2, %v991_v4  ;;  %v1013_v12 = vmul.f32 %v1000_v2, %v992_v5 }
 0x2a0   : > { %v1020_v16 = vsel %vm1019_vm3, %v1016_v8, 0.0  ;;  %v1029_v17 = vsel %vm1019_vm3, %v1017_v9, 0.0 }
 0x2a1   : > { %v1005_v10 = vpop.permute.xlu0 %1004 }
 0x2a2   : > { %v1014_v13 = vmul.f32 %v1005_v10, %v993_v6  ;;  %v1015_v14 = vmul.f32 %v1005_v10, %v994_v7 }
 0x2a4   : > { %v1018_v15 = vadd.f32 %v1014_v13, %v1012_v11  ;;  %v1028_v60 = vadd.f32 %v1015_v14, %v1013_v12 }
 0x2a6   : > { %v1021_v18 = vadd.f32 %v1020_v16, %v1018_v15  ;;  %v1030_v19 = vadd.f32 %v1029_v17, %v1028_v60 }
 0x2a8   : > { %v1022_v20 = vrot.slane %v1021_v18, 4  ;;  %v1031_v53 = vrot.slane %v1030_v19, 4 }
 0x2aa   : > { %v1023_v21 = vadd.f32 %v1022_v20, %v1021_v18  ;;  %v1032_v22 = vadd.f32 %v1031_v53, %v1030_v19 }
 0x2ac   : > { %v1024_v23 = vrot.slane %v1023_v21, 2  ;;  %v1033_v54 = vrot.slane %v1032_v22, 2 }
 0x2ae   : > { %v1034_v24 = vadd.f32 %v1033_v54, %v1032_v22  ;;  %v1025_v25 = vadd.f32 %v1024_v23, %v1023_v21 }
 0x2b0   : > { %v1035_v26 = vrot.slane %v1034_v24, 1  ;;  %v1026_v27 = vrot.slane %v1025_v25, 1 }
 0x2b2   : > { %v1036_v28 = vadd.f32 %v1035_v26, %v1034_v24  ;;  %v1027_v29 = vadd.f32 %v1026_v27, %v1025_v25 }
 0x2b4   : > { %1134 = vmatprep.mubr.f32.mxu1 %v1036_v28 }
 0x2b5   : > { %1135 = vmatmul.mubr.f32.vlgmr.msra.gmra.mxu1 %v1027_v29 }
 0x375   : > { %v1422_v30 = vpop.f32.mrf.mxu1 }
 0x377   : > { %v1423_v32 = vpop.f32.mrf.mxu1 }
 0x378   : > { %v1424_v34 = vadd.f32 %v1423_v32, %v1422_v30 }
 0x37a   : > { %v1137_v35 = vadd.f32 %v1424_v34, %v1069_v31 }
 0x37c   : > { %v1140_v38 = vmax.f32 %v1137_v35, 0.0 }
 0x37e   : > { %v1150_v39 = vmul.f32 %v1148_v37, %v1140_v38  ;;  %v1142_v40 = vmul.f32 %v1141_v33, %v1140_v38 }
 0x380   : > { %v1151_v41 = vsel %vm1143_vm4, %v1150_v39, 0.0  ;;  %v1144_v42 = vsel %vm1143_vm4, %v1142_v40, 0.0 }
 0x381   : > { %1152 = vadd.xlane.f32.xlu0 %v1151_v41  ;;  %1145 = vadd.xlane.f32.xlu1 %v1144_v42 }
 0x40a   : > { %v1153_v43 = vpop.xlane.xlu0 %1152  ;;  %v1146_v44 = vpop.xlane.xlu1 %1145 }
 0x40b   : > { %v1154_v45 = vsel %vm954_vm1, %v1146_v44, %v1153_v43 }
 0x40c   : > { %v1156_v47 = vadd.f32 %v1155_v36, %v1154_v45 }
 0x40e   : > { %v1158_v48 = vmul.f32 %v1157_v46, %v1156_v47  ;;  %1165 = vst.msk [vmem:[%s509_s13] sm:$0x1] %vm1159_vm5, %v1156_v47 }
 0x410   : > { %v1160_v49 = vsel %vm1159_vm5, %v1158_v48, 0.0 }
 0x411   : > { %1161 = vadd.xlane.f32.xlu0 %v1160_v49 }
 0x412   : > { %1560 = shalt.err (!%p1557_p3)
}
 0x413   : > { %s1561_s7 = scalar_lea.hbm %s1189_s29, 16  ;;  %s1565_s13 = scalar_lea.hbm %s2176_s15, 32 }
 0x414   : > { %p1562_p4 = scmp.ne.s32.totalorder %s1189_s29, %s1561_s7  ;;  %p1566_p9 = scmp.lt.s32.totalorder %s1189_s29, %s2176_s15 }
 0x415   : > { %p1567_p10 = scmp.lt.s32.totalorder %s1565_s13, %s1561_s7 }
 0x416   : > { %p1563_p7 = pnand %p1562_p4, %p1737_p5 }
 0x417   : > { %p1568_p11 = por %p1567_p10, %p1566_p9 }
 0x418   : > { %p1564_p8 = pneg %p1563_p7 }
 0x41a   : > { %p1569_p12 = pnand %p1568_p11, %p1564_p8 }
 0x41c   : > { %1572 = shalt.err (!%p1569_p12)
}
 0x41d   : > { %1467 = dma.vmem_to_hbm [thread:$0]  (%p1737_p5), %s1192_s20, 16, %s1189_s29, %s1176_s25   ;;  %v1163_v50 = vld [vmem:[#allocation3] sm:$0x1]  ;;  %vm1170_vm6 = vcmask 0  }
 0x41e   : > { %s521_s26 = scalar_lea.vmem %s2175_s14, %s1838_s24 }
 0x49a   : > { %v1162_v51 = vpop.xlane.xlu0 %1161 }
 0x49b   : > { %v1164_v52 = vadd.f32 %v1163_v50, %v1162_v51 }
 0x49d   : > { %v1166_v55 = vmul.f32 0.5, %v1164_v52 }
 0x49f   : > { %1545 = vtanh.f32 %v1166_v55 }
 0x4ac   : > { %v1546_v56 = vpop.eup %1545 }
 0x4ad   : > { %v1168_v57 = vadd.f32 1.0, %v1546_v56 }
 0x4af   : > { %v1169_v58 = vmul.f32 0.5, %v1168_v57 }
 0x4b1   : > { %1171 = vst.msk [vmem:[%s521_s26] sm:$0x1] %vm1170_vm6, %v1169_v58 }
 0x4b2 PF: > { %s2192_s22 = sld [smem:[#allocation9_spill]] }
 0x4b3   : > { %s2193_s19 = sld [smem:[#allocation7_spill]] }
 0x4b8   : > { %p1473_p13 = scmp.ge.s32.totalorder %s2192_s22, 2 }
 0x4b9   : > { %s1209_s20 = sand.u32 1, %s2193_s19  }
 0x4ba   : > { %p1470_p5 = pnand %p1473_p13, %p1741_p6  ;;  %s1210_s29 = scalar_lea.sflag [#allocation5], %s1209_s20 }
 0x4bc   : > { %p1471_p0 = pneg %p1470_p5 }
 0x4be   : > { %1590 = dma.done.wait (%p1471_p0), %s1210_s29, 16  }
 0x4bf   : > { %1592 = vsyncadd (%p1471_p0), %s1210_s29, 4294967280  ;;  %s2195_s25 = sld [smem:[#allocation10_spill]]  ;;  %s2198_s22 = smov %s1599_s23 }
 0x4c0   : > { %s2196_s7 = sld [smem:[#allocation8_spill]] }
 0x4c1   : > { %s2197_s24 = sld [smem:[#allocation11_spill]] }
 0x4c5   : > { %p30_p1 = scmp.ge.s32.totalorder %s2195_s25, 4  }
 0x4c6   : > { %s2199_s23 = smov %s2196_s7 }
 0x4c7   :  { %32 = sbr.rel (!%p30_p1) target bundleno = 6 (0x6), region = 126 }
 0x4cc   :  { %1214 = vsyncpa [#allocation5], 1 }
 0x4cd   :  { %1216 = vsyncpa [#allocation5 + $0x1], 1 }

// kernel: forward.3
= control target key start
LH: loop header
LB: loop body
LE: loop exit
PB: predicated region body
PF: predicated region fallthrough
CT: control target
= control target key end

     0   :  { %18 = vsyncpa [#allocation3], 0  ;;  %s3357_s0 = inlined_call_operand.vmem [shape: s32[2,32,1], index: 0, kind: input, shape index: {}]   ;;  %s3358_s1 = inlined_call_operand.vmem [shape: f32[28,64], index: 1, kind: input, shape index: {}]   ;;  %s3359_s2 = inlined_call_operand.vmem [shape: f32[32,64], index: 2, kind: input, shape index: {}]   ;;  %s3360_s3 = inlined_call_operand.vmem [shape: f32[1,64], index: 3, kind: input, shape index: {}]   ;;  %s3361_s4 = inlined_call_operand.vmem [shape: f32[1,64], index: 4, kind: input, shape index: {}]   ;;  %s3362_s5 = inlined_call_operand.hbm [shape: bf16[640,256], index: 5, kind: input, shape index: {}]   ;;  %s3363_s6 = inlined_call_operand.vmem [shape: f32[1,256], index: 6, kind: input, shape index: {}]   ;;  %s3364_s7 = inlined_call_operand.vmem [shape: f32[1,256], index: 7, kind: input, shape index: {}]   ;;  %s3365_s8 = inlined_call_operand.vmem [shape: f32[1,256], index: 8, kind: input, shape index: {}]   ;;  %s3366_s9 = inlined_call_operand.hbm [shape: f32[256,256], index: 9, kind: input, shape index: {}]   ;;  %s3367_s10 = inlined_call_operand.vmem [shape: f32[1,256], index: 10, kind: input, shape index: {}]   ;;  %s3368_s11 = inlined_call_operand.hbm [shape: f32[256,256], index: 11, kind: input, shape index: {}]   ;;  %s3369_s12 = inlined_call_operand.vmem [shape: f32[1,256], index: 12, kind: input, shape index: {}]   ;;  %s3370_s13 = inlined_call_operand.vmem [shape: bf16[2,23,256], index: 13, kind: output, shape index: {}]  }
   0x1   :  { %19 = vsyncpa [#allocation5], 0  ;;  %s2966_s25 = smov 0  }
   0x2 LB: > { %s2886_s26 = smov [#allocation4]   ;;  %s2972_s28 = sadd.s32 4294967295, %s2884_s25   ;;  %s2884_s25 = sphi %s2966_s25, %s25_s25  }
   0x3   : > { %s380_s27 = sshll.u32 %s2886_s26, 4  ;;  %p2454_p0 = scmp.ge.s32.totalorder %s2884_s25, 1  ;;  %s381_s27 = int_to_ptr.vmem [resolvable:$true] %s380_s27 }
   0x4   : > { %p334_p1 = scmp.lt.s32.totalorder %s2884_s25, 3  ;;  %p2634_p2 = scmp.eq.s32.totalorder %s2972_s28, 0 }
   0x5   : > { %s2887_s30 = smov [#allocation2]   ;;  %s2888_s16 = smov [#allocation6]  }
   0x6   : > { %p2977_p3 = pnand %p2454_p0, %p334_p1  ;;  %s358_s14 = sshll.u32 %s2887_s30, 4  ;;  %s2983_s14 = int_to_ptr.vmem [resolvable:$true] %s358_s14 }
   0x7   : > { %s2991_s17 = sshll.u32 %s2888_s16, 4  ;;  %s2803_s18 = scalar_lea.vmem %s381_s27, 8192  ;;  %s397_s17 = int_to_ptr.vmem [resolvable:$true] %s2991_s17 }
   0x8   : > { %p2624_p4 = pneg %p2977_p3  ;;  %p2804_p7 = scmp.ne.s32.totalorder %s381_s27, %s2803_s18 }
   0x9   : > { %p2811_p10 = scmp.lt.s32.totalorder %s381_s27, %s381_s27  ;;  %p2812_p11 = scmp.lt.s32.totalorder %s2803_s18, %s2803_s18 }
   0xa   : > { %p2987_p5 = pnand %p2634_p2, %p2624_p4 }
   0xb   : > { %p2813_p12 = por %p2812_p11, %p2811_p10 }
   0xc   : > { %p2794_p6 = pneg %p2987_p5 }
   0xe   : > { %p2806_p8 = pnand %p2804_p7, %p2794_p6 }
  0x10   : > { %p2807_p9 = pneg %p2806_p8 }
  0x12   : > { %p2814_p13 = pnand %p2813_p12, %p2807_p9 }
  0x14   : > { %2817 = shalt.err (!%p2814_p13)
}
  0x15   : > { %s2889_s19 = smov 256   ;;  %s2890_s20 = smov 16  }
  0x16   : > { %2630 = dma.hbm_to_vmem [thread:$0]  (!%p2987_p5), %s3366_s9, 8192, %s381_s27, [#allocation5], %s2889_s19, %s2889_s19, %s2890_s20  }
  0x17   : > { %s2829_s23 = scalar_lea.vmem %s2983_s14, 10240  ;;  %p2837_p7 = scmp.lt.s32.totalorder %s2983_s14, %s2983_s14 }
  0x18   : > { %p2830_p0 = scmp.ne.s32.totalorder %s2983_s14, %s2829_s23  ;;  %p2838_p8 = scmp.lt.s32.totalorder %s2829_s23, %s2829_s23 }
  0x1a   : > { %p2832_p1 = pnand %p2830_p0, %p2794_p6  ;;  %p2839_p9 = por %p2838_p8, %p2837_p7 }
  0x1c   : > { %p2833_p4 = pneg %p2832_p1 }
  0x1e   : > { %p2840_p10 = pnand %p2839_p9, %p2833_p4 }
  0x20   : > { %2843 = shalt.err (!%p2840_p10)
}
  0x21   : > { %s2891_s24 = smov 128   ;;  %s2892_s26 = smov 8  }
  0x22   : > { %2627 = dma.hbm_to_vmem [thread:$0]  (!%p2987_p5), %s3362_s5, 10240, %s2983_s14, [#allocation3], %s2891_s24, %s2891_s24, %s2892_s26  }
  0x23   : > { %s2855_s16 = scalar_lea.vmem %s397_s17, 8192  ;;  %p2863_p0 = scmp.lt.s32.totalorder %s397_s17, %s397_s17 }
  0x24   : > { %p2856_p11 = scmp.ne.s32.totalorder %s397_s17, %s2855_s16  ;;  %p2864_p1 = scmp.lt.s32.totalorder %s2855_s16, %s2855_s16 }
  0x26   : > { %p2858_p12 = pnand %p2856_p11, %p2794_p6  ;;  %p2865_p4 = por %p2864_p1, %p2863_p0 }
  0x28   : > { %p2859_p13 = pneg %p2858_p12 }
  0x2a   : > { %p2866_p7 = pnand %p2865_p4, %p2859_p13 }
  0x2c   : > { %2869 = shalt.err (!%p2866_p7)
}
  0x2d   : > { %2633 = dma.hbm_to_vmem [thread:$0]  (!%p2987_p5), %s3368_s11, 8192, %s397_s17, [#allocation5], %s2889_s19, %s2889_s19, %s2890_s20  }
  0x2e   : > { %423 = sbr.rel (%p2977_p3) target bundleno = 1612 (0x64c), region = 72 }
  0x33   : > { %2875 = dma.done.wait (%p2634_p2), [#allocation3], 10240  }
  0x34   : > { %2877 = vsyncadd (%p2634_p2), [#allocation3], 4294957056 }
  0x35   : > { %2879 = dma.done.wait (%p2634_p2), [#allocation5], 16384  }
  0x36   : > { %2881 = vsyncadd (%p2634_p2), [#allocation5], 4294950912  ;;  %p475_p6 = scmp.lt.s32.totalorder %s2972_s28, 1  ;;  %v2893_v0 = vmov 0   ;;  %vm537_vm0 = vcmask 1043456   ;;  %v518_v6 = vld [vmem:[%s3358_s1 + $0x10] sm:$0xff]  ;;  %v490_v9 = vlaneseq }
  0x37   : > { %2659 = vset.pattern.permute.xlu1 %v2893_v0  ;;  %2658 = vset.pattern.permute.xlu0 %v2893_v0  ;;  %v519_v4 = vld [vmem:[%s3358_s1 + $0x18] sm:$0xf]  ;;  %v517_v7 = vld [vmem:[%s3358_s1 + $0x8] sm:$0xff]  ;;  %v516_v8 = vld [vmem:[%s3358_s1] sm:$0xff]  ;;  %vm524_vm1 = vcmask 228352   ;;  %v2894_v13 = vmov 0.0  }
  0x38   : > { %s3378_s28 = smov (!%p475_p6, %s2972_s28), 1  ;;  %814 = vmatprep.mubr.bf16.mxu1 %v2893_v0  ;;  %2597 = vmatprep.subr.msk.mxu0 %vm537_vm0, %v519_v4  ;;  %v491_v10 = vand.u32 127, %v490_v9  ;;  %v521_v20 = vld [vmem:[%s3359_s2 + $0x8] sm:$0xff]  ;;  %v520_v22 = vld [vmem:[%s3359_s2] sm:$0xff]  ;;  %vm626_vm6 = vcmask 523264   ;;  %v522_v28 = vld [vmem:[%s3359_s2 + $0x10] sm:$0xff] }
  0x39   : > { %s2585_s29 = sshll.u32 %s3378_s28, 5  ;;  %2598 = vmatpush3.msk.msra.mxu0 %vm537_vm0, %v519_v4  ;;  %v523_v30 = vld [vmem:[%s3359_s2 + $0x18] sm:$0xff]  ;;  %v2665_v58 = vld [vmem:[#allocation2 + $0x24] ss:$8 sps:$4 sm:$0xff]   ;;  %v2663_v59 = vld [vmem:[#allocation2 + $0x20] ss:$8 sps:$4 sm:$0xff]  }
  0x3a   : > { %s479_s17 = scalar_lea.vmem %s3357_s0, %s2585_s29  ;;  %2599 = vmatprep.subr.mxu0 %v518_v6  ;;  %v2662_v56 = vld [vmem:[#allocation2 + $0x34] ss:$8 sps:$4 sm:$0xff]   ;;  %v2660_v57 = vld [vmem:[#allocation2 + $0x30] ss:$8 sps:$4 sm:$0xff]   ;;  %v2677_v4 = vld [vmem:[#allocation2 + $0x60] ss:$8 sps:$4 sm:$0xff]  }
  0x3b   : > { %v488_v1 = vld [vmem:[%s479_s17 + $0x10] sm:$0xff]  ;;  %v486_v2 = vld [vmem:[%s479_s17] sm:$0xff]  ;;  %v489_v3 = vld [vmem:[%s479_s17 + $0x18] sm:$0xff]  ;;  %2600 = vmatpush3.msra.mxu0 %v518_v6  ;;  %vm720_vm7 = vsmask.f32 7424  ;;  %vm939_vm9 = vcmask 1046528  }
  0x3c   : > { %499 = vperm.xlu1 %2659, %v488_v1   ;;  %493 = vperm.xlu0 %2658, %v486_v2   ;;  %v487_v5 = vld [vmem:[%s479_s17 + $0x8] sm:$0xff]  ;;  %v2668_v60 = vld [vmem:[#allocation2 + $0x14] ss:$8 sps:$4 sm:$0xff]   ;;  %v2666_v61 = vld [vmem:[#allocation2 + $0x10] ss:$8 sps:$4 sm:$0xff]   ;;  %vm1178_vm11 = vcmask 1045504  }
  0x3d   : > { %2601 = vmatprep.subr.mxu0 %v517_v7  ;;  %v2669_v62 = vld [vmem:[#allocation2 + $0x74] ss:$8 sps:$4 sm:$0xff]   ;;  %v2671_v63 = vld [vmem:[#allocation2 + $0x70] ss:$8 sps:$4 sm:$0xff]   ;;  %v2674_v1 = vld [vmem:[#allocation2 + $0x4] ss:$8 sps:$4 sm:$0xff]  }
  0x3e   : > { %2602 = vmatpush3.msra.mxu0 %v517_v7  ;;  %790 = vmatprep.subr.bf16.mxu1 %v2669_v62  ;;  %v2672_v2 = vld [vmem:[#allocation2] ss:$8 sps:$4 sm:$0xff]   ;;  %v2681_v6 = vld [vmem:[#allocation2 + $0x54] ss:$8 sps:$4 sm:$0xff]   ;;  %v2683_v7 = vld [vmem:[#allocation2 + $0x50] ss:$8 sps:$4 sm:$0xff]  }
  0x3f   : > { %2603 = vmatprep.subr.mxu0 %v516_v8  ;;  %791 = vmatpush1.bf16.msra.mxu1 %v2671_v63  ;;  %vm1054_vm8 = vsmask.f32 6400  ;;  %vm1293_vm10 = vsmask.f32 5376  ;;  %vm1527_vm12 = vsmask.f32 4352 }
  0x40   : > { %502 = vperm.xlu1 %2659, %v489_v3   ;;  %496 = vperm.xlu0 %2658, %v487_v5   ;;  %v2675_v3 = vld [vmem:[#allocation2 + $0x64] ss:$8 sps:$4 sm:$0xff]   ;;  %v2680_v5 = vld [vmem:[#allocation2 + $0xf4] ss:$8 sps:$4 sm:$0xff]   ;;  %vm1412_vm13 = vcmask 1044480   ;;  %vm1935_vm14 = vcmask 187392  }
  0x41   : > { %2604 = vmatpush3.msra.mxu0 %v516_v8  ;;  %792 = vmatprep.subr.bf16.mxu1 %v2675_v3  ;;  %v2687_v8 = vld [vmem:[#allocation2 + $0x44] ss:$8 sps:$4 sm:$0xff]   ;;  %v2699_v3 = vld [vmem:[#allocation2 + $0xa0] ss:$8 sps:$4 sm:$0xff]   ;;  %s2611_s19 = smul.u32 24, %s3378_s28 }
  0x42   : > { %885 = vmatprep.subr.bf16.mxu0 %v2662_v56  ;;  %vm2358_vm15 = vsmask.f32 3328 }
  0x43   : > { %793 = vmatpush1.bf16.msra.mxu1 %v2677_v4  ;;  %s484_s23 = scalar_lea.vmem %s3370_s13, %s2611_s19 }
  0x44   : > { %794 = vmatprep.subr.bf16.mxu1 %v2681_v6  ;;  %v2704_v6 = vld [vmem:[#allocation2 + $0x174] ss:$8 sps:$4 sm:$0xff]  }
  0x47   : > { %795 = vmatpush1.bf16.msra.mxu1 %v2683_v7  ;;  %v2707_v7 = vld [vmem:[#allocation2 + $0x94] ss:$8 sps:$4 sm:$0xff]  }
  0x48   : > { %796 = vmatprep.subr.bf16.mxu1 %v2687_v8 }
  0xb7   : > { %v500_v11 = vpop.permute.xlu1 %499  ;;  %v494_v12 = vpop.permute.xlu0 %493 }
  0xb8   : > { %vm504_vm2 = vcmp.eq.s32.totalorder %v494_v12, %v491_v10  ;;  %vm506_vm3 = vcmp.eq.s32.totalorder %v500_v11, %v491_v10  ;;  %v2695_v11 = vld [vmem:[#allocation2 + $0xb4] ss:$8 sps:$4 sm:$0xff]  }
  0xb9   : > { %v2466_v14 = vsel %vm504_vm2, 1.0, %v2894_v13  ;;  %v2468_v17 = vsel %vm506_vm3, 1.0, %v2894_v13  ;;  %vm3331_vm2 = vmand %vm537_vm0, %vm2358_vm15 }
  0xba   : > { %2605 = vmatprep.mubr.msk.f32.mxu0 %vm524_vm1, %v2466_v14 }
  0xbb   : > { %v503_v15 = vpop.permute.xlu1 %502  ;;  %v497_v16 = vpop.permute.xlu0 %496 }
  0xbc   : > { %vm505_vm4 = vcmp.eq.s32.totalorder %v497_v16, %v491_v10  ;;  %vm507_vm5 = vcmp.eq.s32.totalorder %v503_v15, %v491_v10  ;;  %v2689_v10 = vld [vmem:[#allocation2 + $0x40] ss:$8 sps:$4 sm:$0xff]  }
  0xbd   : > { %v2467_v18 = vsel %vm505_vm4, 1.0, %v2894_v13  ;;  %v2469_v19 = vsel %vm507_vm5, 1.0, %v2894_v13  ;;  %797 = vmatpush1.bf16.msra.mxu1 %v2689_v10 }
  0xbe   : > { %2606 = vmatmul.mubr.msk.f32.vlgmr.msra.gmra.mxu0 %vm524_vm1, %v2467_v18  ;;  %997 = vmatprep.subr.bf16.mxu1 %v2695_v11  ;;  %v2702_v11 = vld [vmem:[#allocation2 + $0x170] ss:$8 sps:$4 sm:$0xff]  }
  0xbf   : > { %2608 = vmatprep.mubr.msk.f32.mxu0 %vm524_vm1, %v2468_v17  ;;  %886 = vmatpush1.bf16.msra.mxu0 %v2660_v57  ;;  %v2693_v57 = vld [vmem:[#allocation2 + $0xb0] ss:$8 sps:$4 sm:$0xff]  }
  0xc0   : > { %887 = vmatprep.subr.bf16.mxu0 %v2665_v58  ;;  %v2698_v58 = vld [vmem:[#allocation2 + $0xc4] ss:$8 sps:$4 sm:$0xff]  }
  0xc2   : > { %2609 = vmatmul.mubr.msk.f32.gmra.mxu0 %vm524_vm1, %v2469_v19  ;;  %vm2360_vm1 = vcmask 1047556  }
  0xc3   : > { %909 = vmatprep.mubr.bf16.mxu0 %v2893_v0  ;;  %888 = vmatpush1.bf16.msra.mxu0 %v2663_v59  ;;  %v2701_v59 = vld [vmem:[#allocation2 + $0xa4] ss:$8 sps:$4 sm:$0xff]   ;;  %vm3339_vm3 = vmand %vm2360_vm1, %vm720_vm7 }
  0xc4   : > { %889 = vmatprep.subr.bf16.mxu0 %v2668_v60  ;;  %vm2362_vm0 = vmor %vm3339_vm3, %vm3331_vm2 }
  0xc7   : > { %890 = vmatpush1.bf16.msra.mxu0 %v2666_v61 }
  0xc8   : > { %891 = vmatprep.subr.bf16.mxu0 %v2674_v1 }
  0xcb   : > { %892 = vmatpush1.bf16.msra.mxu0 %v2672_v2  ;;  %v2696_v2 = vld [vmem:[#allocation2 + $0xc0] ss:$8 sps:$4 sm:$0xff]  }
  0xcc   : > { %1121 = vmatprep.subr.bf16.mxu0 %v2680_v5 }
 0x17e   : > { %v2607_v21 = vpop.f32.mrf.mxu0 }
 0x17f   : > { %v613_v23 = vadd.f32 %v2607_v21, %v521_v20 }
 0x180   : > { %v607_v24 = vpop.f32.mrf.mxu0 }
 0x181   : > { %v608_v25 = vadd.f32 %v607_v24, %v520_v22  ;;  %v630_v26 = vsel %vm626_vm6, %v613_v23, 0.0 }
 0x182   : > { %631 = vadd.xlane.f32.xlu1 %v630_v26  ;;  %v2610_v27 = vpop.f32.mrf.mxu0  ;;  %v2475_v26 = vld [vmem:[%s3360_s3] ss:$0 sm:$0xff] }
 0x183   : > { %v627_v29 = vsel %vm626_vm6, %v608_v25, 0.0  ;;  %v623_v33 = vadd.f32 %v2610_v27, %v523_v30 }
 0x184   : > { %v617_v31 = vpop.f32.mrf.mxu0  ;;  %628 = vadd.xlane.f32.xlu0 %v627_v29 }
 0x185   : > { %v618_v32 = vadd.f32 %v617_v31, %v522_v28  ;;  %v636_v35 = vsel %vm626_vm6, %v623_v33, 0.0  ;;  %v2476_v31 = vld [vmem:[%s3361_s4] ss:$0 sm:$0xff] }
 0x187   : > { %v633_v34 = vsel %vm626_vm6, %v618_v32, 0.0 }
 0x188   : > { %634 = vadd.xlane.f32.xlu0 %v633_v34 }
 0x18c   : > { %637 = vadd.xlane.f32.xlu0 %v636_v35 }
 0x20b   : > { %v632_v36 = vpop.xlane.xlu1 %631 }
 0x20c   : > { %v641_v37 = vmul.f32 0.015625, %v632_v36 }
 0x20d   : > { %v629_v38 = vpop.xlane.xlu0 %628 }
 0x20e   : > { %v3082_v39 = vsub.f32 %v613_v23, %v641_v37  ;;  %v640_v40 = vmul.f32 0.015625, %v629_v38  ;;  %v2678_v37 = vld [vmem:[#allocation2 + $0xf0] ss:$8 sps:$4 sm:$0xff]  }
 0x210   : > { %v3084_v41 = vsub.f32 %v608_v25, %v640_v40  ;;  %v649_v42 = vmul.f32 %v3082_v39, %v3082_v39 }
 0x211   : > { %v635_v43 = vpop.xlane.xlu0 %634 }
 0x212   : > { %v642_v44 = vmul.f32 0.015625, %v635_v43  ;;  %v655_v45 = vsel %vm626_vm6, %v649_v42, 0.0  ;;  %v648_v46 = vmul.f32 %v3084_v41, %v3084_v41 }
 0x213   : > { %656 = vadd.xlane.f32.xlu0 %v655_v45  ;;  %v2684_v45 = vld [vmem:[#allocation2 + $0xe0] ss:$8 sps:$4 sm:$0xff]  }
 0x214   : > { %v3091_v47 = vsub.f32 %v618_v32, %v642_v44  ;;  %v652_v48 = vsel %vm626_vm6, %v648_v46, 0.0 }
 0x215   : > { %653 = vadd.xlane.f32.xlu1 %v652_v48  ;;  %v638_v49 = vpop.xlane.xlu0 %637  ;;  %v2692_v48 = vld [vmem:[#allocation2 + $0xd4] ss:$8 sps:$4 sm:$0xff]  }
 0x216   : > { %v643_v50 = vmul.f32 0.015625, %v638_v49  ;;  %v650_v51 = vmul.f32 %v3091_v47, %v3091_v47 }
 0x218   : > { %v3096_v52 = vsub.f32 %v623_v33, %v643_v50  ;;  %v658_v53 = vsel %vm626_vm6, %v650_v51, 0.0 }
 0x219   : > { %659 = vadd.xlane.f32.xlu1 %v658_v53  ;;  %v2690_v53 = vld [vmem:[#allocation2 + $0xd0] ss:$8 sps:$4 sm:$0xff]  }
 0x21a   : > { %v651_v54 = vmul.f32 %v3096_v52, %v3096_v52 }
 0x21c   : > { %v661_v55 = vsel %vm626_vm6, %v651_v54, 0.0 }
 0x21d   : > { %662 = vadd.xlane.f32.xlu0 %v661_v55 }
 0x29c   : > { %v657_v12 = vpop.xlane.xlu0 %656 }
 0x29d   : > { %v665_v14 = vmul.f32 0.015625, %v657_v12 }
 0x29e   : > { %v654_v15 = vpop.xlane.xlu1 %653 }
 0x29f   : > { %v669_v16 = vadd.f32 1e-05, %v665_v14  ;;  %v664_v17 = vmul.f32 0.015625, %v654_v15  ;;  %v2705_v15 = vld [vmem:[#allocation2 + $0x90] ss:$8 sps:$4 sm:$0xff]  }
 0x2a1   : > { %2780 = vrsqrt.f32 %v669_v16  ;;  %v668_v18 = vadd.f32 1e-05, %v664_v17  ;;  %v2710_v16 = vld [vmem:[#allocation2 + $0x164] ss:$8 sps:$4 sm:$0xff]  }
 0x2a2   : > { %v660_v19 = vpop.xlane.xlu1 %659 }
 0x2a3   : > { %2782 = vrsqrt.f32 %v668_v18  ;;  %v666_v20 = vmul.f32 0.015625, %v660_v19  ;;  %v2713_v18 = vld [vmem:[#allocation2 + $0x84] ss:$8 sps:$4 sm:$0xff]   ;;  %v2708_v19 = vld [vmem:[#allocation2 + $0x160] ss:$8 sps:$4 sm:$0xff]  }
 0x2a5   : > { %v670_v21 = vadd.f32 1e-05, %v666_v20  ;;  %v2711_v20 = vld [vmem:[#allocation2 + $0x80] ss:$8 sps:$4 sm:$0xff]  }
 0x2a6   : > { %v663_v22 = vpop.xlane.xlu0 %662 }
 0x2a7   : > { %2784 = vrsqrt.f32 %v670_v21  ;;  %v667_v23 = vmul.f32 0.015625, %v663_v22  ;;  %v2716_v21 = vld [vmem:[#allocation2 + $0x154] ss:$8 sps:$4 sm:$0xff]  }
 0x2a8   : > { %v2719_v22 = vld [vmem:[#allocation2 + $0x134] ss:$8 sps:$4 sm:$0xff]  }
 0x2a9   : > { %v671_v24 = vadd.f32 1e-05, %v667_v23 }
 0x2ab   : > { %2786 = vrsqrt.f32 %v671_v24  ;;  %v2714_v24 = vld [vmem:[#allocation2 + $0x150] ss:$8 sps:$4 sm:$0xff]  }
 0x2ae   : > { %v2781_v25 = vpop.eup %2780 }
 0x2af   : > { %v677_v27 = vmul.f32 %v2781_v25, %v3082_v39  ;;  %v2686_v39 = vld [vmem:[#allocation2 + $0xe4] ss:$8 sps:$4 sm:$0xff]  }
 0x2b0   : > { %v2783_v28 = vpop.eup %2782 }
 0x2b1   : > { %v688_v29 = vmul.f32 %v2475_v26, %v677_v27  ;;  %v676_v30 = vmul.f32 %v2783_v28, %v3084_v41  ;;  %v2722_v27 = vld [vmem:[#allocation2 + $0x144] ss:$8 sps:$4 sm:$0xff]  }
 0x2b2   : > { %v2725_v28 = vld [vmem:[#allocation2 + $0x124] ss:$8 sps:$4 sm:$0xff]  }
 0x2b3   : > { %v687_v32 = vmul.f32 %v2475_v26, %v676_v30  ;;  %v3111_v36 = vadd.f32 %v2476_v31, %v688_v29 }
 0x2b4   : > { %v2785_v33 = vpop.eup %2784 }
 0x2b5   : > { %v678_v34 = vmul.f32 %v2785_v33, %v3091_v47  ;;  %v698_v35 = vadd.f32 %v2476_v31, %v687_v32  ;;  %v2720_v32 = vld [vmem:[#allocation2 + $0x140] ss:$8 sps:$4 sm:$0xff]  }
 0x2b7   : > { %v3114_v38 = vpack.c.bf16 %v3111_v36, %v698_v35  ;;  %v689_v40 = vmul.f32 %v2475_v26, %v678_v34  ;;  %v2723_v35 = vld [vmem:[#allocation2 + $0x120] ss:$8 sps:$4 sm:$0xff]  }
 0x2b8   : > { %v2787_v42 = vpop.eup %2786 }
 0x2b9   : > { %v679_v41 = vmul.f32 %v2787_v42, %v3096_v52  ;;  %2495 = vmatmul.mubr.msk.bf16.vlgmr.msra.gmra.mxu0 %vm626_vm6, %v3114_v38  ;;  %v3119_v43 = vadd.f32 %v2476_v31, %v689_v40  ;;  %v3122_v44 = vshll.u32 %v3114_v38, 16  ;;  %v3129_v50 = vshrl.u32 %v3114_v38, 16  ;;  %v2731_v40 = vld [vmem:[#allocation2 + $0x114] ss:$8 sps:$4 sm:$0xff]  }
 0x2ba   : > { %1122 = vmatpush1.bf16.msra.mxu0 %v2678_v37  ;;  %919 = vmatprep.mubr.bf16.mxu0 %v2893_v0  ;;  %v940_v25 = vrot.slane %v3114_v38, 1  ;;  %v2728_v37 = vld [vmem:[#allocation2 + $0x1f4] ss:$8 sps:$4 sm:$0xff]  }
 0x2bb   : > { %v690_v46 = vmul.f32 %v2475_v26, %v679_v41  ;;  %1123 = vmatprep.subr.bf16.mxu0 %v2686_v39  ;;  %v703_v47 = vpack.c.bf16 %v3119_v43, %v3119_v43  ;;  %v726_v49 = vrot.slane %v3122_v44, 1  ;;  %v1055_v60 = vrot.slane %v3129_v50, 1  ;;  %v2717_v26 = vld [vmem:[#allocation2 + $0x130] ss:$8 sps:$4 sm:$0xff]  }
 0x2bc   : > { %v1056_v62 = vrot.slane %v3122_v44, 2  ;;  %v1294_v33 = vrot.slane %v3129_v50, 2  ;;  %v1295_v34 = vrot.slane %v3122_v44, 3  ;;  %v2726_v41 = vld [vmem:[#allocation2 + $0x1f0] ss:$8 sps:$4 sm:$0xff]  }
 0x2bd   : > { %v3131_v51 = vadd.f32 %v2476_v31, %v690_v46  ;;  %v729_v52 = vshll.u32 %v703_v47, 16  ;;  %v727_v55 = vor.u32 %v726_v49, %v3129_v50  ;;  %v733_v12 = vshrl.u32 %v703_v47, 16  ;;  %v2734_v46 = vld [vmem:[#allocation2 + $0x1e4] ss:$8 sps:$4 sm:$0xff]   ;;  %v2732_v49 = vld [vmem:[#allocation2 + $0x1e0] ss:$8 sps:$4 sm:$0xff]  }
 0x2be   : > { %1124 = vmatpush1.bf16.msra.mxu0 %v2684_v45  ;;  %v1057_v8 = vor.u32 %v1056_v62, %v1055_v60  ;;  %v1296_v42 = vor.u32 %v1295_v34, %v1294_v33  ;;  %v2729_v45 = vld [vmem:[#allocation2 + $0x110] ss:$8 sps:$4 sm:$0xff]   ;;  %v2746_v60 = vld [vmem:[#allocation2 + $0x1c4] ss:$8 sps:$4 sm:$0xff]  }
 0x2bf   : > { %v3135_v54 = vpack.c.bf16 %v3131_v51, %v3119_v43  ;;  %1125 = vmatprep.subr.bf16.mxu0 %v2692_v48  ;;  %v731_v56 = vrot.slane %v729_v52, 1  ;;  %v2737_v48 = vld [vmem:[#allocation2 + $0x104] ss:$8 sps:$4 sm:$0xff]   ;;  %v2735_v52 = vld [vmem:[#allocation2 + $0x100] ss:$8 sps:$4 sm:$0xff]  }
 0x2c0   : > { %v2779_v34 = vld [vmem:[#allocation2 + $0x204] ss:$8 sps:$4 sm:$0xff]  }
 0x2c1   : > { %2496 = vmatmul.mubr.msk.bf16.gmra.mxu0 %vm626_vm6, %v703_v47  ;;  %v732_v61 = vsel %vm720_vm7, %v727_v55, %v731_v56  ;;  %v3143_v63 = vshrl.u32 %v3135_v54, 16  ;;  %v3146_v1 = vshll.u32 %v3135_v54, 16  ;;  %v735_v17 = vor.u32 %v733_v12, %v731_v56  ;;  %v2743_v55 = vld [vmem:[#allocation2 + $0x1b4] ss:$8 sps:$4 sm:$0xff]   ;;  %v2758_v12 = vld [vmem:[#allocation2 + $0x264] ss:$8 sps:$4 sm:$0xff]  }
 0x2c2   : > { %2485 = vmatmul.mubr.msk.bf16.vlgmr.msra.gmra.mxu1 %vm626_vm6, %v732_v61  ;;  %1126 = vmatpush1.bf16.msra.mxu0 %v2690_v53  ;;  %v941_v23 = vrot.slane %v3135_v54, 1  ;;  %v2740_v53 = vld [vmem:[#allocation2 + $0x1d4] ss:$8 sps:$4 sm:$0xff]   ;;  %v1180_v56 = vrot.slane %v3135_v54, 2  ;;  %v2749_v61 = vld [vmem:[#allocation2 + $0x1a4] ss:$8 sps:$4 sm:$0xff]  }
 0x2c3   : > { %998 = vmatpush1.bf16.msra.mxu1 %v2693_v57  ;;  %1127 = vmatprep.subr.bf16.mxu0 %v2698_v58  ;;  %v1061_v4 = vrot.slane %v3143_v63, 1  ;;  %v1064_v5 = vrot.slane %v3146_v1, 2  ;;  %v1297_v29 = vrot.slane %v3143_v63, 2  ;;  %v1298_v30 = vrot.slane %v3146_v1, 3  ;;  %v2738_v57 = vld [vmem:[#allocation2 + $0x1d0] ss:$8 sps:$4 sm:$0xff]  }
 0x2c4   : > { %999 = vmatprep.subr.bf16.mxu1 %v2701_v59  ;;  %1145 = vmatprep.mubr.bf16.mxu0 %v2893_v0  ;;  %v942_v31 = vsel %vm939_vm9, %v940_v25, %v941_v23  ;;  %v1179_v58 = vrot.slane %v3114_v38, 2  ;;  %v2741_v59 = vld [vmem:[#allocation2 + $0x1b0] ss:$8 sps:$4 sm:$0xff]   ;;  %v1531_v62 = vrot.slane %v3143_v63, 3  ;;  %v2773_v25 = vld [vmem:[#allocation2 + $0x224] ss:$8 sps:$4 sm:$0xff]  }
 0x2c5   : > { %824 = vmatprep.mubr.bf16.mxu1 %v2893_v0  ;;  %v1065_v10 = vor.u32 %v1064_v5, %v1061_v4  ;;  %v1299_v39 = vor.u32 %v1298_v30, %v1297_v29  ;;  %v2744_v4 = vld [vmem:[#allocation2 + $0x1c0] ss:$8 sps:$4 sm:$0xff]   ;;  %v1528_v5 = vrot.slane %v3129_v50, 3  ;;  %v2753_v50 = vld [vmem:[#allocation2 + $0x190] ss:$8 sps:$4 sm:$0xff]  }
 0x2c6   : > { %1128 = vmatpush1.bf16.msra.mxu0 %v2696_v2  ;;  %v1532_v2 = vrot.slane %v3146_v1, 4  ;;  %v2755_v1 = vld [vmem:[#allocation2 + $0x194] ss:$8 sps:$4 sm:$0xff]  }
 0x2c7   : > { %1000 = vmatpush1.bf16.msra.mxu1 %v2699_v3  ;;  %v1066_v14 = vsel %vm1054_vm8, %v1057_v8, %v1065_v10  ;;  %1355 = vmatprep.subr.bf16.mxu0 %v2704_v6  ;;  %v1300_v47 = vsel %vm1293_vm10, %v1296_v42, %v1299_v39  ;;  %v1181_v3 = vsel %vm1178_vm11, %v1179_v58, %v1180_v56  ;;  %v1529_v6 = vrot.slane %v3122_v44, 4  ;;  %v2752_v8 = vld [vmem:[#allocation2 + $0x274] ss:$8 sps:$4 sm:$0xff]   ;;  %v2033_v58 = vld [vmem:[#allocation4 + $0x80] sm:$0xff] }
 0x2c8   : > { %1001 = vmatprep.subr.bf16.mxu1 %v2707_v7  ;;  %v2747_v7 = vld [vmem:[#allocation2 + $0x1a0] ss:$8 sps:$4 sm:$0xff]   ;;  %v1533_v63 = vor.u32 %v1532_v2, %v1531_v62  ;;  %v2776_v30 = vld [vmem:[#allocation2 + $0x214] ss:$8 sps:$4 sm:$0xff]  }
 0x2c9   : > { %2515 = vmatmul.mubr.msk.bf16.vlgmr.msra.gmra.mxu0 %vm626_vm6, %v1066_v14  ;;  %v2761_v14 = vld [vmem:[#allocation2 + $0x184] ss:$8 sps:$4 sm:$0xff]   ;;  %v2047_v42 = vld [vmem:[#allocation4 + $0xf0] sm:$0xff]  ;;  %v2028_v2 = vld [vmem:[#allocation4 + $0x58] sm:$0xff] }
 0x2ca   : > { %2486 = vmatmul.mubr.msk.bf16.gmra.mxu1 %vm626_vm6, %v735_v17  ;;  %1356 = vmatpush1.bf16.msra.mxu0 %v2702_v11  ;;  %v2750_v11 = vld [vmem:[#allocation2 + $0x270] ss:$8 sps:$4 sm:$0xff]   ;;  %v2759_v17 = vld [vmem:[#allocation2 + $0x180] ss:$8 sps:$4 sm:$0xff]  }
 0x2cb   : > { %1002 = vmatpush1.bf16.msra.mxu1 %v2705_v15  ;;  %1357 = vmatprep.subr.bf16.mxu0 %v2710_v16  ;;  %v1638_v15 = vpack.c.bf16 %v3119_v43, %v3111_v36  ;;  %v2756_v16 = vld [vmem:[#allocation2 + $0x260] ss:$8 sps:$4 sm:$0xff]   ;;  %v2762_v36 = vld [vmem:[#allocation2 + $0x250] ss:$8 sps:$4 sm:$0xff]  }
 0x2cc   : > { %1003 = vmatprep.subr.bf16.mxu1 %v2713_v18  ;;  %1155 = vmatprep.mubr.bf16.mxu0 %v2893_v0  ;;  %v2764_v18 = vld [vmem:[#allocation2 + $0x254] ss:$8 sps:$4 sm:$0xff]   ;;  %v2029_v62 = vld [vmem:[#allocation4 + $0x60] sm:$0xff] }
 0x2cd   : > { %1021 = vmatprep.mubr.bf16.mxu1 %v2893_v0  ;;  %v1761_v43 = vshll.u32 %v1638_v15, 16 }
 0x2ce   : > { %1358 = vmatpush1.bf16.msra.mxu0 %v2708_v19  ;;  %v2767_v19 = vld [vmem:[#allocation2 + $0x234] ss:$8 sps:$4 sm:$0xff]  }
 0x2cf   : > { %1004 = vmatpush1.bf16.msra.mxu1 %v2711_v20  ;;  %1359 = vmatprep.subr.bf16.mxu0 %v2716_v21  ;;  %v1639_v20 = vpack.c.bf16 %v3131_v51, %v3131_v51  ;;  %v1414_v21 = vrot.slane %v3135_v54, 3  ;;  %v2768_v54 = vld [vmem:[#allocation2 + $0x240] ss:$8 sps:$4 sm:$0xff]  }
 0x2d0   : > { %1236 = vmatprep.subr.bf16.mxu1 %v2719_v22  ;;  %v1413_v22 = vrot.slane %v3114_v38, 3  ;;  %v1759_v38 = vshrl.u32 %v1638_v15, 16 }
 0x2d1   : > { %2516 = vmatmul.mubr.msk.bf16.gmra.mxu0 %vm626_vm6, %v1065_v10  ;;  %v1530_v10 = vor.u32 %v1529_v6, %v1528_v5  ;;  %v2025_v5 = vld [vmem:[#allocation4 + $0x40] sm:$0xff]  ;;  %v2024_v6 = vld [vmem:[#allocation4 + $0x38] sm:$0xff] }
 0x2d2   : > { %2505 = vmatmul.mubr.msk.bf16.vlgmr.msra.gmra.mxu1 %vm626_vm6, %v942_v31  ;;  %1360 = vmatpush1.bf16.msra.mxu0 %v2714_v24  ;;  %v2770_v24 = vld [vmem:[#allocation2 + $0x244] ss:$8 sps:$4 sm:$0xff]   ;;  %v1415_v51 = vsel %vm1412_vm13, %v1413_v22, %v1414_v21 }
 0x2d3   : > { %1237 = vmatpush1.bf16.msra.mxu1 %v2717_v26  ;;  %1361 = vmatprep.subr.bf16.mxu0 %v2722_v27  ;;  %v1534_v44 = vsel %vm1527_vm12, %v1530_v10, %v1533_v63  ;;  %v1765_v26 = vshll.u32 %v1639_v20, 16  ;;  %v1763_v27 = vrot.slane %v1761_v43, 1  ;;  %v2020_v10 = vld [vmem:[#allocation4 + $0x18] sm:$0xff]  ;;  %v2075_v43 = vld [vmem:[#allocation4 + $0x1d0] sm:$0xff] }
 0x2d4   : > { %1238 = vmatprep.subr.bf16.mxu1 %v2725_v28  ;;  %1379 = vmatprep.mubr.bf16.mxu0 %v2893_v0  ;;  %v2771_v28 = vld [vmem:[#allocation2 + $0x220] ss:$8 sps:$4 sm:$0xff]  }
 0x2d5   : > { %1031 = vmatprep.mubr.bf16.mxu1 %v2893_v0  ;;  %v1767_v29 = vrot.slane %v1765_v26, 1  ;;  %v1764_v31 = vor.u32 %v1763_v27, %v1759_v38  ;;  %v2073_v26 = vld [vmem:[#allocation4 + $0x1c0] sm:$0xff] }
 0x2d6   : > { %1362 = vmatpush1.bf16.msra.mxu0 %v2720_v32  ;;  %v2774_v32 = vld [vmem:[#allocation2 + $0x210] ss:$8 sps:$4 sm:$0xff]  }
 0x2d7   : > { %1239 = vmatpush1.bf16.msra.mxu1 %v2723_v35  ;;  %1589 = vmatprep.subr.bf16.mxu0 %v2728_v37  ;;  %v1768_v33 = vsel %vm720_vm7, %v1764_v31, %v1767_v29  ;;  %v2777_v35 = vld [vmem:[#allocation2 + $0x200] ss:$8 sps:$4 sm:$0xff]   ;;  %v1769_v37 = vshrl.u32 %v1639_v20, 16 }
 0x2d8   : > { %1240 = vmatprep.subr.bf16.mxu1 %v2731_v40  ;;  %v2048_v40 = vld [vmem:[#allocation4 + $0xf8] sm:$0xff]  ;;  %v2069_v31 = vld [vmem:[#allocation4 + $0x1a0] sm:$0xff] }
 0x2d9   : > { %2535 = vmatmul.mubr.msk.bf16.vlgmr.msra.gmra.mxu0 %vm626_vm6, %v1300_v47  ;;  %v2043_v47 = vld [vmem:[#allocation4 + $0xd0] sm:$0xff] }
 0x2da   : > { %2506 = vmatmul.mubr.msk.bf16.gmra.mxu1 %vm626_vm6, %v941_v23  ;;  %1590 = vmatpush1.bf16.msra.mxu0 %v2726_v41  ;;  %v2765_v23 = vld [vmem:[#allocation2 + $0x230] ss:$8 sps:$4 sm:$0xff]   ;;  %v2046_v41 = vld [vmem:[#allocation4 + $0xe8] sm:$0xff] }
 0x2db   : > { %1241 = vmatpush1.bf16.msra.mxu1 %v2729_v45  ;;  %1591 = vmatprep.subr.bf16.mxu0 %v2734_v46  ;;  %v2045_v45 = vld [vmem:[#allocation4 + $0xe0] sm:$0xff]  ;;  %v2044_v46 = vld [vmem:[#allocation4 + $0xd8] sm:$0xff] }
 0x2dc   : > { %1242 = vmatprep.subr.bf16.mxu1 %v2737_v48  ;;  %1389 = vmatprep.mubr.bf16.mxu0 %v2893_v0  ;;  %v2042_v48 = vld [vmem:[#allocation4 + $0xc8] sm:$0xff] }
 0x2dd   : > { %1260 = vmatprep.mubr.bf16.mxu1 %v2893_v0 }
 0x2de   : > { %1592 = vmatpush1.bf16.msra.mxu0 %v2732_v49  ;;  %v2041_v49 = vld [vmem:[#allocation4 + $0xc0] sm:$0xff] }
 0x2df   : > { %1243 = vmatpush1.bf16.msra.mxu1 %v2735_v52  ;;  %1593 = vmatprep.subr.bf16.mxu0 %v2740_v53  ;;  %v2040_v52 = vld [vmem:[#allocation4 + $0xb8] sm:$0xff]  ;;  %v2038_v53 = vld [vmem:[#allocation4 + $0xa8] sm:$0xff] }
 0x2e0   : > { %1470 = vmatprep.subr.bf16.mxu1 %v2743_v55  ;;  %v2036_v55 = vld [vmem:[#allocation4 + $0x98] sm:$0xff] }
 0x2e1   : > { %2536 = vmatmul.mubr.msk.bf16.gmra.mxu0 %vm626_vm6, %v1299_v39  ;;  %v1771_v39 = vor.u32 %v1769_v37, %v1767_v29  ;;  %v2070_v29 = vld [vmem:[#allocation4 + $0x1a8] sm:$0xff] }
 0x2e2   : > { %2525 = vmatmul.mubr.msk.bf16.vlgmr.msra.gmra.mxu1 %vm626_vm6, %v1181_v3  ;;  %1594 = vmatpush1.bf16.msra.mxu0 %v2738_v57  ;;  %v2034_v57 = vld [vmem:[#allocation4 + $0x88] sm:$0xff]  ;;  %v2027_v3 = vld [vmem:[#allocation4 + $0x50] sm:$0xff] }
 0x2e3   : > { %1471 = vmatpush1.bf16.msra.mxu1 %v2741_v59  ;;  %1595 = vmatprep.subr.bf16.mxu0 %v2746_v60  ;;  %v2032_v59 = vld [vmem:[#allocation4 + $0x78] sm:$0xff]  ;;  %v2031_v60 = vld [vmem:[#allocation4 + $0x70] sm:$0xff] }
 0x2e4   : > { %1472 = vmatprep.subr.bf16.mxu1 %v2749_v61  ;;  %1613 = vmatprep.mubr.bf16.mxu0 %v2893_v0  ;;  %v2030_v61 = vld [vmem:[#allocation4 + $0x68] sm:$0xff] }
 0x2e5   : > { %1270 = vmatprep.mubr.bf16.mxu1 %v2893_v0 }
 0x2e6   : > { %1596 = vmatpush1.bf16.msra.mxu0 %v2744_v4  ;;  %v2026_v4 = vld [vmem:[#allocation4 + $0x48] sm:$0xff] }
 0x2e7   : > { %1473 = vmatpush1.bf16.msra.mxu1 %v2747_v7  ;;  %1826 = vmatprep.subr.bf16.mxu0 %v2752_v8  ;;  %v2023_v7 = vld [vmem:[#allocation4 + $0x30] sm:$0xff]  ;;  %v2022_v8 = vld [vmem:[#allocation4 + $0x28] sm:$0xff] }
 0x2e8   : > { %1474 = vmatprep.subr.bf16.mxu1 %v2755_v1 }
 0x2e9   : > { %2555 = vmatmul.mubr.msk.bf16.vlgmr.msra.gmra.mxu0 %vm626_vm6, %v1534_v44  ;;  %v2017_v44 = vld [vmem:[#allocation4] sm:$0xff] }
 0x2ea   : > { %2526 = vmatmul.mubr.msk.bf16.gmra.mxu1 %vm626_vm6, %v1180_v56  ;;  %1827 = vmatpush1.bf16.msra.mxu0 %v2750_v11  ;;  %v2035_v56 = vld [vmem:[#allocation4 + $0x90] sm:$0xff] }
 0x2eb   : > { %1475 = vmatpush1.bf16.msra.mxu1 %v2753_v50  ;;  %1828 = vmatprep.subr.bf16.mxu0 %v2758_v12  ;;  %v2019_v11 = vld [vmem:[#allocation4 + $0x10] sm:$0xff]  ;;  %v2018_v12 = vld [vmem:[#allocation4 + $0x8] sm:$0xff] }
 0x2ec   : > { %1476 = vmatprep.subr.bf16.mxu1 %v2761_v14  ;;  %1623 = vmatprep.mubr.bf16.mxu0 %v2893_v0 }
 0x2ed   : > { %1494 = vmatprep.mubr.bf16.mxu1 %v2893_v0 }
 0x2ee   : > { %1829 = vmatpush1.bf16.msra.mxu0 %v2756_v16  ;;  %v2079_v16 = vld [vmem:[#allocation4 + $0x1f0] sm:$0xff] }
 0x2ef   : > { %1477 = vmatpush1.bf16.msra.mxu1 %v2759_v17  ;;  %1830 = vmatprep.subr.bf16.mxu0 %v2764_v18  ;;  %v2078_v18 = vld [vmem:[#allocation4 + $0x1e8] sm:$0xff] }
 0x2f0   : > { %1702 = vmatprep.subr.bf16.mxu1 %v2767_v19  ;;  %v2077_v19 = vld [vmem:[#allocation4 + $0x1e0] sm:$0xff] }
 0x2f1   : > { %2556 = vmatmul.mubr.msk.bf16.gmra.mxu0 %vm626_vm6, %v1533_v63  ;;  %v2021_v63 = vld [vmem:[#allocation4 + $0x20] sm:$0xff] }
 0x2f2   : > { %2545 = vmatmul.mubr.msk.bf16.vlgmr.msra.gmra.mxu1 %vm626_vm6, %v1415_v51  ;;  %1831 = vmatpush1.bf16.msra.mxu0 %v2762_v36 }
 0x2f3   : > { %1703 = vmatpush1.bf16.msra.mxu1 %v2765_v23  ;;  %1832 = vmatprep.subr.bf16.mxu0 %v2770_v24  ;;  %v2074_v24 = vld [vmem:[#allocation4 + $0x1c8] sm:$0xff] }
 0x2f4   : > { %1704 = vmatprep.subr.bf16.mxu1 %v2773_v25  ;;  %1850 = vmatprep.mubr.bf16.mxu0 %v2893_v0 }
 0x2f5   : > { %1504 = vmatprep.mubr.bf16.mxu1 %v2893_v0 }
 0x2f6   : > { %1833 = vmatpush1.bf16.msra.mxu0 %v2768_v54  ;;  %v2072_v54 = vld [vmem:[#allocation4 + $0x1b8] sm:$0xff] }
 0x2f7   : > { %1705 = vmatpush1.bf16.msra.mxu1 %v2771_v28  ;;  %2093 = vmatprep.subr.mxu0 %v2048_v40  ;;  %v2071_v28 = vld [vmem:[#allocation4 + $0x1b0] sm:$0xff] }
 0x2f8   : > { %1706 = vmatprep.subr.bf16.mxu1 %v2776_v30 }
 0x2f9   : > { %2575 = vmatmul.mubr.msk.bf16.vlgmr.msra.gmra.mxu0 %vm626_vm6, %v1768_v33  ;;  %v2068_v33 = vld [vmem:[#allocation4 + $0x198] sm:$0xff] }
 0x2fa   : > { %2546 = vmatmul.mubr.msk.bf16.gmra.mxu1 %vm626_vm6, %v1414_v21  ;;  %1860 = vmatprep.mubr.bf16.mxu0 %v2893_v0  ;;  %v2076_v21 = vld [vmem:[#allocation4 + $0x1d8] sm:$0xff] }
 0x2fb   : > { %1707 = vmatpush1.bf16.msra.mxu1 %v2774_v32  ;;  %1726 = vmatprep.mubr.bf16.mxu1 %v2893_v0 }
 0x2fc   : > { %1708 = vmatprep.subr.bf16.mxu1 %v2779_v34  ;;  %2094 = vmatpush1.msra.mxu0 %v2047_v42  ;;  %v2065_v42 = vld [vmem:[#allocation4 + $0x180] sm:$0xff] }
 0x2fd   : > { %2095 = vmatprep.subr.mxu0 %v2046_v41 }
 0x2fe   : > { %2096 = vmatpush1.msra.mxu0 %v2045_v45  ;;  %v2064_v45 = vld [vmem:[#allocation4 + $0x178] sm:$0xff] }
 0x2ff   : > { %1709 = vmatpush1.bf16.msra.mxu1 %v2777_v35  ;;  %2097 = vmatprep.subr.mxu0 %v2044_v46  ;;  %v2067_v35 = vld [vmem:[#allocation4 + $0x190] sm:$0xff] }
 0x300   : > { %2098 = vmatpush1.msra.mxu0 %v2043_v47  ;;  %v2063_v47 = vld [vmem:[#allocation4 + $0x170] sm:$0xff] }
 0x301   : > { %2576 = vmatmul.mubr.msk.bf16.gmra.mxu0 %vm626_vm6, %v1771_v39  ;;  %2099 = vmatprep.subr.mxu0 %v2042_v48  ;;  %v2066_v39 = vld [vmem:[#allocation4 + $0x188] sm:$0xff] }
 0x302   : > { %2565 = vmatmul.mubr.msk.bf16.vlgmr.msra.gmra.mxu1 %vm626_vm6, %v1638_v15  ;;  %2100 = vmatpush1.msra.mxu0 %v2041_v49  ;;  %v2080_v15 = vld [vmem:[#allocation4 + $0x1f8] sm:$0xff]  ;;  %v2062_v49 = vld [vmem:[#allocation4 + $0x168] sm:$0xff] }
 0x303   : > { %1736 = vmatprep.mubr.bf16.mxu1 %v2893_v0  ;;  %v2039_v0 = vld [vmem:[#allocation4 + $0xb0] sm:$0xff]  ;;  %2101 = vmatprep.subr.mxu0 %v2040_v52 }
 0x304   : > { %2102 = vmatpush1.msra.mxu0 %v2039_v0  ;;  %v2061_v0 = vld [vmem:[#allocation4 + $0x160] sm:$0xff] }
 0x305   : > { %2103 = vmatprep.subr.mxu0 %v2038_v53 }
 0x30a   : > { %2566 = vmatmul.mubr.msk.bf16.gmra.mxu1 %vm626_vm6, %v1639_v20 }
 0x30b   : > { %2010 = vmatprep.mubr.f32.mxu1 %v2894_v13  ;;  %v2037_v13 = vld [vmem:[#allocation4 + $0xa0] sm:$0xff] }
 0x30c   : > { %2104 = vmatpush1.msra.mxu0 %v2037_v13  ;;  %v2060_v13 = vld [vmem:[#allocation4 + $0x158] sm:$0xff] }
 0x30d   : > { %2105 = vmatprep.subr.mxu0 %v2036_v55 }
 0x30e   : > { %2106 = vmatpush1.msra.mxu0 %v2035_v56  ;;  %v2059_v56 = vld [vmem:[#allocation4 + $0x150] sm:$0xff] }
 0x30f   : > { %2107 = vmatprep.subr.mxu0 %v2034_v57 }
 0x310   : > { %2108 = vmatpush1.msra.mxu0 %v2033_v58  ;;  %v2058_v58 = vld [vmem:[#allocation4 + $0x148] sm:$0xff] }
 0x311   : > { %2109 = vmatprep.subr.mxu0 %v2032_v59 }
 0x312   : > { %2110 = vmatpush1.msra.mxu0 %v2031_v60  ;;  %v2057_v60 = vld [vmem:[#allocation4 + $0x140] sm:$0xff] }
 0x313   : > { %2111 = vmatprep.subr.mxu0 %v2030_v61 }
 0x314   : > { %2112 = vmatpush1.msra.mxu0 %v2029_v62  ;;  %v2056_v62 = vld [vmem:[#allocation4 + $0x138] sm:$0xff] }
 0x315   : > { %2113 = vmatprep.subr.mxu0 %v2028_v2 }
 0x316   : > { %2114 = vmatpush1.msra.mxu0 %v2027_v3  ;;  %v2055_v3 = vld [vmem:[#allocation4 + $0x130] sm:$0xff] }
 0x317   : > { %2115 = vmatprep.subr.mxu0 %v2026_v4 }
 0x318   : > { %2116 = vmatpush1.msra.mxu0 %v2025_v5  ;;  %v2054_v5 = vld [vmem:[#allocation4 + $0x128] sm:$0xff] }
 0x319   : > { %2117 = vmatprep.subr.mxu0 %v2024_v6 }
 0x31a   : > { %2118 = vmatpush1.msra.mxu0 %v2023_v7  ;;  %v2053_v7 = vld [vmem:[#allocation4 + $0x120] sm:$0xff] }
 0x31b   : > { %2119 = vmatprep.subr.mxu0 %v2022_v8 }
 0x31c   : > { %2120 = vmatpush1.msra.mxu0 %v2021_v63 }
 0x31d   : > { %2121 = vmatprep.subr.mxu0 %v2020_v10 }
 0x31e   : > { %2122 = vmatpush1.msra.mxu0 %v2019_v11 }
 0x31f   : > { %2123 = vmatprep.subr.mxu0 %v2018_v12 }
 0x320   : > { %2124 = vmatpush1.msra.mxu0 %v2017_v44 }
 0x321   : > { %2125 = vmatprep.subr.mxu0 %v2080_v15 }
 0x322   : > { %2126 = vmatpush2.msra.mxu0 %v2079_v16 }
 0x323   : > { %2127 = vmatprep.subr.mxu0 %v2078_v18 }
 0x324   : > { %2128 = vmatpush2.msra.mxu0 %v2077_v19 }
 0x325   : > { %2129 = vmatprep.subr.mxu0 %v2076_v21 }
 0x326   : > { %2130 = vmatpush2.msra.mxu0 %v2075_v43 }
 0x327   : > { %2131 = vmatprep.subr.mxu0 %v2074_v24 }
 0x328   : > { %2132 = vmatpush2.msra.mxu0 %v2073_v26 }
 0x329   : > { %2133 = vmatprep.subr.mxu0 %v2072_v54 }
 0x32a   : > { %2134 = vmatpush2.msra.mxu0 %v2071_v28 }
 0x32b   : > { %2135 = vmatprep.subr.mxu0 %v2070_v29 }
 0x32c   : > { %2136 = vmatpush2.msra.mxu0 %v2069_v31 }
 0x32d   : > { %2137 = vmatprep.subr.mxu0 %v2068_v33 }
 0x32e   : > { %2138 = vmatpush2.msra.mxu0 %v2067_v35 }
 0x32f   : > { %2139 = vmatprep.subr.mxu0 %v2066_v39 }
 0x330   : > { %2140 = vmatpush2.msra.mxu0 %v2065_v42 }
 0x331   : > { %2141 = vmatprep.subr.mxu0 %v2064_v45 }
 0x332   : > { %2142 = vmatpush2.msra.mxu0 %v2063_v47 }
 0x333   : > { %2143 = vmatprep.subr.mxu0 %v2062_v49 }
 0x334   : > { %2144 = vmatpush2.msra.mxu0 %v2061_v0 }
 0x335   : > { %2145 = vmatprep.subr.mxu0 %v2060_v13 }
 0x336   : > { %2146 = vmatpush2.msra.mxu0 %v2059_v56 }
 0x337   : > { %2147 = vmatprep.subr.mxu0 %v2058_v58 }
 0x338   : > { %2148 = vmatpush2.msra.mxu0 %v2057_v60 }
 0x339   : > { %2149 = vmatprep.subr.mxu0 %v2056_v62 }
 0x33a   : > { %2150 = vmatpush2.msra.mxu0 %v2055_v3 }
 0x33b   : > { %2151 = vmatprep.subr.mxu0 %v2054_v5 }
 0x33c   : > { %2152 = vmatpush2.msra.mxu0 %v2053_v7 }
 0x379   : > { %v911_v1 = vpop.f32.mrf.mxu0 }
 0x37b   : > { %v3206_v50 = vpop.f32.mrf.mxu0 }
 0x37d   : > { %v3208_v14 = vpop.f32.mrf.mxu0 }
 0x37f   : > { %v3210_v17 = vpop.f32.mrf.mxu0 }
 0x381   : > { %v3212_v20 = vpop.f32.mrf.mxu0 }
 0x382   : > { %v816_v36 = vpop.f32.mrf.mxu1 }
 0x383   : > { %v3214_v22 = vadd.f32 %v911_v1, %v816_v36  ;;  %v3216_v23 = vpop.f32.mrf.mxu0 }
 0x384   : > { %v3218_v25 = vpop.f32.mrf.mxu1 }
 0x385   : > { %v925_v51 = vpop.f32.mrf.mxu0  ;;  %v914_v45 = vadd.f32 %v3206_v50, %v3218_v25 }
 0x386   : > { %v3220_v27 = vpop.f32.mrf.mxu1 }
 0x387   : > { %v926_v38 = vpop.f32.mrf.mxu0 }
 0x388   : > { %v3222_v30 = vpop.f32.mrf.mxu1 }
 0x389   : > { %v3224_v32 = vpop.f32.mrf.mxu0 }
 0x38a   : > { %v3226_v34 = vpop.f32.mrf.mxu1 }
 0x38b   : > { %v3228_v37 = vpop.f32.mrf.mxu0  ;;  %v922_v50 = vadd.f32 %v3212_v20, %v3226_v34 }
 0x38c   : > { %v3230_v40 = vpop.f32.mrf.mxu1 }
 0x38d   : > { %v3232_v41 = vpop.f32.mrf.mxu0 }
 0x38e   : > { %v830_v46 = vpop.f32.mrf.mxu1 }
 0x38f   : > { %v3234_v48 = vpop.f32.mrf.mxu0  ;;  %v916_v46 = vadd.f32 %v3208_v14, %v3220_v27  ;;  %v924_v14 = vadd.f32 %v3216_v23, %v3230_v40 }
 0x390   : > { %v831_v52 = vpop.f32.mrf.mxu1 }
 0x391   : > { %v3236_v53 = vpop.f32.mrf.mxu0  ;;  %v918_v52 = vadd.f32 %v3210_v17, %v3222_v30 }
 0x392   : > { %v1023_v55 = vpop.f32.mrf.mxu1 }
 0x393   : > { %v3238_v57 = vpop.f32.mrf.mxu0  ;;  %v1040_v58 = vadd.f32 %v1023_v55, %v3214_v22 }
 0x394   : > { %v1025_v59 = vpop.f32.mrf.mxu1 }
 0x395   : > { %v1161_v61 = vpop.f32.mrf.mxu0  ;;  %v1041_v0 = vadd.f32 %v1025_v59, %v914_v45  ;;  %v1164_v59 = vadd.f32 %v3224_v32, %v1040_v58 }
 0x396   : > { %v1027_v2 = vpop.f32.mrf.mxu1 }
 0x397   : > { %v1162_v4 = vpop.f32.mrf.mxu0  ;;  %v1042_v13 = vadd.f32 %v1027_v2, %v916_v46  ;;  %v1165_v27 = vadd.f32 %v3228_v37, %v1041_v0 }
 0x398   : > { %v1029_v6 = vpop.f32.mrf.mxu1 }
 0x399   : > { %v3240_v8 = vpop.f32.mrf.mxu0  ;;  %v1043_v61 = vadd.f32 %v1029_v6, %v918_v52  ;;  %v1166_v3 = vadd.f32 %v3232_v41, %v1042_v13 }
 0x39a   : > { %v1033_v63 = vpop.f32.mrf.mxu1 }
 0x39b   : > { %v1383_v1 = vpop.f32.mrf.mxu0  ;;  %v1044_v30 = vadd.f32 %v1033_v63, %v922_v50  ;;  %v1167_v5 = vadd.f32 %v3234_v48, %v1043_v61 }
 0x39c   : > { %v1035_v10 = vpop.f32.mrf.mxu1 }
 0x39d   : > { %v1385_v11 = vpop.f32.mrf.mxu0  ;;  %v1045_v22 = vadd.f32 %v1035_v10, %v924_v14  ;;  %v1168_v23 = vadd.f32 %v3236_v53, %v1044_v30  ;;  %v1878_v53 = vshrl.u32 %v490_v9, 7 }
 0x39e   : > { %v1037_v12 = vpop.f32.mrf.mxu1 }
 0x39f   : > { %v1387_v44 = vpop.f32.mrf.mxu0  ;;  %v1169_v40 = vadd.f32 %v3238_v57, %v1045_v22  ;;  %v3275_v52 = vsub.s32 1, %v1878_v53  ;;  %v3279_v58 = vsub.s32 0, %v1878_v53 }
 0x3a0   : > { %v1038_v15 = vpop.f32.mrf.mxu1 }
 0x3a1   : > { %v3242_v16 = vpop.f32.mrf.mxu0 }
 0x3a2   : > { %v1262_v18 = vpop.f32.mrf.mxu1 }
 0x3a3   : > { %v3244_v19 = vpop.f32.mrf.mxu0  ;;  %v1279_v20 = vadd.f32 %v1262_v18, %v1164_v59 }
 0x3a4   : > { %v1264_v21 = vpop.f32.mrf.mxu1 }
 0x3a5   : > { %v1395_v36 = vpop.f32.mrf.mxu0  ;;  %v1280_v55 = vadd.f32 %v1264_v21, %v1165_v27  ;;  %v1398_v10 = vadd.f32 %v3240_v8, %v1279_v20 }
 0x3a6   : > { %v1266_v43 = vpop.f32.mrf.mxu1 }
 0x3a7   : > { %v1396_v24 = vpop.f32.mrf.mxu0  ;;  %v1281_v4 = vadd.f32 %v1266_v43, %v1166_v3  ;;  %v1399_v41 = vadd.f32 %v1383_v1, %v1280_v55 }
 0x3a8   : > { %v1268_v26 = vpop.f32.mrf.mxu1 }
 0x3a9   : > { %v3246_v51 = vpop.f32.mrf.mxu0  ;;  %v1282_v7 = vadd.f32 %v1268_v26, %v1167_v5  ;;  %v1400_v63 = vadd.f32 %v1385_v11, %v1281_v4 }
 0x3aa   : > { %v1272_v54 = vpop.f32.mrf.mxu1 }
 0x3ab   : > { %v1617_v28 = vpop.f32.mrf.mxu0  ;;  %v1283_v32 = vadd.f32 %v1272_v54, %v1168_v23  ;;  %v1401_v24 = vadd.f32 %v1387_v44, %v1282_v7 }
 0x3ac   : > { %v1274_v38 = vpop.f32.mrf.mxu1 }
 0x3ad   : > { %v1619_v29 = vpop.f32.mrf.mxu0  ;;  %v1284_v36 = vadd.f32 %v1274_v38, %v1169_v40  ;;  %v1402_v57 = vadd.f32 %v3242_v16, %v1283_v32 }
 0x3ae   : > { %v1276_v31 = vpop.f32.mrf.mxu1 }
 0x3af   : > { %v3248_v33 = vpop.f32.mrf.mxu0  ;;  %v1403_v11 = vadd.f32 %v3244_v19, %v1284_v36  ;;  %v1875_v19 = vld [vmem:[%s3363_s6] sm:$0x3] }
 0x3b0   : > { %v1277_v35 = vpop.f32.mrf.mxu1  ;;  %v1884_v50 = vrot.slane %v1875_v19, %v3275_v52  ;;  %v1880_v27 = vrot.slane %v1875_v19, %v3279_v58  ;;  %v2188_v19 = vld [vmem:[#allocation6 + $0xb0] sm:$0xff] }
 0x3b1   : > { %v3250_v39 = vpop.f32.mrf.mxu0 }
 0x3b2   : > { %v1496_v42 = vpop.f32.mrf.mxu1 }
 0x3b3   : > { %v3256_v47 = vpop.f32.mrf.mxu0  ;;  %v1513_v31 = vadd.f32 %v1496_v42, %v1398_v10 }
 0x3b4   : > { %v1498_v49 = vpop.f32.mrf.mxu1 }
 0x3b5   : > { %v1629_v56 = vpop.f32.mrf.mxu0  ;;  %v1514_v43 = vadd.f32 %v1498_v49, %v1399_v41  ;;  %v1632_v44 = vadd.f32 %v3246_v51, %v1513_v31  ;;  %v1917_v41 = vld [vmem:[%s3365_s8] sm:$0x3] }
 0x3b6   : > { %v1500_v60 = vpop.f32.mrf.mxu1  ;;  %v1926_v36 = vrot.slane %v1917_v41, %v3275_v52 }
 0x3b7   : > { %v1630_v62 = vpop.f32.mrf.mxu0  ;;  %v1515_v48 = vadd.f32 %v1500_v60, %v1400_v63  ;;  %v1633_v54 = vadd.f32 %v1617_v28, %v1514_v43 }
 0x3b8   : > { %v1502_v25 = vpop.f32.mrf.mxu1 }
 0x3b9   : > { %v1852_v17 = vpop.f32.mrf.mxu0  ;;  %v1516_v35 = vadd.f32 %v1502_v25, %v1401_v24  ;;  %v1634_v8 = vadd.f32 %v1619_v29, %v1515_v48  ;;  %v1922_v24 = vrot.slane %v1917_v41, %v3279_v58  ;;  %v2222_v41 = vld [vmem:[#allocation6 + $0x1c0] sm:$0xff] }
 0x3ba   : > { %v1506_v2 = vpop.f32.mrf.mxu1 }
 0x3bb   : > { %v1854_v6 = vpop.f32.mrf.mxu0  ;;  %v1517_v38 = vadd.f32 %v1506_v2, %v1402_v57  ;;  %v1635_v9 = vadd.f32 %v3248_v33, %v1516_v35 }
 0x3bc   : > { %v1508_v34 = vpop.f32.mrf.mxu1 }
 0x3bd   : > { %v1856_v12 = vpop.f32.mrf.mxu0  ;;  %v1518_v42 = vadd.f32 %v1508_v34, %v1403_v11  ;;  %v1636_v61 = vadd.f32 %v3250_v39, %v1517_v38  ;;  %v1899_v39 = vld [vmem:[%s3364_s7] sm:$0x3]  ;;  %v2895_v11 = vmov 0.04347826  }
 0x3be   : > { %v1510_v37 = vpop.f32.mrf.mxu1  ;;  %v2049_v38 = vld [vmem:[#allocation4 + $0x100] sm:$0xff] }
 0x3bf   : > { %v1858_v15 = vpop.f32.mrf.mxu0  ;;  %v1637_v14 = vadd.f32 %v3256_v47, %v1518_v42  ;;  %v2195_v42 = vld [vmem:[#allocation6 + $0xe8] sm:$0xff] }
 0x3c0   : > { %v1511_v21 = vpop.f32.mrf.mxu1 }
 0x3c1   : > { %v1862_v18 = vpop.f32.mrf.mxu0 }
 0x3c2   : > { %v1728_v26 = vpop.f32.mrf.mxu1 }
 0x3c3   : > { %v1864_v45 = vpop.f32.mrf.mxu0  ;;  %v1745_v16 = vadd.f32 %v1728_v26, %v1632_v44  ;;  %v2197_v44 = vld [vmem:[#allocation6 + $0xf8] sm:$0xff] }
 0x3c4   : > { %v1730_v1 = vpop.f32.mrf.mxu1 }
 0x3c5   : > { %v1866_v46 = vpop.f32.mrf.mxu0  ;;  %v1746_v0 = vadd.f32 %v1730_v1, %v1633_v54  ;;  %v1869_v33 = vadd.f32 %v1852_v17, %v1745_v16  ;;  %v2052_v54 = vld [vmem:[#allocation4 + $0x118] sm:$0xff]  ;;  %v2190_v16 = vld [vmem:[#allocation6 + $0xc0] sm:$0xff] }
 0x3c6   : > { %v1732_v49 = vpop.f32.mrf.mxu1  ;;  %v2051_v46 = vld [vmem:[#allocation4 + $0x110] sm:$0xff]  ;;  %2153 = vmatprep.subr.mxu0 %v2052_v54  ;;  %v2209_v54 = vld [vmem:[#allocation6 + $0x158] sm:$0xff] }
 0x3c7   : > { %v1747_v13 = vadd.f32 %v1732_v49, %v1634_v8  ;;  %v1867_v56 = vpop.f32.mrf.mxu0  ;;  %v1870_v62 = vadd.f32 %v1854_v6, %v1746_v0  ;;  %v1887_v20 = vadd.f32 %v1880_v27, %v1869_v33  ;;  %2154 = vmatpush2.msra.mxu0 %v2051_v46  ;;  %v2050_v8 = vld [vmem:[#allocation4 + $0x108] sm:$0xff]  ;;  %v2196_v49 = vld [vmem:[#allocation6 + $0xf0] sm:$0xff]  ;;  %v2194_v0 = vld [vmem:[#allocation6 + $0xe0] sm:$0xff] }
 0x3c8   : > { %v1734_v60 = vpop.f32.mrf.mxu1  ;;  %2155 = vmatprep.subr.mxu0 %v2050_v8  ;;  %v2192_v56 = vld [vmem:[#allocation6 + $0xd0] sm:$0xff]  ;;  %v2179_v33 = vld [vmem:[#allocation6 + $0x68] sm:$0xff] }
 0x3c9   : > { %v1748_v28 = vadd.f32 %v1734_v60, %v1635_v9  ;;  %v1871_v29 = vadd.f32 %v1856_v12, %v1747_v13  ;;  %v1888_v5 = vadd.f32 %v1884_v50, %v1870_v62  ;;  %v1904_v12 = vrot.slane %v1899_v39, %v3279_v58  ;;  %2156 = vmatpush2.msra.mxu0 %v2049_v38  ;;  %v2193_v13 = vld [vmem:[#allocation6 + $0xd8] sm:$0xff]  ;;  %v2191_v9 = vld [vmem:[#allocation6 + $0xc8] sm:$0xff]  ;;  %v2208_v46 = vld [vmem:[#allocation6 + $0x150] sm:$0xff] }
 0x3ca   : > { %v1738_v51 = vpop.f32.mrf.mxu1  ;;  %v1893_v32 = vmax.f32 %v1887_v20, 0.0  ;;  %v2189_v60 = vld [vmem:[#allocation6 + $0xb8] sm:$0xff]  ;;  %v2183_v62 = vld [vmem:[#allocation6 + $0x88] sm:$0xff]  ;;  %v2206_v38 = vld [vmem:[#allocation6 + $0x140] sm:$0xff] }
 0x3cb   : > { %v1872_v25 = vadd.f32 %v1858_v15, %v1748_v28  ;;  %v1749_v3 = vadd.f32 %v1738_v51, %v1636_v61  ;;  %v1889_v22 = vadd.f32 %v1880_v27, %v1871_v29  ;;  %v1894_v40 = vmax.f32 %v1888_v5, 0.0  ;;  %v2187_v28 = vld [vmem:[#allocation6 + $0xa8] sm:$0xff]  ;;  %v2186_v29 = vld [vmem:[#allocation6 + $0xa0] sm:$0xff]  ;;  %v2185_v61 = vld [vmem:[#allocation6 + $0x98] sm:$0xff] }
 0x3cc   : > { %v1740_v30 = vpop.f32.mrf.mxu1  ;;  %v1908_v15 = vrot.slane %v1899_v39, %v3275_v52  ;;  %v1911_v26 = vmul.f32 %v1904_v12, %v1893_v32  ;;  %v2184_v51 = vld [vmem:[#allocation6 + $0x90] sm:$0xff]  ;;  %v2170_v39 = vld [vmem:[#allocation6 + $0x20] sm:$0xff]  ;;  %v2169_v5 = vld [vmem:[#allocation6 + $0x18] sm:$0xff] }
 0x3cd   : > { %v1890_v59 = vadd.f32 %v1884_v50, %v1872_v25  ;;  %v1750_v2 = vadd.f32 %v1740_v30, %v1637_v14  ;;  %v1873_v55 = vadd.f32 %v1862_v18, %v1749_v3  ;;  %v1895_v23 = vmax.f32 %v1889_v22, 0.0  ;;  %v2181_v25 = vld [vmem:[#allocation6 + $0x78] sm:$0xff]  ;;  %v2180_v14 = vld [vmem:[#allocation6 + $0x70] sm:$0xff]  ;;  %v2167_v20 = vld [vmem:[#allocation6 + $0x8] sm:$0xff] }
 0x3ce   : > { %v1742_v4 = vpop.f32.mrf.mxu1  ;;  %v1912_v31 = vmul.f32 %v1908_v15, %v1894_v40  ;;  %v3314_v1 = vadd.f32 %v1922_v24, %v1911_v26  ;;  %v2177_v3 = vld [vmem:[#allocation6 + $0x58] sm:$0xff]  ;;  %v2176_v30 = vld [vmem:[#allocation6 + $0x50] sm:$0xff]  ;;  %v2223_v40 = vld [vmem:[#allocation6 + $0x1c8] sm:$0xff] }
 0x3cf   : > { %v1874_v6 = vadd.f32 %v1864_v45, %v1750_v2  ;;  %v1891_v34 = vadd.f32 %v1880_v27, %v1873_v55  ;;  %v1896_v47 = vmax.f32 %v1890_v59, 0.0  ;;  %v1913_v48 = vmul.f32 %v1904_v12, %v1895_v23  ;;  %v2178_v27 = vld [vmem:[#allocation6 + $0x60] sm:$0xff]  ;;  %v2175_v59 = vld [vmem:[#allocation6 + $0x48] sm:$0xff]  ;;  %v2173_v22 = vld [vmem:[#allocation6 + $0x38] sm:$0xff] }
 0x3d0   : > { %v1743_v7 = vpop.f32.mrf.mxu1  ;;  %v3311_v57 = vadd.f32 %v1926_v36, %v1912_v31  ;;  %v2174_v2 = vld [vmem:[#allocation6 + $0x40] sm:$0xff]  ;;  %v2172_v55 = vld [vmem:[#allocation6 + $0x30] sm:$0xff]  ;;  %v2171_v4 = vld [vmem:[#allocation6 + $0x28] sm:$0xff] }
 0x3d1   : > { %v1892_v17 = vadd.f32 %v1884_v50, %v1874_v6  ;;  %v1897_v37 = vmax.f32 %v1891_v34, 0.0  ;;  %v1914_v43 = vmul.f32 %v1908_v15, %v1896_v47  ;;  %v3308_v53 = vadd.f32 %v1922_v24, %v1913_v48  ;;  %v2182_v50 = vld [vmem:[#allocation6 + $0x80] sm:$0xff]  ;;  %v2168_v6 = vld [vmem:[#allocation6 + $0x10] sm:$0xff]  ;;  %v2229_v7 = vld [vmem:[#allocation6 + $0x1f8] sm:$0xff] }
 0x3d2   : > { %v2166_v34 = vld [vmem:[#allocation6] sm:$0xff]  ;;  %v2228_v47 = vld [vmem:[#allocation6 + $0x1f0] sm:$0xff]  ;;  %v2225_v23 = vld [vmem:[#allocation6 + $0x1d8] sm:$0xff] }
 0x3d3   : > { %v1898_v63 = vmax.f32 %v1892_v17, 0.0  ;;  %v1915_v10 = vmul.f32 %v1904_v12, %v1897_v37  ;;  %v3304_v45 = vadd.f32 %v1926_v36, %v1914_v43  ;;  %v2227_v17 = vld [vmem:[#allocation6 + $0x1e8] sm:$0xff]  ;;  %v2226_v12 = vld [vmem:[#allocation6 + $0x1e0] sm:$0xff]  ;;  %v2224_v37 = vld [vmem:[#allocation6 + $0x1d0] sm:$0xff] }
 0x3d4   : > { %v2219_v32 = vld [vmem:[#allocation6 + $0x1a8] sm:$0xff]  ;;  %v2214_v48 = vld [vmem:[#allocation6 + $0x180] sm:$0xff]  ;;  %v2212_v31 = vld [vmem:[#allocation6 + $0x170] sm:$0xff] }
 0x3d5   : > { %v1916_v21 = vmul.f32 %v1908_v15, %v1898_v63  ;;  %v3300_v35 = vadd.f32 %v1922_v24, %v1915_v10  ;;  %v2221_v63 = vld [vmem:[#allocation6 + $0x1b8] sm:$0xff]  ;;  %v2220_v15 = vld [vmem:[#allocation6 + $0x1b0] sm:$0xff]  ;;  %v2218_v10 = vld [vmem:[#allocation6 + $0x1a0] sm:$0xff] }
 0x3d6   : > { %v2215_v43 = vld [vmem:[#allocation6 + $0x188] sm:$0xff]  ;;  %v2213_v24 = vld [vmem:[#allocation6 + $0x178] sm:$0xff] }
 0x3d7   : > { %v3298_v18 = vadd.f32 %v1926_v36, %v1916_v21  ;;  %v2217_v21 = vld [vmem:[#allocation6 + $0x198] sm:$0xff]  ;;  %v2216_v36 = vld [vmem:[#allocation6 + $0x190] sm:$0xff]  ;;  %v2211_v26 = vld [vmem:[#allocation6 + $0x168] sm:$0xff] }
 0x3d8   : > { %v2207_v8 = vld [vmem:[#allocation6 + $0x148] sm:$0xff] }
 0x3d9   : > { %2577 = vmatprep.subr.msk.mxu1 %vm939_vm9, %v3298_v18 }
 0x3da   : > { %2578 = vmatpush1.msk.msra.mxu1 %vm939_vm9, %v3300_v35 }
 0x3db   : > { %1974 = vmatprep.subr.mxu1 %v3304_v45 }
 0x3dc   : > { %1975 = vmatpush1.msra.mxu1 %v3308_v53 }
 0x3dd   : > { %1976 = vmatprep.subr.mxu1 %v3311_v57 }
 0x3de   : > { %1977 = vmatpush1.msra.mxu1 %v3314_v1 }
 0x3df   : > { %2579 = vmatmul.mubr.msk.f32.vlgmr.msra.gmra.mxu1 %vm1935_vm14, %v2895_v11  ;;  %2242 = vmatprep.subr.mxu1 %v2197_v44  ;;  %v2210_v11 = vld [vmem:[#allocation6 + $0x160] sm:$0xff] }
 0x3e0   : > { %2243 = vmatpush1.msra.mxu1 %v2196_v49 }
 0x3e1   : > { %2244 = vmatprep.subr.mxu1 %v2195_v42  ;;  %v2205_v42 = vld [vmem:[#allocation6 + $0x138] sm:$0xff] }
 0x3e2   : > { %2245 = vmatpush1.msra.mxu1 %v2194_v0  ;;  %v2204_v0 = vld [vmem:[#allocation6 + $0x130] sm:$0xff] }
 0x3e3   : > { %2246 = vmatprep.subr.mxu1 %v2193_v13  ;;  %v2203_v13 = vld [vmem:[#allocation6 + $0x128] sm:$0xff] }
 0x3e4   : > { %2247 = vmatpush1.msra.mxu1 %v2192_v56  ;;  %v2202_v56 = vld [vmem:[#allocation6 + $0x120] sm:$0xff] }
 0x3e5   : > { %2248 = vmatprep.subr.mxu1 %v2191_v9  ;;  %v2201_v9 = vld [vmem:[#allocation6 + $0x118] sm:$0xff] }
 0x3e6   : > { %2249 = vmatpush1.msra.mxu1 %v2190_v16  ;;  %v2200_v16 = vld [vmem:[#allocation6 + $0x110] sm:$0xff] }
 0x3e7   : > { %2250 = vmatprep.subr.mxu1 %v2189_v60  ;;  %v2199_v60 = vld [vmem:[#allocation6 + $0x108] sm:$0xff] }
 0x3e8   : > { %2251 = vmatpush1.msra.mxu1 %v2188_v19  ;;  %v2198_v19 = vld [vmem:[#allocation6 + $0x100] sm:$0xff] }
 0x3e9   : > { %2252 = vmatprep.subr.mxu1 %v2187_v28  ;;  %v2081_v28 = vld [vmem:[%s3367_s10] sm:$0x3] }
 0x3ea   : > { %2253 = vmatpush1.msra.mxu1 %v2186_v29  ;;  %v2086_v29 = vrot.slane %v2081_v28, %v3279_v58 }
 0x3eb   : > { %2254 = vmatprep.subr.mxu1 %v2185_v61  ;;  %v2090_v61 = vrot.slane %v2081_v28, %v3275_v52 }
 0x3ec   : > { %2255 = vmatpush1.msra.mxu1 %v2184_v51 }
 0x3ed   : > { %2256 = vmatprep.subr.mxu1 %v2183_v62 }
 0x3ee   : > { %2257 = vmatpush1.msra.mxu1 %v2182_v50 }
 0x3ef   : > { %2258 = vmatprep.subr.mxu1 %v2181_v25 }
 0x3f0   : > { %2259 = vmatpush1.msra.mxu1 %v2180_v14 }
 0x3f1   : > { %2260 = vmatprep.subr.mxu1 %v2179_v33 }
 0x3f2   : > { %2261 = vmatpush1.msra.mxu1 %v2178_v27  ;;  %v2230_v27 = vld [vmem:[%s3369_s12] sm:$0x3] }
 0x3f3   : > { %2262 = vmatprep.subr.mxu1 %v2177_v3  ;;  %v2235_v3 = vrot.slane %v2230_v27, %v3279_v58 }
 0x3f4   : > { %2263 = vmatpush1.msra.mxu1 %v2176_v30  ;;  %v2239_v30 = vrot.slane %v2230_v27, %v3275_v52 }
 0x3f5   : > { %2264 = vmatprep.subr.mxu1 %v2175_v59 }
 0x3f6   : > { %2265 = vmatpush1.msra.mxu1 %v2174_v2 }
 0x3f7   : > { %2266 = vmatprep.subr.mxu1 %v2173_v22 }
 0x3f8   : > { %2267 = vmatpush1.msra.mxu1 %v2172_v55 }
 0x3f9   : > { %2268 = vmatprep.subr.mxu1 %v2171_v4 }
 0x3fa   : > { %2269 = vmatpush1.msra.mxu1 %v2170_v39 }
 0x3fb   : > { %2270 = vmatprep.subr.mxu1 %v2169_v5 }
 0x3fc   : > { %2271 = vmatpush1.msra.mxu1 %v2168_v6 }
 0x3fd   : > { %2272 = vmatprep.subr.mxu1 %v2167_v20 }
 0x3fe   : > { %2273 = vmatpush1.msra.mxu1 %v2166_v34 }
 0x3ff   : > { %2274 = vmatprep.subr.mxu1 %v2229_v7 }
 0x400   : > { %2275 = vmatpush2.msra.mxu1 %v2228_v47 }
 0x401   : > { %2276 = vmatprep.subr.mxu1 %v2227_v17 }
 0x402   : > { %2277 = vmatpush2.msra.mxu1 %v2226_v12 }
 0x403   : > { %2278 = vmatprep.subr.mxu1 %v2225_v23 }
 0x404   : > { %2279 = vmatpush2.msra.mxu1 %v2224_v37 }
 0x405   : > { %2280 = vmatprep.subr.mxu1 %v2223_v40 }
 0x406   : > { %2281 = vmatpush2.msra.mxu1 %v2222_v41 }
 0x407   : > { %2282 = vmatprep.subr.mxu1 %v2221_v63 }
 0x408   : > { %2283 = vmatpush2.msra.mxu1 %v2220_v15 }
 0x409   : > { %2284 = vmatprep.subr.mxu1 %v2219_v32 }
 0x40a   : > { %2285 = vmatpush2.msra.mxu1 %v2218_v10  ;;  %v2363_v10 = vld [vmem:[%s484_s23 + $0x10] sm:$0xff] }
 0x40b   : > { %2286 = vmatprep.subr.mxu1 %v2217_v21 }
 0x40c   : > { %2287 = vmatpush2.msra.mxu1 %v2216_v36 }
 0x40d   : > { %2288 = vmatprep.subr.mxu1 %v2215_v43 }
 0x40e   : > { %2289 = vmatpush2.msra.mxu1 %v2214_v48 }
 0x40f   : > { %2290 = vmatprep.subr.mxu1 %v2213_v24 }
 0x410   : > { %2291 = vmatpush2.msra.mxu1 %v2212_v31 }
 0x411   : > { %2292 = vmatprep.subr.mxu1 %v2211_v26 }
 0x412   : > { %2293 = vmatpush2.msra.mxu1 %v2210_v11 }
 0x413   : > { %2294 = vmatprep.subr.mxu1 %v2209_v54 }
 0x414   : > { %2295 = vmatpush2.msra.mxu1 %v2208_v46 }
 0x415   : > { %2296 = vmatprep.subr.mxu1 %v2207_v8 }
 0x416   : > { %2297 = vmatpush2.msra.mxu1 %v2206_v38 }
 0x417   : > { %2298 = vmatprep.subr.mxu1 %v2205_v42 }
 0x418   : > { %2299 = vmatpush2.msra.mxu1 %v2204_v0 }
 0x419   : > { %2300 = vmatprep.subr.mxu1 %v2203_v13 }
 0x41a   : > { %2301 = vmatpush2.msra.mxu1 %v2202_v56 }
 0x41b   : > { %2302 = vmatprep.subr.mxu1 %v2201_v9 }
 0x41c   : > { %2303 = vmatpush2.msra.mxu1 %v2200_v16 }
 0x41d   : > { %2304 = vmatprep.subr.mxu1 %v2199_v60 }
 0x41e   : > { %2305 = vmatpush2.msra.mxu1 %v2198_v19 }
 0x49f   : > { %v2012_v44 = vpop.f32.mrf.mxu1 }
 0x4a1   : > { %v2014_v49 = vpop.f32.mrf.mxu1 }
 0x4a2   : > { %2157 = vmatprep.mubr.f32.mxu0 %v2014_v49 }
 0x4a3   : > { %2158 = vmatmul.mubr.f32.vlgmr.msra.gmra.mxu0 %v2012_v44 }
 0x563   : > { %v2159_v51 = vpop.f32.mrf.mxu0 }
 0x564   : > { %v2160_v62 = vadd.f32 %v2159_v51, %v2086_v29 }
 0x565   : > { %v2161_v50 = vpop.f32.mrf.mxu0 }
 0x566   : > { %v2162_v25 = vadd.f32 %v2161_v50, %v2090_v61  ;;  %v2164_v33 = vmax.f32 %v2160_v62, 0.0 }
 0x568   : > { %v2165_v14 = vmax.f32 %v2162_v25, 0.0 }
 0x56a   : > { %2306 = vmatprep.mubr.f32.mxu1 %v2165_v14 }
 0x56b   : > { %2307 = vmatmul.mubr.f32.vlgmr.msra.gmra.mxu1 %v2164_v33 }
 0x62b   : > { %v2308_v59 = vpop.f32.mrf.mxu1 }
 0x62c   : > { %v2309_v2 = vadd.f32 %v2308_v59, %v2235_v3 }
 0x62d   : > { %v2310_v22 = vpop.f32.mrf.mxu1 }
 0x62e   : > { %v2313_v55 = vmul.f32 0.5, %v2309_v2  ;;  %v2311_v4 = vadd.f32 %v2310_v22, %v2239_v30 }
 0x630   : > { %2788 = vtanh.f32 %v2313_v55  ;;  %v2314_v39 = vmul.f32 0.5, %v2311_v4 }
 0x632   : > { %2790 = vtanh.f32 %v2314_v39 }
 0x63d   : > { %v2789_v5 = vpop.eup %2788 }
 0x63e   : > { %v2317_v6 = vadd.f32 1.0, %v2789_v5 }
 0x63f   : > { %v2791_v20 = vpop.eup %2790 }
 0x640   : > { %v2319_v34 = vmul.f32 0.5, %v2317_v6  ;;  %v2318_v7 = vadd.f32 1.0, %v2791_v20 }
 0x642   : > { %v2324_v47 = vrot.slane %v2319_v34, %v3279_v58  ;;  %v2320_v17 = vmul.f32 0.5, %v2318_v7 }
 0x644   : > { %v2328_v23 = vrot.slane %v2320_v17, %v3279_v58  ;;  %v2329_v37 = vmul.f32 %v2324_v47, %v3314_v1  ;;  %v2331_v40 = vmul.f32 %v2324_v47, %v3308_v53  ;;  %v2333_v41 = vmul.f32 %v2324_v47, %v3300_v35 }
 0x646   : > { %v2330_v63 = vmul.f32 %v2328_v23, %v3311_v57  ;;  %v2332_v15 = vmul.f32 %v2328_v23, %v3304_v45  ;;  %v2334_v32 = vmul.f32 %v2328_v23, %v3298_v18 }
 0x648   : > { %v2586_v21 = vpack.c.bf16 %v2330_v63, %v2329_v37  ;;  %v2587_v58 = vpack.c.bf16 %v2332_v15, %v2331_v40  ;;  %v2588_v36 = vpack.c.bf16 %v2334_v32, %v2333_v41 }
 0x64a   : > { %2355 = vst [vmem:[%s484_s23] sm:$0xff] %v2586_v21  ;;  %2356 = vst [vmem:[%s484_s23 + $0x8] sm:$0xff] %v2587_v58  ;;  %v2364_v53 = vsel %vm2362_vm0, %v2588_v36, %v2363_v10 }
 0x64b   : > { %2365 = vst [vmem:[%s484_s23 + $0x10] sm:$0xff] %v2364_v53 }
 0x64c PF: > { %s25_s25 = sadd.s32 1, %s2884_s25  }
 0x64d   : > { %p22_p2 = scmp.ge.s32.totalorder %s25_s25, 4  }
 0x64f   :  { %24 = sbr.rel (!%p22_p2) target bundleno = 2 (0x2), region = 115 }
 0x654   :  { %2387 = vsyncpa [#allocation3], 1 }
 0x655   :  { %2389 = vsyncpa [#allocation3 + $0x1], 1 }
 0x656   :  { %2390 = vsyncpa [#allocation5], 1 }

// kernel: forward.4
= control target key start
LH: loop header
LB: loop body
LE: loop exit
PB: predicated region body
PF: predicated region fallthrough
CT: control target
= control target key end

     0   :  { %s7044_s2 = inlined_call_operand.vmem [shape: bf16[256,1024], index: 2, kind: input, shape index: {}]   ;;  %s7045_s5 = inlined_call_operand.vmem [shape: bf16[192,128], index: 5, kind: output, shape index: {0}]   ;;  %s7046_s6 = inlined_call_operand.vmem [shape: bf16[192,128], index: 6, kind: output, shape index: {1}]   ;;  %s7047_s7 = inlined_call_operand.vmem [shape: f32[8,256], index: 7, kind: output, shape index: {2}]   ;;  %s7048_s0 = inlined_call_operand.vmem [shape: bf16[192,256], index: 0, kind: input, shape index: {}, may-alias: {0,1}]   ;;  %s7049_s1 = inlined_call_operand.vmem [shape: bf16[192,256], index: 1, kind: input, shape index: {}, may-alias: {0,1}]   ;;  %s7050_s3 = inlined_call_operand.vmem [shape: bf16[256,1024], index: 3, kind: input, shape index: {}]   ;;  %s7051_s4 = inlined_call_operand.vmem [shape: f32[1,1024], index: 4, kind: input, shape index: {}]  }
   0x1   :  { %v122_v0 = vld [vmem:[%s7044_s2 + $0x1c0] sm:$0xff]  ;;  %v123_v2 = vld [vmem:[%s7044_s2 + $0x1c8] sm:$0xff] }
   0x2   :  { %v124_v1 = vld [vmem:[%s7044_s2 + $0x1e0] sm:$0xff]  ;;  %v125_v4 = vld [vmem:[%s7044_s2 + $0x1e8] sm:$0xff] }
   0x3   :  { %v3943_v3 = vcombine.high %v122_v0, %v124_v1  ;;  %v3942_v5 = vcombine.low %v122_v0, %v124_v1  ;;  %v118_v6 = vld [vmem:[%s7044_s2 + $0x180] sm:$0xff]  ;;  %v3945_v8 = vcombine.high %v123_v2, %v125_v4  ;;  %v3944_v9 = vcombine.low %v123_v2, %v125_v4  ;;  %v119_v11 = vld [vmem:[%s7044_s2 + $0x188] sm:$0xff] }
   0x4   :  { %v120_v7 = vld [vmem:[%s7044_s2 + $0x1a0] sm:$0xff]  ;;  %v121_v12 = vld [vmem:[%s7044_s2 + $0x1a8] sm:$0xff] }
   0x5   :  { %v3939_v10 = vcombine.high %v118_v6, %v120_v7  ;;  %v114_v13 = vld [vmem:[%s7044_s2 + $0x140] sm:$0xff]  ;;  %598 = vmatprep.subr.bf16.mxu0 %v3943_v3  ;;  %v3941_v14 = vcombine.high %v119_v11, %v121_v12  ;;  %v115_v16 = vld [vmem:[%s7044_s2 + $0x148] sm:$0xff]  ;;  %751 = vmatprep.subr.bf16.mxu1 %v3945_v8  ;;  %v3938_v18 = vcombine.low %v118_v6, %v120_v7 }
   0x6   :  { %v116_v15 = vld [vmem:[%s7044_s2 + $0x160] sm:$0xff]  ;;  %v117_v17 = vld [vmem:[%s7044_s2 + $0x168] sm:$0xff]  ;;  %599 = vmatpush1.bf16.msra.mxu0 %v3942_v5  ;;  %752 = vmatpush1.bf16.msra.mxu1 %v3944_v9  ;;  %v3940_v19 = vcombine.low %v119_v11, %v121_v12 }
   0x7   :  { %600 = vmatprep.subr.bf16.mxu0 %v3939_v10  ;;  %v3935_v20 = vcombine.high %v114_v13, %v116_v15  ;;  %753 = vmatprep.subr.bf16.mxu1 %v3941_v14  ;;  %v3937_v21 = vcombine.high %v115_v16, %v117_v17  ;;  %v110_v22 = vld [vmem:[%s7044_s2 + $0x100] sm:$0xff]  ;;  %v111_v24 = vld [vmem:[%s7044_s2 + $0x108] sm:$0xff]  ;;  %v3934_v26 = vcombine.low %v114_v13, %v116_v15 }
   0x8   :  { %v112_v23 = vld [vmem:[%s7044_s2 + $0x120] sm:$0xff]  ;;  %v113_v25 = vld [vmem:[%s7044_s2 + $0x128] sm:$0xff]  ;;  %v3936_v27 = vcombine.low %v115_v16, %v117_v17 }
   0x9   :  { %v3931_v28 = vcombine.high %v110_v22, %v112_v23  ;;  %v3933_v29 = vcombine.high %v111_v24, %v113_v25  ;;  %v106_v30 = vld [vmem:[%s7044_s2 + $0xc0] sm:$0xff]  ;;  %v107_v32 = vld [vmem:[%s7044_s2 + $0xc8] sm:$0xff]  ;;  %v3930_v34 = vcombine.low %v110_v22, %v112_v23  ;;  %v3932_v35 = vcombine.low %v111_v24, %v113_v25 }
   0xa   :  { %601 = vmatpush1.bf16.msra.mxu0 %v3938_v18  ;;  %754 = vmatpush1.bf16.msra.mxu1 %v3940_v19  ;;  %v108_v31 = vld [vmem:[%s7044_s2 + $0xe0] sm:$0xff]  ;;  %v109_v33 = vld [vmem:[%s7044_s2 + $0xe8] sm:$0xff] }
   0xb   :  { %602 = vmatprep.subr.bf16.mxu0 %v3935_v20  ;;  %755 = vmatprep.subr.bf16.mxu1 %v3937_v21  ;;  %v3927_v36 = vcombine.high %v106_v30, %v108_v31  ;;  %v3929_v37 = vcombine.high %v107_v32, %v109_v33  ;;  %v102_v38 = vld [vmem:[%s7044_s2 + $0x80] sm:$0xff]  ;;  %v103_v40 = vld [vmem:[%s7044_s2 + $0x88] sm:$0xff]  ;;  %v3926_v42 = vcombine.low %v106_v30, %v108_v31 }
   0xc   :  { %v104_v39 = vld [vmem:[%s7044_s2 + $0xa0] sm:$0xff]  ;;  %v105_v41 = vld [vmem:[%s7044_s2 + $0xa8] sm:$0xff]  ;;  %v3928_v43 = vcombine.low %v107_v32, %v109_v33 }
   0xd   :  { %v3923_v44 = vcombine.high %v102_v38, %v104_v39  ;;  %v3925_v45 = vcombine.high %v103_v40, %v105_v41  ;;  %v98_v46 = vld [vmem:[%s7044_s2 + $0x40] sm:$0xff]  ;;  %v99_v48 = vld [vmem:[%s7044_s2 + $0x48] sm:$0xff]  ;;  %v3922_v50 = vcombine.low %v102_v38, %v104_v39  ;;  %v3924_v51 = vcombine.low %v103_v40, %v105_v41 }
   0xe   :  { %603 = vmatpush1.bf16.msra.mxu0 %v3934_v26  ;;  %756 = vmatpush1.bf16.msra.mxu1 %v3936_v27  ;;  %v100_v47 = vld [vmem:[%s7044_s2 + $0x60] sm:$0xff]  ;;  %v101_v49 = vld [vmem:[%s7044_s2 + $0x68] sm:$0xff] }
   0xf   :  { %604 = vmatprep.subr.bf16.mxu0 %v3931_v28  ;;  %757 = vmatprep.subr.bf16.mxu1 %v3933_v29  ;;  %v3919_v52 = vcombine.high %v98_v46, %v100_v47  ;;  %v3921_v53 = vcombine.high %v99_v48, %v101_v49  ;;  %v94_v54 = vld [vmem:[%s7044_s2] sm:$0xff]  ;;  %v95_v57 = vld [vmem:[%s7044_s2 + $0x8] sm:$0xff]  ;;  %v3918_v59 = vcombine.low %v98_v46, %v100_v47 }
  0x10   :  { %v96_v55 = vld [vmem:[%s7044_s2 + $0x20] sm:$0xff]  ;;  %v97_v58 = vld [vmem:[%s7044_s2 + $0x28] sm:$0xff]  ;;  %v3920_v60 = vcombine.low %v99_v48, %v101_v49 }
  0x11   :  { %v4287_v56 = vld [vmem:[%s7048_s0 + $0x4] ss:$8 sps:$4 sm:$0xff]   ;;  %v3915_v61 = vcombine.high %v94_v54, %v96_v55  ;;  %v3917_v62 = vcombine.high %v95_v57, %v97_v58  ;;  %v3914_v3 = vcombine.low %v94_v54, %v96_v55  ;;  %v3916_v4 = vcombine.low %v95_v57, %v97_v58 }
  0x12   :  { %605 = vmatpush1.bf16.msra.mxu0 %v3930_v34  ;;  %758 = vmatpush1.bf16.msra.mxu1 %v3932_v35  ;;  %v154_v63 = vld [vmem:[%s7044_s2 + $0x3c0] sm:$0xff]  ;;  %v155_v1 = vld [vmem:[%s7044_s2 + $0x3c8] sm:$0xff] }
  0x13   :  { %606 = vmatprep.subr.bf16.mxu0 %v3927_v36  ;;  %759 = vmatprep.subr.bf16.mxu1 %v3929_v37  ;;  %v156_v0 = vld [vmem:[%s7044_s2 + $0x3e0] sm:$0xff]  ;;  %v157_v2 = vld [vmem:[%s7044_s2 + $0x3e8] sm:$0xff] }
  0x14   :  { %630 = vmatprep.mubr.bf16.mxu0 %v4287_v56  ;;  %783 = vmatprep.mubr.bf16.mxu1 %v4287_v56  ;;  %v3975_v5 = vcombine.high %v154_v63, %v156_v0  ;;  %v3977_v6 = vcombine.high %v155_v1, %v157_v2  ;;  %v150_v7 = vld [vmem:[%s7044_s2 + $0x380] sm:$0xff]  ;;  %v151_v9 = vld [vmem:[%s7044_s2 + $0x388] sm:$0xff]  ;;  %v3974_v11 = vcombine.low %v154_v63, %v156_v0  ;;  %v1052_v63 = vld [vmem:[%s7044_s2 + $0x1d0] sm:$0xff] }
  0x15   :  { %v152_v8 = vld [vmem:[%s7044_s2 + $0x3a0] sm:$0xff]  ;;  %v153_v10 = vld [vmem:[%s7044_s2 + $0x3a8] sm:$0xff]  ;;  %v3976_v12 = vcombine.low %v155_v1, %v157_v2  ;;  %v1054_v0 = vld [vmem:[%s7044_s2 + $0x1f0] sm:$0xff] }
  0x16   :  { %607 = vmatpush1.bf16.msra.mxu0 %v3926_v42  ;;  %760 = vmatpush1.bf16.msra.mxu1 %v3928_v43  ;;  %v3971_v13 = vcombine.high %v150_v7, %v152_v8  ;;  %v3973_v14 = vcombine.high %v151_v9, %v153_v10  ;;  %v146_v15 = vld [vmem:[%s7044_s2 + $0x340] sm:$0xff]  ;;  %v147_v17 = vld [vmem:[%s7044_s2 + $0x348] sm:$0xff]  ;;  %v3970_v19 = vcombine.low %v150_v7, %v152_v8  ;;  %v1053_v1 = vld [vmem:[%s7044_s2 + $0x1d8] sm:$0xff] }
  0x17   :  { %608 = vmatprep.subr.bf16.mxu0 %v3923_v44  ;;  %761 = vmatprep.subr.bf16.mxu1 %v3925_v45  ;;  %v148_v16 = vld [vmem:[%s7044_s2 + $0x360] sm:$0xff]  ;;  %v149_v18 = vld [vmem:[%s7044_s2 + $0x368] sm:$0xff]  ;;  %v3972_v20 = vcombine.low %v151_v9, %v153_v10  ;;  %v1055_v2 = vld [vmem:[%s7044_s2 + $0x1f8] sm:$0xff] }
  0x18   :  { %v3967_v21 = vcombine.high %v146_v15, %v148_v16  ;;  %v3969_v22 = vcombine.high %v147_v17, %v149_v18  ;;  %v142_v23 = vld [vmem:[%s7044_s2 + $0x300] sm:$0xff]  ;;  %v143_v25 = vld [vmem:[%s7044_s2 + $0x308] sm:$0xff]  ;;  %v3966_v27 = vcombine.low %v146_v15, %v148_v16  ;;  %v3968_v28 = vcombine.low %v147_v17, %v149_v18  ;;  %v1048_v8 = vld [vmem:[%s7044_s2 + $0x190] sm:$0xff] }
  0x19   :  { %v144_v24 = vld [vmem:[%s7044_s2 + $0x320] sm:$0xff]  ;;  %v145_v26 = vld [vmem:[%s7044_s2 + $0x328] sm:$0xff]  ;;  %v4033_v7 = vcombine.high %v1053_v1, %v1055_v2  ;;  %v1050_v9 = vld [vmem:[%s7044_s2 + $0x1b0] sm:$0xff]  ;;  %v4032_v16 = vcombine.low %v1053_v1, %v1055_v2 }
  0x1a   :  { %609 = vmatpush1.bf16.msra.mxu0 %v3922_v50  ;;  %762 = vmatpush1.bf16.msra.mxu1 %v3924_v51  ;;  %v3963_v29 = vcombine.high %v142_v23, %v144_v24  ;;  %v3965_v30 = vcombine.high %v143_v25, %v145_v26  ;;  %v138_v31 = vld [vmem:[%s7044_s2 + $0x2c0] sm:$0xff]  ;;  %v139_v33 = vld [vmem:[%s7044_s2 + $0x2c8] sm:$0xff]  ;;  %v3962_v35 = vcombine.low %v142_v23, %v144_v24  ;;  %v1049_v10 = vld [vmem:[%s7044_s2 + $0x198] sm:$0xff] }
  0x1b   :  { %610 = vmatprep.subr.bf16.mxu0 %v3919_v52  ;;  %763 = vmatprep.subr.bf16.mxu1 %v3921_v53  ;;  %v140_v32 = vld [vmem:[%s7044_s2 + $0x2e0] sm:$0xff]  ;;  %v141_v34 = vld [vmem:[%s7044_s2 + $0x2e8] sm:$0xff]  ;;  %v3964_v36 = vcombine.low %v143_v25, %v145_v26  ;;  %v1046_v15 = vld [vmem:[%s7044_s2 + $0x170] sm:$0xff]  ;;  %v4027_v17 = vcombine.high %v1048_v8, %v1050_v9 }
  0x1c   :  { %v3959_v37 = vcombine.high %v138_v31, %v140_v32  ;;  %v3961_v38 = vcombine.high %v139_v33, %v141_v34  ;;  %v134_v39 = vld [vmem:[%s7044_s2 + $0x280] sm:$0xff]  ;;  %v135_v41 = vld [vmem:[%s7044_s2 + $0x288] sm:$0xff]  ;;  %v3958_v43 = vcombine.low %v138_v31, %v140_v32  ;;  %v3960_v44 = vcombine.low %v139_v33, %v141_v34  ;;  %v1045_v18 = vld [vmem:[%s7044_s2 + $0x158] sm:$0xff] }
  0x1d   :  { %v136_v40 = vld [vmem:[%s7044_s2 + $0x2a0] sm:$0xff]  ;;  %v137_v42 = vld [vmem:[%s7044_s2 + $0x2a8] sm:$0xff]  ;;  %v4290_v25 = vld [vmem:[%s7048_s0 + $0x10] ss:$8 sps:$4 sm:$0xff]  }
  0x1e   :  { %611 = vmatpush1.bf16.msra.mxu0 %v3918_v59  ;;  %764 = vmatpush1.bf16.msra.mxu1 %v3920_v60  ;;  %v3955_v45 = vcombine.high %v134_v39, %v136_v40  ;;  %v3957_v46 = vcombine.high %v135_v41, %v137_v42  ;;  %v130_v47 = vld [vmem:[%s7044_s2 + $0x240] sm:$0xff]  ;;  %v131_v49 = vld [vmem:[%s7044_s2 + $0x248] sm:$0xff]  ;;  %v3954_v51 = vcombine.low %v134_v39, %v136_v40  ;;  %v1040_v26 = vld [vmem:[%s7044_s2 + $0x110] sm:$0xff] }
  0x1f   :  { %612 = vmatprep.subr.bf16.mxu0 %v3915_v61  ;;  %765 = vmatprep.subr.bf16.mxu1 %v3917_v62  ;;  %v132_v48 = vld [vmem:[%s7044_s2 + $0x260] sm:$0xff]  ;;  %v133_v50 = vld [vmem:[%s7044_s2 + $0x268] sm:$0xff]  ;;  %v3956_v52 = vcombine.low %v135_v41, %v137_v42  ;;  %v1036_v34 = vld [vmem:[%s7044_s2 + $0xd0] sm:$0xff] }
  0x20   :  { %v3951_v53 = vcombine.high %v130_v47, %v132_v48  ;;  %v3953_v54 = vcombine.high %v131_v49, %v133_v50  ;;  %v126_v55 = vld [vmem:[%s7044_s2 + $0x200] sm:$0xff]  ;;  %v127_v57 = vld [vmem:[%s7044_s2 + $0x208] sm:$0xff]  ;;  %v3950_v59 = vcombine.low %v130_v47, %v132_v48  ;;  %v3952_v60 = vcombine.low %v131_v49, %v133_v50  ;;  %v1033_v47 = vld [vmem:[%s7044_s2 + $0x98] sm:$0xff] }
  0x21   :  { %v128_v56 = vld [vmem:[%s7044_s2 + $0x220] sm:$0xff]  ;;  %v129_v58 = vld [vmem:[%s7044_s2 + $0x228] sm:$0xff]  ;;  %v1035_v48 = vld [vmem:[%s7044_s2 + $0xb8] sm:$0xff] }
  0x22   :  { %613 = vmatpush1.bf16.msra.mxu0 %v3914_v3  ;;  %766 = vmatpush1.bf16.msra.mxu1 %v3916_v4  ;;  %v3947_v61 = vcombine.high %v126_v55, %v128_v56  ;;  %v3949_v62 = vcombine.high %v127_v57, %v129_v58  ;;  %v3946_v3 = vcombine.low %v126_v55, %v128_v56  ;;  %v4291_v32 = vld [vmem:[%s7048_s0 + $0x24] ss:$8 sps:$4 sm:$0xff]   ;;  %v1029_v55 = vld [vmem:[%s7044_s2 + $0x58] sm:$0xff] }
  0x23   :  { %614 = vmatprep.subr.bf16.mxu0 %v3975_v5  ;;  %767 = vmatprep.subr.bf16.mxu1 %v3977_v6  ;;  %v3948_v4 = vcombine.low %v127_v57, %v129_v58  ;;  %v4285_v5 = vld [vmem:[%s7048_s0] ss:$8 sps:$4 sm:$0xff]   ;;  %v4031_v6 = vcombine.high %v1052_v63, %v1054_v0  ;;  %v1031_v56 = vld [vmem:[%s7044_s2 + $0x78] sm:$0xff]  ;;  %v4012_v58 = vcombine.low %v1033_v47, %v1035_v48 }
  0x24   :  { %v1025_v1 = vld [vmem:[%s7044_s2 + $0x18] sm:$0xff] }
  0x25   :  { %v1027_v2 = vld [vmem:[%s7044_s2 + $0x38] sm:$0xff] }
  0x26   :  { %615 = vmatpush2.bf16.msra.mxu0 %v3974_v11  ;;  %768 = vmatpush2.bf16.msra.mxu1 %v3976_v12  ;;  %v1051_v11 = vld [vmem:[%s7044_s2 + $0x1b8] sm:$0xff]  ;;  %v4030_v12 = vcombine.low %v1052_v63, %v1054_v0  ;;  %v1026_v63 = vld [vmem:[%s7044_s2 + $0x30] sm:$0xff]  ;;  %v4297_v0 = vld [vmem:[%s7048_s0 + $0x44] ss:$8 sps:$4 sm:$0xff]  }
  0x27   :  { %616 = vmatprep.subr.bf16.mxu0 %v3971_v13  ;;  %769 = vmatprep.subr.bf16.mxu1 %v3973_v14  ;;  %v4288_v13 = vld [vmem:[%s7048_s0 + $0x14] ss:$8 sps:$4 sm:$0xff]  }
  0x28   :  { %v1044_v14 = vld [vmem:[%s7044_s2 + $0x150] sm:$0xff] }
  0x29   :  { %v4023_v23 = vcombine.high %v1044_v14, %v1046_v15 }
  0x2a   :  { %617 = vmatpush2.bf16.msra.mxu0 %v3970_v19  ;;  %770 = vmatpush2.bf16.msra.mxu1 %v3972_v20  ;;  %v1047_v19 = vld [vmem:[%s7044_s2 + $0x178] sm:$0xff]  ;;  %v4029_v20 = vcombine.high %v1049_v10, %v1051_v11 }
  0x2b   :  { %618 = vmatprep.subr.bf16.mxu0 %v3967_v21  ;;  %771 = vmatprep.subr.bf16.mxu1 %v3969_v22  ;;  %v4026_v21 = vcombine.low %v1048_v8, %v1050_v9  ;;  %v4028_v22 = vcombine.low %v1049_v10, %v1051_v11  ;;  %v4025_v24 = vcombine.high %v1045_v18, %v1047_v19  ;;  %v1086_v8 = vld [vmem:[%s7044_s2 + $0x3f0] sm:$0xff]  ;;  %v1085_v9 = vld [vmem:[%s7044_s2 + $0x3d8] sm:$0xff] }
  0x2c   :  { %v4024_v31 = vcombine.low %v1045_v18, %v1047_v19  ;;  %v1087_v10 = vld [vmem:[%s7044_s2 + $0x3f8] sm:$0xff] }
  0x2d   :  { %v4300_v18 = vld [vmem:[%s7048_s0 + $0x54] ss:$8 sps:$4 sm:$0xff]  }
  0x2e   :  { %619 = vmatpush2.bf16.msra.mxu0 %v3966_v27  ;;  %772 = vmatpush2.bf16.msra.mxu1 %v3968_v28  ;;  %v1042_v27 = vld [vmem:[%s7044_s2 + $0x130] sm:$0xff]  ;;  %v4022_v28 = vcombine.low %v1044_v14, %v1046_v15  ;;  %v4299_v14 = vld [vmem:[%s7048_s0 + $0x40] ss:$8 sps:$4 sm:$0xff]   ;;  %v4065_v15 = vcombine.high %v1085_v9, %v1087_v10  ;;  %v1081_v19 = vld [vmem:[%s7044_s2 + $0x398] sm:$0xff] }
  0x2f   :  { %620 = vmatprep.subr.bf16.mxu0 %v3963_v29  ;;  %773 = vmatprep.subr.bf16.mxu1 %v3965_v30  ;;  %v1041_v29 = vld [vmem:[%s7044_s2 + $0x118] sm:$0xff]  ;;  %v4019_v33 = vcombine.high %v1040_v26, %v1042_v27  ;;  %v4018_v39 = vcombine.low %v1040_v26, %v1042_v27  ;;  %v1078_v26 = vld [vmem:[%s7044_s2 + $0x370] sm:$0xff] }
  0x30   :  { %v1043_v30 = vld [vmem:[%s7044_s2 + $0x138] sm:$0xff] }
  0x31   :  { %v4020_v40 = vcombine.low %v1041_v29, %v1043_v30  ;;  %v1077_v27 = vld [vmem:[%s7044_s2 + $0x358] sm:$0xff] }
  0x32   :  { %621 = vmatpush2.bf16.msra.mxu0 %v3962_v35  ;;  %774 = vmatpush2.bf16.msra.mxu1 %v3964_v36  ;;  %v1038_v35 = vld [vmem:[%s7044_s2 + $0xf0] sm:$0xff]  ;;  %v4021_v36 = vcombine.high %v1041_v29, %v1043_v30 }
  0x33   :  { %622 = vmatprep.subr.bf16.mxu0 %v3959_v37  ;;  %775 = vmatprep.subr.bf16.mxu1 %v3961_v38  ;;  %v1037_v37 = vld [vmem:[%s7044_s2 + $0xd8] sm:$0xff]  ;;  %v4015_v41 = vcombine.high %v1036_v34, %v1038_v35  ;;  %v4014_v49 = vcombine.low %v1036_v34, %v1038_v35  ;;  %v1072_v34 = vld [vmem:[%s7044_s2 + $0x310] sm:$0xff] }
  0x34   :  { %v1039_v38 = vld [vmem:[%s7044_s2 + $0xf8] sm:$0xff]  ;;  %v1074_v35 = vld [vmem:[%s7044_s2 + $0x330] sm:$0xff] }
  0x35   :  { %v4017_v42 = vcombine.high %v1037_v37, %v1039_v38  ;;  %v4016_v50 = vcombine.low %v1037_v37, %v1039_v38  ;;  %v1073_v37 = vld [vmem:[%s7044_s2 + $0x318] sm:$0xff] }
  0x36   :  { %623 = vmatpush2.bf16.msra.mxu0 %v3958_v43  ;;  %776 = vmatpush2.bf16.msra.mxu1 %v3960_v44  ;;  %v4293_v43 = vld [vmem:[%s7048_s0 + $0x20] ss:$8 sps:$4 sm:$0xff]   ;;  %v1032_v44 = vld [vmem:[%s7044_s2 + $0x90] sm:$0xff]  ;;  %v1075_v38 = vld [vmem:[%s7044_s2 + $0x338] sm:$0xff] }
  0x37   :  { %624 = vmatprep.subr.bf16.mxu0 %v3955_v45  ;;  %777 = vmatprep.subr.bf16.mxu1 %v3957_v46  ;;  %v1034_v45 = vld [vmem:[%s7044_s2 + $0xb0] sm:$0xff] }
  0x38   :  { %v4294_v46 = vld [vmem:[%s7048_s0 + $0x34] ss:$8 sps:$4 sm:$0xff]   ;;  %v4010_v57 = vcombine.low %v1032_v44, %v1034_v45 }
  0x3a   :  { %625 = vmatpush2.bf16.msra.mxu0 %v3954_v51  ;;  %778 = vmatpush2.bf16.msra.mxu1 %v3956_v52  ;;  %v4011_v51 = vcombine.high %v1032_v44, %v1034_v45  ;;  %v4013_v52 = vcombine.high %v1033_v47, %v1035_v48  ;;  %v1070_v44 = vld [vmem:[%s7044_s2 + $0x2f0] sm:$0xff]  ;;  %v1069_v45 = vld [vmem:[%s7044_s2 + $0x2d8] sm:$0xff]  ;;  %v4050_v47 = vcombine.low %v1072_v34, %v1074_v35 }
  0x3b   :  { %626 = vmatprep.subr.bf16.mxu0 %v3951_v53  ;;  %779 = vmatprep.subr.bf16.mxu1 %v3953_v54  ;;  %v1028_v53 = vld [vmem:[%s7044_s2 + $0x50] sm:$0xff]  ;;  %v4052_v48 = vcombine.low %v1073_v37, %v1075_v38 }
  0x3c   :  { %v1030_v54 = vld [vmem:[%s7044_s2 + $0x70] sm:$0xff] }
  0x3e   :  { %627 = vmatpush2.bf16.msra.mxu0 %v3950_v59  ;;  %780 = vmatpush2.bf16.msra.mxu1 %v3952_v60  ;;  %v4007_v59 = vcombine.high %v1028_v53, %v1030_v54  ;;  %v4296_v60 = vld [vmem:[%s7048_s0 + $0x30] ss:$8 sps:$4 sm:$0xff]  }
  0x3f   :  { %628 = vmatprep.subr.bf16.mxu0 %v3947_v61  ;;  %781 = vmatprep.subr.bf16.mxu1 %v3949_v62  ;;  %v4009_v61 = vcombine.high %v1029_v55, %v1031_v56  ;;  %v1024_v62 = vld [vmem:[%s7044_s2 + $0x10] sm:$0xff] }
  0x40   :  { %v4002_v11 = vcombine.low %v1024_v62, %v1026_v63 }
  0x42   :  { %629 = vmatpush2.bf16.msra.mxu0 %v3946_v3  ;;  %782 = vmatpush2.bf16.msra.mxu1 %v3948_v4  ;;  %v4006_v3 = vcombine.low %v1028_v53, %v1030_v54  ;;  %v4008_v4 = vcombine.low %v1029_v55, %v1031_v56  ;;  %v1066_v53 = vld [vmem:[%s7044_s2 + $0x2b0] sm:$0xff]  ;;  %v1065_v55 = vld [vmem:[%s7044_s2 + $0x298] sm:$0xff] }
  0x43   :  { %1528 = vmatprep.subr.bf16.mxu0 %v4031_v6  ;;  %1681 = vmatprep.subr.bf16.mxu1 %v4033_v7  ;;  %v4005_v6 = vcombine.high %v1025_v1, %v1027_v2  ;;  %v1084_v7 = vld [vmem:[%s7044_s2 + $0x3d0] sm:$0xff]  ;;  %v1067_v56 = vld [vmem:[%s7044_s2 + $0x2b8] sm:$0xff] }
  0x44   :  { %v4306_v54 = vld [vmem:[%s7048_s0 + $0x74] ss:$8 sps:$4 sm:$0xff]  }
  0x45   :  { %631 = vmatmul.mubr.bf16.vlgmr.msra.gmra.mxu0 %v4285_v5  ;;  %784 = vmatmul.mubr.bf16.vlgmr.msra.gmra.mxu1 %v4285_v5  ;;  %v4003_v5 = vcombine.high %v1024_v62, %v1026_v63  ;;  %v1062_v62 = vld [vmem:[%s7044_s2 + $0x270] sm:$0xff]  ;;  %v1061_v63 = vld [vmem:[%s7044_s2 + $0x258] sm:$0xff] }
  0x46   :  { %1529 = vmatpush1.bf16.msra.mxu0 %v4030_v12  ;;  %1682 = vmatpush1.bf16.msra.mxu1 %v4032_v16  ;;  %v4004_v12 = vcombine.low %v1025_v1, %v1027_v2  ;;  %v1080_v16 = vld [vmem:[%s7044_s2 + $0x390] sm:$0xff]  ;;  %v4044_v2 = vcombine.low %v1065_v55, %v1067_v56 }
  0x47   :  { %1530 = vmatprep.subr.bf16.mxu0 %v4027_v17  ;;  %1683 = vmatprep.subr.bf16.mxu1 %v4029_v20  ;;  %v1082_v17 = vld [vmem:[%s7044_s2 + $0x3b0] sm:$0xff]  ;;  %v1083_v20 = vld [vmem:[%s7044_s2 + $0x3b8] sm:$0xff] }
  0x48   :  { %640 = vmatprep.mubr.bf16.mxu0 %v4288_v13  ;;  %793 = vmatprep.mubr.bf16.mxu1 %v4288_v13  ;;  %v4063_v13 = vcombine.high %v1084_v7, %v1086_v8  ;;  %v4058_v29 = vcombine.low %v1080_v16, %v1082_v17  ;;  %v4060_v30 = vcombine.low %v1081_v19, %v1083_v20 }
  0x4a   :  { %1531 = vmatpush1.bf16.msra.mxu0 %v4026_v21  ;;  %1684 = vmatpush1.bf16.msra.mxu1 %v4028_v22  ;;  %v4062_v21 = vcombine.low %v1084_v7, %v1086_v8  ;;  %v4064_v22 = vcombine.low %v1085_v9, %v1087_v10  ;;  %v1058_v7 = vld [vmem:[%s7044_s2 + $0x230] sm:$0xff]  ;;  %v4309_v8 = vld [vmem:[%s7048_s0 + $0x84] ss:$8 sps:$4 sm:$0xff]   ;;  %v1057_v9 = vld [vmem:[%s7044_s2 + $0x218] sm:$0xff] }
  0x4b   :  { %1532 = vmatprep.subr.bf16.mxu0 %v4023_v23  ;;  %1685 = vmatprep.subr.bf16.mxu1 %v4025_v24  ;;  %v4059_v23 = vcombine.high %v1080_v16, %v1082_v17  ;;  %v4061_v24 = vcombine.high %v1081_v19, %v1083_v20  ;;  %v1059_v10 = vld [vmem:[%s7044_s2 + $0x238] sm:$0xff]  ;;  %v4311_v17 = vld [vmem:[%s7048_s0 + $0x80] ss:$8 sps:$4 sm:$0xff]   ;;  %v4315_v20 = vld [vmem:[%s7048_s0 + $0xa4] ss:$8 sps:$4 sm:$0xff]  }
  0x4c   :  { %v4036_v16 = vcombine.low %v1057_v9, %v1059_v10  ;;  %v4314_v19 = vld [vmem:[%s7048_s0 + $0x90] ss:$8 sps:$4 sm:$0xff]  }
  0x4d   :  { %641 = vmatmul.mubr.bf16.gmra.mxu0 %v4290_v25  ;;  %794 = vmatmul.mubr.bf16.gmra.mxu1 %v4290_v25  ;;  %v1076_v25 = vld [vmem:[%s7044_s2 + $0x350] sm:$0xff] }
  0x4e   :  { %1533 = vmatpush1.bf16.msra.mxu0 %v4022_v28  ;;  %1686 = vmatpush1.bf16.msra.mxu1 %v4024_v31  ;;  %v1079_v28 = vld [vmem:[%s7044_s2 + $0x378] sm:$0xff]  ;;  %v4055_v31 = vcombine.high %v1076_v25, %v1078_v26 }
  0x4f   :  { %650 = vmatprep.mubr.bf16.mxu0 %v4291_v32  ;;  %803 = vmatprep.mubr.bf16.mxu1 %v4291_v32  ;;  %v4302_v32 = vld [vmem:[%s7048_s0 + $0x50] ss:$8 sps:$4 sm:$0xff]  }
  0x50   :  { %1534 = vmatprep.subr.bf16.mxu0 %v4019_v33  ;;  %1687 = vmatprep.subr.bf16.mxu1 %v4021_v36  ;;  %v4057_v33 = vcombine.high %v1077_v27, %v1079_v28  ;;  %v4303_v36 = vld [vmem:[%s7048_s0 + $0x64] ss:$8 sps:$4 sm:$0xff]  }
  0x52   :  { %1535 = vmatpush1.bf16.msra.mxu0 %v4018_v39  ;;  %1688 = vmatpush1.bf16.msra.mxu1 %v4020_v40  ;;  %v4054_v39 = vcombine.low %v1076_v25, %v1078_v26  ;;  %v4056_v40 = vcombine.low %v1077_v27, %v1079_v28  ;;  %v4321_v25 = vld [vmem:[%s7049_s1] ss:$8 sps:$4 sm:$0xff]   ;;  %v4324_v26 = vld [vmem:[%s7049_s1 + $0x14] ss:$8 sps:$4 sm:$0xff]   ;;  %v4326_v27 = vld [vmem:[%s7049_s1 + $0x10] ss:$8 sps:$4 sm:$0xff]  }
  0x53   :  { %1536 = vmatprep.subr.bf16.mxu0 %v4015_v41  ;;  %1689 = vmatprep.subr.bf16.mxu1 %v4017_v42  ;;  %v4051_v41 = vcombine.high %v1072_v34, %v1074_v35  ;;  %v4053_v42 = vcombine.high %v1073_v37, %v1075_v38  ;;  %v4327_v28 = vld [vmem:[%s7049_s1 + $0x24] ss:$8 sps:$4 sm:$0xff]   ;;  %v4336_v34 = vld [vmem:[%s7049_s1 + $0x54] ss:$8 sps:$4 sm:$0xff]   ;;  %v4338_v35 = vld [vmem:[%s7049_s1 + $0x50] ss:$8 sps:$4 sm:$0xff]  }
  0x54   :  { %v4341_v37 = vld [vmem:[%s7049_s1 + $0x60] ss:$8 sps:$4 sm:$0xff]   ;;  %v4342_v38 = vld [vmem:[%s7049_s1 + $0x74] ss:$8 sps:$4 sm:$0xff]  }
  0x55   :  { %651 = vmatmul.mubr.bf16.gmra.mxu0 %v4293_v43  ;;  %804 = vmatmul.mubr.bf16.gmra.mxu1 %v4293_v43  ;;  %v1068_v43 = vld [vmem:[%s7044_s2 + $0x2d0] sm:$0xff] }
  0x56   :  { %660 = vmatprep.mubr.bf16.mxu0 %v4294_v46  ;;  %813 = vmatprep.mubr.bf16.mxu1 %v4294_v46  ;;  %v1071_v46 = vld [vmem:[%s7044_s2 + $0x2f8] sm:$0xff] }
  0x57   :  { %1537 = vmatpush1.bf16.msra.mxu0 %v4014_v49  ;;  %1690 = vmatpush1.bf16.msra.mxu1 %v4016_v50  ;;  %v4047_v49 = vcombine.high %v1068_v43, %v1070_v44  ;;  %v4305_v50 = vld [vmem:[%s7048_s0 + $0x60] ss:$8 sps:$4 sm:$0xff]  }
  0x58   :  { %1538 = vmatprep.subr.bf16.mxu0 %v4011_v51  ;;  %1691 = vmatprep.subr.bf16.mxu1 %v4013_v52  ;;  %v4049_v51 = vcombine.high %v1069_v45, %v1071_v46  ;;  %v1064_v52 = vld [vmem:[%s7044_s2 + $0x290] sm:$0xff] }
  0x59   :  { %v4042_v1 = vcombine.low %v1064_v52, %v1066_v53 }
  0x5b   :  { %1539 = vmatpush1.bf16.msra.mxu0 %v4010_v57  ;;  %1692 = vmatpush1.bf16.msra.mxu1 %v4012_v58  ;;  %v4046_v57 = vcombine.low %v1068_v43, %v1070_v44  ;;  %v4048_v58 = vcombine.low %v1069_v45, %v1071_v46  ;;  %v4350_v43 = vld [vmem:[%s7049_s1 + $0x90] ss:$8 sps:$4 sm:$0xff]   ;;  %v4351_v44 = vld [vmem:[%s7049_s1 + $0xa4] ss:$8 sps:$4 sm:$0xff]   ;;  %v4353_v45 = vld [vmem:[%s7049_s1 + $0xa0] ss:$8 sps:$4 sm:$0xff]  }
  0x5c   :  { %1540 = vmatprep.subr.bf16.mxu0 %v4007_v59  ;;  %1693 = vmatprep.subr.bf16.mxu1 %v4009_v61  ;;  %v4043_v59 = vcombine.high %v1064_v52, %v1066_v53  ;;  %v1060_v61 = vld [vmem:[%s7044_s2 + $0x250] sm:$0xff] }
  0x5d   :  { %661 = vmatmul.mubr.bf16.gmra.mxu0 %v4296_v60  ;;  %814 = vmatmul.mubr.bf16.gmra.mxu1 %v4296_v60  ;;  %v4045_v60 = vcombine.high %v1065_v55, %v1067_v56  ;;  %v4354_v46 = vld [vmem:[%s7049_s1 + $0xb4] ss:$8 sps:$4 sm:$0xff]  }
  0x5e   :  { %670 = vmatprep.mubr.bf16.mxu0 %v4297_v0  ;;  %823 = vmatprep.mubr.bf16.mxu1 %v4297_v0  ;;  %v1063_v0 = vld [vmem:[%s7044_s2 + $0x278] sm:$0xff] }
  0x5f   :  { %1541 = vmatpush1.bf16.msra.mxu0 %v4006_v3  ;;  %1694 = vmatpush1.bf16.msra.mxu1 %v4008_v4  ;;  %v4039_v3 = vcombine.high %v1060_v61, %v1062_v62  ;;  %v4308_v4 = vld [vmem:[%s7048_s0 + $0x70] ss:$8 sps:$4 sm:$0xff]  }
  0x60   :  { %1542 = vmatprep.subr.bf16.mxu0 %v4003_v5  ;;  %1695 = vmatprep.subr.bf16.mxu1 %v4005_v6  ;;  %v4041_v5 = vcombine.high %v1061_v63, %v1063_v0  ;;  %v1056_v6 = vld [vmem:[%s7044_s2 + $0x210] sm:$0xff] }
  0x63   :  { %1543 = vmatpush1.bf16.msra.mxu0 %v4002_v11  ;;  %1696 = vmatpush1.bf16.msra.mxu1 %v4004_v12  ;;  %v4038_v11 = vcombine.low %v1060_v61, %v1062_v62  ;;  %v4040_v12 = vcombine.low %v1061_v63, %v1063_v0 }
  0x64   :  { %1544 = vmatprep.subr.bf16.mxu0 %v4063_v13  ;;  %1697 = vmatprep.subr.bf16.mxu1 %v4065_v15  ;;  %v4035_v13 = vcombine.high %v1056_v6, %v1058_v7  ;;  %v4034_v15 = vcombine.low %v1056_v6, %v1058_v7 }
  0x65   :  { %671 = vmatmul.mubr.bf16.gmra.mxu0 %v4299_v14  ;;  %824 = vmatmul.mubr.bf16.gmra.mxu1 %v4299_v14  ;;  %v4037_v14 = vcombine.high %v1057_v9, %v1059_v10 }
  0x66   :  { %680 = vmatprep.mubr.bf16.mxu0 %v4300_v18  ;;  %833 = vmatprep.mubr.bf16.mxu1 %v4300_v18  ;;  %v4312_v18 = vld [vmem:[%s7048_s0 + $0x94] ss:$8 sps:$4 sm:$0xff]  }
  0x67   :  { %1545 = vmatpush2.bf16.msra.mxu0 %v4062_v21  ;;  %1698 = vmatpush2.bf16.msra.mxu1 %v4064_v22  ;;  %v4317_v21 = vld [vmem:[%s7048_s0 + $0xa0] ss:$8 sps:$4 sm:$0xff]   ;;  %v4318_v22 = vld [vmem:[%s7048_s0 + $0xb4] ss:$8 sps:$4 sm:$0xff]  }
  0x68   :  { %1546 = vmatprep.subr.bf16.mxu0 %v4059_v23  ;;  %1699 = vmatprep.subr.bf16.mxu1 %v4061_v24  ;;  %v4320_v23 = vld [vmem:[%s7048_s0 + $0xb0] ss:$8 sps:$4 sm:$0xff]   ;;  %v4323_v24 = vld [vmem:[%s7049_s1 + $0x4] ss:$8 sps:$4 sm:$0xff]  }
  0x6b   :  { %1547 = vmatpush2.bf16.msra.mxu0 %v4058_v29  ;;  %1700 = vmatpush2.bf16.msra.mxu1 %v4060_v30  ;;  %v4329_v29 = vld [vmem:[%s7049_s1 + $0x20] ss:$8 sps:$4 sm:$0xff]   ;;  %v4330_v30 = vld [vmem:[%s7049_s1 + $0x34] ss:$8 sps:$4 sm:$0xff]  }
  0x6c   :  { %1548 = vmatprep.subr.bf16.mxu0 %v4055_v31  ;;  %1701 = vmatprep.subr.bf16.mxu1 %v4057_v33  ;;  %v4332_v31 = vld [vmem:[%s7049_s1 + $0x30] ss:$8 sps:$4 sm:$0xff]   ;;  %v4335_v33 = vld [vmem:[%s7049_s1 + $0x40] ss:$8 sps:$4 sm:$0xff]  }
  0x6d   :  { %681 = vmatmul.mubr.bf16.gmra.mxu0 %v4302_v32  ;;  %834 = vmatmul.mubr.bf16.gmra.mxu1 %v4302_v32  ;;  %v4333_v32 = vld [vmem:[%s7049_s1 + $0x44] ss:$8 sps:$4 sm:$0xff]  }
  0x6e   :  { %690 = vmatprep.mubr.bf16.mxu0 %v4303_v36  ;;  %843 = vmatprep.mubr.bf16.mxu1 %v4303_v36  ;;  %v4339_v36 = vld [vmem:[%s7049_s1 + $0x64] ss:$8 sps:$4 sm:$0xff]  }
  0x6f   :  { %1549 = vmatpush2.bf16.msra.mxu0 %v4054_v39  ;;  %1702 = vmatpush2.bf16.msra.mxu1 %v4056_v40  ;;  %v4344_v39 = vld [vmem:[%s7049_s1 + $0x70] ss:$8 sps:$4 sm:$0xff]   ;;  %v4345_v40 = vld [vmem:[%s7049_s1 + $0x84] ss:$8 sps:$4 sm:$0xff]  }
  0x70   :  { %1550 = vmatprep.subr.bf16.mxu0 %v4051_v41  ;;  %1703 = vmatprep.subr.bf16.mxu1 %v4053_v42  ;;  %v4347_v41 = vld [vmem:[%s7049_s1 + $0x80] ss:$8 sps:$4 sm:$0xff]   ;;  %v4348_v42 = vld [vmem:[%s7049_s1 + $0x94] ss:$8 sps:$4 sm:$0xff]  }
  0x73   :  { %1551 = vmatpush2.bf16.msra.mxu0 %v4050_v47  ;;  %1704 = vmatpush2.bf16.msra.mxu1 %v4052_v48  ;;  %v4356_v47 = vld [vmem:[%s7049_s1 + $0xb0] ss:$8 sps:$4 sm:$0xff]  }
  0x74   :  { %1552 = vmatprep.subr.bf16.mxu0 %v4047_v49  ;;  %1705 = vmatprep.subr.bf16.mxu1 %v4049_v51 }
  0x75   :  { %691 = vmatmul.mubr.bf16.gmra.mxu0 %v4305_v50  ;;  %844 = vmatmul.mubr.bf16.gmra.mxu1 %v4305_v50 }
  0x76   :  { %700 = vmatprep.mubr.bf16.mxu0 %v4306_v54  ;;  %853 = vmatprep.mubr.bf16.mxu1 %v4306_v54 }
  0x77   :  { %1553 = vmatpush2.bf16.msra.mxu0 %v4046_v57  ;;  %1706 = vmatpush2.bf16.msra.mxu1 %v4048_v58 }
  0x78   :  { %1554 = vmatprep.subr.bf16.mxu0 %v4043_v59  ;;  %1707 = vmatprep.subr.bf16.mxu1 %v4045_v60 }
  0x7b   :  { %1555 = vmatpush2.bf16.msra.mxu0 %v4042_v1  ;;  %1708 = vmatpush2.bf16.msra.mxu1 %v4044_v2 }
  0x7c   :  { %1556 = vmatprep.subr.bf16.mxu0 %v4039_v3  ;;  %1709 = vmatprep.subr.bf16.mxu1 %v4041_v5 }
  0x7d   :  { %701 = vmatmul.mubr.bf16.gmra.mxu0 %v4308_v4  ;;  %854 = vmatmul.mubr.bf16.gmra.mxu1 %v4308_v4 }
  0x7e   :  { %710 = vmatprep.mubr.bf16.mxu0 %v4309_v8  ;;  %863 = vmatprep.mubr.bf16.mxu1 %v4309_v8 }
  0x7f   :  { %1557 = vmatpush2.bf16.msra.mxu0 %v4038_v11  ;;  %1710 = vmatpush2.bf16.msra.mxu1 %v4040_v12 }
  0x80   :  { %1558 = vmatprep.subr.bf16.mxu0 %v4035_v13  ;;  %1711 = vmatprep.subr.bf16.mxu1 %v4037_v14 }
  0x83   :  { %1559 = vmatpush2.bf16.msra.mxu0 %v4034_v15  ;;  %1712 = vmatpush2.bf16.msra.mxu1 %v4036_v16 }
  0x85   :  { %711 = vmatmul.mubr.bf16.gmra.mxu0 %v4311_v17  ;;  %864 = vmatmul.mubr.bf16.gmra.mxu1 %v4311_v17 }
  0x86   :  { %720 = vmatprep.mubr.bf16.mxu0 %v4312_v18  ;;  %873 = vmatprep.mubr.bf16.mxu1 %v4312_v18 }
  0x8d   :  { %721 = vmatmul.mubr.bf16.gmra.mxu0 %v4314_v19  ;;  %874 = vmatmul.mubr.bf16.gmra.mxu1 %v4314_v19 }
  0x8e   :  { %730 = vmatprep.mubr.bf16.mxu0 %v4315_v20  ;;  %883 = vmatprep.mubr.bf16.mxu1 %v4315_v20 }
  0x95   :  { %731 = vmatmul.mubr.bf16.gmra.mxu0 %v4317_v21  ;;  %884 = vmatmul.mubr.bf16.gmra.mxu1 %v4317_v21 }
  0x96   :  { %740 = vmatprep.mubr.bf16.mxu0 %v4318_v22  ;;  %893 = vmatprep.mubr.bf16.mxu1 %v4318_v22 }
  0x9d   :  { %741 = vmatmul.mubr.bf16.gmra.mxu0 %v4320_v23  ;;  %894 = vmatmul.mubr.bf16.gmra.mxu1 %v4320_v23 }
  0x9e   :  { %1560 = vmatprep.mubr.bf16.mxu0 %v4323_v24  ;;  %1713 = vmatprep.mubr.bf16.mxu1 %v4323_v24 }
  0xa5   :  { %1561 = vmatmul.mubr.bf16.vlgmr.msra.gmra.mxu0 %v4321_v25  ;;  %1714 = vmatmul.mubr.bf16.vlgmr.msra.gmra.mxu1 %v4321_v25 }
  0xa6   :  { %1570 = vmatprep.mubr.bf16.mxu0 %v4324_v26  ;;  %1723 = vmatprep.mubr.bf16.mxu1 %v4324_v26 }
  0xad   :  { %1571 = vmatmul.mubr.bf16.gmra.mxu0 %v4326_v27  ;;  %1724 = vmatmul.mubr.bf16.gmra.mxu1 %v4326_v27 }
  0xae   :  { %1580 = vmatprep.mubr.bf16.mxu0 %v4327_v28  ;;  %1733 = vmatprep.mubr.bf16.mxu1 %v4327_v28 }
  0xb5   :  { %1581 = vmatmul.mubr.bf16.gmra.mxu0 %v4329_v29  ;;  %1734 = vmatmul.mubr.bf16.gmra.mxu1 %v4329_v29 }
  0xb6   :  { %1590 = vmatprep.mubr.bf16.mxu0 %v4330_v30  ;;  %1743 = vmatprep.mubr.bf16.mxu1 %v4330_v30 }
  0xbd   :  { %1591 = vmatmul.mubr.bf16.gmra.mxu0 %v4332_v31  ;;  %1744 = vmatmul.mubr.bf16.gmra.mxu1 %v4332_v31 }
  0xbe   :  { %1600 = vmatprep.mubr.bf16.mxu0 %v4333_v32  ;;  %1753 = vmatprep.mubr.bf16.mxu1 %v4333_v32 }
  0xc5   :  { %1601 = vmatmul.mubr.bf16.gmra.mxu0 %v4335_v33  ;;  %1754 = vmatmul.mubr.bf16.gmra.mxu1 %v4335_v33 }
  0xc6   :  { %1610 = vmatprep.mubr.bf16.mxu0 %v4336_v34  ;;  %1763 = vmatprep.mubr.bf16.mxu1 %v4336_v34 }
  0xcd   :  { %1611 = vmatmul.mubr.bf16.gmra.mxu0 %v4338_v35  ;;  %1764 = vmatmul.mubr.bf16.gmra.mxu1 %v4338_v35 }
  0xce   :  { %1620 = vmatprep.mubr.bf16.mxu0 %v4339_v36  ;;  %1773 = vmatprep.mubr.bf16.mxu1 %v4339_v36 }
  0xd5   :  { %1621 = vmatmul.mubr.bf16.gmra.mxu0 %v4341_v37  ;;  %1774 = vmatmul.mubr.bf16.gmra.mxu1 %v4341_v37 }
  0xd6   :  { %1630 = vmatprep.mubr.bf16.mxu0 %v4342_v38  ;;  %1783 = vmatprep.mubr.bf16.mxu1 %v4342_v38 }
  0xdd   :  { %1631 = vmatmul.mubr.bf16.gmra.mxu0 %v4344_v39  ;;  %1784 = vmatmul.mubr.bf16.gmra.mxu1 %v4344_v39 }
  0xde   :  { %1640 = vmatprep.mubr.bf16.mxu0 %v4345_v40  ;;  %1793 = vmatprep.mubr.bf16.mxu1 %v4345_v40 }
  0xe5   :  { %1641 = vmatmul.mubr.bf16.gmra.mxu0 %v4347_v41  ;;  %1794 = vmatmul.mubr.bf16.gmra.mxu1 %v4347_v41 }
  0xe6   :  { %1650 = vmatprep.mubr.bf16.mxu0 %v4348_v42  ;;  %1803 = vmatprep.mubr.bf16.mxu1 %v4348_v42 }
  0xed   :  { %1651 = vmatmul.mubr.bf16.gmra.mxu0 %v4350_v43  ;;  %1804 = vmatmul.mubr.bf16.gmra.mxu1 %v4350_v43 }
  0xee   :  { %1660 = vmatprep.mubr.bf16.mxu0 %v4351_v44  ;;  %1813 = vmatprep.mubr.bf16.mxu1 %v4351_v44 }
  0xf5   :  { %1661 = vmatmul.mubr.bf16.gmra.mxu0 %v4353_v45  ;;  %1814 = vmatmul.mubr.bf16.gmra.mxu1 %v4353_v45 }
  0xf6   :  { %1670 = vmatprep.mubr.bf16.mxu0 %v4354_v46  ;;  %1823 = vmatprep.mubr.bf16.mxu1 %v4354_v46 }
  0xfd   :  { %1671 = vmatmul.mubr.bf16.gmra.mxu0 %v4356_v47  ;;  %1824 = vmatmul.mubr.bf16.gmra.mxu1 %v4356_v47 }
 0x105   :  { %v632_v48 = vpop.f32.mrf.mxu0  ;;  %v785_v49 = vpop.f32.mrf.mxu1 }
 0x106   :  { %904 = vst [vmem:[#allocation2] sm:$0xff] %v632_v48  ;;  %906 = vst [vmem:[#allocation2 + $0x10] sm:$0xff] %v785_v49  ;;  %v5048_v49 = vld [vmem:[%s7050_s3] sm:$0xff] }
 0x107   :  { %v634_v50 = vpop.f32.mrf.mxu0  ;;  %v787_v51 = vpop.f32.mrf.mxu1  ;;  %7488 = vst [vmem:[#allocation6_spill] sm:$0xff] %v5048_v49 }
 0x108   :  { %905 = vst [vmem:[#allocation2 + $0x8] sm:$0xff] %v634_v50  ;;  %907 = vst [vmem:[#allocation2 + $0x18] sm:$0xff] %v787_v51  ;;  %v5053_v50 = vld [vmem:[%s7050_s3 + $0x8] sm:$0xff]  ;;  %v5058_v51 = vld [vmem:[%s7050_s3 + $0x10] sm:$0xff] }
 0x109   :  { %v636_v52 = vpop.f32.mrf.mxu0  ;;  %v789_v53 = vpop.f32.mrf.mxu1  ;;  %7489 = vst [vmem:[#allocation7_spill] sm:$0xff] %v5053_v50  ;;  %7490 = vst [vmem:[#allocation8_spill] sm:$0xff] %v5058_v51  ;;  %v5368_v51 = vld [vmem:[%s7050_s3 + $0x200] sm:$0xff] }
 0x10a   :  { %908 = vst [vmem:[#allocation2 + $0x20] sm:$0xff] %v636_v52  ;;  %910 = vst [vmem:[#allocation2 + $0x30] sm:$0xff] %v789_v53  ;;  %v5063_v53 = vld [vmem:[%s7050_s3 + $0x18] sm:$0xff] }
 0x10b   :  { %v638_v54 = vpop.f32.mrf.mxu0  ;;  %v791_v55 = vpop.f32.mrf.mxu1  ;;  %7491 = vst [vmem:[#allocation9_spill] sm:$0xff] %v5063_v53  ;;  %v5358_v53 = vld [vmem:[%s7050_s3 + $0x1f0] sm:$0xff]  ;;  %7552 = vst [vmem:[#allocation70_spill] sm:$0xff] %v5368_v51 }
 0x10c   :  { %909 = vst [vmem:[#allocation2 + $0x28] sm:$0xff] %v638_v54  ;;  %911 = vst [vmem:[#allocation2 + $0x38] sm:$0xff] %v791_v55  ;;  %v5068_v54 = vld [vmem:[%s7050_s3 + $0x20] sm:$0xff]  ;;  %v5073_v55 = vld [vmem:[%s7050_s3 + $0x28] sm:$0xff] }
 0x10d   :  { %v642_v56 = vpop.f32.mrf.mxu0  ;;  %v795_v57 = vpop.f32.mrf.mxu1  ;;  %7492 = vst [vmem:[#allocation10_spill] sm:$0xff] %v5068_v54  ;;  %7493 = vst [vmem:[#allocation11_spill] sm:$0xff] %v5073_v55 }
 0x10e   :  { %912 = vst [vmem:[#allocation2 + $0x40] sm:$0xff] %v642_v56  ;;  %914 = vst [vmem:[#allocation2 + $0x50] sm:$0xff] %v795_v57  ;;  %v5078_v57 = vld [vmem:[%s7050_s3 + $0x30] sm:$0xff] }
 0x10f   :  { %v644_v58 = vpop.f32.mrf.mxu0  ;;  %v797_v59 = vpop.f32.mrf.mxu1  ;;  %7494 = vst [vmem:[#allocation12_spill] sm:$0xff] %v5078_v57  ;;  %7550 = vst [vmem:[#allocation68_spill] sm:$0xff] %v5358_v53  ;;  %v5373_v57 = vld [vmem:[%s7050_s3 + $0x208] sm:$0xff] }
 0x110   :  { %913 = vst [vmem:[#allocation2 + $0x48] sm:$0xff] %v644_v58  ;;  %915 = vst [vmem:[#allocation2 + $0x58] sm:$0xff] %v797_v59  ;;  %v5083_v58 = vld [vmem:[%s7050_s3 + $0x38] sm:$0xff]  ;;  %v5088_v59 = vld [vmem:[%s7050_s3 + $0x40] sm:$0xff] }
 0x111   :  { %v646_v60 = vpop.f32.mrf.mxu0  ;;  %v799_v61 = vpop.f32.mrf.mxu1  ;;  %7495 = vst [vmem:[#allocation13_spill] sm:$0xff] %v5083_v58  ;;  %7496 = vst [vmem:[#allocation14_spill] sm:$0xff] %v5088_v59 }
 0x112   :  { %916 = vst [vmem:[#allocation2 + $0x60] sm:$0xff] %v646_v60  ;;  %918 = vst [vmem:[#allocation2 + $0x70] sm:$0xff] %v799_v61  ;;  %v5093_v61 = vld [vmem:[%s7050_s3 + $0x48] sm:$0xff] }
 0x113   :  { %v648_v62 = vpop.f32.mrf.mxu0  ;;  %v801_v63 = vpop.f32.mrf.mxu1  ;;  %7497 = vst [vmem:[#allocation15_spill] sm:$0xff] %v5093_v61  ;;  %7553 = vst [vmem:[#allocation71_spill] sm:$0xff] %v5373_v57 }
 0x114   :  { %917 = vst [vmem:[#allocation2 + $0x68] sm:$0xff] %v648_v62  ;;  %919 = vst [vmem:[#allocation2 + $0x78] sm:$0xff] %v801_v63  ;;  %v5098_v62 = vld [vmem:[%s7050_s3 + $0x50] sm:$0xff]  ;;  %v5103_v63 = vld [vmem:[%s7050_s3 + $0x58] sm:$0xff] }
 0x115   :  { %v652_v0 = vpop.f32.mrf.mxu0  ;;  %v805_v1 = vpop.f32.mrf.mxu1  ;;  %7498 = vst [vmem:[#allocation16_spill] sm:$0xff] %v5098_v62  ;;  %7499 = vst [vmem:[#allocation17_spill] sm:$0xff] %v5103_v63  ;;  %v5388_v62 = vld [vmem:[%s7050_s3 + $0x220] sm:$0xff] }
 0x116   :  { %920 = vst [vmem:[#allocation2 + $0x80] sm:$0xff] %v652_v0  ;;  %922 = vst [vmem:[#allocation2 + $0x90] sm:$0xff] %v805_v1  ;;  %v5108_v1 = vld [vmem:[%s7050_s3 + $0x60] sm:$0xff] }
 0x117   :  { %v654_v2 = vpop.f32.mrf.mxu0  ;;  %v807_v3 = vpop.f32.mrf.mxu1  ;;  %7500 = vst [vmem:[#allocation18_spill] sm:$0xff] %v5108_v1  ;;  %7556 = vst [vmem:[#allocation74_spill] sm:$0xff] %v5388_v62  ;;  %v5673_v62 = vld [vmem:[%s7050_s3 + $0x3e8] sm:$0xff] }
 0x118   :  { %921 = vst [vmem:[#allocation2 + $0x88] sm:$0xff] %v654_v2  ;;  %923 = vst [vmem:[#allocation2 + $0x98] sm:$0xff] %v807_v3  ;;  %v5113_v2 = vld [vmem:[%s7050_s3 + $0x68] sm:$0xff]  ;;  %v5118_v3 = vld [vmem:[%s7050_s3 + $0x70] sm:$0xff] }
 0x119   :  { %v656_v4 = vpop.f32.mrf.mxu0  ;;  %v809_v5 = vpop.f32.mrf.mxu1  ;;  %7501 = vst [vmem:[#allocation19_spill] sm:$0xff] %v5113_v2  ;;  %7502 = vst [vmem:[#allocation20_spill] sm:$0xff] %v5118_v3 }
 0x11a   :  { %924 = vst [vmem:[#allocation2 + $0xa0] sm:$0xff] %v656_v4  ;;  %926 = vst [vmem:[#allocation2 + $0xb0] sm:$0xff] %v809_v5  ;;  %v5123_v5 = vld [vmem:[%s7050_s3 + $0x78] sm:$0xff] }
 0x11b   :  { %v658_v6 = vpop.f32.mrf.mxu0  ;;  %v811_v7 = vpop.f32.mrf.mxu1  ;;  %7503 = vst [vmem:[#allocation21_spill] sm:$0xff] %v5123_v5  ;;  %v5383_v5 = vld [vmem:[%s7050_s3 + $0x218] sm:$0xff]  ;;  %7613 = vst [vmem:[#allocation131_spill] sm:$0xff] %v5673_v62 }
 0x11c   :  { %925 = vst [vmem:[#allocation2 + $0xa8] sm:$0xff] %v658_v6  ;;  %927 = vst [vmem:[#allocation2 + $0xb8] sm:$0xff] %v811_v7  ;;  %v5128_v6 = vld [vmem:[%s7050_s3 + $0x80] sm:$0xff]  ;;  %v5133_v7 = vld [vmem:[%s7050_s3 + $0x88] sm:$0xff] }
 0x11d   :  { %v662_v8 = vpop.f32.mrf.mxu0  ;;  %v815_v9 = vpop.f32.mrf.mxu1  ;;  %7504 = vst [vmem:[#allocation22_spill] sm:$0xff] %v5128_v6  ;;  %7505 = vst [vmem:[#allocation23_spill] sm:$0xff] %v5133_v7 }
 0x11e   :  { %928 = vst [vmem:[#allocation2 + $0xc0] sm:$0xff] %v662_v8  ;;  %930 = vst [vmem:[#allocation2 + $0xd0] sm:$0xff] %v815_v9  ;;  %v5138_v9 = vld [vmem:[%s7050_s3 + $0x90] sm:$0xff] }
 0x11f   :  { %v664_v10 = vpop.f32.mrf.mxu0  ;;  %v817_v11 = vpop.f32.mrf.mxu1  ;;  %7506 = vst [vmem:[#allocation24_spill] sm:$0xff] %v5138_v9  ;;  %7555 = vst [vmem:[#allocation73_spill] sm:$0xff] %v5383_v5  ;;  %v5403_v5 = vld [vmem:[%s7050_s3 + $0x238] sm:$0xff] }
 0x120   :  { %929 = vst [vmem:[#allocation2 + $0xc8] sm:$0xff] %v664_v10  ;;  %931 = vst [vmem:[#allocation2 + $0xd8] sm:$0xff] %v817_v11  ;;  %v5143_v10 = vld [vmem:[%s7050_s3 + $0x98] sm:$0xff]  ;;  %v5148_v11 = vld [vmem:[%s7050_s3 + $0xa0] sm:$0xff] }
 0x121   :  { %v666_v12 = vpop.f32.mrf.mxu0  ;;  %v819_v13 = vpop.f32.mrf.mxu1  ;;  %7507 = vst [vmem:[#allocation25_spill] sm:$0xff] %v5143_v10  ;;  %7508 = vst [vmem:[#allocation26_spill] sm:$0xff] %v5148_v11 }
 0x122   :  { %932 = vst [vmem:[#allocation2 + $0xe0] sm:$0xff] %v666_v12  ;;  %934 = vst [vmem:[#allocation2 + $0xf0] sm:$0xff] %v819_v13  ;;  %v5153_v13 = vld [vmem:[%s7050_s3 + $0xa8] sm:$0xff] }
 0x123   :  { %v668_v14 = vpop.f32.mrf.mxu0  ;;  %v821_v15 = vpop.f32.mrf.mxu1  ;;  %7509 = vst [vmem:[#allocation27_spill] sm:$0xff] %v5153_v13  ;;  %7559 = vst [vmem:[#allocation77_spill] sm:$0xff] %v5403_v5  ;;  %v5428_v5 = vld [vmem:[%s7050_s3 + $0x260] sm:$0xff] }
 0x124   :  { %933 = vst [vmem:[#allocation2 + $0xe8] sm:$0xff] %v668_v14  ;;  %935 = vst [vmem:[#allocation2 + $0xf8] sm:$0xff] %v821_v15  ;;  %v5158_v14 = vld [vmem:[%s7050_s3 + $0xb0] sm:$0xff]  ;;  %v5163_v15 = vld [vmem:[%s7050_s3 + $0xb8] sm:$0xff] }
 0x125   :  { %v672_v16 = vpop.f32.mrf.mxu0  ;;  %v825_v17 = vpop.f32.mrf.mxu1  ;;  %7510 = vst [vmem:[#allocation28_spill] sm:$0xff] %v5158_v14  ;;  %7511 = vst [vmem:[#allocation29_spill] sm:$0xff] %v5163_v15  ;;  %v5413_v15 = vld [vmem:[%s7050_s3 + $0x248] sm:$0xff] }
 0x126   :  { %936 = vst [vmem:[#allocation2 + $0x100] sm:$0xff] %v672_v16  ;;  %938 = vst [vmem:[#allocation2 + $0x110] sm:$0xff] %v825_v17  ;;  %v5168_v17 = vld [vmem:[%s7050_s3 + $0xc0] sm:$0xff]  ;;  %v5433_v14 = vld [vmem:[%s7050_s3 + $0x268] sm:$0xff] }
 0x127   :  { %v674_v18 = vpop.f32.mrf.mxu0  ;;  %v827_v19 = vpop.f32.mrf.mxu1  ;;  %7512 = vst [vmem:[#allocation30_spill] sm:$0xff] %v5168_v17  ;;  %7561 = vst [vmem:[#allocation79_spill] sm:$0xff] %v5413_v15 }
 0x128   :  { %937 = vst [vmem:[#allocation2 + $0x108] sm:$0xff] %v674_v18  ;;  %939 = vst [vmem:[#allocation2 + $0x118] sm:$0xff] %v827_v19  ;;  %v5173_v18 = vld [vmem:[%s7050_s3 + $0xc8] sm:$0xff]  ;;  %v5178_v19 = vld [vmem:[%s7050_s3 + $0xd0] sm:$0xff] }
 0x129   :  { %v676_v20 = vpop.f32.mrf.mxu0  ;;  %v829_v21 = vpop.f32.mrf.mxu1  ;;  %7513 = vst [vmem:[#allocation31_spill] sm:$0xff] %v5173_v18  ;;  %7514 = vst [vmem:[#allocation32_spill] sm:$0xff] %v5178_v19 }
 0x12a   :  { %940 = vst [vmem:[#allocation2 + $0x120] sm:$0xff] %v676_v20  ;;  %942 = vst [vmem:[#allocation2 + $0x130] sm:$0xff] %v829_v21  ;;  %v5183_v21 = vld [vmem:[%s7050_s3 + $0xd8] sm:$0xff] }
 0x12b   :  { %v678_v22 = vpop.f32.mrf.mxu0  ;;  %v831_v23 = vpop.f32.mrf.mxu1  ;;  %7515 = vst [vmem:[#allocation33_spill] sm:$0xff] %v5183_v21  ;;  %7564 = vst [vmem:[#allocation82_spill] sm:$0xff] %v5428_v5 }
 0x12c   :  { %941 = vst [vmem:[#allocation2 + $0x128] sm:$0xff] %v678_v22  ;;  %943 = vst [vmem:[#allocation2 + $0x138] sm:$0xff] %v831_v23  ;;  %v5188_v22 = vld [vmem:[%s7050_s3 + $0xe0] sm:$0xff]  ;;  %v5193_v23 = vld [vmem:[%s7050_s3 + $0xe8] sm:$0xff] }
 0x12d   :  { %v682_v24 = vpop.f32.mrf.mxu0  ;;  %v835_v25 = vpop.f32.mrf.mxu1  ;;  %7516 = vst [vmem:[#allocation34_spill] sm:$0xff] %v5188_v22  ;;  %7517 = vst [vmem:[#allocation35_spill] sm:$0xff] %v5193_v23 }
 0x12e   :  { %944 = vst [vmem:[#allocation2 + $0x140] sm:$0xff] %v682_v24  ;;  %946 = vst [vmem:[#allocation2 + $0x150] sm:$0xff] %v835_v25  ;;  %v5198_v25 = vld [vmem:[%s7050_s3 + $0xf0] sm:$0xff] }
 0x12f   :  { %v684_v26 = vpop.f32.mrf.mxu0  ;;  %v837_v27 = vpop.f32.mrf.mxu1  ;;  %7518 = vst [vmem:[#allocation36_spill] sm:$0xff] %v5198_v25  ;;  %7565 = vst [vmem:[#allocation83_spill] sm:$0xff] %v5433_v14  ;;  %v5473_v25 = vld [vmem:[%s7050_s3 + $0x2a8] sm:$0xff] }
 0x130   :  { %945 = vst [vmem:[#allocation2 + $0x148] sm:$0xff] %v684_v26  ;;  %947 = vst [vmem:[#allocation2 + $0x158] sm:$0xff] %v837_v27  ;;  %v5203_v26 = vld [vmem:[%s7050_s3 + $0xf8] sm:$0xff]  ;;  %v5208_v27 = vld [vmem:[%s7050_s3 + $0x100] sm:$0xff] }
 0x131   :  { %v686_v28 = vpop.f32.mrf.mxu0  ;;  %v839_v29 = vpop.f32.mrf.mxu1  ;;  %7519 = vst [vmem:[#allocation37_spill] sm:$0xff] %v5203_v26  ;;  %7520 = vst [vmem:[#allocation38_spill] sm:$0xff] %v5208_v27 }
 0x132   :  { %948 = vst [vmem:[#allocation2 + $0x160] sm:$0xff] %v686_v28  ;;  %950 = vst [vmem:[#allocation2 + $0x170] sm:$0xff] %v839_v29  ;;  %v5213_v29 = vld [vmem:[%s7050_s3 + $0x108] sm:$0xff] }
 0x133   :  { %v688_v30 = vpop.f32.mrf.mxu0  ;;  %v841_v31 = vpop.f32.mrf.mxu1  ;;  %7521 = vst [vmem:[#allocation39_spill] sm:$0xff] %v5213_v29  ;;  %7573 = vst [vmem:[#allocation91_spill] sm:$0xff] %v5473_v25 }
 0x134   :  { %949 = vst [vmem:[#allocation2 + $0x168] sm:$0xff] %v688_v30  ;;  %951 = vst [vmem:[#allocation2 + $0x178] sm:$0xff] %v841_v31  ;;  %v5218_v30 = vld [vmem:[%s7050_s3 + $0x110] sm:$0xff]  ;;  %v5223_v31 = vld [vmem:[%s7050_s3 + $0x118] sm:$0xff] }
 0x135   :  { %v692_v32 = vpop.f32.mrf.mxu0  ;;  %v845_v33 = vpop.f32.mrf.mxu1  ;;  %7522 = vst [vmem:[#allocation40_spill] sm:$0xff] %v5218_v30  ;;  %7523 = vst [vmem:[#allocation41_spill] sm:$0xff] %v5223_v31 }
 0x136   :  { %952 = vst [vmem:[#allocation2 + $0x180] sm:$0xff] %v692_v32  ;;  %954 = vst [vmem:[#allocation2 + $0x190] sm:$0xff] %v845_v33  ;;  %v5228_v33 = vld [vmem:[%s7050_s3 + $0x120] sm:$0xff] }
 0x137   :  { %v694_v34 = vpop.f32.mrf.mxu0  ;;  %v847_v35 = vpop.f32.mrf.mxu1  ;;  %7524 = vst [vmem:[#allocation42_spill] sm:$0xff] %v5228_v33 }
 0x138   :  { %953 = vst [vmem:[#allocation2 + $0x188] sm:$0xff] %v694_v34  ;;  %955 = vst [vmem:[#allocation2 + $0x198] sm:$0xff] %v847_v35  ;;  %v5233_v34 = vld [vmem:[%s7050_s3 + $0x128] sm:$0xff]  ;;  %v5238_v35 = vld [vmem:[%s7050_s3 + $0x130] sm:$0xff] }
 0x139   :  { %v696_v36 = vpop.f32.mrf.mxu0  ;;  %v849_v37 = vpop.f32.mrf.mxu1  ;;  %7525 = vst [vmem:[#allocation43_spill] sm:$0xff] %v5233_v34  ;;  %7526 = vst [vmem:[#allocation44_spill] sm:$0xff] %v5238_v35 }
 0x13a   :  { %956 = vst [vmem:[#allocation2 + $0x1a0] sm:$0xff] %v696_v36  ;;  %958 = vst [vmem:[#allocation2 + $0x1b0] sm:$0xff] %v849_v37  ;;  %v5243_v37 = vld [vmem:[%s7050_s3 + $0x138] sm:$0xff] }
 0x13b   :  { %v698_v38 = vpop.f32.mrf.mxu0  ;;  %v851_v39 = vpop.f32.mrf.mxu1  ;;  %7527 = vst [vmem:[#allocation45_spill] sm:$0xff] %v5243_v37  ;;  %v5493_v37 = vld [vmem:[%s7050_s3 + $0x2c8] sm:$0xff] }
 0x13c   :  { %957 = vst [vmem:[#allocation2 + $0x1a8] sm:$0xff] %v698_v38  ;;  %959 = vst [vmem:[#allocation2 + $0x1b8] sm:$0xff] %v851_v39  ;;  %v5248_v38 = vld [vmem:[%s7050_s3 + $0x140] sm:$0xff]  ;;  %v5253_v39 = vld [vmem:[%s7050_s3 + $0x148] sm:$0xff] }
 0x13d   :  { %v702_v40 = vpop.f32.mrf.mxu0  ;;  %v855_v41 = vpop.f32.mrf.mxu1  ;;  %7528 = vst [vmem:[#allocation46_spill] sm:$0xff] %v5248_v38  ;;  %7529 = vst [vmem:[#allocation47_spill] sm:$0xff] %v5253_v39 }
 0x13e   :  { %960 = vst [vmem:[#allocation2 + $0x1c0] sm:$0xff] %v702_v40  ;;  %962 = vst [vmem:[#allocation2 + $0x1d0] sm:$0xff] %v855_v41  ;;  %v5258_v41 = vld [vmem:[%s7050_s3 + $0x150] sm:$0xff] }
 0x13f   :  { %v704_v42 = vpop.f32.mrf.mxu0  ;;  %v857_v43 = vpop.f32.mrf.mxu1  ;;  %7530 = vst [vmem:[#allocation48_spill] sm:$0xff] %v5258_v41  ;;  %7577 = vst [vmem:[#allocation95_spill] sm:$0xff] %v5493_v37 }
 0x140   :  { %961 = vst [vmem:[#allocation2 + $0x1c8] sm:$0xff] %v704_v42  ;;  %963 = vst [vmem:[#allocation2 + $0x1d8] sm:$0xff] %v857_v43  ;;  %v5263_v42 = vld [vmem:[%s7050_s3 + $0x158] sm:$0xff]  ;;  %v5268_v43 = vld [vmem:[%s7050_s3 + $0x160] sm:$0xff] }
 0x141   :  { %v706_v44 = vpop.f32.mrf.mxu0  ;;  %v859_v45 = vpop.f32.mrf.mxu1  ;;  %7531 = vst [vmem:[#allocation49_spill] sm:$0xff] %v5263_v42  ;;  %7532 = vst [vmem:[#allocation50_spill] sm:$0xff] %v5268_v43 }
 0x142   :  { %964 = vst [vmem:[#allocation2 + $0x1e0] sm:$0xff] %v706_v44  ;;  %966 = vst [vmem:[#allocation2 + $0x1f0] sm:$0xff] %v859_v45  ;;  %v5273_v45 = vld [vmem:[%s7050_s3 + $0x168] sm:$0xff] }
 0x143   :  { %v708_v46 = vpop.f32.mrf.mxu0  ;;  %v861_v47 = vpop.f32.mrf.mxu1  ;;  %7533 = vst [vmem:[#allocation51_spill] sm:$0xff] %v5273_v45 }
 0x144   :  { %965 = vst [vmem:[#allocation2 + $0x1e8] sm:$0xff] %v708_v46  ;;  %967 = vst [vmem:[#allocation2 + $0x1f8] sm:$0xff] %v861_v47  ;;  %v5278_v46 = vld [vmem:[%s7050_s3 + $0x170] sm:$0xff]  ;;  %v5283_v47 = vld [vmem:[%s7050_s3 + $0x178] sm:$0xff] }
 0x145   :  { %v712_v48 = vpop.f32.mrf.mxu0  ;;  %v865_v52 = vpop.f32.mrf.mxu1  ;;  %7534 = vst [vmem:[#allocation52_spill] sm:$0xff] %v5278_v46  ;;  %7535 = vst [vmem:[#allocation53_spill] sm:$0xff] %v5283_v47  ;;  %v5533_v47 = vld [vmem:[%s7050_s3 + $0x308] sm:$0xff] }
 0x146   :  { %968 = vst [vmem:[#allocation2 + $0x200] sm:$0xff] %v712_v48  ;;  %970 = vst [vmem:[#allocation2 + $0x210] sm:$0xff] %v865_v52  ;;  %v5288_v52 = vld [vmem:[%s7050_s3 + $0x180] sm:$0xff]  ;;  %v5553_v46 = vld [vmem:[%s7050_s3 + $0x328] sm:$0xff] }
 0x147   :  { %v714_v56 = vpop.f32.mrf.mxu0  ;;  %v867_v60 = vpop.f32.mrf.mxu1  ;;  %7536 = vst [vmem:[#allocation54_spill] sm:$0xff] %v5288_v52  ;;  %7585 = vst [vmem:[#allocation103_spill] sm:$0xff] %v5533_v47 }
 0x148   :  { %969 = vst [vmem:[#allocation2 + $0x208] sm:$0xff] %v714_v56  ;;  %971 = vst [vmem:[#allocation2 + $0x218] sm:$0xff] %v867_v60  ;;  %v5293_v56 = vld [vmem:[%s7050_s3 + $0x188] sm:$0xff]  ;;  %v5298_v60 = vld [vmem:[%s7050_s3 + $0x190] sm:$0xff] }
 0x149   :  { %v716_v0 = vpop.f32.mrf.mxu0  ;;  %v869_v4 = vpop.f32.mrf.mxu1  ;;  %7537 = vst [vmem:[#allocation55_spill] sm:$0xff] %v5293_v56  ;;  %7538 = vst [vmem:[#allocation56_spill] sm:$0xff] %v5298_v60 }
 0x14a   :  { %972 = vst [vmem:[#allocation2 + $0x220] sm:$0xff] %v716_v0  ;;  %974 = vst [vmem:[#allocation2 + $0x230] sm:$0xff] %v869_v4  ;;  %v5303_v4 = vld [vmem:[%s7050_s3 + $0x198] sm:$0xff] }
 0x14b   :  { %v718_v8 = vpop.f32.mrf.mxu0  ;;  %v871_v12 = vpop.f32.mrf.mxu1  ;;  %7539 = vst [vmem:[#allocation57_spill] sm:$0xff] %v5303_v4  ;;  %7589 = vst [vmem:[#allocation107_spill] sm:$0xff] %v5553_v46 }
 0x14c   :  { %973 = vst [vmem:[#allocation2 + $0x228] sm:$0xff] %v718_v8  ;;  %975 = vst [vmem:[#allocation2 + $0x238] sm:$0xff] %v871_v12  ;;  %v5308_v8 = vld [vmem:[%s7050_s3 + $0x1a0] sm:$0xff]  ;;  %v5313_v12 = vld [vmem:[%s7050_s3 + $0x1a8] sm:$0xff] }
 0x14d   :  { %v722_v16 = vpop.f32.mrf.mxu0  ;;  %v875_v20 = vpop.f32.mrf.mxu1  ;;  %7540 = vst [vmem:[#allocation58_spill] sm:$0xff] %v5308_v8  ;;  %7541 = vst [vmem:[#allocation59_spill] sm:$0xff] %v5313_v12 }
 0x14e   :  { %976 = vst [vmem:[#allocation2 + $0x240] sm:$0xff] %v722_v16  ;;  %978 = vst [vmem:[#allocation2 + $0x250] sm:$0xff] %v875_v20  ;;  %v5318_v20 = vld [vmem:[%s7050_s3 + $0x1b0] sm:$0xff] }
 0x14f   :  { %v724_v24 = vpop.f32.mrf.mxu0  ;;  %v877_v28 = vpop.f32.mrf.mxu1  ;;  %7542 = vst [vmem:[#allocation60_spill] sm:$0xff] %v5318_v20  ;;  %v5593_v20 = vld [vmem:[%s7050_s3 + $0x368] sm:$0xff] }
 0x150   :  { %977 = vst [vmem:[#allocation2 + $0x248] sm:$0xff] %v724_v24  ;;  %979 = vst [vmem:[#allocation2 + $0x258] sm:$0xff] %v877_v28  ;;  %v5323_v24 = vld [vmem:[%s7050_s3 + $0x1b8] sm:$0xff]  ;;  %v5328_v28 = vld [vmem:[%s7050_s3 + $0x1c0] sm:$0xff] }
 0x151   :  { %v726_v32 = vpop.f32.mrf.mxu0  ;;  %v879_v36 = vpop.f32.mrf.mxu1  ;;  %7543 = vst [vmem:[#allocation61_spill] sm:$0xff] %v5323_v24  ;;  %7544 = vst [vmem:[#allocation62_spill] sm:$0xff] %v5328_v28 }
 0x152   :  { %980 = vst [vmem:[#allocation2 + $0x260] sm:$0xff] %v726_v32  ;;  %982 = vst [vmem:[#allocation2 + $0x270] sm:$0xff] %v879_v36  ;;  %v5333_v36 = vld [vmem:[%s7050_s3 + $0x1c8] sm:$0xff] }
 0x153   :  { %v728_v40 = vpop.f32.mrf.mxu0  ;;  %v881_v44 = vpop.f32.mrf.mxu1  ;;  %7545 = vst [vmem:[#allocation63_spill] sm:$0xff] %v5333_v36  ;;  %7597 = vst [vmem:[#allocation115_spill] sm:$0xff] %v5593_v20 }
 0x154   :  { %981 = vst [vmem:[#allocation2 + $0x268] sm:$0xff] %v728_v40  ;;  %983 = vst [vmem:[#allocation2 + $0x278] sm:$0xff] %v881_v44  ;;  %v5338_v40 = vld [vmem:[%s7050_s3 + $0x1d0] sm:$0xff]  ;;  %v5343_v44 = vld [vmem:[%s7050_s3 + $0x1d8] sm:$0xff] }
 0x155   :  { %v732_v48 = vpop.f32.mrf.mxu0  ;;  %v885_v0 = vpop.f32.mrf.mxu1  ;;  %7546 = vst [vmem:[#allocation64_spill] sm:$0xff] %v5338_v40  ;;  %7547 = vst [vmem:[#allocation65_spill] sm:$0xff] %v5343_v44 }
 0x156   :  { %984 = vst [vmem:[#allocation2 + $0x280] sm:$0xff] %v732_v48  ;;  %986 = vst [vmem:[#allocation2 + $0x290] sm:$0xff] %v885_v0  ;;  %v5348_v0 = vld [vmem:[%s7050_s3 + $0x1e0] sm:$0xff] }
 0x157   :  { %v734_v16 = vpop.f32.mrf.mxu0  ;;  %v887_v32 = vpop.f32.mrf.mxu1  ;;  %7548 = vst [vmem:[#allocation66_spill] sm:$0xff] %v5348_v0 }
 0x158   :  { %985 = vst [vmem:[#allocation2 + $0x288] sm:$0xff] %v734_v16  ;;  %987 = vst [vmem:[#allocation2 + $0x298] sm:$0xff] %v887_v32  ;;  %v5353_v16 = vld [vmem:[%s7050_s3 + $0x1e8] sm:$0xff]  ;;  %v5363_v32 = vld [vmem:[%s7050_s3 + $0x1f8] sm:$0xff] }
 0x159   :  { %v736_v48 = vpop.f32.mrf.mxu0  ;;  %7549 = vst [vmem:[#allocation67_spill] sm:$0xff] %v5353_v16  ;;  %v889_v58 = vpop.f32.mrf.mxu1  ;;  %7551 = vst [vmem:[#allocation69_spill] sm:$0xff] %v5363_v32  ;;  %v5613_v32 = vld [vmem:[%s7050_s3 + $0x388] sm:$0xff] }
 0x15a   :  { %988 = vst [vmem:[#allocation2 + $0x2a0] sm:$0xff] %v736_v48  ;;  %990 = vst [vmem:[#allocation2 + $0x2b0] sm:$0xff] %v889_v58  ;;  %v5378_v48 = vld [vmem:[%s7050_s3 + $0x210] sm:$0xff]  ;;  %v5393_v58 = vld [vmem:[%s7050_s3 + $0x228] sm:$0xff] }
 0x15b   :  { %v738_v63 = vpop.f32.mrf.mxu0  ;;  %7554 = vst [vmem:[#allocation72_spill] sm:$0xff] %v5378_v48  ;;  %v891_v3 = vpop.f32.mrf.mxu1  ;;  %7557 = vst [vmem:[#allocation75_spill] sm:$0xff] %v5393_v58  ;;  %v5398_v48 = vld [vmem:[%s7050_s3 + $0x230] sm:$0xff]  ;;  %v5653_v58 = vld [vmem:[%s7050_s3 + $0x3c8] sm:$0xff] }
 0x15c   :  { %989 = vst [vmem:[#allocation2 + $0x2a8] sm:$0xff] %v738_v63  ;;  %7558 = vst [vmem:[#allocation76_spill] sm:$0xff] %v5398_v48  ;;  %v5408_v63 = vld [vmem:[%s7050_s3 + $0x240] sm:$0xff]  ;;  %v5418_v48 = vld [vmem:[%s7050_s3 + $0x250] sm:$0xff] }
 0x15d   :  { %991 = vst [vmem:[#allocation2 + $0x2b8] sm:$0xff] %v891_v3  ;;  %v742_v10 = vpop.f32.mrf.mxu0  ;;  %7560 = vst [vmem:[#allocation78_spill] sm:$0xff] %v5408_v63  ;;  %v895_v9 = vpop.f32.mrf.mxu1  ;;  %v5423_v3 = vld [vmem:[%s7050_s3 + $0x258] sm:$0xff] }
 0x15e   :  { %7562 = vst [vmem:[#allocation80_spill] sm:$0xff] %v5418_v48  ;;  %992 = vst [vmem:[#allocation2 + $0x2c0] sm:$0xff] %v742_v10  ;;  %v5438_v10 = vld [vmem:[%s7050_s3 + $0x270] sm:$0xff]  ;;  %v5448_v48 = vld [vmem:[%s7050_s3 + $0x280] sm:$0xff] }
 0x15f   :  { %7563 = vst [vmem:[#allocation81_spill] sm:$0xff] %v5423_v3  ;;  %994 = vst [vmem:[#allocation2 + $0x2d0] sm:$0xff] %v895_v9  ;;  %v744_v21 = vpop.f32.mrf.mxu0  ;;  %v5443_v3 = vld [vmem:[%s7050_s3 + $0x278] sm:$0xff]  ;;  %v897_v26 = vpop.f32.mrf.mxu1  ;;  %v5453_v9 = vld [vmem:[%s7050_s3 + $0x288] sm:$0xff] }
 0x160   :  { %7566 = vst [vmem:[#allocation84_spill] sm:$0xff] %v5438_v10  ;;  %7567 = vst [vmem:[#allocation85_spill] sm:$0xff] %v5443_v3  ;;  %v5458_v10 = vld [vmem:[%s7050_s3 + $0x290] sm:$0xff]  ;;  %v5463_v3 = vld [vmem:[%s7050_s3 + $0x298] sm:$0xff] }
 0x161   :  { %7568 = vst [vmem:[#allocation86_spill] sm:$0xff] %v5448_v48  ;;  %993 = vst [vmem:[#allocation2 + $0x2c8] sm:$0xff] %v744_v21  ;;  %v746_v19 = vpop.f32.mrf.mxu0  ;;  %v5468_v21 = vld [vmem:[%s7050_s3 + $0x2a0] sm:$0xff]  ;;  %v899_v31 = vpop.f32.mrf.mxu1 }
 0x162   :  { %7569 = vst [vmem:[#allocation87_spill] sm:$0xff] %v5453_v9  ;;  %7570 = vst [vmem:[#allocation88_spill] sm:$0xff] %v5458_v10  ;;  %v5478_v10 = vld [vmem:[%s7050_s3 + $0x2b0] sm:$0xff] }
 0x163   :  { %7571 = vst [vmem:[#allocation89_spill] sm:$0xff] %v5463_v3  ;;  %995 = vst [vmem:[#allocation2 + $0x2d8] sm:$0xff] %v897_v26  ;;  %v5483_v26 = vld [vmem:[%s7050_s3 + $0x2b8] sm:$0xff]  ;;  %v5488_v3 = vld [vmem:[%s7050_s3 + $0x2c0] sm:$0xff]  ;;  %v748_v30 = vpop.f32.mrf.mxu0  ;;  %v901_v35 = vpop.f32.mrf.mxu1 }
 0x164   :  { %7572 = vst [vmem:[#allocation90_spill] sm:$0xff] %v5468_v21  ;;  %7574 = vst [vmem:[#allocation92_spill] sm:$0xff] %v5478_v10  ;;  %v5508_v10 = vld [vmem:[%s7050_s3 + $0x2e0] sm:$0xff] }
 0x165   :  { %996 = vst [vmem:[#allocation2 + $0x2e0] sm:$0xff] %v746_v19  ;;  %7575 = vst [vmem:[#allocation93_spill] sm:$0xff] %v5483_v26  ;;  %v5498_v19 = vld [vmem:[%s7050_s3 + $0x2d0] sm:$0xff]  ;;  %v5503_v26 = vld [vmem:[%s7050_s3 + $0x2d8] sm:$0xff]  ;;  %v1562_v42 = vpop.f32.mrf.mxu0  ;;  %v1715_v41 = vpop.f32.mrf.mxu1 }
 0x166   :  { %7576 = vst [vmem:[#allocation94_spill] sm:$0xff] %v5488_v3  ;;  %998 = vst [vmem:[#allocation2 + $0x2f0] sm:$0xff] %v899_v31  ;;  %v5513_v31 = vld [vmem:[%s7050_s3 + $0x2e8] sm:$0xff] }
 0x167   :  { %7578 = vst [vmem:[#allocation96_spill] sm:$0xff] %v5498_v19  ;;  %7579 = vst [vmem:[#allocation97_spill] sm:$0xff] %v5503_v26  ;;  %v5518_v19 = vld [vmem:[%s7050_s3 + $0x2f0] sm:$0xff]  ;;  %v5523_v26 = vld [vmem:[%s7050_s3 + $0x2f8] sm:$0xff]  ;;  %v1564_v4 = vpop.f32.mrf.mxu0  ;;  %v1717_v24 = vpop.f32.mrf.mxu1 }
 0x168   :  { %7580 = vst [vmem:[#allocation98_spill] sm:$0xff] %v5508_v10  ;;  %997 = vst [vmem:[#allocation2 + $0x2e8] sm:$0xff] %v748_v30  ;;  %v5528_v30 = vld [vmem:[%s7050_s3 + $0x300] sm:$0xff] }
 0x169   :  { %7581 = vst [vmem:[#allocation99_spill] sm:$0xff] %v5513_v31  ;;  %7582 = vst [vmem:[#allocation100_spill] sm:$0xff] %v5518_v19  ;;  %v5538_v19 = vld [vmem:[%s7050_s3 + $0x310] sm:$0xff]  ;;  %v1566_v60 = vpop.f32.mrf.mxu0  ;;  %v1719_v44 = vpop.f32.mrf.mxu1 }
 0x16a   :  { %7583 = vst [vmem:[#allocation101_spill] sm:$0xff] %v5523_v26  ;;  %999 = vst [vmem:[#allocation2 + $0x2f8] sm:$0xff] %v901_v35  ;;  %v5543_v35 = vld [vmem:[%s7050_s3 + $0x318] sm:$0xff]  ;;  %v5548_v26 = vld [vmem:[%s7050_s3 + $0x320] sm:$0xff] }
 0x16b   :  { %7584 = vst [vmem:[#allocation102_spill] sm:$0xff] %v5528_v30  ;;  %7586 = vst [vmem:[#allocation104_spill] sm:$0xff] %v5538_v19  ;;  %v5568_v19 = vld [vmem:[%s7050_s3 + $0x340] sm:$0xff]  ;;  %v1568_v40 = vpop.f32.mrf.mxu0  ;;  %v1721_v53 = vpop.f32.mrf.mxu1 }
 0x16c   :  { %1834 = vst [vmem:[#allocation3] sm:$0xff] %v1562_v42  ;;  %7587 = vst [vmem:[#allocation105_spill] sm:$0xff] %v5543_v35  ;;  %v5558_v42 = vld [vmem:[%s7050_s3 + $0x330] sm:$0xff]  ;;  %v5563_v35 = vld [vmem:[%s7050_s3 + $0x338] sm:$0xff] }
 0x16d   :  { %7588 = vst [vmem:[#allocation106_spill] sm:$0xff] %v5548_v26  ;;  %1836 = vst [vmem:[#allocation3 + $0x10] sm:$0xff] %v1715_v41  ;;  %v5573_v41 = vld [vmem:[%s7050_s3 + $0x348] sm:$0xff]  ;;  %v1572_v57 = vpop.f32.mrf.mxu0  ;;  %v1725_v51 = vpop.f32.mrf.mxu1 }
 0x16e   :  { %7590 = vst [vmem:[#allocation108_spill] sm:$0xff] %v5558_v42  ;;  %7591 = vst [vmem:[#allocation109_spill] sm:$0xff] %v5563_v35  ;;  %v5578_v42 = vld [vmem:[%s7050_s3 + $0x350] sm:$0xff]  ;;  %v5583_v35 = vld [vmem:[%s7050_s3 + $0x358] sm:$0xff] }
 0x16f   :  { %7592 = vst [vmem:[#allocation110_spill] sm:$0xff] %v5568_v19  ;;  %1835 = vst [vmem:[#allocation3 + $0x8] sm:$0xff] %v1564_v4  ;;  %v5588_v4 = vld [vmem:[%s7050_s3 + $0x360] sm:$0xff]  ;;  %v1574_v15 = vpop.f32.mrf.mxu0  ;;  %v1727_v14 = vpop.f32.mrf.mxu1 }
 0x170   :  { %7593 = vst [vmem:[#allocation111_spill] sm:$0xff] %v5573_v41  ;;  %7594 = vst [vmem:[#allocation112_spill] sm:$0xff] %v5578_v42  ;;  %v5598_v42 = vld [vmem:[%s7050_s3 + $0x370] sm:$0xff] }
 0x171   :  { %7595 = vst [vmem:[#allocation113_spill] sm:$0xff] %v5583_v35  ;;  %1837 = vst [vmem:[#allocation3 + $0x18] sm:$0xff] %v1717_v24  ;;  %v5603_v24 = vld [vmem:[%s7050_s3 + $0x378] sm:$0xff]  ;;  %v5608_v35 = vld [vmem:[%s7050_s3 + $0x380] sm:$0xff]  ;;  %v1576_v63 = vpop.f32.mrf.mxu0 }
 0x172   :  { %7596 = vst [vmem:[#allocation114_spill] sm:$0xff] %v5588_v4  ;;  %7598 = vst [vmem:[#allocation116_spill] sm:$0xff] %v5598_v42  ;;  %v5628_v42 = vld [vmem:[%s7050_s3 + $0x3a0] sm:$0xff] }
 0x173   :  { %1838 = vst [vmem:[#allocation3 + $0x20] sm:$0xff] %v1566_v60  ;;  %7599 = vst [vmem:[#allocation117_spill] sm:$0xff] %v5603_v24  ;;  %v5618_v60 = vld [vmem:[%s7050_s3 + $0x390] sm:$0xff]  ;;  %v5623_v24 = vld [vmem:[%s7050_s3 + $0x398] sm:$0xff]  ;;  %v1578_v5 = vpop.f32.mrf.mxu0 }
 0x174   :  { %7600 = vst [vmem:[#allocation118_spill] sm:$0xff] %v5608_v35  ;;  %7601 = vst [vmem:[#allocation119_spill] sm:$0xff] %v5613_v32 }
 0x175   :  { %1840 = vst [vmem:[#allocation3 + $0x30] sm:$0xff] %v1719_v44  ;;  %7602 = vst [vmem:[#allocation120_spill] sm:$0xff] %v5618_v60  ;;  %v5633_v44 = vld [vmem:[%s7050_s3 + $0x3a8] sm:$0xff]  ;;  %v5638_v60 = vld [vmem:[%s7050_s3 + $0x3b0] sm:$0xff]  ;;  %v1582_v9 = vpop.f32.mrf.mxu0 }
 0x176   :  { %7603 = vst [vmem:[#allocation121_spill] sm:$0xff] %v5623_v24  ;;  %7604 = vst [vmem:[#allocation122_spill] sm:$0xff] %v5628_v42  ;;  %v5643_v24 = vld [vmem:[%s7050_s3 + $0x3b8] sm:$0xff] }
 0x177   :  { %1839 = vst [vmem:[#allocation3 + $0x28] sm:$0xff] %v1568_v40  ;;  %7605 = vst [vmem:[#allocation123_spill] sm:$0xff] %v5633_v44  ;;  %v5648_v40 = vld [vmem:[%s7050_s3 + $0x3c0] sm:$0xff] }
 0x178   :  { %7606 = vst [vmem:[#allocation124_spill] sm:$0xff] %v5638_v60  ;;  %7607 = vst [vmem:[#allocation125_spill] sm:$0xff] %v5643_v24  ;;  %v5658_v60 = vld [vmem:[%s7050_s3 + $0x3d0] sm:$0xff]  ;;  %v5668_v24 = vld [vmem:[%s7050_s3 + $0x3e0] sm:$0xff] }
 0x179   :  { %1841 = vst [vmem:[#allocation3 + $0x38] sm:$0xff] %v1721_v53  ;;  %7608 = vst [vmem:[#allocation126_spill] sm:$0xff] %v5648_v40  ;;  %v5663_v53 = vld [vmem:[%s7050_s3 + $0x3d8] sm:$0xff] }
 0x17a   :  { %7609 = vst [vmem:[#allocation127_spill] sm:$0xff] %v5653_v58  ;;  %7610 = vst [vmem:[#allocation128_spill] sm:$0xff] %v5658_v60  ;;  %v5688_v60 = vld [vmem:[%s7051_s4] sm:$0xf] }
 0x17b   :  { %1842 = vst [vmem:[#allocation3 + $0x40] sm:$0xff] %v1572_v57  ;;  %7611 = vst [vmem:[#allocation129_spill] sm:$0xff] %v5663_v53  ;;  %v5678_v57 = vld [vmem:[%s7050_s3 + $0x3f0] sm:$0xff]  ;;  %v5683_v53 = vld [vmem:[%s7050_s3 + $0x3f8] sm:$0xff]  ;;  %s5703_s3 = smov 0  }
 0x17c   :  { %7612 = vst [vmem:[#allocation130_spill] sm:$0xff] %v5668_v24  ;;  %1844 = vst [vmem:[#allocation3 + $0x50] sm:$0xff] %v1725_v51  ;;  %v5693_v51 = vld [vmem:[%s7051_s4 + $0x4] sm:$0xf] }
 0x17d   :  { %7614 = vst [vmem:[#allocation132_spill] sm:$0xff] %v5678_v57  ;;  %7615 = vst [vmem:[#allocation133_spill] sm:$0xff] %v5683_v53  ;;  %v1729_v57 = vpop.f32.mrf.mxu1 }
 0x17e   :  { %7616 = vst [vmem:[#allocation134_spill] sm:$0xff] %v5688_v60  ;;  %1843 = vst [vmem:[#allocation3 + $0x48] sm:$0xff] %v1574_v15  ;;  %v1584_v15 = vpop.f32.mrf.mxu0 }
 0x17f   :  { %7617 = vst [vmem:[#allocation135_spill] sm:$0xff] %v5693_v51  ;;  %1845 = vst [vmem:[#allocation3 + $0x58] sm:$0xff] %v1727_v14  ;;  %v1731_v53 = vpop.f32.mrf.mxu1 }
 0x180   :  { %1846 = vst [vmem:[#allocation3 + $0x60] sm:$0xff] %v1576_v63  ;;  %1848 = vst [vmem:[#allocation3 + $0x70] sm:$0xff] %v1729_v57  ;;  %v1586_v48 = vpop.f32.mrf.mxu0 }
 0x181   :  { %1847 = vst [vmem:[#allocation3 + $0x68] sm:$0xff] %v1578_v5  ;;  %1849 = vst [vmem:[#allocation3 + $0x78] sm:$0xff] %v1731_v53  ;;  %v1735_v25 = vpop.f32.mrf.mxu1 }
 0x182   :  { %1850 = vst [vmem:[#allocation3 + $0x80] sm:$0xff] %v1582_v9  ;;  %1852 = vst [vmem:[#allocation3 + $0x90] sm:$0xff] %v1735_v25  ;;  %v1588_v14 = vpop.f32.mrf.mxu0 }
 0x183   :  { %1851 = vst [vmem:[#allocation3 + $0x88] sm:$0xff] %v1584_v15  ;;  %v1737_v60 = vpop.f32.mrf.mxu1  ;;  %1854 = vst [vmem:[#allocation3 + $0xa0] sm:$0xff] %v1586_v48 }
 0x184   :  { %1853 = vst [vmem:[#allocation3 + $0x98] sm:$0xff] %v1737_v60  ;;  %1855 = vst [vmem:[#allocation3 + $0xa8] sm:$0xff] %v1588_v14  ;;  %v1592_v57 = vpop.f32.mrf.mxu0 }
 0x185   :  { %v1739_v51 = vpop.f32.mrf.mxu1  ;;  %1858 = vst [vmem:[#allocation3 + $0xc0] sm:$0xff] %v1592_v57 }
 0x186   :  { %1856 = vst [vmem:[#allocation3 + $0xb0] sm:$0xff] %v1739_v51  ;;  %v1594_v53 = vpop.f32.mrf.mxu0 }
 0x187   :  { %v1741_v63 = vpop.f32.mrf.mxu1  ;;  %1859 = vst [vmem:[#allocation3 + $0xc8] sm:$0xff] %v1594_v53 }
 0x188   :  { %1857 = vst [vmem:[#allocation3 + $0xb8] sm:$0xff] %v1741_v63  ;;  %v1596_v25 = vpop.f32.mrf.mxu0 }
 0x189   :  { %v1745_v5 = vpop.f32.mrf.mxu1  ;;  %1862 = vst [vmem:[#allocation3 + $0xe0] sm:$0xff] %v1596_v25 }
 0x18a   :  { %1860 = vst [vmem:[#allocation3 + $0xd0] sm:$0xff] %v1745_v5  ;;  %v1598_v60 = vpop.f32.mrf.mxu0 }
 0x18b   :  { %v1747_v9 = vpop.f32.mrf.mxu1  ;;  %1863 = vst [vmem:[#allocation3 + $0xe8] sm:$0xff] %v1598_v60 }
 0x18c   :  { %1861 = vst [vmem:[#allocation3 + $0xd8] sm:$0xff] %v1747_v9  ;;  %v1602_v51 = vpop.f32.mrf.mxu0 }
 0x18d   :  { %v1749_v15 = vpop.f32.mrf.mxu1  ;;  %1866 = vst [vmem:[#allocation3 + $0x100] sm:$0xff] %v1602_v51 }
 0x18e   :  { %1864 = vst [vmem:[#allocation3 + $0xf0] sm:$0xff] %v1749_v15  ;;  %v1604_v63 = vpop.f32.mrf.mxu0 }
 0x18f   :  { %v1751_v48 = vpop.f32.mrf.mxu1  ;;  %1867 = vst [vmem:[#allocation3 + $0x108] sm:$0xff] %v1604_v63 }
 0x190   :  { %1865 = vst [vmem:[#allocation3 + $0xf8] sm:$0xff] %v1751_v48  ;;  %v1606_v5 = vpop.f32.mrf.mxu0 }
 0x191   :  { %v1755_v14 = vpop.f32.mrf.mxu1  ;;  %1870 = vst [vmem:[#allocation3 + $0x120] sm:$0xff] %v1606_v5 }
 0x192   :  { %1868 = vst [vmem:[#allocation3 + $0x110] sm:$0xff] %v1755_v14  ;;  %v1608_v9 = vpop.f32.mrf.mxu0 }
 0x193   :  { %v1757_v57 = vpop.f32.mrf.mxu1  ;;  %1871 = vst [vmem:[#allocation3 + $0x128] sm:$0xff] %v1608_v9 }
 0x194   :  { %1869 = vst [vmem:[#allocation3 + $0x118] sm:$0xff] %v1757_v57  ;;  %v1612_v15 = vpop.f32.mrf.mxu0 }
 0x195   :  { %v1759_v53 = vpop.f32.mrf.mxu1  ;;  %1874 = vst [vmem:[#allocation3 + $0x140] sm:$0xff] %v1612_v15 }
 0x196   :  { %1872 = vst [vmem:[#allocation3 + $0x130] sm:$0xff] %v1759_v53  ;;  %v1614_v48 = vpop.f32.mrf.mxu0 }
 0x197   :  { %v1761_v25 = vpop.f32.mrf.mxu1  ;;  %1875 = vst [vmem:[#allocation3 + $0x148] sm:$0xff] %v1614_v48 }
 0x198   :  { %1873 = vst [vmem:[#allocation3 + $0x138] sm:$0xff] %v1761_v25  ;;  %v1616_v14 = vpop.f32.mrf.mxu0 }
 0x199   :  { %v1765_v60 = vpop.f32.mrf.mxu1  ;;  %1878 = vst [vmem:[#allocation3 + $0x160] sm:$0xff] %v1616_v14 }
 0x19a   :  { %1876 = vst [vmem:[#allocation3 + $0x150] sm:$0xff] %v1765_v60  ;;  %v1618_v57 = vpop.f32.mrf.mxu0 }
 0x19b   :  { %v1767_v51 = vpop.f32.mrf.mxu1  ;;  %1879 = vst [vmem:[#allocation3 + $0x168] sm:$0xff] %v1618_v57 }
 0x19c   :  { %1877 = vst [vmem:[#allocation3 + $0x158] sm:$0xff] %v1767_v51  ;;  %v1622_v53 = vpop.f32.mrf.mxu0 }
 0x19d   :  { %v1769_v63 = vpop.f32.mrf.mxu1  ;;  %1882 = vst [vmem:[#allocation3 + $0x180] sm:$0xff] %v1622_v53 }
 0x19e   :  { %1880 = vst [vmem:[#allocation3 + $0x170] sm:$0xff] %v1769_v63  ;;  %v1624_v25 = vpop.f32.mrf.mxu0 }
 0x19f   :  { %v1771_v5 = vpop.f32.mrf.mxu1  ;;  %1883 = vst [vmem:[#allocation3 + $0x188] sm:$0xff] %v1624_v25 }
 0x1a0   :  { %1881 = vst [vmem:[#allocation3 + $0x178] sm:$0xff] %v1771_v5  ;;  %v1626_v60 = vpop.f32.mrf.mxu0 }
 0x1a1   :  { %v1775_v9 = vpop.f32.mrf.mxu1  ;;  %1886 = vst [vmem:[#allocation3 + $0x1a0] sm:$0xff] %v1626_v60 }
 0x1a2   :  { %1884 = vst [vmem:[#allocation3 + $0x190] sm:$0xff] %v1775_v9  ;;  %v1628_v51 = vpop.f32.mrf.mxu0 }
 0x1a3   :  { %v1777_v15 = vpop.f32.mrf.mxu1  ;;  %1887 = vst [vmem:[#allocation3 + $0x1a8] sm:$0xff] %v1628_v51 }
 0x1a4   :  { %1885 = vst [vmem:[#allocation3 + $0x198] sm:$0xff] %v1777_v15  ;;  %v1632_v63 = vpop.f32.mrf.mxu0 }
 0x1a5   :  { %v1779_v48 = vpop.f32.mrf.mxu1  ;;  %1890 = vst [vmem:[#allocation3 + $0x1c0] sm:$0xff] %v1632_v63 }
 0x1a6   :  { %1888 = vst [vmem:[#allocation3 + $0x1b0] sm:$0xff] %v1779_v48  ;;  %v1634_v5 = vpop.f32.mrf.mxu0 }
 0x1a7   :  { %v1781_v14 = vpop.f32.mrf.mxu1  ;;  %1891 = vst [vmem:[#allocation3 + $0x1c8] sm:$0xff] %v1634_v5 }
 0x1a8   :  { %1889 = vst [vmem:[#allocation3 + $0x1b8] sm:$0xff] %v1781_v14  ;;  %v1636_v9 = vpop.f32.mrf.mxu0 }
 0x1a9   :  { %v1785_v57 = vpop.f32.mrf.mxu1  ;;  %1894 = vst [vmem:[#allocation3 + $0x1e0] sm:$0xff] %v1636_v9 }
 0x1aa   :  { %1892 = vst [vmem:[#allocation3 + $0x1d0] sm:$0xff] %v1785_v57  ;;  %v1638_v15 = vpop.f32.mrf.mxu0 }
 0x1ab   :  { %v1787_v53 = vpop.f32.mrf.mxu1  ;;  %1895 = vst [vmem:[#allocation3 + $0x1e8] sm:$0xff] %v1638_v15 }
 0x1ac   :  { %1893 = vst [vmem:[#allocation3 + $0x1d8] sm:$0xff] %v1787_v53  ;;  %v1642_v48 = vpop.f32.mrf.mxu0 }
 0x1ad   :  { %v1789_v25 = vpop.f32.mrf.mxu1  ;;  %1898 = vst [vmem:[#allocation3 + $0x200] sm:$0xff] %v1642_v48 }
 0x1ae   :  { %1896 = vst [vmem:[#allocation3 + $0x1f0] sm:$0xff] %v1789_v25  ;;  %v1644_v14 = vpop.f32.mrf.mxu0 }
 0x1af   :  { %v1791_v60 = vpop.f32.mrf.mxu1  ;;  %1899 = vst [vmem:[#allocation3 + $0x208] sm:$0xff] %v1644_v14 }
 0x1b0   :  { %1897 = vst [vmem:[#allocation3 + $0x1f8] sm:$0xff] %v1791_v60  ;;  %v1646_v57 = vpop.f32.mrf.mxu0 }
 0x1b1   :  { %v1795_v51 = vpop.f32.mrf.mxu1  ;;  %1902 = vst [vmem:[#allocation3 + $0x220] sm:$0xff] %v1646_v57 }
 0x1b2   :  { %1900 = vst [vmem:[#allocation3 + $0x210] sm:$0xff] %v1795_v51  ;;  %v1648_v53 = vpop.f32.mrf.mxu0 }
 0x1b3   :  { %v1797_v63 = vpop.f32.mrf.mxu1  ;;  %1903 = vst [vmem:[#allocation3 + $0x228] sm:$0xff] %v1648_v53 }
 0x1b4   :  { %1901 = vst [vmem:[#allocation3 + $0x218] sm:$0xff] %v1797_v63  ;;  %v1652_v25 = vpop.f32.mrf.mxu0 }
 0x1b5   :  { %v1799_v5 = vpop.f32.mrf.mxu1  ;;  %1906 = vst [vmem:[#allocation3 + $0x240] sm:$0xff] %v1652_v25 }
 0x1b6   :  { %1904 = vst [vmem:[#allocation3 + $0x230] sm:$0xff] %v1799_v5  ;;  %v1654_v60 = vpop.f32.mrf.mxu0 }
 0x1b7   :  { %v1801_v9 = vpop.f32.mrf.mxu1  ;;  %1907 = vst [vmem:[#allocation3 + $0x248] sm:$0xff] %v1654_v60 }
 0x1b8   :  { %1905 = vst [vmem:[#allocation3 + $0x238] sm:$0xff] %v1801_v9  ;;  %v1656_v51 = vpop.f32.mrf.mxu0 }
 0x1b9   :  { %v1805_v15 = vpop.f32.mrf.mxu1  ;;  %1910 = vst [vmem:[#allocation3 + $0x260] sm:$0xff] %v1656_v51 }
 0x1ba   :  { %1908 = vst [vmem:[#allocation3 + $0x250] sm:$0xff] %v1805_v15  ;;  %v1658_v63 = vpop.f32.mrf.mxu0 }
 0x1bb   :  { %v1807_v48 = vpop.f32.mrf.mxu1  ;;  %1911 = vst [vmem:[#allocation3 + $0x268] sm:$0xff] %v1658_v63 }
 0x1bc   :  { %1909 = vst [vmem:[#allocation3 + $0x258] sm:$0xff] %v1807_v48  ;;  %v1662_v5 = vpop.f32.mrf.mxu0 }
 0x1bd   :  { %v1809_v14 = vpop.f32.mrf.mxu1  ;;  %1914 = vst [vmem:[#allocation3 + $0x280] sm:$0xff] %v1662_v5 }
 0x1be   :  { %1912 = vst [vmem:[#allocation3 + $0x270] sm:$0xff] %v1809_v14  ;;  %v1664_v9 = vpop.f32.mrf.mxu0 }
 0x1bf   :  { %v1811_v57 = vpop.f32.mrf.mxu1  ;;  %1915 = vst [vmem:[#allocation3 + $0x288] sm:$0xff] %v1664_v9 }
 0x1c0   :  { %1913 = vst [vmem:[#allocation3 + $0x278] sm:$0xff] %v1811_v57  ;;  %v1666_v15 = vpop.f32.mrf.mxu0 }
 0x1c1   :  { %v1815_v53 = vpop.f32.mrf.mxu1  ;;  %1918 = vst [vmem:[#allocation3 + $0x2a0] sm:$0xff] %v1666_v15 }
 0x1c2   :  { %1916 = vst [vmem:[#allocation3 + $0x290] sm:$0xff] %v1815_v53  ;;  %v1668_v48 = vpop.f32.mrf.mxu0 }
 0x1c3   :  { %v1817_v25 = vpop.f32.mrf.mxu1  ;;  %1919 = vst [vmem:[#allocation3 + $0x2a8] sm:$0xff] %v1668_v48  ;;  %v5697_v48 = vmov 0.0  }
 0x1c4   :  { %1917 = vst [vmem:[#allocation3 + $0x298] sm:$0xff] %v1817_v25  ;;  %v1672_v14 = vpop.f32.mrf.mxu0 }
 0x1c5   :  { %v1819_v60 = vpop.f32.mrf.mxu1  ;;  %1922 = vst [vmem:[#allocation3 + $0x2c0] sm:$0xff] %v1672_v14  ;;  %v5701_v14 = vmov 0.0  }
 0x1c6   :  { %1920 = vst [vmem:[#allocation3 + $0x2b0] sm:$0xff] %v1819_v60  ;;  %v1674_v57 = vpop.f32.mrf.mxu0  ;;  %v5695_v60 = vmov 0.0  }
 0x1c7   :  { %v1821_v51 = vpop.f32.mrf.mxu1  ;;  %1923 = vst [vmem:[#allocation3 + $0x2c8] sm:$0xff] %v1674_v57 }
 0x1c8   :  { %1921 = vst [vmem:[#allocation3 + $0x2b8] sm:$0xff] %v1821_v51  ;;  %v1676_v53 = vpop.f32.mrf.mxu0  ;;  %v5699_v51 = vmov 0.0  }
 0x1c9   :  { %v1825_v63 = vpop.f32.mrf.mxu1  ;;  %1926 = vst [vmem:[#allocation3 + $0x2e0] sm:$0xff] %v1676_v53 }
 0x1ca   :  { %1924 = vst [vmem:[#allocation3 + $0x2d0] sm:$0xff] %v1825_v63  ;;  %v1678_v25 = vpop.f32.mrf.mxu0 }
 0x1cb   :  { %v1827_v5 = vpop.f32.mrf.mxu1  ;;  %1927 = vst [vmem:[#allocation3 + $0x2e8] sm:$0xff] %v1678_v25 }
 0x1cc   :  { %1925 = vst [vmem:[#allocation3 + $0x2d8] sm:$0xff] %v1827_v5 }
 0x1cd   :  { %v1829_v9 = vpop.f32.mrf.mxu1 }
 0x1ce   :  { %1928 = vst [vmem:[#allocation3 + $0x2f0] sm:$0xff] %v1829_v9 }
 0x1cf   :  { %v1831_v15 = vpop.f32.mrf.mxu1 }
 0x1d0   :  { %1929 = vst [vmem:[#allocation3 + $0x2f8] sm:$0xff] %v1831_v15 }
 0x1d1 LB: > { %v7618_v21 = vld [vmem:[#allocation90_spill] sm:$0xff]  ;;  %v7619_v37 = vld [vmem:[#allocation95_spill] sm:$0xff]  ;;  %7671 = vst [vmem:[#allocation136_spill] sm:$0xff] %v4459_v60  ;;  %7672 = vst [vmem:[#allocation137_spill] sm:$0xff] %v4463_v48  ;;  %s6443_s4 = sshll.u32 %s4475_s3, 5  ;;  %s6478_s28 = sshll.u32 %s4475_s3, 2  ;;  %v4467_v51 = vphi %v5699_v51, %v6993_v51   ;;  %v4463_v48 = vphi %v5697_v48, %v8157_v48   ;;  %v4459_v60 = vphi %v5695_v60, %v8156_v60   ;;  %s4475_s3 = sphi %s5703_s3, %s2070_s3   ;;  %v4471_v14 = vphi %v5701_v14, %v8158_v14  }
 0x1d2   : > { %v7620_v31 = vld [vmem:[#allocation99_spill] sm:$0xff]  ;;  %v7621_v10 = vld [vmem:[#allocation98_spill] sm:$0xff]  ;;  %7673 = vst [vmem:[#allocation138_spill] sm:$0xff] %v4467_v51  ;;  %7674 = vst [vmem:[#allocation139_spill] sm:$0xff] %v4471_v14  ;;  %s2885_s1 = sshra.s32 %s6443_s4, 3  ;;  %p2998_p0 = scmp.lt.s32.totalorder %s6478_s28, 23 }
 0x1d3   : > { %v7622_v3 = vld [vmem:[#allocation94_spill] sm:$0xff]  ;;  %v7623_v47 = vld [vmem:[#allocation103_spill] sm:$0xff]  ;;  %s4227_s26 = sshll.u32 %s2885_s1, 5  ;;  %s4201_s30 = sshll.u32 %s2885_s1, 2 }
 0x1d4   : > { %v7624_v46 = vld [vmem:[#allocation107_spill] sm:$0xff]  ;;  %v7625_v30 = vld [vmem:[#allocation102_spill] sm:$0xff]  ;;  %s2889_s27 = scalar_lea.vmem [#allocation2], %s4227_s26  ;;  %s3012_s10 = scalar_lea.vmem %s7045_s5, %s4201_s30 }
 0x1d5   : > { %v7626_v26 = vld [vmem:[#allocation106_spill] sm:$0xff]  ;;  %v7627_v41 = vld [vmem:[#allocation111_spill] sm:$0xff]  ;;  %s3000_s29 = scalar_select %p2998_p0, 1, 0 }
 0x1d6   : > { %v7628_v20 = vld [vmem:[#allocation115_spill] sm:$0xff]  ;;  %v7629_v19 = vld [vmem:[#allocation110_spill] sm:$0xff]  ;;  %s2883_s0 = ssub.s32 23, %s6478_s28  ;;  %p2999_p1 = scmp.ge.s32.totalorder %s6478_s28, 1 }
 0x1d7   : > { %v7630_v4 = vld [vmem:[#allocation114_spill] sm:$0xff]  ;;  %v7631_v44 = vld [vmem:[#allocation123_spill] sm:$0xff]  ;;  %s6499_s11 = sshll.u32 %s2883_s0, 3  ;;  %s4230_s19 = sadd.s32 8, %s6443_s4 }
 0x1d8   : > { %v7632_v42 = vld [vmem:[#allocation122_spill] sm:$0xff]  ;;  %v7634_v32 = vld [vmem:[#allocation119_spill] sm:$0xff]  ;;  %s2923_s12 = sshra.s32 %s6499_s11, 3  ;;  %s6677_s20 = sshra.s32 %s4230_s19, 3 }
 0x1d9   : > { %v7633_v35 = vld [vmem:[#allocation118_spill] sm:$0xff]  ;;  %v7635_v62 = vld [vmem:[#allocation131_spill] sm:$0xff]  ;;  %s4228_s13 = sshll.u32 %s2923_s12, 5  ;;  %s4202_s16 = sshll.u32 %s2923_s12, 2 }
 0x1da   : > { %v7636_v58 = vld [vmem:[#allocation127_spill] sm:$0xff]  ;;  %v7637_v40 = vld [vmem:[#allocation126_spill] sm:$0xff]  ;;  %s2927_s14 = scalar_lea.vmem [#allocation3], %s4228_s13  ;;  %s3016_s18 = scalar_lea.vmem %s7046_s6, %s4202_s16 }
 0x1db   : > { %v7638_v24 = vld [vmem:[#allocation130_spill] sm:$0xff]  ;;  %v7639_v55 = vld [vmem:[#allocation11_spill] sm:$0xff]  ;;  %s3005_s15 = scalar_select %p2999_p1, 1, 0 }
 0x1dc   : > { %v7640_v54 = vld [vmem:[#allocation10_spill] sm:$0xff]  ;;  %v7641_v50 = vld [vmem:[#allocation7_spill] sm:$0xff]  ;;  %s4231_s21 = sshll.u32 %s6677_s20, 5  ;;  %s3018_s23 = sadd.s32 1, %s6478_s28 }
 0x1dd   : > { %v7642_v49 = vld [vmem:[#allocation6_spill] sm:$0xff]  ;;  %v7643_v61 = vld [vmem:[#allocation15_spill] sm:$0xff]  ;;  %s3190_s22 = scalar_lea.vmem [#allocation2], %s4231_s21  ;;  %p3257_p2 = scmp.lt.s32.totalorder %s3018_s23, 23 }
 0x1de   : > { %v7644_v59 = vld [vmem:[#allocation14_spill] sm:$0xff]  ;;  %v7645_v2 = vld [vmem:[#allocation19_spill] sm:$0xff]  ;;  %s4209_s25 = sshll.u32 %s6677_s20, 2  ;;  %p3258_p3 = scmp.ge.s32.totalorder %s3018_s23, 1 }
 0x1df   : > { %v7646_v1 = vld [vmem:[#allocation18_spill] sm:$0xff]  ;;  %v7647_v13 = vld [vmem:[#allocation27_spill] sm:$0xff]  ;;  %s3259_s24 = scalar_select %p3257_p2, 1, 0 }
 0x1e0   : > { %v7648_v11 = vld [vmem:[#allocation26_spill] sm:$0xff]  ;;  %v7649_v7 = vld [vmem:[#allocation23_spill] sm:$0xff]  ;;  %s3264_s0 = scalar_select %p3258_p3, 1, 0 }
 0x1e1   : > { %v7650_v6 = vld [vmem:[#allocation22_spill] sm:$0xff]  ;;  %v7651_v56 = vld [vmem:[#allocation55_spill] sm:$0xff]  ;;  %s2070_s3 = sadd.s32 1, %s4475_s3  }
 0x1e2   : > { %v7652_v23 = vld [vmem:[#allocation35_spill] sm:$0xff]  ;;  %v7653_v22 = vld [vmem:[#allocation34_spill] sm:$0xff]  ;;  %p2067_p8 = scmp.ge.s32.totalorder %s2070_s3, 6  }
 0x1e3   : > { %v7654_v18 = vld [vmem:[#allocation31_spill] sm:$0xff]  ;;  %v7655_v17 = vld [vmem:[#allocation30_spill] sm:$0xff] }
 0x1e4   : > { %v7656_v34 = vld [vmem:[#allocation43_spill] sm:$0xff]  ;;  %v7657_v33 = vld [vmem:[#allocation42_spill] sm:$0xff] }
 0x1e5   : > { %v7658_v29 = vld [vmem:[#allocation39_spill] sm:$0xff]  ;;  %v7659_v27 = vld [vmem:[#allocation38_spill] sm:$0xff] }
 0x1e6   : > { %v7660_v45 = vld [vmem:[#allocation51_spill] sm:$0xff]  ;;  %v7661_v43 = vld [vmem:[#allocation50_spill] sm:$0xff] }
 0x1e7   : > { %v7662_v39 = vld [vmem:[#allocation47_spill] sm:$0xff]  ;;  %v7663_v38 = vld [vmem:[#allocation46_spill] sm:$0xff] }
 0x1e8   : > { %v7664_v52 = vld [vmem:[#allocation54_spill] sm:$0xff]  ;;  %v7665_v36 = vld [vmem:[#allocation63_spill] sm:$0xff] }
 0x1e9   : > { %v7666_v12 = vld [vmem:[#allocation59_spill] sm:$0xff]  ;;  %v7667_v8 = vld [vmem:[#allocation58_spill] sm:$0xff] }
 0x1ea   : > { %v7668_v28 = vld [vmem:[#allocation62_spill] sm:$0xff]  ;;  %v7669_v16 = vld [vmem:[#allocation67_spill] sm:$0xff]  ;;  %v5738_v9 = vcombine.high %v7664_v52, %v7667_v8  ;;  %v5742_v25 = vcombine.high %v7651_v56, %v7666_v12  ;;  %v5750_v15 = vcombine.low %v7664_v52, %v7667_v8  ;;  %v5770_v8 = vcombine.low %v7663_v38, %v7661_v43 }
 0x1eb   : > { %v7670_v0 = vld [vmem:[#allocation66_spill] sm:$0xff]  ;;  %v5730_v5 = vcombine.high %v7665_v36, %v7669_v16  ;;  %v5734_v53 = vcombine.low %v7665_v36, %v7669_v16  ;;  %v5760_v16 = vcombine.high %v7663_v38, %v7661_v43  ;;  %v5780_v36 = vcombine.high %v7659_v27, %v7657_v33  ;;  %v7722_v60 = vld [vmem:[#allocation87_spill] sm:$0xff] }
 0x1ec   : > { %v5722_v63 = vcombine.high %v7668_v28, %v7670_v0  ;;  %v5726_v57 = vcombine.low %v7668_v28, %v7670_v0  ;;  %v5754_v0 = vcombine.low %v7651_v56, %v7666_v12  ;;  %v5764_v28 = vcombine.high %v7662_v39, %v7660_v45  ;;  %7676 = vst [vmem:[#allocation141_spill] sm:$0xff] %v5770_v8 }
 0x1ed   : > { %2759 = vmatprep.subr.bf16.mxu1 %v5730_v5  ;;  %v5774_v12 = vcombine.low %v7662_v39, %v7660_v45  ;;  %7678 = vst [vmem:[#allocation143_spill] sm:$0xff] %v5780_v36  ;;  %v5784_v52 = vcombine.high %v7658_v29, %v7656_v34  ;;  %v5790_v38 = vcombine.low %v7659_v27, %v7657_v33 }
 0x1ee   : > { %2718 = vmatprep.subr.bf16.mxu0 %v5722_v63  ;;  %2760 = vmatpush1.bf16.msra.mxu1 %v5734_v53  ;;  %7675 = vst [vmem:[#allocation140_spill] sm:$0xff] %v5764_v28  ;;  %v5794_v39 = vcombine.low %v7658_v29, %v7656_v34  ;;  %v5800_v43 = vcombine.high %v7655_v17, %v7653_v22 }
 0x1ef   : > { %2719 = vmatpush1.bf16.msra.mxu0 %v5726_v57  ;;  %2761 = vmatprep.subr.bf16.mxu1 %v5742_v25  ;;  %7677 = vst [vmem:[#allocation142_spill] sm:$0xff] %v5774_v12  ;;  %7679 = vst [vmem:[#allocation144_spill] sm:$0xff] %v5784_v52  ;;  %v5804_v45 = vcombine.high %v7654_v18, %v7652_v23  ;;  %v5810_v27 = vcombine.low %v7655_v17, %v7653_v22 }
 0x1f0   : > { %2720 = vmatprep.subr.bf16.mxu0 %v5738_v9  ;;  %7680 = vst [vmem:[#allocation145_spill] sm:$0xff] %v5790_v38  ;;  %7681 = vst [vmem:[#allocation146_spill] sm:$0xff] %v5794_v39  ;;  %v5814_v29 = vcombine.low %v7654_v18, %v7652_v23  ;;  %v5820_v33 = vcombine.high %v7650_v6, %v7648_v11  ;;  %v5824_v34 = vcombine.high %v7649_v7, %v7647_v13 }
 0x1f1   : > { %7682 = vst [vmem:[#allocation147_spill] sm:$0xff] %v5800_v43  ;;  %7683 = vst [vmem:[#allocation148_spill] sm:$0xff] %v5804_v45  ;;  %v5828_v17 = vpack.c.bf16 %v4463_v48, %v4463_v48  ;;  %v5834_v18 = vcombine.low %v7650_v6, %v7648_v11  ;;  %v5838_v22 = vcombine.low %v7649_v7, %v7647_v13  ;;  %v7720_v48 = vld [vmem:[#allocation91_spill] sm:$0xff] }
 0x1f2   : > { %2762 = vmatpush1.bf16.msra.mxu1 %v5754_v0  ;;  %7684 = vst [vmem:[#allocation149_spill] sm:$0xff] %v5810_v27  ;;  %7685 = vst [vmem:[#allocation150_spill] sm:$0xff] %v5814_v29  ;;  %v5844_v23 = vcombine.high %v7644_v59, %v7646_v1  ;;  %v5848_v56 = vcombine.high %v7643_v61, %v7645_v2  ;;  %v5856_v6 = vcombine.low %v7644_v59, %v7646_v1 }
 0x1f3   : > { %2721 = vmatpush1.bf16.msra.mxu0 %v5750_v15  ;;  %2763 = vmatprep.subr.bf16.mxu1 %v5764_v28  ;;  %7686 = vst [vmem:[#allocation151_spill] sm:$0xff] %v5820_v33  ;;  %7687 = vst [vmem:[#allocation152_spill] sm:$0xff] %v5824_v34  ;;  %v5860_v7 = vcombine.low %v7643_v61, %v7645_v2  ;;  %v5866_v11 = vcombine.high %v7642_v49, %v7640_v54 }
 0x1f4   : > { %2722 = vmatprep.subr.bf16.mxu0 %v5760_v16  ;;  %7688 = vst [vmem:[#allocation153_spill] sm:$0xff] %v5834_v18  ;;  %7689 = vst [vmem:[#allocation154_spill] sm:$0xff] %v5838_v22  ;;  %2750 = vmatprep.mubr.bf16.mxu0 %v5828_v17  ;;  %v5870_v13 = vcombine.high %v7641_v50, %v7639_v55  ;;  %v5876_v1 = vcombine.low %v7642_v49, %v7640_v54 }
 0x1f5   : > { %7690 = vst [vmem:[#allocation155_spill] sm:$0xff] %v5844_v23  ;;  %7691 = vst [vmem:[#allocation156_spill] sm:$0xff] %v5848_v56  ;;  %2791 = vmatprep.mubr.bf16.mxu1 %v5828_v17  ;;  %v5880_v2 = vcombine.low %v7641_v50, %v7639_v55  ;;  %v5886_v59 = vcombine.high %v7637_v40, %v7638_v24  ;;  %v5890_v61 = vcombine.high %v7636_v58, %v7635_v62 }
 0x1f6   : > { %2764 = vmatpush1.bf16.msra.mxu1 %v5774_v12  ;;  %7692 = vst [vmem:[#allocation157_spill] sm:$0xff] %v5856_v6  ;;  %7693 = vst [vmem:[#allocation158_spill] sm:$0xff] %v5860_v7  ;;  %v5896_v49 = vcombine.low %v7637_v40, %v7638_v24  ;;  %v5900_v50 = vcombine.low %v7636_v58, %v7635_v62  ;;  %v5906_v54 = vcombine.high %v7633_v35, %v7632_v42 }
 0x1f7   : > { %2723 = vmatpush1.bf16.msra.mxu0 %v5770_v8  ;;  %2765 = vmatprep.subr.bf16.mxu1 %v5784_v52  ;;  %7694 = vst [vmem:[#allocation159_spill] sm:$0xff] %v5866_v11  ;;  %7695 = vst [vmem:[#allocation160_spill] sm:$0xff] %v5870_v13  ;;  %v5910_v55 = vcombine.high %v7634_v32, %v7631_v44  ;;  %v5916_v24 = vcombine.low %v7633_v35, %v7632_v42 }
 0x1f8   : > { %2724 = vmatprep.subr.bf16.mxu0 %v5780_v36  ;;  %7696 = vst [vmem:[#allocation161_spill] sm:$0xff] %v5876_v1  ;;  %7697 = vst [vmem:[#allocation162_spill] sm:$0xff] %v5880_v2  ;;  %v5920_v40 = vcombine.low %v7634_v32, %v7631_v44  ;;  %v5926_v58 = vcombine.high %v7629_v19, %v7630_v4  ;;  %v5930_v62 = vcombine.high %v7627_v41, %v7628_v20 }
 0x1f9   : > { %7698 = vst [vmem:[#allocation163_spill] sm:$0xff] %v5886_v59  ;;  %7699 = vst [vmem:[#allocation164_spill] sm:$0xff] %v5890_v61  ;;  %v5936_v32 = vcombine.low %v7629_v19, %v7630_v4  ;;  %v5940_v35 = vcombine.low %v7627_v41, %v7628_v20  ;;  %v5946_v42 = vcombine.high %v7625_v30, %v7626_v26 }
 0x1fa   : > { %2766 = vmatpush1.bf16.msra.mxu1 %v5794_v39  ;;  %7700 = vst [vmem:[#allocation165_spill] sm:$0xff] %v5896_v49  ;;  %7701 = vst [vmem:[#allocation166_spill] sm:$0xff] %v5900_v50  ;;  %v5950_v44 = vcombine.high %v7623_v47, %v7624_v46  ;;  %v5956_v4 = vcombine.low %v7625_v30, %v7626_v26  ;;  %v5960_v19 = vcombine.low %v7623_v47, %v7624_v46  ;;  %v7718_v46 = vld [vmem:[#allocation86_spill] sm:$0xff] }
 0x1fb   : > { %2725 = vmatpush1.bf16.msra.mxu0 %v5790_v38  ;;  %2767 = vmatprep.subr.bf16.mxu1 %v5804_v45  ;;  %7702 = vst [vmem:[#allocation167_spill] sm:$0xff] %v5906_v54  ;;  %7703 = vst [vmem:[#allocation168_spill] sm:$0xff] %v5910_v55  ;;  %v5966_v20 = vcombine.high %v7622_v3, %v7621_v10  ;;  %v5970_v41 = vcombine.high %v7619_v37, %v7620_v31 }
 0x1fc   : > { %2726 = vmatprep.subr.bf16.mxu0 %v5800_v43  ;;  %7704 = vst [vmem:[#allocation169_spill] sm:$0xff] %v5916_v24  ;;  %7705 = vst [vmem:[#allocation170_spill] sm:$0xff] %v5920_v40  ;;  %v5976_v26 = vcombine.low %v7622_v3, %v7621_v10  ;;  %v5980_v30 = vcombine.low %v7619_v37, %v7620_v31  ;;  %v5986_v47 = vcombine.high %v7718_v46, %v7618_v21  ;;  %v7727_v31 = vld [vmem:[#allocation82_spill] sm:$0xff] }
 0x1fd   : > { %7706 = vst [vmem:[#allocation171_spill] sm:$0xff] %v5926_v58  ;;  %7707 = vst [vmem:[#allocation172_spill] sm:$0xff] %v5930_v62  ;;  %v5990_v51 = vcombine.high %v7722_v60, %v7720_v48  ;;  %v5996_v3 = vcombine.low %v7718_v46, %v7618_v21  ;;  %v7728_v37 = vld [vmem:[#allocation78_spill] sm:$0xff] }
 0x1fe   : > { %2768 = vmatpush1.bf16.msra.mxu1 %v5814_v29  ;;  %7708 = vst [vmem:[#allocation173_spill] sm:$0xff] %v5936_v32  ;;  %7709 = vst [vmem:[#allocation174_spill] sm:$0xff] %v5940_v35  ;;  %v7737_v46 = vld [vmem:[#allocation70_spill] sm:$0xff] }
 0x1ff   : > { %2727 = vmatpush1.bf16.msra.mxu0 %v5810_v27  ;;  %2769 = vmatprep.subr.bf16.mxu1 %v5824_v34  ;;  %7710 = vst [vmem:[#allocation175_spill] sm:$0xff] %v5946_v42  ;;  %7711 = vst [vmem:[#allocation176_spill] sm:$0xff] %v5950_v44 }
 0x200   : > { %2728 = vmatprep.subr.bf16.mxu0 %v5820_v33  ;;  %7712 = vst [vmem:[#allocation177_spill] sm:$0xff] %v5956_v4  ;;  %7713 = vst [vmem:[#allocation178_spill] sm:$0xff] %v5960_v19 }
 0x201   : > { %7714 = vst [vmem:[#allocation179_spill] sm:$0xff] %v5966_v20  ;;  %7715 = vst [vmem:[#allocation180_spill] sm:$0xff] %v5970_v41 }
 0x202   : > { %2770 = vmatpush1.bf16.msra.mxu1 %v5838_v22  ;;  %7716 = vst [vmem:[#allocation181_spill] sm:$0xff] %v5976_v26  ;;  %7717 = vst [vmem:[#allocation182_spill] sm:$0xff] %v5980_v30 }
 0x203   : > { %2729 = vmatpush1.bf16.msra.mxu0 %v5834_v18  ;;  %2771 = vmatprep.subr.bf16.mxu1 %v5848_v56  ;;  %7719 = vst [vmem:[#allocation183_spill] sm:$0xff] %v5986_v47  ;;  %7724 = vst [vmem:[#allocation184_spill] sm:$0xff] %v5990_v51 }
 0x204   : > { %2730 = vmatprep.subr.bf16.mxu0 %v5844_v23  ;;  %7725 = vst [vmem:[#allocation185_spill] sm:$0xff] %v5996_v3 }
 0x206   : > { %2772 = vmatpush1.bf16.msra.mxu1 %v5860_v7 }
 0x207   : > { %2731 = vmatpush1.bf16.msra.mxu0 %v5856_v6  ;;  %2773 = vmatprep.subr.bf16.mxu1 %v5870_v13 }
 0x208   : > { %2732 = vmatprep.subr.bf16.mxu0 %v5866_v11 }
 0x20a   : > { %2774 = vmatpush1.bf16.msra.mxu1 %v5880_v2 }
 0x20b   : > { %2733 = vmatpush1.bf16.msra.mxu0 %v5876_v1  ;;  %2775 = vmatprep.subr.bf16.mxu1 %v5890_v61 }
 0x20c   : > { %2734 = vmatprep.subr.bf16.mxu0 %v5886_v59 }
 0x20e   : > { %2776 = vmatpush2.bf16.msra.mxu1 %v5900_v50 }
 0x20f   : > { %2735 = vmatpush2.bf16.msra.mxu0 %v5896_v49  ;;  %2777 = vmatprep.subr.bf16.mxu1 %v5910_v55 }
 0x210   : > { %2736 = vmatprep.subr.bf16.mxu0 %v5906_v54 }
 0x212   : > { %2778 = vmatpush2.bf16.msra.mxu1 %v5920_v40 }
 0x213   : > { %2737 = vmatpush2.bf16.msra.mxu0 %v5916_v24  ;;  %2779 = vmatprep.subr.bf16.mxu1 %v5930_v62 }
 0x214   : > { %2738 = vmatprep.subr.bf16.mxu0 %v5926_v58 }
 0x216   : > { %2780 = vmatpush2.bf16.msra.mxu1 %v5940_v35 }
 0x217   : > { %2739 = vmatpush2.bf16.msra.mxu0 %v5936_v32  ;;  %2781 = vmatprep.subr.bf16.mxu1 %v5950_v44  ;;  %v7721_v44 = vmov %v7720_v48  ;;  %v7730_v48 = vld [vmem:[#allocation83_spill] sm:$0xff] }
 0x218   : > { %2740 = vmatprep.subr.bf16.mxu0 %v5946_v42 }
 0x21a   : > { %2782 = vmatpush2.bf16.msra.mxu1 %v5960_v19 }
 0x21b   : > { %2741 = vmatpush2.bf16.msra.mxu0 %v5956_v4  ;;  %2783 = vmatprep.subr.bf16.mxu1 %v5970_v41  ;;  %v7723_v4 = vmov %v7722_v60  ;;  %v6006_v60 = vcombine.high %v7728_v37, %v7727_v31  ;;  %v7731_v41 = vmov %v7730_v48 }
 0x21c   : > { %2742 = vmatprep.subr.bf16.mxu0 %v5966_v20  ;;  %v6000_v10 = vcombine.low %v7723_v4, %v7721_v44  ;;  %v6016_v4 = vcombine.low %v7728_v37, %v7727_v31  ;;  %v7736_v44 = vld [vmem:[#allocation74_spill] sm:$0xff]  ;;  %v7745_v37 = vld [vmem:[#allocation68_spill] sm:$0xff] }
 0x21d   : > { %7729 = vst [vmem:[#allocation187_spill] sm:$0xff] %v6006_v60 }
 0x21e   : > { %2784 = vmatpush2.bf16.msra.mxu1 %v5980_v30  ;;  %7726 = vst [vmem:[#allocation186_spill] sm:$0xff] %v6000_v10  ;;  %7734 = vst [vmem:[#allocation189_spill] sm:$0xff] %v6016_v4 }
 0x21f   : > { %2743 = vmatpush2.bf16.msra.mxu0 %v5976_v26  ;;  %2785 = vmatprep.subr.bf16.mxu1 %v5990_v51  ;;  %v7732_v26 = vld [vmem:[#allocation79_spill] sm:$0xff] }
 0x220   : > { %2744 = vmatprep.subr.bf16.mxu0 %v5986_v47  ;;  %v6010_v20 = vcombine.high %v7732_v26, %v7730_v48  ;;  %v6020_v21 = vcombine.low %v7732_v26, %v7731_v41  ;;  %v6026_v48 = vcombine.high %v7737_v46, %v7736_v44  ;;  %v7739_v51 = vld [vmem:[#allocation75_spill] sm:$0xff]  ;;  %v6036_v26 = vcombine.low %v7737_v46, %v7736_v44  ;;  %v7746_v41 = vld [vmem:[#allocation64_spill] sm:$0xff] }
 0x221   : > { %v7740_v47 = vmov %v7739_v51  ;;  %v6054_v44 = vpack.c.bf16 %v4471_v14, %v4471_v14 }
 0x222   : > { %7733 = vst [vmem:[#allocation188_spill] sm:$0xff] %v6010_v20  ;;  %2786 = vmatpush2.bf16.msra.mxu1 %v6000_v10  ;;  %7735 = vst [vmem:[#allocation190_spill] sm:$0xff] %v6020_v21 }
 0x223   : > { %2745 = vmatpush2.bf16.msra.mxu0 %v5996_v3  ;;  %2787 = vmatprep.subr.bf16.mxu1 %v6010_v20  ;;  %7738 = vst [vmem:[#allocation191_spill] sm:$0xff] %v6026_v48  ;;  %v7741_v3 = vld [vmem:[#allocation71_spill] sm:$0xff]  ;;  %7743 = vst [vmem:[#allocation193_spill] sm:$0xff] %v6036_v26  ;;  %v7748_v20 = vld [vmem:[#allocation69_spill] sm:$0xff] }
 0x224   : > { %2746 = vmatprep.subr.bf16.mxu0 %v6006_v60  ;;  %v6030_v30 = vcombine.high %v7741_v3, %v7739_v51  ;;  %v6040_v31 = vcombine.low %v7741_v3, %v7740_v47  ;;  %v6046_v51 = vcombine.high %v7746_v41, %v7745_v37  ;;  %v6060_v3 = vcombine.low %v7746_v41, %v7745_v37  ;;  %v7752_v47 = vld [vmem:[#allocation60_spill] sm:$0xff] }
 0x225   : > { %v7763_v41 = vld [vmem:[#allocation48_spill] sm:$0xff] }
 0x226   : > { %7742 = vst [vmem:[#allocation192_spill] sm:$0xff] %v6030_v30  ;;  %2788 = vmatpush2.bf16.msra.mxu1 %v6020_v21  ;;  %7744 = vst [vmem:[#allocation194_spill] sm:$0xff] %v6040_v31 }
 0x227   : > { %2747 = vmatpush2.bf16.msra.mxu0 %v6016_v4  ;;  %2789 = vmatprep.subr.bf16.mxu1 %v6030_v30  ;;  %7747 = vst [vmem:[#allocation195_spill] sm:$0xff] %v6046_v51  ;;  %v7749_v4 = vld [vmem:[#allocation65_spill] sm:$0xff]  ;;  %7751 = vst [vmem:[#allocation197_spill] sm:$0xff] %v6060_v3  ;;  %v7753_v30 = vld [vmem:[#allocation56_spill] sm:$0xff] }
 0x228   : > { %2748 = vmatprep.subr.bf16.mxu0 %v6026_v48  ;;  %v6050_v60 = vcombine.high %v7749_v4, %v7748_v20  ;;  %v6064_v46 = vcombine.low %v7749_v4, %v7748_v20  ;;  %v6070_v14 = vcombine.high %v7753_v30, %v7752_v47  ;;  %v7755_v48 = vld [vmem:[#allocation61_spill] sm:$0xff]  ;;  %v6082_v4 = vcombine.low %v7753_v30, %v7752_v47  ;;  %v7773_v30 = vld [vmem:[#allocation40_spill] sm:$0xff] }
 0x229   : > { %v7756_v21 = vmov %v7755_v48 }
 0x22a   : > { %7750 = vst [vmem:[#allocation196_spill] sm:$0xff] %v6050_v60  ;;  %2790 = vmatpush2.bf16.msra.mxu1 %v6040_v31  ;;  %7754 = vst [vmem:[#allocation198_spill] sm:$0xff] %v6070_v14 }
 0x22b   : > { %2749 = vmatpush2.bf16.msra.mxu0 %v6036_v26  ;;  %2841 = vmatprep.subr.bf16.mxu1 %v6050_v60  ;;  %v7757_v26 = vld [vmem:[#allocation57_spill] sm:$0xff]  ;;  %7759 = vst [vmem:[#allocation200_spill] sm:$0xff] %v6082_v4 }
 0x22c   : > { %2800 = vmatprep.subr.bf16.mxu0 %v6046_v51  ;;  %v6074_v10 = vcombine.high %v7757_v26, %v7755_v48  ;;  %v6086_v20 = vcombine.low %v7757_v26, %v7756_v21  ;;  %v7761_v48 = vld [vmem:[#allocation52_spill] sm:$0xff]  ;;  %v7765_v51 = vld [vmem:[#allocation53_spill] sm:$0xff] }
 0x22d   : > { %2792 = vmatmul.mubr.bf16.vlgmr.msra.gmra.mxu1 %v6054_v44  ;;  %v7762_v37 = vmov %v7761_v48  ;;  %v6092_v60 = vcombine.high %v7763_v41, %v7761_v48  ;;  %v7766_v31 = vmov %v7765_v51 }
 0x22e   : > { %7758 = vst [vmem:[#allocation199_spill] sm:$0xff] %v6074_v10  ;;  %2751 = vmatmul.mubr.bf16.vlgmr.msra.gmra.mxu0 %v6054_v44  ;;  %2842 = vmatpush1.bf16.msra.mxu1 %v6064_v46  ;;  %7760 = vst [vmem:[#allocation201_spill] sm:$0xff] %v6086_v20  ;;  %v6104_v21 = vcombine.low %v7763_v41, %v7762_v37  ;;  %v7782_v41 = vld [vmem:[#allocation32_spill] sm:$0xff] }
 0x22f   : > { %2801 = vmatpush1.bf16.msra.mxu0 %v6060_v3  ;;  %2843 = vmatprep.subr.bf16.mxu1 %v6074_v10  ;;  %7764 = vst [vmem:[#allocation202_spill] sm:$0xff] %v6092_v60  ;;  %v7767_v3 = vld [vmem:[#allocation49_spill] sm:$0xff] }
 0x230   : > { %2802 = vmatprep.subr.bf16.mxu0 %v6070_v14  ;;  %v6096_v19 = vcombine.high %v7767_v3, %v7765_v51  ;;  %2832 = vmatprep.mubr.bf16.mxu0 %v5828_v17  ;;  %7769 = vst [vmem:[#allocation204_spill] sm:$0xff] %v6104_v21  ;;  %v6108_v48 = vcombine.low %v7767_v3, %v7766_v31  ;;  %v7771_v51 = vld [vmem:[#allocation44_spill] sm:$0xff] }
 0x231   : > { %2873 = vmatprep.mubr.bf16.mxu1 %v5828_v17  ;;  %v7772_v26 = vmov %v7771_v51  ;;  %v6114_v47 = vcombine.high %v7773_v30, %v7771_v51  ;;  %v7775_v17 = vld [vmem:[#allocation45_spill] sm:$0xff]  ;;  %v7780_v51 = vld [vmem:[#allocation36_spill] sm:$0xff] }
 0x232   : > { %7768 = vst [vmem:[#allocation203_spill] sm:$0xff] %v6096_v19  ;;  %2844 = vmatpush1.bf16.msra.mxu1 %v6086_v20  ;;  %7770 = vst [vmem:[#allocation205_spill] sm:$0xff] %v6108_v48  ;;  %v6124_v3 = vcombine.low %v7773_v30, %v7772_v26  ;;  %v7781_v37 = vmov %v7780_v51  ;;  %v7792_v30 = vld [vmem:[#allocation24_spill] sm:$0xff] }
 0x233   : > { %2803 = vmatpush1.bf16.msra.mxu0 %v6082_v4  ;;  %2845 = vmatprep.subr.bf16.mxu1 %v6096_v19  ;;  %7774 = vst [vmem:[#allocation206_spill] sm:$0xff] %v6114_v47  ;;  %v7776_v4 = vld [vmem:[#allocation41_spill] sm:$0xff]  ;;  %v6134_v19 = vcombine.high %v7782_v41, %v7780_v51  ;;  %v7790_v51 = vld [vmem:[#allocation28_spill] sm:$0xff] }
 0x234   : > { %2804 = vmatprep.subr.bf16.mxu0 %v6092_v60  ;;  %v6118_v10 = vcombine.high %v7776_v4, %v7775_v17  ;;  %7778 = vst [vmem:[#allocation208_spill] sm:$0xff] %v6124_v3  ;;  %v6128_v31 = vcombine.low %v7776_v4, %v7775_v17  ;;  %v7784_v60 = vld [vmem:[#allocation37_spill] sm:$0xff]  ;;  %v6144_v4 = vcombine.low %v7782_v41, %v7781_v37  ;;  %v7801_v41 = vld [vmem:[#allocation16_spill] sm:$0xff] }
 0x235   : > { %7783 = vst [vmem:[#allocation210_spill] sm:$0xff] %v6134_v19  ;;  %v7785_v20 = vmov %v7784_v60  ;;  %v7791_v26 = vmov %v7790_v51 }
 0x236   : > { %7777 = vst [vmem:[#allocation207_spill] sm:$0xff] %v6118_v10  ;;  %2846 = vmatpush1.bf16.msra.mxu1 %v6108_v48  ;;  %7779 = vst [vmem:[#allocation209_spill] sm:$0xff] %v6128_v31 }
 0x237   : > { %2805 = vmatpush1.bf16.msra.mxu0 %v6104_v21  ;;  %2847 = vmatprep.subr.bf16.mxu1 %v6118_v10  ;;  %v7786_v21 = vld [vmem:[#allocation33_spill] sm:$0xff]  ;;  %7788 = vst [vmem:[#allocation212_spill] sm:$0xff] %v6144_v4 }
 0x238   : > { %2806 = vmatprep.subr.bf16.mxu0 %v6114_v47  ;;  %v6138_v14 = vcombine.high %v7786_v21, %v7784_v60  ;;  %v6148_v17 = vcombine.low %v7786_v21, %v7785_v20  ;;  %v6154_v60 = vcombine.high %v7792_v30, %v7790_v51  ;;  %v7794_v10 = vld [vmem:[#allocation29_spill] sm:$0xff]  ;;  %v6164_v20 = vcombine.low %v7792_v30, %v7791_v26  ;;  %v7799_v51 = vld [vmem:[#allocation20_spill] sm:$0xff] }
 0x239   : > { %v7800_v37 = vmov %v7799_v51  ;;  %v7810_v30 = vld [vmem:[#allocation8_spill] sm:$0xff] }
 0x23a   : > { %7787 = vst [vmem:[#allocation211_spill] sm:$0xff] %v6138_v14  ;;  %2848 = vmatpush1.bf16.msra.mxu1 %v6128_v31  ;;  %7789 = vst [vmem:[#allocation213_spill] sm:$0xff] %v6148_v17 }
 0x23b   : > { %2807 = vmatpush1.bf16.msra.mxu0 %v6124_v3  ;;  %2849 = vmatprep.subr.bf16.mxu1 %v6138_v14  ;;  %7793 = vst [vmem:[#allocation214_spill] sm:$0xff] %v6154_v60  ;;  %v7795_v3 = vld [vmem:[#allocation25_spill] sm:$0xff]  ;;  %7797 = vst [vmem:[#allocation216_spill] sm:$0xff] %v6164_v20  ;;  %v6174_v14 = vcombine.high %v7801_v41, %v7799_v51  ;;  %v7808_v51 = vld [vmem:[#allocation12_spill] sm:$0xff] }
 0x23c   : > { %2808 = vmatprep.subr.bf16.mxu0 %v6134_v19  ;;  %v6158_v47 = vcombine.high %v7795_v3, %v7794_v10  ;;  %v6168_v21 = vcombine.low %v7795_v3, %v7794_v10  ;;  %v7803_v19 = vld [vmem:[#allocation21_spill] sm:$0xff]  ;;  %v6184_v3 = vcombine.low %v7801_v41, %v7800_v37  ;;  %v7809_v26 = vmov %v7808_v51  ;;  %v7820_v41 = vld [vmem:[#allocation128_spill] sm:$0xff] }
 0x23d   : > { %7802 = vst [vmem:[#allocation218_spill] sm:$0xff] %v6174_v14 }
 0x23e   : > { %7796 = vst [vmem:[#allocation215_spill] sm:$0xff] %v6158_v47  ;;  %2850 = vmatpush1.bf16.msra.mxu1 %v6148_v17  ;;  %7798 = vst [vmem:[#allocation217_spill] sm:$0xff] %v6168_v21 }
 0x23f   : > { %2809 = vmatpush1.bf16.msra.mxu0 %v6144_v4  ;;  %2851 = vmatprep.subr.bf16.mxu1 %v6158_v47  ;;  %v7804_v4 = vld [vmem:[#allocation17_spill] sm:$0xff]  ;;  %7806 = vst [vmem:[#allocation220_spill] sm:$0xff] %v6184_v3  ;;  %v6194_v47 = vcombine.high %v7810_v30, %v7808_v51  ;;  %v7818_v51 = vld [vmem:[#allocation132_spill] sm:$0xff] }
 0x240   : > { %2810 = vmatprep.subr.bf16.mxu0 %v6154_v60  ;;  %v6178_v31 = vcombine.high %v7804_v4, %v7803_v19  ;;  %v6188_v10 = vcombine.low %v7804_v4, %v7803_v19  ;;  %v7812_v60 = vld [vmem:[#allocation13_spill] sm:$0xff]  ;;  %v6204_v4 = vcombine.low %v7810_v30, %v7809_v26  ;;  %v7819_v37 = vmov %v7818_v51  ;;  %v7829_v30 = vld [vmem:[#allocation120_spill] sm:$0xff] }
 0x241   : > { %7811 = vst [vmem:[#allocation222_spill] sm:$0xff] %v6194_v47  ;;  %v7813_v17 = vmov %v7812_v60 }
 0x242   : > { %7805 = vst [vmem:[#allocation219_spill] sm:$0xff] %v6178_v31  ;;  %2852 = vmatpush1.bf16.msra.mxu1 %v6168_v21  ;;  %7807 = vst [vmem:[#allocation221_spill] sm:$0xff] %v6188_v10 }
 0x243   : > { %2811 = vmatpush1.bf16.msra.mxu0 %v6164_v20  ;;  %2853 = vmatprep.subr.bf16.mxu1 %v6178_v31  ;;  %v7814_v20 = vld [vmem:[#allocation9_spill] sm:$0xff]  ;;  %7816 = vst [vmem:[#allocation224_spill] sm:$0xff] %v6204_v4 }
 0x244   : > { %2812 = vmatprep.subr.bf16.mxu0 %v6174_v14  ;;  %v6198_v48 = vcombine.high %v7814_v20, %v7812_v60  ;;  %v6208_v19 = vcombine.low %v7814_v20, %v7813_v17  ;;  %v6214_v60 = vcombine.high %v7820_v41, %v7818_v51  ;;  %v7822_v31 = vld [vmem:[#allocation133_spill] sm:$0xff]  ;;  %v6224_v17 = vcombine.low %v7820_v41, %v7819_v37  ;;  %v7827_v51 = vld [vmem:[#allocation124_spill] sm:$0xff] }
 0x245   : > { %v7828_v26 = vmov %v7827_v51  ;;  %v7838_v41 = vld [vmem:[#allocation112_spill] sm:$0xff] }
 0x246   : > { %7815 = vst [vmem:[#allocation223_spill] sm:$0xff] %v6198_v48  ;;  %2854 = vmatpush1.bf16.msra.mxu1 %v6188_v10  ;;  %7817 = vst [vmem:[#allocation225_spill] sm:$0xff] %v6208_v19 }
 0x247   : > { %2813 = vmatpush1.bf16.msra.mxu0 %v6184_v3  ;;  %2855 = vmatprep.subr.bf16.mxu1 %v6198_v48  ;;  %7821 = vst [vmem:[#allocation226_spill] sm:$0xff] %v6214_v60  ;;  %v7823_v3 = vld [vmem:[#allocation129_spill] sm:$0xff]  ;;  %7825 = vst [vmem:[#allocation228_spill] sm:$0xff] %v6224_v17  ;;  %v6234_v48 = vcombine.high %v7829_v30, %v7827_v51  ;;  %v7836_v51 = vld [vmem:[#allocation116_spill] sm:$0xff] }
 0x248   : > { %2814 = vmatprep.subr.bf16.mxu0 %v6194_v47  ;;  %v6218_v14 = vcombine.high %v7823_v3, %v7822_v31  ;;  %v6228_v20 = vcombine.low %v7823_v3, %v7822_v31  ;;  %v7831_v47 = vld [vmem:[#allocation125_spill] sm:$0xff]  ;;  %v6244_v3 = vcombine.low %v7829_v30, %v7828_v26  ;;  %v7837_v37 = vmov %v7836_v51 }
 0x249   : > { %7830 = vst [vmem:[#allocation230_spill] sm:$0xff] %v6234_v48 }
 0x24a   : > { %7824 = vst [vmem:[#allocation227_spill] sm:$0xff] %v6218_v14  ;;  %2856 = vmatpush1.bf16.msra.mxu1 %v6208_v19  ;;  %7826 = vst [vmem:[#allocation229_spill] sm:$0xff] %v6228_v20 }
 0x24b   : > { %2815 = vmatpush1.bf16.msra.mxu0 %v6204_v4  ;;  %2857 = vmatprep.subr.bf16.mxu1 %v6218_v14  ;;  %v7832_v4 = vld [vmem:[#allocation121_spill] sm:$0xff]  ;;  %7834 = vst [vmem:[#allocation232_spill] sm:$0xff] %v6244_v3  ;;  %v6254_v14 = vcombine.high %v7838_v41, %v7836_v51  ;;  %v7846_v51 = vld [vmem:[#allocation108_spill] sm:$0xff] }
 0x24c   : > { %2816 = vmatprep.subr.bf16.mxu0 %v6214_v60  ;;  %v6238_v10 = vcombine.high %v7832_v4, %v7831_v47  ;;  %v6248_v31 = vcombine.low %v7832_v4, %v7831_v47  ;;  %v7840_v60 = vld [vmem:[#allocation117_spill] sm:$0xff]  ;;  %v6264_v4 = vcombine.low %v7838_v41, %v7837_v37  ;;  %v7847_v30 = vmov %v7846_v51  ;;  %v7848_v47 = vld [vmem:[#allocation104_spill] sm:$0xff] }
 0x24d   : > { %7839 = vst [vmem:[#allocation234_spill] sm:$0xff] %v6254_v14  ;;  %v7841_v19 = vmov %v7840_v60  ;;  %v7857_v41 = vld [vmem:[#allocation96_spill] sm:$0xff] }
 0x24e   : > { %7833 = vst [vmem:[#allocation231_spill] sm:$0xff] %v6238_v10  ;;  %2858 = vmatpush2.bf16.msra.mxu1 %v6228_v20  ;;  %7835 = vst [vmem:[#allocation233_spill] sm:$0xff] %v6248_v31 }
 0x24f   : > { %2817 = vmatpush2.bf16.msra.mxu0 %v6224_v17  ;;  %2859 = vmatprep.subr.bf16.mxu1 %v6238_v10  ;;  %v7842_v17 = vld [vmem:[#allocation113_spill] sm:$0xff]  ;;  %7844 = vst [vmem:[#allocation236_spill] sm:$0xff] %v6264_v4 }
 0x250   : > { %2818 = vmatprep.subr.bf16.mxu0 %v6234_v48  ;;  %v6258_v21 = vcombine.high %v7842_v17, %v7840_v60  ;;  %v6268_v26 = vcombine.low %v7842_v17, %v7841_v19  ;;  %v6274_v60 = vcombine.high %v7848_v47, %v7846_v51  ;;  %v7850_v10 = vld [vmem:[#allocation109_spill] sm:$0xff]  ;;  %v6284_v17 = vcombine.low %v7848_v47, %v7847_v30  ;;  %v7855_v51 = vld [vmem:[#allocation100_spill] sm:$0xff] }
 0x251   : > { %v7856_v37 = vmov %v7855_v51  ;;  %v7867_v47 = vld [vmem:[#allocation88_spill] sm:$0xff] }
 0x252   : > { %7843 = vst [vmem:[#allocation235_spill] sm:$0xff] %v6258_v21  ;;  %2860 = vmatpush2.bf16.msra.mxu1 %v6248_v31  ;;  %7845 = vst [vmem:[#allocation237_spill] sm:$0xff] %v6268_v26 }
 0x253   : > { %2819 = vmatpush2.bf16.msra.mxu0 %v6244_v3  ;;  %2861 = vmatprep.subr.bf16.mxu1 %v6258_v21  ;;  %7849 = vst [vmem:[#allocation238_spill] sm:$0xff] %v6274_v60  ;;  %v7851_v3 = vld [vmem:[#allocation105_spill] sm:$0xff]  ;;  %7853 = vst [vmem:[#allocation240_spill] sm:$0xff] %v6284_v17  ;;  %v6294_v21 = vcombine.high %v7857_v41, %v7855_v51  ;;  %v7865_v51 = vld [vmem:[#allocation92_spill] sm:$0xff] }
 0x254   : > { %2820 = vmatprep.subr.bf16.mxu0 %v6254_v14  ;;  %v6278_v48 = vcombine.high %v7851_v3, %v7850_v10  ;;  %v6288_v19 = vcombine.low %v7851_v3, %v7850_v10  ;;  %v7859_v14 = vld [vmem:[#allocation101_spill] sm:$0xff]  ;;  %v6304_v3 = vcombine.low %v7857_v41, %v7856_v37  ;;  %v7866_v30 = vmov %v7865_v51  ;;  %v7877_v41 = vld [vmem:[#allocation80_spill] sm:$0xff] }
 0x255   : > { %7858 = vst [vmem:[#allocation242_spill] sm:$0xff] %v6294_v21  ;;  %v7860_v31 = vmov %v7859_v14 }
 0x256   : > { %7852 = vst [vmem:[#allocation239_spill] sm:$0xff] %v6278_v48  ;;  %2862 = vmatpush2.bf16.msra.mxu1 %v6268_v26  ;;  %7854 = vst [vmem:[#allocation241_spill] sm:$0xff] %v6288_v19 }
 0x257   : > { %2821 = vmatpush2.bf16.msra.mxu0 %v6264_v4  ;;  %2863 = vmatprep.subr.bf16.mxu1 %v6278_v48  ;;  %v7861_v4 = vld [vmem:[#allocation97_spill] sm:$0xff]  ;;  %7863 = vst [vmem:[#allocation244_spill] sm:$0xff] %v6304_v3 }
 0x258   : > { %2822 = vmatprep.subr.bf16.mxu0 %v6274_v60  ;;  %v6298_v20 = vcombine.high %v7861_v4, %v7859_v14  ;;  %v6308_v10 = vcombine.low %v7861_v4, %v7860_v31  ;;  %v6314_v14 = vcombine.high %v7867_v47, %v7865_v51  ;;  %v7869_v48 = vld [vmem:[#allocation93_spill] sm:$0xff]  ;;  %v6324_v4 = vcombine.low %v7867_v47, %v7866_v30  ;;  %v7875_v51 = vld [vmem:[#allocation84_spill] sm:$0xff] }
 0x259   : > { %v7870_v26 = vmov %v7869_v48  ;;  %v7876_v37 = vmov %v7875_v51  ;;  %v7886_v47 = vld [vmem:[#allocation72_spill] sm:$0xff] }
 0x25a   : > { %7862 = vst [vmem:[#allocation243_spill] sm:$0xff] %v6298_v20  ;;  %2864 = vmatpush2.bf16.msra.mxu1 %v6288_v19  ;;  %7864 = vst [vmem:[#allocation245_spill] sm:$0xff] %v6308_v10 }
 0x25b   : > { %2823 = vmatpush2.bf16.msra.mxu0 %v6284_v17  ;;  %2865 = vmatprep.subr.bf16.mxu1 %v6298_v20  ;;  %7868 = vst [vmem:[#allocation246_spill] sm:$0xff] %v6314_v14  ;;  %v7871_v17 = vld [vmem:[#allocation89_spill] sm:$0xff]  ;;  %7873 = vst [vmem:[#allocation248_spill] sm:$0xff] %v6324_v4 }
 0x25c   : > { %2824 = vmatprep.subr.bf16.mxu0 %v6294_v21  ;;  %v6318_v60 = vcombine.high %v7871_v17, %v7869_v48  ;;  %v6328_v31 = vcombine.low %v7871_v17, %v7870_v26  ;;  %v6334_v48 = vcombine.high %v7877_v41, %v7875_v51  ;;  %v7879_v20 = vld [vmem:[#allocation85_spill] sm:$0xff]  ;;  %v6344_v17 = vcombine.low %v7877_v41, %v7876_v37  ;;  %v7884_v51 = vld [vmem:[#allocation76_spill] sm:$0xff]  ;;  %v7900_v37 = vld [vmem:[#allocation182_spill] sm:$0xff] }
 0x25d   : > { %v7885_v30 = vmov %v7884_v51  ;;  %v7901_v41 = vld [vmem:[#allocation183_spill] sm:$0xff] }
 0x25e   : > { %7872 = vst [vmem:[#allocation247_spill] sm:$0xff] %v6318_v60  ;;  %2866 = vmatpush2.bf16.msra.mxu1 %v6308_v10  ;;  %7874 = vst [vmem:[#allocation249_spill] sm:$0xff] %v6328_v31 }
 0x25f   : > { %2825 = vmatpush2.bf16.msra.mxu0 %v6304_v3  ;;  %2867 = vmatprep.subr.bf16.mxu1 %v6318_v60  ;;  %7878 = vst [vmem:[#allocation250_spill] sm:$0xff] %v6334_v48  ;;  %v7880_v3 = vld [vmem:[#allocation81_spill] sm:$0xff]  ;;  %7882 = vst [vmem:[#allocation252_spill] sm:$0xff] %v6344_v17  ;;  %v6354_v60 = vcombine.high %v7886_v47, %v7884_v51  ;;  %v7896_v51 = vld [vmem:[#allocation178_spill] sm:$0xff] }
 0x260   : > { %2826 = vmatprep.subr.bf16.mxu0 %v6314_v14  ;;  %v6338_v21 = vcombine.high %v7880_v3, %v7879_v20  ;;  %v6348_v26 = vcombine.low %v7880_v3, %v7879_v20  ;;  %v7888_v14 = vld [vmem:[#allocation77_spill] sm:$0xff]  ;;  %v6364_v3 = vcombine.low %v7886_v47, %v7885_v30  ;;  %v7902_v47 = vld [vmem:[#allocation184_spill] sm:$0xff] }
 0x261   : > { %7887 = vst [vmem:[#allocation254_spill] sm:$0xff] %v6354_v60  ;;  %v7889_v10 = vmov %v7888_v14  ;;  %v7899_v30 = vld [vmem:[#allocation181_spill] sm:$0xff] }
 0x262   : > { %7881 = vst [vmem:[#allocation251_spill] sm:$0xff] %v6338_v21  ;;  %2868 = vmatpush2.bf16.msra.mxu1 %v6328_v31  ;;  %7883 = vst [vmem:[#allocation253_spill] sm:$0xff] %v6348_v26 }
 0x263   : > { %2827 = vmatpush2.bf16.msra.mxu0 %v6324_v4  ;;  %2869 = vmatprep.subr.bf16.mxu1 %v6338_v21  ;;  %v7890_v4 = vld [vmem:[#allocation73_spill] sm:$0xff]  ;;  %7892 = vst [vmem:[#allocation256_spill] sm:$0xff] %v6364_v3 }
 0x264   : > { %2828 = vmatprep.subr.bf16.mxu0 %v6334_v48  ;;  %v6358_v19 = vcombine.high %v7890_v4, %v7888_v14  ;;  %v6368_v20 = vcombine.low %v7890_v4, %v7889_v10  ;;  %v7895_v14 = vld [vmem:[#allocation177_spill] sm:$0xff]  ;;  %v7897_v4 = vld [vmem:[#allocation179_spill] sm:$0xff]  ;;  %v7898_v10 = vld [vmem:[#allocation180_spill] sm:$0xff] }
 0x266   : > { %7891 = vst [vmem:[#allocation255_spill] sm:$0xff] %v6358_v19  ;;  %2870 = vmatpush2.bf16.msra.mxu1 %v6348_v26  ;;  %7893 = vst [vmem:[#allocation257_spill] sm:$0xff] %v6368_v20 }
 0x267   : > { %2829 = vmatpush2.bf16.msra.mxu0 %v6344_v17  ;;  %2871 = vmatprep.subr.bf16.mxu1 %v6358_v19 }
 0x268   : > { %2830 = vmatprep.subr.bf16.mxu0 %v6354_v60 }
 0x26a   : > { %2872 = vmatpush2.bf16.msra.mxu1 %v6368_v20 }
 0x26b   : > { %2831 = vmatpush2.bf16.msra.mxu0 %v6364_v3  ;;  %3060 = vmatprep.subr.bf16.mxu1 %v5730_v5 }
 0x26c   : > { %3019 = vmatprep.subr.bf16.mxu0 %v5722_v63 }
 0x26d   : > { %2874 = vmatmul.mubr.bf16.vlgmr.msra.gmra.mxu1 %v6054_v44 }
 0x26e   : > { %2833 = vmatmul.mubr.bf16.vlgmr.msra.gmra.mxu0 %v6054_v44  ;;  %3061 = vmatpush1.bf16.msra.mxu1 %v5734_v53  ;;  %v7894_v44 = vld [vmem:[#allocation176_spill] sm:$0xff] }
 0x26f   : > { %3020 = vmatpush1.bf16.msra.mxu0 %v5726_v57  ;;  %3062 = vmatprep.subr.bf16.mxu1 %v5742_v25 }
 0x270   : > { %3021 = vmatprep.subr.bf16.mxu0 %v5738_v9 }
 0x272   : > { %3063 = vmatpush1.bf16.msra.mxu1 %v5754_v0 }
 0x273   : > { %3022 = vmatpush1.bf16.msra.mxu0 %v5750_v15  ;;  %3064 = vmatprep.subr.bf16.mxu1 %v5764_v28 }
 0x274   : > { %3023 = vmatprep.subr.bf16.mxu0 %v5760_v16 }
 0x276   : > { %3065 = vmatpush1.bf16.msra.mxu1 %v5774_v12 }
 0x277   : > { %3024 = vmatpush1.bf16.msra.mxu0 %v5770_v8  ;;  %3066 = vmatprep.subr.bf16.mxu1 %v5784_v52 }
 0x278   : > { %3025 = vmatprep.subr.bf16.mxu0 %v5780_v36 }
 0x27a   : > { %3067 = vmatpush1.bf16.msra.mxu1 %v5794_v39 }
 0x27b   : > { %3026 = vmatpush1.bf16.msra.mxu0 %v5790_v38  ;;  %3068 = vmatprep.subr.bf16.mxu1 %v5804_v45 }
 0x27c   : > { %3027 = vmatprep.subr.bf16.mxu0 %v5800_v43 }
 0x27e   : > { %3069 = vmatpush1.bf16.msra.mxu1 %v5814_v29 }
 0x27f   : > { %3028 = vmatpush1.bf16.msra.mxu0 %v5810_v27  ;;  %3070 = vmatprep.subr.bf16.mxu1 %v5824_v34 }
 0x280   : > { %3029 = vmatprep.subr.bf16.mxu0 %v5820_v33 }
 0x282   : > { %3071 = vmatpush1.bf16.msra.mxu1 %v5838_v22 }
 0x283   : > { %3030 = vmatpush1.bf16.msra.mxu0 %v5834_v18  ;;  %3072 = vmatprep.subr.bf16.mxu1 %v5848_v56 }
 0x284   : > { %3031 = vmatprep.subr.bf16.mxu0 %v5844_v23 }
 0x286   : > { %3073 = vmatpush1.bf16.msra.mxu1 %v5860_v7 }
 0x287   : > { %3032 = vmatpush1.bf16.msra.mxu0 %v5856_v6  ;;  %3074 = vmatprep.subr.bf16.mxu1 %v5870_v13 }
 0x288   : > { %3033 = vmatprep.subr.bf16.mxu0 %v5866_v11 }
 0x28a   : > { %3075 = vmatpush1.bf16.msra.mxu1 %v5880_v2 }
 0x28b   : > { %3034 = vmatpush1.bf16.msra.mxu0 %v5876_v1  ;;  %3076 = vmatprep.subr.bf16.mxu1 %v5890_v61 }
 0x28c   : > { %3035 = vmatprep.subr.bf16.mxu0 %v5886_v59 }
 0x28e   : > { %3077 = vmatpush2.bf16.msra.mxu1 %v5900_v50 }
 0x28f   : > { %3036 = vmatpush2.bf16.msra.mxu0 %v5896_v49  ;;  %3078 = vmatprep.subr.bf16.mxu1 %v5910_v55 }
 0x290   : > { %3037 = vmatprep.subr.bf16.mxu0 %v5906_v54 }
 0x292   : > { %3079 = vmatpush2.bf16.msra.mxu1 %v5920_v40 }
 0x293   : > { %3038 = vmatpush2.bf16.msra.mxu0 %v5916_v24  ;;  %3080 = vmatprep.subr.bf16.mxu1 %v5930_v62 }
 0x294   : > { %3039 = vmatprep.subr.bf16.mxu0 %v5926_v58 }
 0x296   : > { %3081 = vmatpush2.bf16.msra.mxu1 %v5940_v35  ;;  %v7910_v35 = vld [vmem:[#allocation192_spill] sm:$0xff] }
 0x297   : > { %3040 = vmatpush2.bf16.msra.mxu0 %v5936_v32  ;;  %3082 = vmatprep.subr.bf16.mxu1 %v7894_v44  ;;  %v7904_v44 = vld [vmem:[#allocation186_spill] sm:$0xff] }
 0x298   : > { %3041 = vmatprep.subr.bf16.mxu0 %v5946_v42  ;;  %v7903_v42 = vld [vmem:[#allocation185_spill] sm:$0xff] }
 0x29a   : > { %3083 = vmatpush2.bf16.msra.mxu1 %v7896_v51  ;;  %v7906_v51 = vld [vmem:[#allocation188_spill] sm:$0xff] }
 0x29b   : > { %3042 = vmatpush2.bf16.msra.mxu0 %v7895_v14  ;;  %3084 = vmatprep.subr.bf16.mxu1 %v7898_v10  ;;  %v7905_v14 = vld [vmem:[#allocation187_spill] sm:$0xff]  ;;  %v7908_v10 = vld [vmem:[#allocation190_spill] sm:$0xff] }
 0x29c   : > { %3043 = vmatprep.subr.bf16.mxu0 %v7897_v4  ;;  %v7907_v4 = vld [vmem:[#allocation189_spill] sm:$0xff] }
 0x29e   : > { %3085 = vmatpush2.bf16.msra.mxu1 %v7900_v37  ;;  %v7911_v37 = vld [vmem:[#allocation193_spill] sm:$0xff] }
 0x29f   : > { %3044 = vmatpush2.bf16.msra.mxu0 %v7899_v30  ;;  %3086 = vmatprep.subr.bf16.mxu1 %v7902_v47  ;;  %v7909_v30 = vld [vmem:[#allocation191_spill] sm:$0xff] }
 0x2a0   : > { %3045 = vmatprep.subr.bf16.mxu0 %v7901_v41  ;;  %v7912_v41 = vld [vmem:[#allocation194_spill] sm:$0xff]  ;;  %v7913_v47 = vld [vmem:[#allocation195_spill] sm:$0xff] }
 0x2a2   : > { %3087 = vmatpush2.bf16.msra.mxu1 %v7904_v44  ;;  %v2891_v44 = vld [vmem:[%s2889_s27 + $0x8] sm:$0xff] }
 0x2a3   : > { %3046 = vmatpush2.bf16.msra.mxu0 %v7903_v42  ;;  %3088 = vmatprep.subr.bf16.mxu1 %v7906_v51  ;;  %v7914_v42 = vld [vmem:[#allocation196_spill] sm:$0xff]  ;;  %v2899_v51 = vlaneseq }
 0x2a4   : > { %3047 = vmatprep.subr.bf16.mxu0 %v7905_v14 }
 0x2a6   : > { %3089 = vmatpush2.bf16.msra.mxu1 %v7908_v10 }
 0x2a7   : > { %3048 = vmatpush2.bf16.msra.mxu0 %v7907_v4  ;;  %3090 = vmatprep.subr.bf16.mxu1 %v7910_v35  ;;  %v6446_v4 = vshrl.u32 %v2899_v51, 7 }
 0x2a8   : > { %3049 = vmatprep.subr.bf16.mxu0 %v7909_v30  ;;  %v2892_v30 = vld [vmem:[%s2889_s27 + $0x10] sm:$0xff] }
 0x2a9   : > { %v7423_v35 = vsub.s32 0, %v6446_v4 }
 0x2aa   : > { %3091 = vmatpush2.bf16.msra.mxu1 %v7912_v41  ;;  %v7437_v41 = vsub.s32 1, %v6446_v4 }
 0x2ab   : > { %3050 = vmatpush2.bf16.msra.mxu0 %v7911_v37  ;;  %3142 = vmatprep.subr.bf16.mxu1 %v7914_v42  ;;  %v7434_v37 = vsub.s32 2, %v6446_v4  ;;  %v7915_v42 = vld [vmem:[#allocation134_spill] sm:$0xff] }
 0x2ac   : > { %3101 = vmatprep.subr.bf16.mxu0 %v7913_v47  ;;  %v2890_v47 = vld [vmem:[%s2889_s27] sm:$0xff]  ;;  %v6456_v10 = vrot.slane %v7915_v42, %v7423_v35  ;;  %v6466_v58 = vrot.slane %v7915_v42, %v7437_v41  ;;  %v7438_v41 = vsub.s32 3, %v6446_v4 }
 0x2ad   : > { %v6461_v32 = vrot.slane %v7915_v42, %v7434_v37 }
 0x2ae   : > { %7916 = vst [vmem:[#allocation258_spill] sm:$0xff] %v6456_v10  ;;  %7918 = vst [vmem:[#allocation260_spill] sm:$0xff] %v6466_v58 }
 0x2af   : > { %7917 = vst [vmem:[#allocation259_spill] sm:$0xff] %v6461_v32 }
 0x2ed   : > { %v2793_v51 = vpop.f32.mrf.mxu1 }
 0x2ee   : > { %v2752_v14 = vpop.f32.mrf.mxu0  ;;  %v2896_v40 = vadd.f32 %v2892_v30, %v2793_v51  ;;  %v2893_v30 = vld [vmem:[%s2889_s27 + $0x18] sm:$0xff]  ;;  %s3271_s27 = scalar_lea.vmem %s7045_s5, %s4209_s25 }
 0x2ef   : > { %v2894_v62 = vadd.f32 %v2890_v47, %v2752_v14  ;;  %v2795_v55 = vpop.f32.mrf.mxu1 }
 0x2f0   : > { %v2754_v24 = vpop.f32.mrf.mxu0  ;;  %v2921_v50 = vadd.f32 %v6461_v32, %v2896_v40  ;;  %v2897_v51 = vadd.f32 %v2893_v30, %v2795_v55  ;;  %v3001_v40 = vstv %s3000_s29  ;;  %s3184_s29 = ssub.s32 22, %s6478_s28 }
 0x2f1   : > { %v2919_v35 = vadd.f32 %v6456_v10, %v2894_v62  ;;  %v2895_v54 = vadd.f32 %v2891_v44, %v2754_v24  ;;  %v2797_v61 = vpop.f32.mrf.mxu1  ;;  %v6475_v62 = vrot.slane %v7915_v42, %v7438_v41  ;;  %v7920_v44 = vld [vmem:[#allocation138_spill] sm:$0xff]  ;;  %vm3002_vm0 = vcmp.eq.s32.totalorder %v3001_v40, 1  ;;  %v2929_v40 = vld [vmem:[%s2927_s14 + $0x8] sm:$0xff]  ;;  %s6703_s30 = sshll.u32 %s3184_s29, 3 }
 0x2f2   : > { %v2756_v49 = vpop.f32.mrf.mxu0  ;;  %s3203_s8 = sshra.s32 %s6703_s30, 3 }
 0x2f3   : > { %v2961_v59 = vmul.f32 0.5, %v2919_v35  ;;  %v2920_v37 = vadd.f32 %v6466_v58, %v2895_v54  ;;  %v2798_v14 = vpop.f32.mrf.mxu1  ;;  %7919 = vst [vmem:[#allocation261_spill] sm:$0xff] %v6475_v62  ;;  %v2922_v49 = vadd.f32 %v6475_v62, %v2897_v51  ;;  %s4232_s9 = sshll.u32 %s3203_s8, 5  ;;  %s4210_s11 = sshll.u32 %s3203_s8, 2 }
 0x2f4   : > { %v2757_v47 = vpop.f32.mrf.mxu0 }
 0x2f5   : > { %4357 = vtanh.f32 %v2961_v59  ;;  %v2965_v2 = vmul.f32 0.5, %v2920_v37  ;;  %v2970_v54 = vmul.f32 0.5, %v2922_v49 }
 0x2f6   : > { %4359 = vtanh.f32 %v2921_v50 }
 0x2f7   : > { %4361 = vtanh.f32 %v2965_v2 }
 0x2f8   : > { %4363 = vtanh.f32 %v2970_v54  ;;  %v7922_v54 = vld [vmem:[#allocation139_spill] sm:$0xff] }
 0x302   : > { %v4358_v59 = vpop.eup %4357 }
 0x303   : > { %v4360_v61 = vpop.eup %4359  ;;  %v2963_v37 = vadd.f32 1.0, %v4358_v59 }
 0x304   : > { %v4362_v50 = vpop.eup %4361 }
 0x305   : > { %v2964_v2 = vmul.f32 0.5, %v2963_v37  ;;  %v2967_v55 = vadd.f32 1.0, %v4362_v50  ;;  %v4364_v51 = vpop.eup %4363 }
 0x306   : > { %v2972_v49 = vadd.f32 1.0, %v4364_v51  ;;  %v7926_v51 = vsub.s32 1, %v6446_v4 }
 0x307   : > { %v2968_v35 = vmul.f32 0.5, %v2967_v55  ;;  %v2975_v24 = vmul.f32 %v4360_v61, %v2964_v2  ;;  %v7924_v2 = vsub.s32 0, %v6446_v4  ;;  %v7925_v55 = vld [vmem:[#allocation135_spill] sm:$0xff] }
 0x308   : > { %v2973_v59 = vmul.f32 0.5, %v2972_v49  ;;  %v6513_v49 = vrot.slane %v7925_v55, %v7926_v51 }
 0x309   : > { %v2974_v47 = vmul.f32 %v7920_v44, %v2968_v35  ;;  %v6508_v35 = vrot.slane %v7925_v55, %v7924_v2 }
 0x30b   : > { %v2976_v14 = vadd.f32 %v2975_v24, %v2974_v47  ;;  %v2930_v47 = vld [vmem:[%s2927_s14 + $0x10] sm:$0xff] }
 0x30d   : > { %4365 = vtanh.f32 %v2976_v14  ;;  %v6484_v30 = vsel %vm3002_vm0, %v2976_v14, %v7920_v44 }
 0x30e   : > { %7921 = vst [vmem:[#allocation138_spill] sm:$0xff] %v6484_v30  ;;  %v7927_v30 = vsub.s32 2, %v6446_v4 }
 0x310   : > { %v6519_v2 = vrot.slane %v7925_v55, %v7927_v30 }
 0x31a   : > { %v4366_v41 = vpop.eup %4365 }
 0x31b   : > { %v2978_v37 = vmul.f32 %v4366_v41, %v2973_v59  ;;  %v2928_v41 = vld [vmem:[%s2927_s14] sm:$0xff] }
 0x31d   : > { %v6493_v61 = vsel %vm3002_vm0, %v2978_v37, %v7922_v54 }
 0x31e   : > { %7923 = vst [vmem:[#allocation139_spill] sm:$0xff] %v6493_v61  ;;  %v6497_v50 = vpack.c.bf16 %v6493_v61, %v6493_v61 }
 0x320   : > { %3013 = vst [vmem:[%s3012_s10] sm:$0xf] %v6497_v50  ;;  %s3207_s10 = scalar_lea.vmem [#allocation3], %s4232_s9 }
 0x32d   : > { %v2875_v44 = vpop.f32.mrf.mxu1 }
 0x32e   : > { %v2834_v24 = vpop.f32.mrf.mxu0  ;;  %v2934_v61 = vadd.f32 %v2930_v47, %v2875_v44  ;;  %v7928_v44 = vsub.s32 3, %v6446_v4 }
 0x32f   : > { %v2932_v14 = vadd.f32 %v2928_v41, %v2834_v24  ;;  %v2877_v37 = vpop.f32.mrf.mxu1 }
 0x330   : > { %v2836_v59 = vpop.f32.mrf.mxu0  ;;  %v2959_v1 = vadd.f32 %v6519_v2, %v2934_v61  ;;  %v6526_v30 = vrot.slane %v7925_v55, %v7928_v44  ;;  %v7947_v55 = vld [vmem:[#allocation213_spill] sm:$0xff] }
 0x331   : > { %v2957_v54 = vadd.f32 %v6508_v35, %v2932_v14  ;;  %v2933_v42 = vadd.f32 %v2929_v40, %v2836_v59  ;;  %v2879_v32 = vpop.f32.mrf.mxu1  ;;  %v2931_v14 = vld [vmem:[%s2927_s14 + $0x18] sm:$0xff]  ;;  %s3275_s14 = scalar_lea.vmem %s7046_s6, %s4210_s11 }
 0x332   : > { %v2838_v62 = vpop.f32.mrf.mxu0  ;;  %v2935_v40 = vadd.f32 %v2931_v14, %v2877_v37  ;;  %v3006_v37 = vstv %s3005_s15  ;;  %s4234_s15 = sadd.s32 16, %s6443_s4 }
 0x333   : > { %v2979_v41 = vmul.f32 0.5, %v2957_v54  ;;  %v2958_v24 = vadd.f32 %v6513_v49, %v2933_v42  ;;  %v2880_v51 = vpop.f32.mrf.mxu1  ;;  %v7929_v54 = vld [vmem:[#allocation136_spill] sm:$0xff]  ;;  %vm3007_vm1 = vcmp.eq.s32.totalorder %v3006_v37, 1  ;;  %v7935_v37 = vld [vmem:[#allocation201_spill] sm:$0xff]  ;;  %s6862_s16 = sshra.s32 %s4234_s15, 3 }
 0x334   : > { %v2839_v58 = vpop.f32.mrf.mxu0  ;;  %v2960_v32 = vadd.f32 %v6526_v30, %v2935_v40  ;;  %s4235_s2 = sshll.u32 %s6862_s16, 5  ;;  %s4217_s20 = sshll.u32 %s6862_s16, 2 }
 0x335   : > { %4367 = vtanh.f32 %v2979_v41  ;;  %v2983_v10 = vmul.f32 0.5, %v2958_v24  ;;  %s3449_s17 = scalar_lea.vmem [#allocation2], %s4235_s2  ;;  %s3530_s23 = scalar_lea.vmem %s7045_s5, %s4217_s20 }
 0x336   : > { %v2988_v62 = vmul.f32 0.5, %v2960_v32 }
 0x337   : > { %4369 = vtanh.f32 %v2983_v10 }
 0x338   : > { %4371 = vtanh.f32 %v2959_v1 }
 0x339   : > { %4373 = vtanh.f32 %v2988_v62  ;;  %v7930_v62 = vld [vmem:[#allocation137_spill] sm:$0xff] }
 0x342   : > { %v4368_v42 = vpop.eup %4367 }
 0x343   : > { %v2981_v58 = vadd.f32 1.0, %v4368_v42 }
 0x344   : > { %v4370_v47 = vpop.eup %4369 }
 0x345   : > { %v2982_v59 = vmul.f32 0.5, %v2981_v58  ;;  %v2985_v61 = vadd.f32 1.0, %v4370_v47  ;;  %v4372_v10 = vpop.eup %4371 }
 0x346   : > { %v4374_v14 = vpop.eup %4373 }
 0x347   : > { %v2986_v1 = vmul.f32 0.5, %v2985_v61  ;;  %v2993_v41 = vmul.f32 %v4372_v10, %v2982_v59  ;;  %v2990_v40 = vadd.f32 1.0, %v4374_v14  ;;  %v7931_v59 = vld [vmem:[#allocation197_spill] sm:$0xff]  ;;  %v7932_v61 = vld [vmem:[#allocation198_spill] sm:$0xff]  ;;  %v7933_v10 = vld [vmem:[#allocation199_spill] sm:$0xff] }
 0x348   : > { %v7940_v14 = vld [vmem:[#allocation206_spill] sm:$0xff] }
 0x349   : > { %v2992_v4 = vmul.f32 %v7929_v54, %v2986_v1  ;;  %v2991_v44 = vmul.f32 0.5, %v2990_v40  ;;  %v7934_v1 = vld [vmem:[#allocation200_spill] sm:$0xff]  ;;  %v7941_v40 = vld [vmem:[#allocation207_spill] sm:$0xff] }
 0x34b   : > { %v2994_v24 = vadd.f32 %v2993_v41, %v2992_v4  ;;  %v7937_v4 = vld [vmem:[#allocation203_spill] sm:$0xff]  ;;  %v7938_v41 = vld [vmem:[#allocation204_spill] sm:$0xff] }
 0x34d   : > { %4375 = vtanh.f32 %v2994_v24  ;;  %v6532_v51 = vsel %vm3007_vm1, %v2994_v24, %v7929_v54  ;;  %v7936_v54 = vld [vmem:[#allocation202_spill] sm:$0xff]  ;;  %v7939_v24 = vld [vmem:[#allocation205_spill] sm:$0xff] }
 0x35a   : > { %v4376_v32 = vpop.eup %4375 }
 0x35b   : > { %v2996_v42 = vmul.f32 %v4376_v32, %v2991_v44  ;;  %v7942_v44 = vld [vmem:[#allocation208_spill] sm:$0xff]  ;;  %v7943_v32 = vld [vmem:[#allocation209_spill] sm:$0xff] }
 0x35d   : > { %v6540_v58 = vsel %vm3007_vm1, %v2996_v42, %v7930_v62  ;;  %v7944_v42 = vld [vmem:[#allocation210_spill] sm:$0xff]  ;;  %v7945_v62 = vld [vmem:[#allocation211_spill] sm:$0xff] }
 0x35e   : > { %v3014_v47 = vpack.c.bf16 %v6540_v58, %v6540_v58 }
 0x360   : > { %3017 = vst [vmem:[%s3016_s18] sm:$0xf] %v3014_v47  ;;  %3051 = vmatprep.mubr.bf16.mxu0 %v3014_v47  ;;  %3092 = vmatprep.mubr.bf16.mxu1 %v3014_v47  ;;  %s3277_s18 = sadd.s32 2, %s6478_s28 }
 0x361   : > { %3052 = vmatmul.mubr.bf16.vlgmr.msra.gmra.mxu0 %v6497_v50  ;;  %3093 = vmatmul.mubr.bf16.vlgmr.msra.gmra.mxu1 %v6497_v50  ;;  %p3516_p4 = scmp.lt.s32.totalorder %s3277_s18, 23  ;;  %p3517_p5 = scmp.ge.s32.totalorder %s3277_s18, 1 }
 0x362   : > { %3102 = vmatpush1.bf16.msra.mxu0 %v7931_v59  ;;  %3143 = vmatpush1.bf16.msra.mxu1 %v6064_v46  ;;  %s3702_s18 = ssub.s32 20, %s6478_s28 }
 0x363   : > { %3133 = vmatprep.mubr.bf16.mxu0 %v3014_v47  ;;  %3174 = vmatprep.mubr.bf16.mxu1 %v3014_v47  ;;  %v7946_v47 = vld [vmem:[#allocation212_spill] sm:$0xff]  ;;  %s3518_s19 = scalar_select %p3516_p4, 1, 0 }
 0x364   : > { %3103 = vmatprep.subr.bf16.mxu0 %v7932_v61  ;;  %3144 = vmatprep.subr.bf16.mxu1 %v7933_v10  ;;  %s3523_s29 = scalar_select %p3517_p5, 1, 0 }
 0x366   : > { %3104 = vmatpush1.bf16.msra.mxu0 %v7934_v1  ;;  %3145 = vmatpush1.bf16.msra.mxu1 %v7935_v37 }
 0x367   : > { %3105 = vmatprep.subr.bf16.mxu0 %v7936_v54  ;;  %3146 = vmatprep.subr.bf16.mxu1 %v7937_v4  ;;  %v7948_v4 = vld [vmem:[#allocation214_spill] sm:$0xff] }
 0x36a   : > { %3106 = vmatpush1.bf16.msra.mxu0 %v7938_v41  ;;  %3147 = vmatpush1.bf16.msra.mxu1 %v7939_v24  ;;  %v7949_v41 = vld [vmem:[#allocation215_spill] sm:$0xff]  ;;  %v7950_v24 = vld [vmem:[#allocation216_spill] sm:$0xff] }
 0x36b   : > { %3107 = vmatprep.subr.bf16.mxu0 %v7940_v14  ;;  %3148 = vmatprep.subr.bf16.mxu1 %v7941_v40  ;;  %v7951_v14 = vld [vmem:[#allocation217_spill] sm:$0xff]  ;;  %v7952_v40 = vld [vmem:[#allocation218_spill] sm:$0xff] }
 0x36e   : > { %3108 = vmatpush1.bf16.msra.mxu0 %v7942_v44  ;;  %3149 = vmatpush1.bf16.msra.mxu1 %v7943_v32  ;;  %v7953_v44 = vld [vmem:[#allocation219_spill] sm:$0xff]  ;;  %v7954_v32 = vld [vmem:[#allocation220_spill] sm:$0xff] }
 0x36f   : > { %3109 = vmatprep.subr.bf16.mxu0 %v7944_v42  ;;  %3150 = vmatprep.subr.bf16.mxu1 %v7945_v62  ;;  %v7955_v42 = vld [vmem:[#allocation221_spill] sm:$0xff]  ;;  %v7956_v62 = vld [vmem:[#allocation222_spill] sm:$0xff] }
 0x372   : > { %3110 = vmatpush1.bf16.msra.mxu0 %v7946_v47  ;;  %3151 = vmatpush1.bf16.msra.mxu1 %v7947_v55  ;;  %v7957_v47 = vld [vmem:[#allocation223_spill] sm:$0xff]  ;;  %v7958_v55 = vld [vmem:[#allocation224_spill] sm:$0xff] }
 0x373   : > { %3111 = vmatprep.subr.bf16.mxu0 %v7948_v4  ;;  %3152 = vmatprep.subr.bf16.mxu1 %v7949_v41  ;;  %v7959_v4 = vld [vmem:[#allocation225_spill] sm:$0xff]  ;;  %v7960_v41 = vld [vmem:[#allocation226_spill] sm:$0xff] }
 0x376   : > { %3112 = vmatpush1.bf16.msra.mxu0 %v7950_v24  ;;  %3153 = vmatpush1.bf16.msra.mxu1 %v7951_v14  ;;  %v7961_v24 = vld [vmem:[#allocation227_spill] sm:$0xff]  ;;  %v7962_v14 = vld [vmem:[#allocation228_spill] sm:$0xff] }
 0x377   : > { %3113 = vmatprep.subr.bf16.mxu0 %v7952_v40  ;;  %3154 = vmatprep.subr.bf16.mxu1 %v7953_v44  ;;  %v7963_v40 = vld [vmem:[#allocation229_spill] sm:$0xff]  ;;  %v7964_v44 = vld [vmem:[#allocation230_spill] sm:$0xff] }
 0x37a   : > { %3114 = vmatpush1.bf16.msra.mxu0 %v7954_v32  ;;  %3155 = vmatpush1.bf16.msra.mxu1 %v7955_v42  ;;  %v7965_v32 = vld [vmem:[#allocation231_spill] sm:$0xff]  ;;  %v7966_v42 = vld [vmem:[#allocation232_spill] sm:$0xff] }
 0x37b   : > { %3115 = vmatprep.subr.bf16.mxu0 %v7956_v62  ;;  %3156 = vmatprep.subr.bf16.mxu1 %v7957_v47  ;;  %v7967_v62 = vld [vmem:[#allocation233_spill] sm:$0xff]  ;;  %v7968_v47 = vld [vmem:[#allocation234_spill] sm:$0xff] }
 0x37e   : > { %3116 = vmatpush1.bf16.msra.mxu0 %v7958_v55  ;;  %3157 = vmatpush1.bf16.msra.mxu1 %v7959_v4  ;;  %v7969_v55 = vld [vmem:[#allocation235_spill] sm:$0xff]  ;;  %v7970_v4 = vld [vmem:[#allocation236_spill] sm:$0xff] }
 0x37f   : > { %3117 = vmatprep.subr.bf16.mxu0 %v7960_v41  ;;  %3158 = vmatprep.subr.bf16.mxu1 %v7961_v24  ;;  %v7971_v41 = vld [vmem:[#allocation237_spill] sm:$0xff]  ;;  %v7972_v24 = vld [vmem:[#allocation238_spill] sm:$0xff] }
 0x382   : > { %3118 = vmatpush2.bf16.msra.mxu0 %v7962_v14  ;;  %3159 = vmatpush2.bf16.msra.mxu1 %v7963_v40  ;;  %v7973_v14 = vld [vmem:[#allocation239_spill] sm:$0xff]  ;;  %v7974_v40 = vld [vmem:[#allocation240_spill] sm:$0xff] }
 0x383   : > { %3119 = vmatprep.subr.bf16.mxu0 %v7964_v44  ;;  %3160 = vmatprep.subr.bf16.mxu1 %v7965_v32  ;;  %v7975_v44 = vld [vmem:[#allocation241_spill] sm:$0xff]  ;;  %v7976_v32 = vld [vmem:[#allocation242_spill] sm:$0xff] }
 0x386   : > { %3120 = vmatpush2.bf16.msra.mxu0 %v7966_v42  ;;  %3161 = vmatpush2.bf16.msra.mxu1 %v7967_v62  ;;  %v7977_v42 = vld [vmem:[#allocation243_spill] sm:$0xff]  ;;  %v7978_v62 = vld [vmem:[#allocation244_spill] sm:$0xff] }
 0x387   : > { %3121 = vmatprep.subr.bf16.mxu0 %v7968_v47  ;;  %3162 = vmatprep.subr.bf16.mxu1 %v7969_v55  ;;  %v7979_v47 = vld [vmem:[#allocation245_spill] sm:$0xff]  ;;  %v7980_v55 = vld [vmem:[#allocation246_spill] sm:$0xff] }
 0x38a   : > { %3122 = vmatpush2.bf16.msra.mxu0 %v7970_v4  ;;  %3163 = vmatpush2.bf16.msra.mxu1 %v7971_v41  ;;  %v7981_v4 = vld [vmem:[#allocation247_spill] sm:$0xff]  ;;  %v7982_v41 = vld [vmem:[#allocation248_spill] sm:$0xff] }
 0x38b   : > { %3123 = vmatprep.subr.bf16.mxu0 %v7972_v24  ;;  %3164 = vmatprep.subr.bf16.mxu1 %v7973_v14 }
 0x38e   : > { %3124 = vmatpush2.bf16.msra.mxu0 %v7974_v40  ;;  %3165 = vmatpush2.bf16.msra.mxu1 %v7975_v44 }
 0x38f   : > { %3125 = vmatprep.subr.bf16.mxu0 %v7976_v32  ;;  %3166 = vmatprep.subr.bf16.mxu1 %v7977_v42 }
 0x392   : > { %3126 = vmatpush2.bf16.msra.mxu0 %v7978_v62  ;;  %3167 = vmatpush2.bf16.msra.mxu1 %v7979_v47 }
 0x393   : > { %3127 = vmatprep.subr.bf16.mxu0 %v7980_v55  ;;  %3168 = vmatprep.subr.bf16.mxu1 %v7981_v4 }
 0x396   : > { %3128 = vmatpush2.bf16.msra.mxu0 %v7982_v41  ;;  %3169 = vmatpush2.bf16.msra.mxu1 %v6328_v31 }
 0x397   : > { %3129 = vmatprep.subr.bf16.mxu0 %v6334_v48  ;;  %3170 = vmatprep.subr.bf16.mxu1 %v6338_v21 }
 0x39a   : > { %3130 = vmatpush2.bf16.msra.mxu0 %v6344_v17  ;;  %3171 = vmatpush2.bf16.msra.mxu1 %v6348_v26 }
 0x39b   : > { %3131 = vmatprep.subr.bf16.mxu0 %v6354_v60  ;;  %3172 = vmatprep.subr.bf16.mxu1 %v6358_v19 }
 0x39e   : > { %3132 = vmatpush2.bf16.msra.mxu0 %v6364_v3  ;;  %3173 = vmatpush2.bf16.msra.mxu1 %v6368_v20 }
 0x39f   : > { %3278 = vmatprep.subr.bf16.mxu0 %v5722_v63  ;;  %3319 = vmatprep.subr.bf16.mxu1 %v5730_v5 }
 0x3a1   : > { %3134 = vmatmul.mubr.bf16.vlgmr.msra.gmra.mxu0 %v6497_v50  ;;  %3175 = vmatmul.mubr.bf16.vlgmr.msra.gmra.mxu1 %v6497_v50  ;;  %v7983_v50 = vld [vmem:[#allocation161_spill] sm:$0xff] }
 0x3a2   : > { %3279 = vmatpush1.bf16.msra.mxu0 %v5726_v57  ;;  %3320 = vmatpush1.bf16.msra.mxu1 %v5734_v53 }
 0x3a3   : > { %3280 = vmatprep.subr.bf16.mxu0 %v5738_v9  ;;  %3321 = vmatprep.subr.bf16.mxu1 %v5742_v25 }
 0x3a6   : > { %3281 = vmatpush1.bf16.msra.mxu0 %v5750_v15  ;;  %3322 = vmatpush1.bf16.msra.mxu1 %v5754_v0 }
 0x3a7   : > { %3282 = vmatprep.subr.bf16.mxu0 %v5760_v16  ;;  %3323 = vmatprep.subr.bf16.mxu1 %v5764_v28 }
 0x3aa   : > { %3283 = vmatpush1.bf16.msra.mxu0 %v5770_v8  ;;  %3324 = vmatpush1.bf16.msra.mxu1 %v5774_v12  ;;  %v3194_v8 = vld [vmem:[%s3190_s22 + $0x18] sm:$0xff] }
 0x3ab   : > { %3284 = vmatprep.subr.bf16.mxu0 %v5780_v36  ;;  %3325 = vmatprep.subr.bf16.mxu1 %v5784_v52 }
 0x3ae   : > { %3285 = vmatpush1.bf16.msra.mxu0 %v5790_v38  ;;  %3326 = vmatpush1.bf16.msra.mxu1 %v5794_v39  ;;  %v8020_v39 = vld [vmem:[#allocation260_spill] sm:$0xff] }
 0x3af   : > { %3286 = vmatprep.subr.bf16.mxu0 %v5800_v43  ;;  %3327 = vmatprep.subr.bf16.mxu1 %v5804_v45 }
 0x3b2   : > { %3287 = vmatpush1.bf16.msra.mxu0 %v5810_v27  ;;  %3328 = vmatpush1.bf16.msra.mxu1 %v5814_v29  ;;  %v8019_v29 = vld [vmem:[#allocation258_spill] sm:$0xff] }
 0x3b3   : > { %3288 = vmatprep.subr.bf16.mxu0 %v5820_v33  ;;  %3329 = vmatprep.subr.bf16.mxu1 %v5824_v34  ;;  %v7984_v33 = vld [vmem:[#allocation162_spill] sm:$0xff]  ;;  %v7985_v34 = vld [vmem:[#allocation163_spill] sm:$0xff] }
 0x3b6   : > { %3289 = vmatpush1.bf16.msra.mxu0 %v5834_v18  ;;  %3330 = vmatpush1.bf16.msra.mxu1 %v5838_v22  ;;  %v7986_v18 = vld [vmem:[#allocation164_spill] sm:$0xff]  ;;  %v7987_v22 = vld [vmem:[#allocation165_spill] sm:$0xff] }
 0x3b7   : > { %3290 = vmatprep.subr.bf16.mxu0 %v5844_v23  ;;  %3331 = vmatprep.subr.bf16.mxu1 %v5848_v56  ;;  %v7988_v23 = vld [vmem:[#allocation166_spill] sm:$0xff]  ;;  %v7989_v56 = vld [vmem:[#allocation167_spill] sm:$0xff] }
 0x3ba   : > { %3291 = vmatpush1.bf16.msra.mxu0 %v5856_v6  ;;  %3332 = vmatpush1.bf16.msra.mxu1 %v5860_v7  ;;  %v7990_v6 = vld [vmem:[#allocation168_spill] sm:$0xff]  ;;  %v7991_v7 = vld [vmem:[#allocation169_spill] sm:$0xff] }
 0x3bb   : > { %3292 = vmatprep.subr.bf16.mxu0 %v5866_v11  ;;  %3333 = vmatprep.subr.bf16.mxu1 %v5870_v13  ;;  %v7992_v11 = vld [vmem:[#allocation170_spill] sm:$0xff]  ;;  %v7993_v13 = vld [vmem:[#allocation171_spill] sm:$0xff] }
 0x3be   : > { %3293 = vmatpush1.bf16.msra.mxu0 %v7983_v50  ;;  %3334 = vmatpush1.bf16.msra.mxu1 %v7984_v33  ;;  %v7994_v50 = vld [vmem:[#allocation172_spill] sm:$0xff]  ;;  %v7995_v33 = vld [vmem:[#allocation173_spill] sm:$0xff] }
 0x3bf   : > { %3294 = vmatprep.subr.bf16.mxu0 %v7985_v34  ;;  %3335 = vmatprep.subr.bf16.mxu1 %v7986_v18  ;;  %v7996_v34 = vld [vmem:[#allocation174_spill] sm:$0xff]  ;;  %v7997_v18 = vld [vmem:[#allocation175_spill] sm:$0xff] }
 0x3c2   : > { %3295 = vmatpush2.bf16.msra.mxu0 %v7987_v22  ;;  %3336 = vmatpush2.bf16.msra.mxu1 %v7988_v23  ;;  %v7998_v22 = vld [vmem:[#allocation176_spill] sm:$0xff]  ;;  %v7999_v23 = vld [vmem:[#allocation177_spill] sm:$0xff] }
 0x3c3   : > { %3296 = vmatprep.subr.bf16.mxu0 %v7989_v56  ;;  %3337 = vmatprep.subr.bf16.mxu1 %v7990_v6  ;;  %v8000_v56 = vld [vmem:[#allocation178_spill] sm:$0xff]  ;;  %v8001_v6 = vld [vmem:[#allocation179_spill] sm:$0xff] }
 0x3c6   : > { %3297 = vmatpush2.bf16.msra.mxu0 %v7991_v7  ;;  %3338 = vmatpush2.bf16.msra.mxu1 %v7992_v11  ;;  %v8002_v7 = vld [vmem:[#allocation180_spill] sm:$0xff]  ;;  %v8003_v11 = vld [vmem:[#allocation181_spill] sm:$0xff] }
 0x3c7   : > { %3298 = vmatprep.subr.bf16.mxu0 %v7993_v13  ;;  %3339 = vmatprep.subr.bf16.mxu1 %v7994_v50  ;;  %v8004_v13 = vld [vmem:[#allocation182_spill] sm:$0xff]  ;;  %v8014_v50 = vld [vmem:[#allocation192_spill] sm:$0xff] }
 0x3ca   : > { %3299 = vmatpush2.bf16.msra.mxu0 %v7995_v33  ;;  %3340 = vmatpush2.bf16.msra.mxu1 %v7996_v34  ;;  %v8005_v33 = vld [vmem:[#allocation183_spill] sm:$0xff]  ;;  %v8006_v34 = vld [vmem:[#allocation184_spill] sm:$0xff] }
 0x3cb   : > { %3300 = vmatprep.subr.bf16.mxu0 %v7997_v18  ;;  %3341 = vmatprep.subr.bf16.mxu1 %v7998_v22  ;;  %v8007_v18 = vld [vmem:[#allocation185_spill] sm:$0xff]  ;;  %v8008_v22 = vld [vmem:[#allocation186_spill] sm:$0xff] }
 0x3ce   : > { %3301 = vmatpush2.bf16.msra.mxu0 %v7999_v23  ;;  %3342 = vmatpush2.bf16.msra.mxu1 %v8000_v56  ;;  %v8009_v23 = vld [vmem:[#allocation187_spill] sm:$0xff]  ;;  %v8010_v56 = vld [vmem:[#allocation188_spill] sm:$0xff] }
 0x3cf   : > { %3302 = vmatprep.subr.bf16.mxu0 %v8001_v6  ;;  %3343 = vmatprep.subr.bf16.mxu1 %v8002_v7  ;;  %v8011_v6 = vld [vmem:[#allocation189_spill] sm:$0xff]  ;;  %v8012_v7 = vld [vmem:[#allocation190_spill] sm:$0xff] }
 0x3d2   : > { %3303 = vmatpush2.bf16.msra.mxu0 %v8003_v11  ;;  %3344 = vmatpush2.bf16.msra.mxu1 %v8004_v13  ;;  %v8013_v11 = vld [vmem:[#allocation191_spill] sm:$0xff]  ;;  %v8015_v13 = vld [vmem:[#allocation193_spill] sm:$0xff] }
 0x3d3   : > { %3304 = vmatprep.subr.bf16.mxu0 %v8005_v33  ;;  %3345 = vmatprep.subr.bf16.mxu1 %v8006_v34  ;;  %v8016_v33 = vld [vmem:[#allocation194_spill] sm:$0xff]  ;;  %v8017_v34 = vld [vmem:[#allocation195_spill] sm:$0xff] }
 0x3d6   : > { %3305 = vmatpush2.bf16.msra.mxu0 %v8007_v18  ;;  %3346 = vmatpush2.bf16.msra.mxu1 %v8008_v22  ;;  %v8018_v18 = vld [vmem:[#allocation196_spill] sm:$0xff] }
 0x3d7   : > { %3306 = vmatprep.subr.bf16.mxu0 %v8009_v23  ;;  %3347 = vmatprep.subr.bf16.mxu1 %v8010_v56 }
 0x3da   : > { %3307 = vmatpush2.bf16.msra.mxu0 %v8011_v6  ;;  %3348 = vmatpush2.bf16.msra.mxu1 %v8012_v7  ;;  %v3191_v6 = vld [vmem:[%s3190_s22] sm:$0xff] }
 0x3db   : > { %3308 = vmatprep.subr.bf16.mxu0 %v8013_v11  ;;  %3349 = vmatprep.subr.bf16.mxu1 %v8014_v50  ;;  %v3192_v11 = vld [vmem:[%s3190_s22 + $0x8] sm:$0xff]  ;;  %v3193_v50 = vld [vmem:[%s3190_s22 + $0x10] sm:$0xff] }
 0x3de   : > { %3309 = vmatpush2.bf16.msra.mxu0 %v8015_v13  ;;  %3350 = vmatpush2.bf16.msra.mxu1 %v8016_v33 }
 0x3df   : > { %3360 = vmatprep.subr.bf16.mxu0 %v8017_v34  ;;  %3401 = vmatprep.subr.bf16.mxu1 %v8018_v18 }
 0x421   : > { %v3053_v7 = vpop.f32.mrf.mxu0  ;;  %v3094_v56 = vpop.f32.mrf.mxu1 }
 0x422   : > { %v3195_v23 = vadd.f32 %v3191_v6, %v3053_v7  ;;  %v3197_v43 = vadd.f32 %v3193_v50, %v3094_v56  ;;  %v8021_v6 = vld [vmem:[#allocation259_spill] sm:$0xff] }
 0x423   : > { %v3055_v22 = vpop.f32.mrf.mxu0  ;;  %v3096_v13 = vpop.f32.mrf.mxu1 }
 0x424   : > { %v3199_v33 = vadd.f32 %v3195_v23, %v8019_v29  ;;  %v3196_v34 = vadd.f32 %v3192_v11, %v3055_v22  ;;  %v3201_v7 = vadd.f32 %v3197_v43, %v8021_v6  ;;  %v3198_v28 = vadd.f32 %v3194_v8, %v3096_v13  ;;  %v8022_v23 = vld [vmem:[#allocation261_spill] sm:$0xff]  ;;  %v8023_v13 = vld [vmem:[#allocation138_spill] sm:$0xff] }
 0x425   : > { %v3057_v27 = vpop.f32.mrf.mxu0  ;;  %v3098_v18 = vpop.f32.mrf.mxu1  ;;  %v3260_v43 = vstv %s3259_s24  ;;  %v3211_v6 = vld [vmem:[%s3207_s10 + $0x18] sm:$0xff]  ;;  %s3443_s24 = ssub.s32 21, %s6478_s28 }
 0x426   : > { %v3220_v45 = vmul.f32 0.5, %v3199_v33  ;;  %v3200_v38 = vadd.f32 %v3196_v34, %v8020_v39  ;;  %v3202_v11 = vadd.f32 %v3198_v28, %v8022_v23  ;;  %vm3261_vm2 = vcmp.eq.s32.totalorder %v3260_v43, 1  ;;  %v3209_v43 = vld [vmem:[%s3207_s10 + $0x8] sm:$0xff]  ;;  %s6888_s25 = sshll.u32 %s3443_s24, 3 }
 0x427   : > { %v3058_v52 = vpop.f32.mrf.mxu0  ;;  %v3099_v36 = vpop.f32.mrf.mxu1  ;;  %s3462_s1 = sshra.s32 %s6888_s25, 3 }
 0x428   : > { %4377 = vtanh.f32 %v3220_v45  ;;  %v3224_v12 = vmul.f32 0.5, %v3200_v38  ;;  %v3229_v18 = vmul.f32 0.5, %v3202_v11  ;;  %s4236_s26 = sshll.u32 %s3462_s1, 5  ;;  %s4218_s30 = sshll.u32 %s3462_s1, 2 }
 0x42a   : > { %4379 = vtanh.f32 %v3224_v12 }
 0x42b   : > { %4381 = vtanh.f32 %v3201_v7 }
 0x42c   : > { %4383 = vtanh.f32 %v3229_v18  ;;  %v8025_v18 = vld [vmem:[#allocation139_spill] sm:$0xff] }
 0x435   : > { %v4378_v22 = vpop.eup %4377 }
 0x436   : > { %v3222_v27 = vadd.f32 1.0, %v4378_v22 }
 0x437   : > { %v4380_v33 = vpop.eup %4379 }
 0x438   : > { %v3223_v34 = vmul.f32 0.5, %v3222_v27  ;;  %v3226_v45 = vadd.f32 1.0, %v4380_v33  ;;  %v4382_v52 = vpop.eup %4381 }
 0x439   : > { %v4384_v36 = vpop.eup %4383 }
 0x43a   : > { %v3227_v38 = vmul.f32 0.5, %v3226_v45  ;;  %v3234_v8 = vmul.f32 %v4382_v52, %v3223_v34  ;;  %v3231_v50 = vadd.f32 1.0, %v4384_v36  ;;  %v3208_v34 = vld [vmem:[%s3207_s10] sm:$0xff] }
 0x43c   : > { %v3233_v56 = vmul.f32 %v3227_v38, %v8023_v13  ;;  %v3232_v7 = vmul.f32 0.5, %v3231_v50 }
 0x43e   : > { %v3235_v12 = vadd.f32 %v3234_v8, %v3233_v56 }
 0x440   : > { %4385 = vtanh.f32 %v3235_v12  ;;  %v6689_v28 = vsel %vm3261_vm2, %v3235_v12, %v8023_v13  ;;  %v3210_v13 = vld [vmem:[%s3207_s10 + $0x10] sm:$0xff]  ;;  %s3534_s10 = scalar_lea.vmem %s7046_s6, %s4218_s30 }
 0x441   : > { %8024 = vst [vmem:[#allocation136_spill] sm:$0xff] %v6689_v28 }
 0x44d   : > { %v4386_v11 = vpop.eup %4385 }
 0x44e   : > { %v3237_v22 = vmul.f32 %v4386_v11, %v3232_v7 }
 0x450   : > { %v6697_v27 = vsel %vm3261_vm2, %v3237_v22, %v8025_v18 }
 0x451   : > { %8026 = vst [vmem:[#allocation137_spill] sm:$0xff] %v6697_v27  ;;  %v6701_v33 = vpack.c.bf16 %v6697_v27, %v6697_v27 }
 0x453   : > { %3272 = vst [vmem:[%s3271_s27] sm:$0xf] %v6701_v33  ;;  %s3466_s27 = scalar_lea.vmem [#allocation3], %s4236_s26 }
 0x461   : > { %v3135_v45 = vpop.f32.mrf.mxu0  ;;  %v3176_v38 = vpop.f32.mrf.mxu1 }
 0x462   : > { %v3212_v52 = vadd.f32 %v3208_v34, %v3135_v45  ;;  %v3214_v22 = vadd.f32 %v3210_v13, %v3176_v38 }
 0x463   : > { %v3137_v56 = vpop.f32.mrf.mxu0  ;;  %v3178_v8 = vpop.f32.mrf.mxu1 }
 0x464   : > { %v3216_v12 = vadd.f32 %v3212_v52, %v6508_v35  ;;  %v3213_v36 = vadd.f32 %v3209_v43, %v3137_v56  ;;  %v3218_v34 = vadd.f32 %v3214_v22, %v6519_v2  ;;  %v3215_v45 = vadd.f32 %v3211_v6, %v3178_v8 }
 0x465   : > { %v3139_v50 = vpop.f32.mrf.mxu0  ;;  %v3180_v7 = vpop.f32.mrf.mxu1 }
 0x466   : > { %v3238_v11 = vmul.f32 0.5, %v3216_v12  ;;  %v3217_v18 = vadd.f32 %v3213_v36, %v6513_v49  ;;  %v3219_v52 = vadd.f32 %v3215_v45, %v6526_v30  ;;  %v3265_v36 = vstv %s3264_s0  ;;  %s4238_s0 = sadd.s32 24, %s6443_s4  ;;  %s3536_s4 = sadd.s32 3, %s6478_s28 }
 0x467   : > { %v3140_v27 = vpop.f32.mrf.mxu0  ;;  %v3181_v28 = vpop.f32.mrf.mxu1  ;;  %vm3266_vm3 = vcmp.eq.s32.totalorder %v3265_v36, 1  ;;  %v8035_v36 = vld [vmem:[#allocation211_spill] sm:$0xff]  ;;  %s6981_s11 = sshra.s32 %s4238_s0, 3  ;;  %p3775_p6 = scmp.lt.s32.totalorder %s3536_s4, 23 }
 0x468   : > { %4387 = vtanh.f32 %v3238_v11  ;;  %v3242_v23 = vmul.f32 0.5, %v3217_v18  ;;  %v3247_v43 = vmul.f32 0.5, %v3219_v52  ;;  %s4239_s12 = sshll.u32 %s6981_s11, 5  ;;  %s4225_s15 = sshll.u32 %s6981_s11, 2 }
 0x469   : > { %s3708_s13 = scalar_lea.vmem [#allocation2], %s4239_s12  ;;  %p3776_p7 = scmp.ge.s32.totalorder %s3536_s4, 1 }
 0x46a   : > { %4389 = vtanh.f32 %v3242_v23 }
 0x46b   : > { %4391 = vtanh.f32 %v3218_v34 }
 0x46c   : > { %4393 = vtanh.f32 %v3247_v43 }
 0x475   : > { %v4388_v56 = vpop.eup %4387 }
 0x476   : > { %v3240_v12 = vadd.f32 1.0, %v4388_v56  ;;  %v8029_v56 = vld [vmem:[#allocation205_spill] sm:$0xff] }
 0x477   : > { %v4390_v38 = vpop.eup %4389 }
 0x478   : > { %v3241_v13 = vmul.f32 0.5, %v3240_v12  ;;  %v3244_v28 = vadd.f32 1.0, %v4390_v38  ;;  %v4392_v50 = vpop.eup %4391  ;;  %v8030_v12 = vld [vmem:[#allocation206_spill] sm:$0xff]  ;;  %v8031_v38 = vld [vmem:[#allocation207_spill] sm:$0xff] }
 0x479   : > { %v4394_v11 = vpop.eup %4393 }
 0x47a   : > { %v3245_v27 = vmul.f32 0.5, %v3244_v28  ;;  %v3252_v6 = vmul.f32 %v4392_v50, %v3241_v13  ;;  %v3249_v22 = vadd.f32 1.0, %v4394_v11  ;;  %v8032_v13 = vld [vmem:[#allocation208_spill] sm:$0xff]  ;;  %v8033_v28 = vld [vmem:[#allocation209_spill] sm:$0xff] }
 0x47b   : > { %v8036_v50 = vld [vmem:[#allocation212_spill] sm:$0xff] }
 0x47c   : > { %v3251_v23 = vmul.f32 %v3245_v27, %v6532_v51  ;;  %v3250_v18 = vmul.f32 0.5, %v3249_v22  ;;  %v8034_v27 = vld [vmem:[#allocation210_spill] sm:$0xff]  ;;  %v8040_v11 = vld [vmem:[#allocation216_spill] sm:$0xff]  ;;  %v8041_v22 = vld [vmem:[#allocation217_spill] sm:$0xff] }
 0x47e   : > { %v3253_v8 = vadd.f32 %v3252_v6, %v3251_v23  ;;  %v8037_v23 = vld [vmem:[#allocation213_spill] sm:$0xff]  ;;  %v8038_v6 = vld [vmem:[#allocation214_spill] sm:$0xff] }
 0x480   : > { %4395 = vtanh.f32 %v3253_v8  ;;  %v6717_v7 = vsel %vm3266_vm3, %v3253_v8, %v6532_v51  ;;  %v8027_v51 = vld [vmem:[#allocation203_spill] sm:$0xff] }
 0x481   : > { %v8039_v8 = vld [vmem:[#allocation215_spill] sm:$0xff] }
 0x48d   : > { %v4396_v34 = vpop.eup %4395 }
 0x48e   : > { %v3255_v45 = vmul.f32 %v4396_v34, %v3250_v18  ;;  %v8042_v18 = vld [vmem:[#allocation218_spill] sm:$0xff]  ;;  %v8043_v34 = vld [vmem:[#allocation219_spill] sm:$0xff] }
 0x490   : > { %v6725_v52 = vsel %vm3266_vm3, %v3255_v45, %v6540_v58  ;;  %v8028_v58 = vld [vmem:[#allocation204_spill] sm:$0xff] }
 0x491   : > { %v3273_v43 = vpack.c.bf16 %v6725_v52, %v6725_v52  ;;  %v8044_v45 = vld [vmem:[#allocation220_spill] sm:$0xff] }
 0x493   : > { %3276 = vst [vmem:[%s3275_s14] sm:$0xf] %v3273_v43  ;;  %3310 = vmatprep.mubr.bf16.mxu0 %v3273_v43  ;;  %3351 = vmatprep.mubr.bf16.mxu1 %v3273_v43  ;;  %s3777_s14 = scalar_select %p3775_p6, 1, 0 }
 0x494   : > { %3311 = vmatmul.mubr.bf16.vlgmr.msra.gmra.mxu0 %v6701_v33  ;;  %3352 = vmatmul.mubr.bf16.vlgmr.msra.gmra.mxu1 %v6701_v33 }
 0x495   : > { %3361 = vmatpush1.bf16.msra.mxu0 %v7931_v59  ;;  %3402 = vmatpush1.bf16.msra.mxu1 %v6064_v46 }
 0x496   : > { %3392 = vmatprep.mubr.bf16.mxu0 %v3273_v43  ;;  %3433 = vmatprep.mubr.bf16.mxu1 %v3273_v43  ;;  %v8045_v43 = vld [vmem:[#allocation221_spill] sm:$0xff] }
 0x497   : > { %3362 = vmatprep.subr.bf16.mxu0 %v7932_v61  ;;  %3403 = vmatprep.subr.bf16.mxu1 %v7933_v10 }
 0x499   : > { %3363 = vmatpush1.bf16.msra.mxu0 %v7934_v1  ;;  %3404 = vmatpush1.bf16.msra.mxu1 %v7935_v37 }
 0x49a   : > { %3364 = vmatprep.subr.bf16.mxu0 %v7936_v54  ;;  %3405 = vmatprep.subr.bf16.mxu1 %v8027_v51 }
 0x49d   : > { %3365 = vmatpush1.bf16.msra.mxu0 %v8028_v58  ;;  %3406 = vmatpush1.bf16.msra.mxu1 %v8029_v56 }
 0x49e   : > { %3366 = vmatprep.subr.bf16.mxu0 %v8030_v12  ;;  %3407 = vmatprep.subr.bf16.mxu1 %v8031_v38 }
 0x4a1   : > { %3367 = vmatpush1.bf16.msra.mxu0 %v8032_v13  ;;  %3408 = vmatpush1.bf16.msra.mxu1 %v8033_v28 }
 0x4a2   : > { %3368 = vmatprep.subr.bf16.mxu0 %v8034_v27  ;;  %3409 = vmatprep.subr.bf16.mxu1 %v8035_v36  ;;  %v8046_v36 = vld [vmem:[#allocation222_spill] sm:$0xff] }
 0x4a5   : > { %3369 = vmatpush1.bf16.msra.mxu0 %v8036_v50  ;;  %3410 = vmatpush1.bf16.msra.mxu1 %v8037_v23  ;;  %v8047_v50 = vld [vmem:[#allocation223_spill] sm:$0xff]  ;;  %v8048_v23 = vld [vmem:[#allocation224_spill] sm:$0xff] }
 0x4a6   : > { %3370 = vmatprep.subr.bf16.mxu0 %v8038_v6  ;;  %3411 = vmatprep.subr.bf16.mxu1 %v8039_v8  ;;  %v8049_v6 = vld [vmem:[#allocation225_spill] sm:$0xff]  ;;  %v8050_v8 = vld [vmem:[#allocation226_spill] sm:$0xff] }
 0x4a9   : > { %3371 = vmatpush1.bf16.msra.mxu0 %v8040_v11  ;;  %3412 = vmatpush1.bf16.msra.mxu1 %v8041_v22  ;;  %v8051_v11 = vld [vmem:[#allocation227_spill] sm:$0xff]  ;;  %v8052_v22 = vld [vmem:[#allocation228_spill] sm:$0xff] }
 0x4aa   : > { %3372 = vmatprep.subr.bf16.mxu0 %v8042_v18  ;;  %3413 = vmatprep.subr.bf16.mxu1 %v8043_v34  ;;  %v8053_v18 = vld [vmem:[#allocation229_spill] sm:$0xff]  ;;  %v8054_v34 = vld [vmem:[#allocation230_spill] sm:$0xff] }
 0x4ad   : > { %3373 = vmatpush1.bf16.msra.mxu0 %v8044_v45  ;;  %3414 = vmatpush1.bf16.msra.mxu1 %v8045_v43  ;;  %v8055_v45 = vld [vmem:[#allocation231_spill] sm:$0xff]  ;;  %v8056_v43 = vld [vmem:[#allocation232_spill] sm:$0xff] }
 0x4ae   : > { %3374 = vmatprep.subr.bf16.mxu0 %v8046_v36  ;;  %3415 = vmatprep.subr.bf16.mxu1 %v8047_v50  ;;  %v8057_v36 = vld [vmem:[#allocation233_spill] sm:$0xff]  ;;  %v8058_v50 = vld [vmem:[#allocation234_spill] sm:$0xff] }
 0x4b1   : > { %3375 = vmatpush1.bf16.msra.mxu0 %v8048_v23  ;;  %3416 = vmatpush1.bf16.msra.mxu1 %v8049_v6  ;;  %v8059_v23 = vld [vmem:[#allocation235_spill] sm:$0xff]  ;;  %v8060_v6 = vld [vmem:[#allocation236_spill] sm:$0xff] }
 0x4b2   : > { %3376 = vmatprep.subr.bf16.mxu0 %v8050_v8  ;;  %3417 = vmatprep.subr.bf16.mxu1 %v8051_v11  ;;  %v8061_v8 = vld [vmem:[#allocation237_spill] sm:$0xff] }
 0x4b5   : > { %3377 = vmatpush2.bf16.msra.mxu0 %v8052_v22  ;;  %3418 = vmatpush2.bf16.msra.mxu1 %v8053_v18 }
 0x4b6   : > { %3378 = vmatprep.subr.bf16.mxu0 %v8054_v34  ;;  %3419 = vmatprep.subr.bf16.mxu1 %v8055_v45 }
 0x4b9   : > { %3379 = vmatpush2.bf16.msra.mxu0 %v8056_v43  ;;  %3420 = vmatpush2.bf16.msra.mxu1 %v8057_v36 }
 0x4ba   : > { %3380 = vmatprep.subr.bf16.mxu0 %v8058_v50  ;;  %3421 = vmatprep.subr.bf16.mxu1 %v8059_v23 }
 0x4bd   : > { %3381 = vmatpush2.bf16.msra.mxu0 %v8060_v6  ;;  %3422 = vmatpush2.bf16.msra.mxu1 %v8061_v8 }
 0x4be   : > { %3382 = vmatprep.subr.bf16.mxu0 %v7972_v24  ;;  %3423 = vmatprep.subr.bf16.mxu1 %v7973_v14 }
 0x4c1   : > { %3383 = vmatpush2.bf16.msra.mxu0 %v7974_v40  ;;  %3424 = vmatpush2.bf16.msra.mxu1 %v7975_v44 }
 0x4c2   : > { %3384 = vmatprep.subr.bf16.mxu0 %v7976_v32  ;;  %3425 = vmatprep.subr.bf16.mxu1 %v7977_v42 }
 0x4c5   : > { %3385 = vmatpush2.bf16.msra.mxu0 %v7978_v62  ;;  %3426 = vmatpush2.bf16.msra.mxu1 %v7979_v47 }
 0x4c6   : > { %3386 = vmatprep.subr.bf16.mxu0 %v7980_v55  ;;  %3427 = vmatprep.subr.bf16.mxu1 %v7981_v4 }
 0x4c9   : > { %3387 = vmatpush2.bf16.msra.mxu0 %v7982_v41  ;;  %3428 = vmatpush2.bf16.msra.mxu1 %v6328_v31  ;;  %v3453_v31 = vld [vmem:[%s3449_s17 + $0x18] sm:$0xff] }
 0x4ca   : > { %3388 = vmatprep.subr.bf16.mxu0 %v6334_v48  ;;  %3429 = vmatprep.subr.bf16.mxu1 %v6338_v21 }
 0x4cd   : > { %3389 = vmatpush2.bf16.msra.mxu0 %v6344_v17  ;;  %3430 = vmatpush2.bf16.msra.mxu1 %v6348_v26 }
 0x4ce   : > { %3390 = vmatprep.subr.bf16.mxu0 %v6354_v60  ;;  %3431 = vmatprep.subr.bf16.mxu1 %v6358_v19 }
 0x4d1   : > { %3391 = vmatpush2.bf16.msra.mxu0 %v6364_v3  ;;  %3432 = vmatpush2.bf16.msra.mxu1 %v6368_v20  ;;  %v8064_v20 = vld [vmem:[#allocation142_spill] sm:$0xff] }
 0x4d2   : > { %3537 = vmatprep.subr.bf16.mxu0 %v5722_v63  ;;  %3578 = vmatprep.subr.bf16.mxu1 %v5730_v5  ;;  %v8062_v63 = vld [vmem:[#allocation140_spill] sm:$0xff]  ;;  %v8063_v5 = vld [vmem:[#allocation141_spill] sm:$0xff] }
 0x4d4   : > { %3393 = vmatmul.mubr.bf16.vlgmr.msra.gmra.mxu0 %v6701_v33  ;;  %3434 = vmatmul.mubr.bf16.vlgmr.msra.gmra.mxu1 %v6701_v33  ;;  %v8065_v33 = vld [vmem:[#allocation143_spill] sm:$0xff] }
 0x4d5   : > { %3538 = vmatpush1.bf16.msra.mxu0 %v5726_v57  ;;  %3579 = vmatpush1.bf16.msra.mxu1 %v5734_v53  ;;  %v8066_v57 = vld [vmem:[#allocation144_spill] sm:$0xff]  ;;  %v8067_v53 = vld [vmem:[#allocation145_spill] sm:$0xff] }
 0x4d6   : > { %3539 = vmatprep.subr.bf16.mxu0 %v5738_v9  ;;  %3580 = vmatprep.subr.bf16.mxu1 %v5742_v25  ;;  %v8068_v9 = vld [vmem:[#allocation146_spill] sm:$0xff]  ;;  %v8069_v25 = vld [vmem:[#allocation147_spill] sm:$0xff] }
 0x4d9   : > { %3540 = vmatpush1.bf16.msra.mxu0 %v5750_v15  ;;  %3581 = vmatpush1.bf16.msra.mxu1 %v5754_v0  ;;  %v8070_v15 = vld [vmem:[#allocation148_spill] sm:$0xff]  ;;  %v8071_v0 = vld [vmem:[#allocation149_spill] sm:$0xff] }
 0x4da   : > { %3541 = vmatprep.subr.bf16.mxu0 %v5760_v16  ;;  %3582 = vmatprep.subr.bf16.mxu1 %v8062_v63  ;;  %v8072_v16 = vld [vmem:[#allocation150_spill] sm:$0xff]  ;;  %v8073_v63 = vld [vmem:[#allocation151_spill] sm:$0xff] }
 0x4dd   : > { %3542 = vmatpush1.bf16.msra.mxu0 %v8063_v5  ;;  %3583 = vmatpush1.bf16.msra.mxu1 %v8064_v20  ;;  %v8074_v5 = vld [vmem:[#allocation152_spill] sm:$0xff]  ;;  %v8075_v20 = vld [vmem:[#allocation153_spill] sm:$0xff] }
 0x4de   : > { %3543 = vmatprep.subr.bf16.mxu0 %v8065_v33  ;;  %3584 = vmatprep.subr.bf16.mxu1 %v8066_v57  ;;  %v8076_v33 = vld [vmem:[#allocation154_spill] sm:$0xff]  ;;  %v8077_v57 = vld [vmem:[#allocation155_spill] sm:$0xff] }
 0x4e1   : > { %3544 = vmatpush1.bf16.msra.mxu0 %v8067_v53  ;;  %3585 = vmatpush1.bf16.msra.mxu1 %v8068_v9  ;;  %v8078_v53 = vld [vmem:[#allocation156_spill] sm:$0xff]  ;;  %v8079_v9 = vld [vmem:[#allocation157_spill] sm:$0xff] }
 0x4e2   : > { %3545 = vmatprep.subr.bf16.mxu0 %v8069_v25  ;;  %3586 = vmatprep.subr.bf16.mxu1 %v8070_v15  ;;  %v8080_v25 = vld [vmem:[#allocation158_spill] sm:$0xff]  ;;  %v8081_v15 = vld [vmem:[#allocation159_spill] sm:$0xff] }
 0x4e5   : > { %3546 = vmatpush1.bf16.msra.mxu0 %v8071_v0  ;;  %3587 = vmatpush1.bf16.msra.mxu1 %v8072_v16  ;;  %v8082_v0 = vld [vmem:[#allocation160_spill] sm:$0xff]  ;;  %v8083_v16 = vld [vmem:[#allocation161_spill] sm:$0xff] }
 0x4e6   : > { %3547 = vmatprep.subr.bf16.mxu0 %v8073_v63  ;;  %3588 = vmatprep.subr.bf16.mxu1 %v8074_v5  ;;  %v8084_v63 = vld [vmem:[#allocation162_spill] sm:$0xff]  ;;  %v8085_v5 = vld [vmem:[#allocation163_spill] sm:$0xff] }
 0x4e9   : > { %3548 = vmatpush1.bf16.msra.mxu0 %v8075_v20  ;;  %3589 = vmatpush1.bf16.msra.mxu1 %v8076_v33  ;;  %v8086_v20 = vld [vmem:[#allocation164_spill] sm:$0xff]  ;;  %v8087_v33 = vld [vmem:[#allocation165_spill] sm:$0xff] }
 0x4ea   : > { %3549 = vmatprep.subr.bf16.mxu0 %v8077_v57  ;;  %3590 = vmatprep.subr.bf16.mxu1 %v8078_v53  ;;  %v8088_v57 = vld [vmem:[#allocation166_spill] sm:$0xff]  ;;  %v8089_v53 = vld [vmem:[#allocation167_spill] sm:$0xff] }
 0x4ed   : > { %3550 = vmatpush1.bf16.msra.mxu0 %v8079_v9  ;;  %3591 = vmatpush1.bf16.msra.mxu1 %v8080_v25  ;;  %v8090_v9 = vld [vmem:[#allocation168_spill] sm:$0xff]  ;;  %v8091_v25 = vld [vmem:[#allocation169_spill] sm:$0xff] }
 0x4ee   : > { %3551 = vmatprep.subr.bf16.mxu0 %v8081_v15  ;;  %3592 = vmatprep.subr.bf16.mxu1 %v8082_v0  ;;  %v8092_v15 = vld [vmem:[#allocation170_spill] sm:$0xff]  ;;  %v8093_v0 = vld [vmem:[#allocation171_spill] sm:$0xff] }
 0x4f1   : > { %3552 = vmatpush1.bf16.msra.mxu0 %v8083_v16  ;;  %3593 = vmatpush1.bf16.msra.mxu1 %v8084_v63  ;;  %v8094_v16 = vld [vmem:[#allocation172_spill] sm:$0xff]  ;;  %v8095_v63 = vld [vmem:[#allocation173_spill] sm:$0xff] }
 0x4f2   : > { %3553 = vmatprep.subr.bf16.mxu0 %v8085_v5  ;;  %3594 = vmatprep.subr.bf16.mxu1 %v8086_v20  ;;  %v8096_v5 = vld [vmem:[#allocation174_spill] sm:$0xff]  ;;  %v8097_v20 = vld [vmem:[#allocation175_spill] sm:$0xff] }
 0x4f5   : > { %3554 = vmatpush2.bf16.msra.mxu0 %v8087_v33  ;;  %3595 = vmatpush2.bf16.msra.mxu1 %v8088_v57  ;;  %v8098_v33 = vld [vmem:[#allocation176_spill] sm:$0xff]  ;;  %v8099_v57 = vld [vmem:[#allocation177_spill] sm:$0xff] }
 0x4f6   : > { %3555 = vmatprep.subr.bf16.mxu0 %v8089_v53  ;;  %3596 = vmatprep.subr.bf16.mxu1 %v8090_v9  ;;  %v8100_v53 = vld [vmem:[#allocation178_spill] sm:$0xff]  ;;  %v8101_v9 = vld [vmem:[#allocation179_spill] sm:$0xff] }
 0x4f9   : > { %3556 = vmatpush2.bf16.msra.mxu0 %v8091_v25  ;;  %3597 = vmatpush2.bf16.msra.mxu1 %v8092_v15  ;;  %v8102_v25 = vld [vmem:[#allocation180_spill] sm:$0xff]  ;;  %v8103_v15 = vld [vmem:[#allocation181_spill] sm:$0xff] }
 0x4fa   : > { %3557 = vmatprep.subr.bf16.mxu0 %v8093_v0  ;;  %3598 = vmatprep.subr.bf16.mxu1 %v8094_v16  ;;  %v8104_v0 = vld [vmem:[#allocation182_spill] sm:$0xff]  ;;  %v8105_v16 = vld [vmem:[#allocation183_spill] sm:$0xff] }
 0x4fd   : > { %3558 = vmatpush2.bf16.msra.mxu0 %v8095_v63  ;;  %3599 = vmatpush2.bf16.msra.mxu1 %v8096_v5  ;;  %v8106_v63 = vld [vmem:[#allocation184_spill] sm:$0xff]  ;;  %v8107_v5 = vld [vmem:[#allocation185_spill] sm:$0xff] }
 0x4fe   : > { %3559 = vmatprep.subr.bf16.mxu0 %v8097_v20  ;;  %3600 = vmatprep.subr.bf16.mxu1 %v8098_v33  ;;  %v8108_v20 = vld [vmem:[#allocation186_spill] sm:$0xff]  ;;  %v8109_v33 = vld [vmem:[#allocation187_spill] sm:$0xff] }
 0x501   : > { %3560 = vmatpush2.bf16.msra.mxu0 %v8099_v57  ;;  %3601 = vmatpush2.bf16.msra.mxu1 %v8100_v53  ;;  %v8110_v57 = vld [vmem:[#allocation188_spill] sm:$0xff]  ;;  %v8111_v53 = vld [vmem:[#allocation189_spill] sm:$0xff] }
 0x502   : > { %3561 = vmatprep.subr.bf16.mxu0 %v8101_v9  ;;  %3602 = vmatprep.subr.bf16.mxu1 %v8102_v25  ;;  %v8112_v9 = vld [vmem:[#allocation190_spill] sm:$0xff]  ;;  %v8113_v25 = vld [vmem:[#allocation191_spill] sm:$0xff] }
 0x505   : > { %3562 = vmatpush2.bf16.msra.mxu0 %v8103_v15  ;;  %3603 = vmatpush2.bf16.msra.mxu1 %v8104_v0  ;;  %v8114_v15 = vld [vmem:[#allocation192_spill] sm:$0xff]  ;;  %v8115_v0 = vld [vmem:[#allocation193_spill] sm:$0xff] }
 0x506   : > { %3563 = vmatprep.subr.bf16.mxu0 %v8105_v16  ;;  %3604 = vmatprep.subr.bf16.mxu1 %v8106_v63  ;;  %v8116_v16 = vld [vmem:[#allocation194_spill] sm:$0xff]  ;;  %v8117_v63 = vld [vmem:[#allocation195_spill] sm:$0xff] }
 0x509   : > { %3564 = vmatpush2.bf16.msra.mxu0 %v8107_v5  ;;  %3605 = vmatpush2.bf16.msra.mxu1 %v8108_v20  ;;  %v8118_v5 = vld [vmem:[#allocation196_spill] sm:$0xff]  ;;  %v3450_v20 = vld [vmem:[%s3449_s17] sm:$0xff] }
 0x50a   : > { %3565 = vmatprep.subr.bf16.mxu0 %v8109_v33  ;;  %3606 = vmatprep.subr.bf16.mxu1 %v8110_v57 }
 0x50d   : > { %3566 = vmatpush2.bf16.msra.mxu0 %v8111_v53  ;;  %3607 = vmatpush2.bf16.msra.mxu1 %v8112_v9  ;;  %v3451_v53 = vld [vmem:[%s3449_s17 + $0x8] sm:$0xff] }
 0x50e   : > { %3567 = vmatprep.subr.bf16.mxu0 %v8113_v25  ;;  %3608 = vmatprep.subr.bf16.mxu1 %v8114_v15  ;;  %v3452_v25 = vld [vmem:[%s3449_s17 + $0x10] sm:$0xff]  ;;  %s3789_s17 = scalar_lea.vmem %s7045_s5, %s4225_s15 }
 0x511   : > { %3568 = vmatpush2.bf16.msra.mxu0 %v8115_v0  ;;  %3609 = vmatpush2.bf16.msra.mxu1 %v8116_v16 }
 0x512   : > { %3619 = vmatprep.subr.bf16.mxu0 %v8117_v63  ;;  %3660 = vmatprep.subr.bf16.mxu1 %v8118_v5 }
 0x554   : > { %v3312_v33 = vpop.f32.mrf.mxu0  ;;  %v3353_v57 = vpop.f32.mrf.mxu1 }
 0x555   : > { %v3454_v9 = vadd.f32 %v3450_v20, %v3312_v33  ;;  %v3456_v60 = vadd.f32 %v3452_v25, %v3353_v57  ;;  %v8119_v20 = vld [vmem:[#allocation259_spill] sm:$0xff] }
 0x556   : > { %v3314_v15 = vpop.f32.mrf.mxu0  ;;  %v3355_v0 = vpop.f32.mrf.mxu1 }
 0x557   : > { %v3458_v16 = vadd.f32 %v3454_v9, %v8019_v29  ;;  %v3455_v63 = vadd.f32 %v3451_v53, %v3314_v15  ;;  %v3460_v33 = vadd.f32 %v3456_v60, %v8119_v20  ;;  %v3457_v41 = vadd.f32 %v3453_v31, %v3355_v0  ;;  %v8120_v9 = vld [vmem:[#allocation261_spill] sm:$0xff]  ;;  %v8121_v31 = vld [vmem:[#allocation136_spill] sm:$0xff] }
 0x558   : > { %v3316_v3 = vpop.f32.mrf.mxu0  ;;  %v3357_v5 = vpop.f32.mrf.mxu1  ;;  %v3470_v20 = vld [vmem:[%s3466_s27 + $0x18] sm:$0xff] }
 0x559   : > { %v3479_v19 = vmul.f32 0.5, %v3458_v16  ;;  %v3459_v26 = vadd.f32 %v3455_v63, %v8020_v39  ;;  %v3461_v53 = vadd.f32 %v3457_v41, %v8120_v9 }
 0x55a   : > { %v3317_v17 = vpop.f32.mrf.mxu0  ;;  %v3358_v21 = vpop.f32.mrf.mxu1 }
 0x55b   : > { %4397 = vtanh.f32 %v3479_v19  ;;  %v3483_v48 = vmul.f32 0.5, %v3459_v26  ;;  %v3488_v3 = vmul.f32 0.5, %v3461_v53  ;;  %v3519_v19 = vstv %s3518_s19  ;;  %s7005_s19 = sshll.u32 %s3702_s18, 3 }
 0x55c   : > { %vm3520_vm4 = vcmp.eq.s32.totalorder %v3519_v19, 1  ;;  %v3468_v19 = vld [vmem:[%s3466_s27 + $0x8] sm:$0xff]  ;;  %s3721_s20 = sshra.s32 %s7005_s19, 3 }
 0x55d   : > { %4399 = vtanh.f32 %v3483_v48  ;;  %s4240_s21 = sshll.u32 %s3721_s20, 5  ;;  %s4226_s28 = sshll.u32 %s3721_s20, 2 }
 0x55e   : > { %4401 = vtanh.f32 %v3460_v33  ;;  %s3725_s22 = scalar_lea.vmem [#allocation3], %s4240_s21  ;;  %s3793_s1 = scalar_lea.vmem %s7046_s6, %s4226_s28 }
 0x55f   : > { %4403 = vtanh.f32 %v3488_v3  ;;  %v8123_v3 = vld [vmem:[#allocation137_spill] sm:$0xff] }
 0x568   : > { %v4398_v15 = vpop.eup %4397 }
 0x569   : > { %v3481_v57 = vadd.f32 1.0, %v4398_v15 }
 0x56a   : > { %v4400_v25 = vpop.eup %4399 }
 0x56b   : > { %v3482_v17 = vmul.f32 0.5, %v3481_v57  ;;  %v3485_v21 = vadd.f32 1.0, %v4400_v25  ;;  %v4402_v60 = vpop.eup %4401 }
 0x56c   : > { %v4404_v63 = vpop.eup %4403 }
 0x56d   : > { %v3486_v26 = vmul.f32 0.5, %v3485_v21  ;;  %v3493_v0 = vmul.f32 %v4402_v60, %v3482_v17  ;;  %v3490_v5 = vadd.f32 1.0, %v4404_v63  ;;  %v3467_v17 = vld [vmem:[%s3466_s27] sm:$0xff] }
 0x56f   : > { %v3492_v48 = vmul.f32 %v3486_v26, %v8121_v31  ;;  %v3491_v33 = vmul.f32 0.5, %v3490_v5 }
 0x571   : > { %v3494_v41 = vadd.f32 %v3493_v0, %v3492_v48 }
 0x573   : > { %4405 = vtanh.f32 %v3494_v41  ;;  %v6874_v16 = vsel %vm3520_vm4, %v3494_v41, %v8121_v31  ;;  %v3469_v31 = vld [vmem:[%s3466_s27 + $0x10] sm:$0xff] }
 0x574   : > { %8122 = vst [vmem:[#allocation197_spill] sm:$0xff] %v6874_v16 }
 0x580   : > { %v4406_v53 = vpop.eup %4405 }
 0x581   : > { %v3496_v15 = vmul.f32 %v4406_v53, %v3491_v33 }
 0x583   : > { %v6882_v57 = vsel %vm3520_vm4, %v3496_v15, %v8123_v3 }
 0x584   : > { %8124 = vst [vmem:[#allocation198_spill] sm:$0xff] %v6882_v57  ;;  %v6886_v25 = vpack.c.bf16 %v6882_v57, %v6882_v57 }
 0x586   : > { %3531 = vst [vmem:[%s3530_s23] sm:$0xf] %v6886_v25  ;;  %s3782_s23 = scalar_select %p3776_p7, 1, 0 }
 0x594   : > { %v3394_v21 = vpop.f32.mrf.mxu0  ;;  %v3435_v26 = vpop.f32.mrf.mxu1 }
 0x595   : > { %v3471_v60 = vadd.f32 %v3467_v17, %v3394_v21  ;;  %v3473_v15 = vadd.f32 %v3469_v31, %v3435_v26 }
 0x596   : > { %v3396_v48 = vpop.f32.mrf.mxu0  ;;  %v3437_v0 = vpop.f32.mrf.mxu1 }
 0x597   : > { %v3475_v41 = vadd.f32 %v3471_v60, %v6508_v35  ;;  %v3472_v63 = vadd.f32 %v3468_v19, %v3396_v48  ;;  %v3477_v17 = vadd.f32 %v3473_v15, %v6519_v2  ;;  %v3474_v21 = vadd.f32 %v3470_v20, %v3437_v0 }
 0x598   : > { %v3398_v5 = vpop.f32.mrf.mxu0  ;;  %v3439_v33 = vpop.f32.mrf.mxu1 }
 0x599   : > { %v3497_v53 = vmul.f32 0.5, %v3475_v41  ;;  %v3476_v3 = vadd.f32 %v3472_v63, %v6513_v49  ;;  %v3478_v60 = vadd.f32 %v3474_v21, %v6526_v30  ;;  %v3524_v63 = vstv %s3523_s29 }
 0x59a   : > { %v3399_v57 = vpop.f32.mrf.mxu0  ;;  %v3440_v16 = vpop.f32.mrf.mxu1  ;;  %vm3525_vm5 = vcmp.eq.s32.totalorder %v3524_v63, 1  ;;  %v8151_v63 = vld [vmem:[#allocation259_spill] sm:$0xff] }
 0x59b   : > { %4407 = vtanh.f32 %v3497_v53  ;;  %v3501_v9 = vmul.f32 0.5, %v3476_v3  ;;  %v3506_v19 = vmul.f32 0.5, %v3478_v60 }
 0x59d   : > { %4409 = vtanh.f32 %v3501_v9 }
 0x59e   : > { %4411 = vtanh.f32 %v3477_v17 }
 0x59f   : > { %4413 = vtanh.f32 %v3506_v19 }
 0x5a8   : > { %v4408_v48 = vpop.eup %4407 }
 0x5a9   : > { %v3499_v41 = vadd.f32 1.0, %v4408_v48 }
 0x5aa   : > { %v4410_v26 = vpop.eup %4409 }
 0x5ab   : > { %v3500_v31 = vmul.f32 0.5, %v3499_v41  ;;  %v3503_v16 = vadd.f32 1.0, %v4410_v26  ;;  %v4412_v5 = vpop.eup %4411 }
 0x5ac   : > { %v4414_v53 = vpop.eup %4413 }
 0x5ad   : > { %v3504_v57 = vmul.f32 0.5, %v3503_v16  ;;  %v3511_v20 = vmul.f32 %v4412_v5, %v3500_v31  ;;  %v3508_v15 = vadd.f32 1.0, %v4414_v53 }
 0x5af   : > { %v3510_v9 = vmul.f32 %v3504_v57, %v6717_v7  ;;  %v3509_v3 = vmul.f32 0.5, %v3508_v15  ;;  %v3712_v57 = vld [vmem:[%s3708_s13 + $0x18] sm:$0xff] }
 0x5b1   : > { %v3512_v0 = vadd.f32 %v3511_v20, %v3510_v9 }
 0x5b3   : > { %4415 = vtanh.f32 %v3512_v0  ;;  %v6902_v33 = vsel %vm3525_vm5, %v3512_v0, %v6717_v7  ;;  %v8132_v7 = vld [vmem:[#allocation218_spill] sm:$0xff] }
 0x5c0   : > { %v4416_v17 = vpop.eup %4415 }
 0x5c1   : > { %v3514_v21 = vmul.f32 %v4416_v17, %v3509_v3 }
 0x5c3   : > { %v6910_v60 = vsel %vm3525_vm5, %v3514_v21, %v6725_v52  ;;  %v8133_v52 = vld [vmem:[#allocation219_spill] sm:$0xff] }
 0x5c4   : > { %v3532_v19 = vpack.c.bf16 %v6910_v60, %v6910_v60 }
 0x5c6   : > { %3535 = vst [vmem:[%s3534_s10] sm:$0xf] %v3532_v19  ;;  %3569 = vmatprep.mubr.bf16.mxu0 %v3532_v19  ;;  %3610 = vmatprep.mubr.bf16.mxu1 %v3532_v19 }
 0x5c7   : > { %3570 = vmatmul.mubr.bf16.vlgmr.msra.gmra.mxu0 %v6886_v25  ;;  %3611 = vmatmul.mubr.bf16.vlgmr.msra.gmra.mxu1 %v6886_v25 }
 0x5c8   : > { %3620 = vmatpush1.bf16.msra.mxu0 %v7931_v59  ;;  %3661 = vmatpush1.bf16.msra.mxu1 %v6064_v46  ;;  %v8125_v46 = vld [vmem:[#allocation211_spill] sm:$0xff]  ;;  %v8126_v59 = vld [vmem:[#allocation212_spill] sm:$0xff] }
 0x5c9   : > { %3651 = vmatprep.mubr.bf16.mxu0 %v3532_v19  ;;  %3692 = vmatprep.mubr.bf16.mxu1 %v3532_v19  ;;  %v3778_v19 = vstv %s3777_s14 }
 0x5ca   : > { %3621 = vmatprep.subr.bf16.mxu0 %v7932_v61  ;;  %3662 = vmatprep.subr.bf16.mxu1 %v7933_v10  ;;  %v8127_v61 = vld [vmem:[#allocation213_spill] sm:$0xff]  ;;  %v8128_v10 = vld [vmem:[#allocation214_spill] sm:$0xff]  ;;  %vm3779_vm6 = vcmp.eq.s32.totalorder %v3778_v19, 1 }
 0x5cc   : > { %3622 = vmatpush1.bf16.msra.mxu0 %v7934_v1  ;;  %3663 = vmatpush1.bf16.msra.mxu1 %v7935_v37  ;;  %v8129_v1 = vld [vmem:[#allocation215_spill] sm:$0xff]  ;;  %v8130_v37 = vld [vmem:[#allocation216_spill] sm:$0xff] }
 0x5cd   : > { %3623 = vmatprep.subr.bf16.mxu0 %v7936_v54  ;;  %3664 = vmatprep.subr.bf16.mxu1 %v8027_v51  ;;  %v8131_v54 = vld [vmem:[#allocation217_spill] sm:$0xff]  ;;  %v8134_v51 = vld [vmem:[#allocation220_spill] sm:$0xff] }
 0x5d0   : > { %3624 = vmatpush1.bf16.msra.mxu0 %v8028_v58  ;;  %3665 = vmatpush1.bf16.msra.mxu1 %v8029_v56  ;;  %v8135_v58 = vld [vmem:[#allocation221_spill] sm:$0xff]  ;;  %v8136_v56 = vld [vmem:[#allocation222_spill] sm:$0xff] }
 0x5d1   : > { %3625 = vmatprep.subr.bf16.mxu0 %v8030_v12  ;;  %3666 = vmatprep.subr.bf16.mxu1 %v8031_v38  ;;  %v8137_v12 = vld [vmem:[#allocation223_spill] sm:$0xff]  ;;  %v8138_v38 = vld [vmem:[#allocation224_spill] sm:$0xff] }
 0x5d4   : > { %3626 = vmatpush1.bf16.msra.mxu0 %v8032_v13  ;;  %3667 = vmatpush1.bf16.msra.mxu1 %v8033_v28  ;;  %v8139_v13 = vld [vmem:[#allocation225_spill] sm:$0xff]  ;;  %v8140_v28 = vld [vmem:[#allocation226_spill] sm:$0xff] }
 0x5d5   : > { %3627 = vmatprep.subr.bf16.mxu0 %v8034_v27  ;;  %3668 = vmatprep.subr.bf16.mxu1 %v8125_v46  ;;  %v8148_v27 = vld [vmem:[#allocation255_spill] sm:$0xff] }
 0x5d8   : > { %3628 = vmatpush1.bf16.msra.mxu0 %v8126_v59  ;;  %3669 = vmatpush1.bf16.msra.mxu1 %v8127_v61  ;;  %v8153_v59 = vld [vmem:[#allocation197_spill] sm:$0xff] }
 0x5d9   : > { %3629 = vmatprep.subr.bf16.mxu0 %v8128_v10  ;;  %3670 = vmatprep.subr.bf16.mxu1 %v8129_v1 }
 0x5dc   : > { %3630 = vmatpush1.bf16.msra.mxu0 %v8130_v37  ;;  %3671 = vmatpush1.bf16.msra.mxu1 %v8131_v54 }
 0x5dd   : > { %3631 = vmatprep.subr.bf16.mxu0 %v8132_v7  ;;  %3672 = vmatprep.subr.bf16.mxu1 %v8133_v52 }
 0x5e0   : > { %3632 = vmatpush1.bf16.msra.mxu0 %v8134_v51  ;;  %3673 = vmatpush1.bf16.msra.mxu1 %v8135_v58 }
 0x5e1   : > { %3633 = vmatprep.subr.bf16.mxu0 %v8136_v56  ;;  %3674 = vmatprep.subr.bf16.mxu1 %v8137_v12  ;;  %v8154_v56 = vld [vmem:[#allocation198_spill] sm:$0xff] }
 0x5e4   : > { %3634 = vmatpush1.bf16.msra.mxu0 %v8138_v38  ;;  %3675 = vmatpush1.bf16.msra.mxu1 %v8139_v13  ;;  %v3726_v13 = vld [vmem:[%s3725_s22] sm:$0xff] }
 0x5e5   : > { %3635 = vmatprep.subr.bf16.mxu0 %v8140_v28  ;;  %3676 = vmatprep.subr.bf16.mxu1 %v8051_v11 }
 0x5e8   : > { %3636 = vmatpush2.bf16.msra.mxu0 %v8052_v22  ;;  %3677 = vmatpush2.bf16.msra.mxu1 %v8053_v18 }
 0x5e9   : > { %3637 = vmatprep.subr.bf16.mxu0 %v8054_v34  ;;  %3678 = vmatprep.subr.bf16.mxu1 %v8055_v45 }
 0x5ec   : > { %3638 = vmatpush2.bf16.msra.mxu0 %v8056_v43  ;;  %3679 = vmatpush2.bf16.msra.mxu1 %v8057_v36 }
 0x5ed   : > { %3639 = vmatprep.subr.bf16.mxu0 %v8058_v50  ;;  %3680 = vmatprep.subr.bf16.mxu1 %v8059_v23  ;;  %v3710_v23 = vld [vmem:[%s3708_s13 + $0x8] sm:$0xff] }
 0x5f0   : > { %3640 = vmatpush2.bf16.msra.mxu0 %v8060_v6  ;;  %3681 = vmatpush2.bf16.msra.mxu1 %v8061_v8  ;;  %v3711_v8 = vld [vmem:[%s3708_s13 + $0x10] sm:$0xff] }
 0x5f1   : > { %3641 = vmatprep.subr.bf16.mxu0 %v7972_v24  ;;  %3682 = vmatprep.subr.bf16.mxu1 %v7973_v14  ;;  %v8141_v24 = vld [vmem:[#allocation248_spill] sm:$0xff]  ;;  %v8142_v14 = vld [vmem:[#allocation249_spill] sm:$0xff] }
 0x5f4   : > { %3642 = vmatpush2.bf16.msra.mxu0 %v7974_v40  ;;  %3683 = vmatpush2.bf16.msra.mxu1 %v7975_v44  ;;  %v8143_v40 = vld [vmem:[#allocation250_spill] sm:$0xff]  ;;  %v8144_v44 = vld [vmem:[#allocation251_spill] sm:$0xff] }
 0x5f5   : > { %3643 = vmatprep.subr.bf16.mxu0 %v7976_v32  ;;  %3684 = vmatprep.subr.bf16.mxu1 %v7977_v42  ;;  %v8145_v32 = vld [vmem:[#allocation252_spill] sm:$0xff]  ;;  %v8146_v42 = vld [vmem:[#allocation253_spill] sm:$0xff] }
 0x5f8   : > { %3644 = vmatpush2.bf16.msra.mxu0 %v7978_v62  ;;  %3685 = vmatpush2.bf16.msra.mxu1 %v7979_v47  ;;  %v8147_v62 = vld [vmem:[#allocation254_spill] sm:$0xff]  ;;  %v8149_v47 = vld [vmem:[#allocation256_spill] sm:$0xff] }
 0x5f9   : > { %3645 = vmatprep.subr.bf16.mxu0 %v7980_v55  ;;  %3686 = vmatprep.subr.bf16.mxu1 %v7981_v4  ;;  %v8150_v55 = vld [vmem:[#allocation257_spill] sm:$0xff]  ;;  %v3709_v4 = vld [vmem:[%s3708_s13] sm:$0xff] }
 0x5fc   : > { %3646 = vmatpush2.bf16.msra.mxu0 %v8141_v24  ;;  %3687 = vmatpush2.bf16.msra.mxu1 %v8142_v14 }
 0x5fd   : > { %3647 = vmatprep.subr.bf16.mxu0 %v8143_v40  ;;  %3688 = vmatprep.subr.bf16.mxu1 %v8144_v44  ;;  %v3727_v40 = vld [vmem:[%s3725_s22 + $0x8] sm:$0xff] }
 0x600   : > { %3648 = vmatpush2.bf16.msra.mxu0 %v8145_v32  ;;  %3689 = vmatpush2.bf16.msra.mxu1 %v8146_v42  ;;  %v3728_v32 = vld [vmem:[%s3725_s22 + $0x10] sm:$0xff] }
 0x601   : > { %3649 = vmatprep.subr.bf16.mxu0 %v8147_v62  ;;  %3690 = vmatprep.subr.bf16.mxu1 %v8148_v27 }
 0x604   : > { %3650 = vmatpush2.bf16.msra.mxu0 %v8149_v47  ;;  %3691 = vmatpush2.bf16.msra.mxu1 %v8150_v55 }
 0x607   : > { %3652 = vmatmul.mubr.bf16.vlgmr.msra.gmra.mxu0 %v6886_v25  ;;  %3693 = vmatmul.mubr.bf16.vlgmr.msra.gmra.mxu1 %v6886_v25 }
 0x687   : > { %v3571_v36 = vpop.f32.mrf.mxu0  ;;  %v3612_v50 = vpop.f32.mrf.mxu1 }
 0x688   : > { %v3713_v6 = vadd.f32 %v3709_v4, %v3571_v36  ;;  %v3715_v48 = vadd.f32 %v3711_v8, %v3612_v50 }
 0x689   : > { %v3573_v11 = vpop.f32.mrf.mxu0  ;;  %v3614_v22 = vpop.f32.mrf.mxu1 }
 0x68a   : > { %v3717_v18 = vadd.f32 %v3713_v6, %v8019_v29  ;;  %v3714_v34 = vadd.f32 %v3710_v23, %v3573_v11  ;;  %v3719_v5 = vadd.f32 %v3715_v48, %v8151_v63  ;;  %v3716_v9 = vadd.f32 %v3712_v57, %v3614_v22  ;;  %v8152_v29 = vld [vmem:[#allocation261_spill] sm:$0xff] }
 0x68b   : > { %v3575_v45 = vpop.f32.mrf.mxu0  ;;  %v3616_v43 = vpop.f32.mrf.mxu1  ;;  %v3729_v11 = vld [vmem:[%s3725_s22 + $0x18] sm:$0xff] }
 0x68c   : > { %v3738_v25 = vmul.f32 0.5, %v3717_v18  ;;  %v3718_v41 = vadd.f32 %v3714_v34, %v8020_v39  ;;  %v3720_v20 = vadd.f32 %v3716_v9, %v8152_v29 }
 0x68d   : > { %v3576_v26 = vpop.f32.mrf.mxu0  ;;  %v3617_v31 = vpop.f32.mrf.mxu1 }
 0x68e   : > { %4417 = vtanh.f32 %v3738_v25  ;;  %v3742_v16 = vmul.f32 0.5, %v3718_v41  ;;  %v3747_v0 = vmul.f32 0.5, %v3720_v20  ;;  %v3783_v26 = vstv %s3782_s23 }
 0x68f   : > { %vm3784_vm7 = vcmp.eq.s32.totalorder %v3783_v26, 1 }
 0x690   : > { %4419 = vtanh.f32 %v3742_v16 }
 0x691   : > { %4421 = vtanh.f32 %v3719_v5 }
 0x692   : > { %4423 = vtanh.f32 %v3747_v0 }
 0x69b   : > { %v4418_v53 = vpop.eup %4417 }
 0x69c   : > { %v3740_v15 = vadd.f32 1.0, %v4418_v53 }
 0x69d   : > { %v4420_v39 = vpop.eup %4419 }
 0x69e   : > { %v3741_v3 = vmul.f32 0.5, %v3740_v15  ;;  %v3744_v17 = vadd.f32 1.0, %v4420_v39  ;;  %v4422_v46 = vpop.eup %4421 }
 0x69f   : > { %v4424_v37 = vpop.eup %4423 }
 0x6a0   : > { %v3745_v21 = vmul.f32 0.5, %v3744_v17  ;;  %v3752_v10 = vmul.f32 %v4422_v46, %v3741_v3  ;;  %v3749_v54 = vadd.f32 1.0, %v4424_v37 }
 0x6a2   : > { %v3751_v61 = vmul.f32 %v3745_v21, %v8153_v59  ;;  %v3750_v7 = vmul.f32 0.5, %v3749_v54 }
 0x6a4   : > { %v3753_v1 = vadd.f32 %v3752_v10, %v3751_v61 }
 0x6a6   : > { %4425 = vtanh.f32 %v3753_v1  ;;  %v6993_v51 = vsel %vm3779_vm6, %v3753_v1, %v8153_v59  }
 0x6b3   : > { %v4426_v52 = vpop.eup %4425 }
 0x6b4   : > { %v3755_v58 = vmul.f32 %v4426_v52, %v3750_v7 }
 0x6b6   : > { %v7000_v14 = vsel %vm3779_vm6, %v3755_v58, %v8154_v56  }
 0x6b7   : > { %v8155_v12 = vmov %v7000_v14 }
 0x6b8   : > { %v3787_v38 = vpack.c.bf16 %v8155_v12, %v8155_v12  ;;  %3799 = vst [vmem:[%s7047_s7] sm:$0xff] (%p2067_p8), %v8155_v12 }
 0x6ba   : > { %3790 = vst [vmem:[%s3789_s17] sm:$0xf] %v3787_v38 }
 0x6c7   : > { %v3653_v28 = vpop.f32.mrf.mxu0  ;;  %v3694_v24 = vpop.f32.mrf.mxu1 }
 0x6c8   : > { %v3730_v44 = vadd.f32 %v3726_v13, %v3653_v28  ;;  %v3732_v36 = vadd.f32 %v3728_v32, %v3694_v24 }
 0x6c9   : > { %v3655_v14 = vpop.f32.mrf.mxu0  ;;  %v3696_v42 = vpop.f32.mrf.mxu1 }
 0x6ca   : > { %v3734_v62 = vadd.f32 %v3730_v44, %v6508_v35  ;;  %v3731_v27 = vadd.f32 %v3727_v40, %v3655_v14  ;;  %v3736_v22 = vadd.f32 %v3732_v36, %v6519_v2  ;;  %v3733_v18 = vadd.f32 %v3729_v11, %v3696_v42 }
 0x6cb   : > { %v3657_v47 = vpop.f32.mrf.mxu0  ;;  %v3698_v55 = vpop.f32.mrf.mxu1  ;;  %v8158_v14 = vmov %v8155_v12 }
 0x6cc   : > { %v3756_v4 = vmul.f32 0.5, %v3734_v62  ;;  %v3735_v50 = vadd.f32 %v3731_v27, %v6513_v49  ;;  %v3737_v35 = vadd.f32 %v3733_v18, %v6526_v30 }
 0x6cd   : > { %v3658_v23 = vpop.f32.mrf.mxu0  ;;  %v3699_v6 = vpop.f32.mrf.mxu1 }
 0x6ce   : > { %4427 = vtanh.f32 %v3756_v4  ;;  %v3760_v8 = vmul.f32 0.5, %v3735_v50  ;;  %v3765_v34 = vmul.f32 0.5, %v3737_v35 }
 0x6d0   : > { %4429 = vtanh.f32 %v3760_v8 }
 0x6d1   : > { %4431 = vtanh.f32 %v3736_v22 }
 0x6d2   : > { %4433 = vtanh.f32 %v3765_v34 }
 0x6db   : > { %v4428_v45 = vpop.eup %4427 }
 0x6dc   : > { %v3758_v43 = vadd.f32 1.0, %v4428_v45 }
 0x6dd   : > { %v4430_v25 = vpop.eup %4429 }
 0x6de   : > { %v3759_v49 = vmul.f32 0.5, %v3758_v43  ;;  %v3762_v48 = vadd.f32 1.0, %v4430_v25  ;;  %v4432_v31 = vpop.eup %4431 }
 0x6df   : > { %v4434_v63 = vpop.eup %4433 }
 0x6e0   : > { %v3763_v41 = vmul.f32 0.5, %v3762_v48  ;;  %v3770_v16 = vmul.f32 %v4432_v31, %v3759_v49  ;;  %v3767_v5 = vadd.f32 1.0, %v4434_v63 }
 0x6e2   : > { %v3769_v2 = vmul.f32 %v3763_v41, %v6902_v33  ;;  %v3768_v9 = vmul.f32 0.5, %v3767_v5 }
 0x6e4   : > { %v3771_v57 = vadd.f32 %v3770_v16, %v3769_v2 }
 0x6e6   : > { %4435 = vtanh.f32 %v3771_v57  ;;  %v3786_v30 = vsel %vm3784_vm7, %v3771_v57, %v6902_v33  }
 0x6f3   : > { %v4436_v29 = vpop.eup %4435 }
 0x6f4   : > { %v3773_v20 = vmul.f32 %v4436_v29, %v3768_v9 }
 0x6f5   :  { %2069 = sbr.rel (!%p2067_p8) target bundleno = 465 (0x1d1), region = 90 }
 0x6f6   : > { %v3785_v0 = vsel %vm3784_vm7, %v3773_v20, %v6910_v60   ;;  %v8156_v60 = vmov %v3786_v30 }
 0x6f7   : > { %v3791_v53 = vpack.c.bf16 %v3785_v0, %v3785_v0  ;;  %v8157_v48 = vmov %v3785_v0  ;;  %3800 = vst [vmem:[%s7047_s7 + $0x8] sm:$0xff] (%p2067_p8), %v3785_v0 }
 0x6f9   : > { %3794 = vst [vmem:[%s3793_s1] sm:$0xf] %v3791_v53 }

</bundles_post_ra>
